<compile_context>
chip_gen: v5e
topology: v5e:2x2
jax: 0.10.0
libtpu: 0.0.40
codegen_flags: <defaults>
</compile_context>

<pallas_src>
import functools

import jax
import jax.numpy as jnp
from jax.experimental import pallas as pl
from jax.experimental.pallas import tpu as pltpu


# ----------------------------------------------------------------------------
# Fused kernel: one (batch, row-tile) block per grid step.
#   xt_ref : (TH + 2*pad, W + 2*pad, C)   pre-padded / halo'd input rows
#   w1_ref : (C, Cr)      b1_ref : (1, Cr)          conv1 1x1
#   wdw_ref: (K*K, Cr)    bdw_ref: (1, Cr)          conv1 depthwise KxK
#   w2_ref : (Cr, K*K*G)  b2_ref : (1, K*K*G)       conv2 1x1 (HyperNet)
#   o_ref  : (TH, W, C)
# ----------------------------------------------------------------------------
def _fused_idynamic_kernel(H, W, TH, K, C, Cr, G, gc,
                           xt_ref, w1_ref, b1_ref, wdw_ref, bdw_ref,
                           w2_ref, b2_ref, o_ref):
    pad = K // 2
    THp = TH + 2 * pad
    Wp = W + 2 * pad
    KK = K * K
    tile_i = pl.program_id(1)

    xt = xt_ref[...].astype(jnp.float32)          # (THp, Wp, C)
    w1 = w1_ref[...].astype(jnp.float32)          # (C, Cr)

    # ---- conv1: 1x1 conv (C -> Cr), computed on the halo'd tile -------------
    # TODO(synk): at larger channel counts, do this (and conv2) as an MXU matmul
    # on a (pixels, C) view instead of an unrolled channel loop.
    y1 = jnp.zeros((THp, Wp, Cr), jnp.float32) + b1_ref[...]
    for c in range(C):
        y1 = y1 + xt[:, :, c:c + 1] * w1[c:c + 1, :]

    # The original module zero-pads y1 before the depthwise conv; positions in
    # our halo that fall OUTSIDE the original HxW frame must therefore be 0
    # (not the bias).  Positions inside the frame (tile-boundary halo rows)
    # keep their real values.
    row = jax.lax.broadcasted_iota(jnp.int32, (THp, Wp, 1), 0) + (tile_i * TH - pad)
    col = jax.lax.broadcasted_iota(jnp.int32, (THp, Wp, 1), 1) - pad
    inside = (row >= 0) & (row < H) & (col >= 0) & (col < W)
    y1 = jnp.where(inside, y1, 0.0)

    # ---- conv1: static depthwise KxK (pad = K//2), central TH x W region ----
    # TODO(synk): the kh/kw slices shift the sublane axis by non-multiples of 8;
    # pltpu.roll on a re-laid-out tile would move this onto the XLU slot.
    wdw = wdw_ref[...].astype(jnp.float32)        # (K*K, Cr)
    y2 = jnp.zeros((TH, W, Cr), jnp.float32) + bdw_ref[...]
    for kh in range(K):
        for kw in range(K):
            t = kh * K + kw
            y2 = y2 + y1[kh:kh + TH, kw:kw + W, :] * wdw[t:t + 1, :]

    # ---- conv2: 1x1 conv (Cr -> K*K*G) => per-pixel dynamic weights ---------
    # Kept entirely in VMEM; never written to HBM.  Channel order matches the
    # PyTorch view(b, groups, K, K, h, w): d = g*K*K + kh*K + kw.
    w2 = w2_ref[...].astype(jnp.float32)          # (Cr, K*K*G)
    wgt = jnp.zeros((TH, W, KK * G), jnp.float32) + b2_ref[...]
    for r in range(Cr):
        wgt = wgt + y2[:, :, r:r + 1] * w2[r:r + 1, :]

    # ---- idynamic: per-pixel dynamic depthwise conv, pad = (K-1)//2 ----------
    # Group weights are broadcast to channels in-register (per-group lane slice);
    # the (B, H, W, K*K, C) broadcast tensor is never materialized.
    outs = []
    for g in range(G):
        xg = xt[:, :, g * gc:(g + 1) * gc]        # (THp, Wp, gc)
        acc = jnp.zeros((TH, W, gc), jnp.float32)
        for kh in range(K):
            for kw in range(K):
                d = g * KK + kh * K + kw
                acc = acc + wgt[:, :, d:d + 1] * xg[kh:kh + TH, kw:kw + W, :]
        outs.append(acc)
    # TODO(synk): for very small C a channel-major (C-on-sublane, W-on-lane)
    # layout would make these loads/stores lane-dense.
    o_ref[...] = jnp.concatenate(outs, axis=-1).astype(o_ref.dtype)


# ----------------------------------------------------------------------------
# Wrapper: NCHW in/out, row-tiling with halo, single pallas_call.
# ----------------------------------------------------------------------------
def idynamic_dwconv_forward(x_nchw, params, kernel_size, group_channels,
                            row_tile=8):
    B, C, H, W = x_nchw.shape
    K = kernel_size
    assert K % 2 == 1, "IDynamicDWConv expects an odd kernel_size"
    gc = group_channels
    assert C % gc == 0
    G = C // gc
    Cr = params["w1"].shape[1]
    KK = K * K

    if row_tile is None or row_tile <= 0 or H % row_tile != 0:
        TH = H
    else:
        TH = row_tile
    nH = H // TH
    pad = K // 2
    THp, Wp = TH + 2 * pad, W + 2 * pad

    # NCHW -> NHWC, pad spatially once, then build halo'd row tiles so every
    # grid block is a plain (non-overlapping-index) BlockSpec block.
    x = jnp.transpose(x_nchw, (0, 2, 3, 1))                         # (B, H, W, C)
    xpad = jnp.pad(x, ((0, 0), (pad, pad), (pad, pad), (0, 0)))     # (B, Hp, Wp, C)
    rows = jnp.arange(nH)[:, None] * TH + jnp.arange(THp)[None, :]  # (nH, THp)
    xt = xpad[:, rows]                                              # (B, nH, THp, Wp, C)

    wdw = params["w_dw"].reshape(KK, Cr)
    kern = functools.partial(_fused_idynamic_kernel, H, W, TH, K, C, Cr, G, gc)

    out = pl.pallas_call(
        kern,
        out_shape=jax.ShapeDtypeStruct((B, nH, TH, W, C), x.dtype),
        grid=(B, nH),
        in_specs=[
            pl.BlockSpec((None, None, THp, Wp, C), lambda b, i: (b, i, 0, 0, 0)),
            pl.BlockSpec((C, Cr), lambda b, i: (0, 0)),
            pl.BlockSpec((1, Cr), lambda b, i: (0, 0)),
            pl.BlockSpec((KK, Cr), lambda b, i: (0, 0)),
            pl.BlockSpec((1, Cr), lambda b, i: (0, 0)),
            pl.BlockSpec((Cr, KK * G), lambda b, i: (0, 0)),
            pl.BlockSpec((1, KK * G), lambda b, i: (0, 0)),
        ],
        out_specs=pl.BlockSpec((None, None, TH, W, C), lambda b, i: (b, i, 0, 0, 0)),
        compiler_params=pltpu.CompilerParams(
            dimension_semantics=("parallel", "parallel"),
            vmem_limit_bytes=32 * 1024 * 1024),
    )(xt, params["w1"], params["b1"].reshape(1, Cr), wdw,
      params["b_dw"].reshape(1, Cr), params["w2"], params["b2"].reshape(1, KK * G))

    out = out.reshape(B, H, W, C)
    return jnp.transpose(out, (0, 3, 1, 2))                         # -> NCHW


# ----------------------------------------------------------------------------
# Pure-JAX reference (mirrors the PyTorch module / CUDA kernel semantics)
# ----------------------------------------------------------------------------
def idynamic_dwconv_reference(x_nchw, params, kernel_size, group_channels):
    B, C, H, W = x_nchw.shape
    K = kernel_size
    groups = C // group_channels
    x = jnp.transpose(x_nchw, (0, 2, 3, 1))

    y1 = jnp.einsum("bhwc,cd->bhwd", x, params["w1"]) + params["b1"]
    pad = K // 2
    y1p = jnp.pad(y1, ((0, 0), (pad, pad), (pad, pad), (0, 0)))
    y2 = jnp.zeros_like(y1)
    for kh in range(K):
        for kw in range(K):
            y2 = y2 + y1p[:, kh:kh + H, kw:kw + W, :] * params["w_dw"][kh, kw, :]
    y2 = y2 + params["b_dw"]

    wgt = jnp.einsum("bhwc,cd->bhwd", y2, params["w2"]) + params["b2"]
    wgt = wgt.reshape(B, H, W, groups, K * K)
    wdyn = jnp.repeat(jnp.transpose(wgt, (0, 1, 2, 4, 3)), group_channels, axis=-1)

    pad2 = (K - 1) // 2
    xp = jnp.pad(x, ((0, 0), (pad2, pad2), (pad2, pad2), (0, 0)))
    out = jnp.zeros((B, H, W, C), x.dtype)
    for kh in range(K):
        for kw in range(K):
            out = out + wdyn[:, :, :, kh * K + kw, :] * xp[:, kh:kh + H, kw:kw + W, :]
    return jnp.transpose(out, (0, 3, 1, 2))


def init_params(key, channels, kernel_size, group_channels):
    reduction_ratio = 4
    Cr = channels // reduction_ratio
    groups = channels // group_channels
    K = kernel_size
    k1, k2, k3, k4, k5, k6 = jax.random.split(key, 6)
    return {
        "w1": jax.random.normal(k1, (channels, Cr), jnp.float32) * 0.1,
        "b1": jax.random.normal(k2, (Cr,), jnp.float32) * 0.1,
        "w_dw": jax.random.normal(k3, (K, K, Cr), jnp.float32) * 0.1,
        "b_dw": jax.random.normal(k4, (Cr,), jnp.float32) * 0.1,
        "w2": jax.random.normal(k5, (Cr, K * K * groups), jnp.float32) * 0.1,
        "b2": jax.random.normal(k6, (K * K * groups,), jnp.float32) * 0.1,
    }


if __name__ == "__main__":
    B, C, H, W = 2, 8, 16, 16
    kernel_size = 3
    group_channels = 4  # -> groups = 2

    key = jax.random.PRNGKey(0)
    kx, kp = jax.random.split(key)
    x = jax.random.normal(kx, (B, C, H, W), jnp.float32)
    params = init_params(kp, C, kernel_size, group_channels)

    out = idynamic_dwconv_forward(x, params, kernel_size, group_channels, row_tile=8)
    out = jax.block_until_ready(out)

    ref = idynamic_dwconv_reference(x, params, kernel_size, group_channels)
    ref = jax.block_until_ready(ref)

    assert out.shape == (B, C, H, W)
    max_err = float(jnp.max(jnp.abs(out - ref)))
    assert max_err < 1e-4, f"mismatch vs reference: {max_err}"

    print("KERNEL_OK")
</pallas_src>

<mosaic_0001>
module attributes {stable_mosaic.version = 11 : i64} {
  func.func @_fused_idynamic_kernel(%arg0: i32, %arg1: i32, %arg2: memref<1x1x10x18x8xf32, #tpu.memory_space<vmem>>, %arg3: memref<8x2xf32, #tpu.memory_space<vmem>>, %arg4: memref<1x2xf32, #tpu.memory_space<vmem>>, %arg5: memref<9x2xf32, #tpu.memory_space<vmem>>, %arg6: memref<1x2xf32, #tpu.memory_space<vmem>>, %arg7: memref<2x18xf32, #tpu.memory_space<vmem>>, %arg8: memref<1x18xf32, #tpu.memory_space<vmem>>, %arg9: memref<1x1x8x16x8xf32, #tpu.memory_space<vmem>>) attributes {dimension_semantics = [#tpu.dimension_semantics<parallel>, #tpu.dimension_semantics<parallel>], iteration_bounds = array<i64: 2, 2>, scalar_prefetch = 0 : i64, scratch_operands = 0 : i64, tpu.core_type = #tpu.core_type<tc>, window_params = [{transform_indices = @transform_0, window_bounds = array<i64: 1, 1, 10, 18, 8>}, {pipeline_mode = #tpu.pipeline_mode<synchronous>, transform_indices = @transform_1, window_bounds = array<i64: 8, 2>}, {pipeline_mode = #tpu.pipeline_mode<synchronous>, transform_indices = @transform_2, window_bounds = array<i64: 1, 2>}, {pipeline_mode = #tpu.pipeline_mode<synchronous>, transform_indices = @transform_3, window_bounds = array<i64: 9, 2>}, {pipeline_mode = #tpu.pipeline_mode<synchronous>, transform_indices = @transform_4, window_bounds = array<i64: 1, 2>}, {pipeline_mode = #tpu.pipeline_mode<synchronous>, transform_indices = @transform_5, window_bounds = array<i64: 2, 18>}, {pipeline_mode = #tpu.pipeline_mode<synchronous>, transform_indices = @transform_6, window_bounds = array<i64: 1, 18>}, {transform_indices = @transform_7, window_bounds = array<i64: 1, 1, 8, 16, 8>}]} {
    %c0 = arith.constant 0 : index
    %c0_0 = arith.constant 0 : index
    %c0_1 = arith.constant 0 : index
    %c0_2 = arith.constant 0 : index
    %c0_3 = arith.constant 0 : index
    %0 = vector.load %arg2[%c0, %c0_0, %c0_1, %c0_2, %c0_3] : memref<1x1x10x18x8xf32, #tpu.memory_space<vmem>>, vector<1x1x10x18x8xf32>
    %1 = vector.shape_cast %0 : vector<1x1x10x18x8xf32> to vector<10x18x8xf32>
    %c0_4 = arith.constant 0 : index
    %c0_5 = arith.constant 0 : index
    %2 = vector.load %arg3[%c0_4, %c0_5] : memref<8x2xf32, #tpu.memory_space<vmem>>, vector<8x2xf32>
    %cst = arith.constant 0.000000e+00 : f32
    %3 = vector.broadcast %cst : f32 to vector<10x18x2xf32>
    %c0_6 = arith.constant 0 : index
    %c0_7 = arith.constant 0 : index
    %4 = vector.load %arg4[%c0_6, %c0_7] : memref<1x2xf32, #tpu.memory_space<vmem>>, vector<1x2xf32>
    %5 = vector.shape_cast %4 : vector<1x2xf32> to vector<1x1x2xf32>
    %6 = vector.broadcast %5 : vector<1x1x2xf32> to vector<10x18x2xf32>
    %7 = arith.addf %3, %6 : vector<10x18x2xf32>
    %8 = vector.extract_strided_slice %1 {offsets = [0, 0, 0], sizes = [10, 18, 1], strides = [1, 1, 1]} : vector<10x18x8xf32> to vector<10x18x1xf32>
    %9 = vector.extract_strided_slice %2 {offsets = [0, 0], sizes = [1, 2], strides = [1, 1]} : vector<8x2xf32> to vector<1x2xf32>
    %10 = vector.shape_cast %9 : vector<1x2xf32> to vector<1x1x2xf32>
    %11 = vector.broadcast %8 : vector<10x18x1xf32> to vector<10x18x2xf32>
    %12 = vector.broadcast %10 : vector<1x1x2xf32> to vector<10x18x2xf32>
    %13 = arith.mulf %11, %12 : vector<10x18x2xf32>
    %14 = arith.addf %7, %13 : vector<10x18x2xf32>
    %15 = vector.extract_strided_slice %1 {offsets = [0, 0, 1], sizes = [10, 18, 1], strides = [1, 1, 1]} : vector<10x18x8xf32> to vector<10x18x1xf32>
    %16 = vector.extract_strided_slice %2 {offsets = [1, 0], sizes = [1, 2], strides = [1, 1]} : vector<8x2xf32> to vector<1x2xf32>
    %17 = vector.shape_cast %16 : vector<1x2xf32> to vector<1x1x2xf32>
    %18 = vector.broadcast %15 : vector<10x18x1xf32> to vector<10x18x2xf32>
    %19 = vector.broadcast %17 : vector<1x1x2xf32> to vector<10x18x2xf32>
    %20 = arith.mulf %18, %19 : vector<10x18x2xf32>
    %21 = arith.addf %14, %20 : vector<10x18x2xf32>
    %22 = vector.extract_strided_slice %1 {offsets = [0, 0, 2], sizes = [10, 18, 1], strides = [1, 1, 1]} : vector<10x18x8xf32> to vector<10x18x1xf32>
    %23 = vector.extract_strided_slice %2 {offsets = [2, 0], sizes = [1, 2], strides = [1, 1]} : vector<8x2xf32> to vector<1x2xf32>
    %24 = vector.shape_cast %23 : vector<1x2xf32> to vector<1x1x2xf32>
    %25 = vector.broadcast %22 : vector<10x18x1xf32> to vector<10x18x2xf32>
    %26 = vector.broadcast %24 : vector<1x1x2xf32> to vector<10x18x2xf32>
    %27 = arith.mulf %25, %26 : vector<10x18x2xf32>
    %28 = arith.addf %21, %27 : vector<10x18x2xf32>
    %29 = vector.extract_strided_slice %1 {offsets = [0, 0, 3], sizes = [10, 18, 1], strides = [1, 1, 1]} : vector<10x18x8xf32> to vector<10x18x1xf32>
    %30 = vector.extract_strided_slice %2 {offsets = [3, 0], sizes = [1, 2], strides = [1, 1]} : vector<8x2xf32> to vector<1x2xf32>
    %31 = vector.shape_cast %30 : vector<1x2xf32> to vector<1x1x2xf32>
    %32 = vector.broadcast %29 : vector<10x18x1xf32> to vector<10x18x2xf32>
    %33 = vector.broadcast %31 : vector<1x1x2xf32> to vector<10x18x2xf32>
    %34 = arith.mulf %32, %33 : vector<10x18x2xf32>
    %35 = arith.addf %28, %34 : vector<10x18x2xf32>
    %36 = vector.extract_strided_slice %1 {offsets = [0, 0, 4], sizes = [10, 18, 1], strides = [1, 1, 1]} : vector<10x18x8xf32> to vector<10x18x1xf32>
    %37 = vector.extract_strided_slice %2 {offsets = [4, 0], sizes = [1, 2], strides = [1, 1]} : vector<8x2xf32> to vector<1x2xf32>
    %38 = vector.shape_cast %37 : vector<1x2xf32> to vector<1x1x2xf32>
    %39 = vector.broadcast %36 : vector<10x18x1xf32> to vector<10x18x2xf32>
    %40 = vector.broadcast %38 : vector<1x1x2xf32> to vector<10x18x2xf32>
    %41 = arith.mulf %39, %40 : vector<10x18x2xf32>
    %42 = arith.addf %35, %41 : vector<10x18x2xf32>
    %43 = vector.extract_strided_slice %1 {offsets = [0, 0, 5], sizes = [10, 18, 1], strides = [1, 1, 1]} : vector<10x18x8xf32> to vector<10x18x1xf32>
    %44 = vector.extract_strided_slice %2 {offsets = [5, 0], sizes = [1, 2], strides = [1, 1]} : vector<8x2xf32> to vector<1x2xf32>
    %45 = vector.shape_cast %44 : vector<1x2xf32> to vector<1x1x2xf32>
    %46 = vector.broadcast %43 : vector<10x18x1xf32> to vector<10x18x2xf32>
    %47 = vector.broadcast %45 : vector<1x1x2xf32> to vector<10x18x2xf32>
    %48 = arith.mulf %46, %47 : vector<10x18x2xf32>
    %49 = arith.addf %42, %48 : vector<10x18x2xf32>
    %50 = vector.extract_strided_slice %1 {offsets = [0, 0, 6], sizes = [10, 18, 1], strides = [1, 1, 1]} : vector<10x18x8xf32> to vector<10x18x1xf32>
    %51 = vector.extract_strided_slice %2 {offsets = [6, 0], sizes = [1, 2], strides = [1, 1]} : vector<8x2xf32> to vector<1x2xf32>
    %52 = vector.shape_cast %51 : vector<1x2xf32> to vector<1x1x2xf32>
    %53 = vector.broadcast %50 : vector<10x18x1xf32> to vector<10x18x2xf32>
    %54 = vector.broadcast %52 : vector<1x1x2xf32> to vector<10x18x2xf32>
    %55 = arith.mulf %53, %54 : vector<10x18x2xf32>
    %56 = arith.addf %49, %55 : vector<10x18x2xf32>
    %57 = vector.extract_strided_slice %1 {offsets = [0, 0, 7], sizes = [10, 18, 1], strides = [1, 1, 1]} : vector<10x18x8xf32> to vector<10x18x1xf32>
    %58 = vector.extract_strided_slice %2 {offsets = [7, 0], sizes = [1, 2], strides = [1, 1]} : vector<8x2xf32> to vector<1x2xf32>
    %59 = vector.shape_cast %58 : vector<1x2xf32> to vector<1x1x2xf32>
    %60 = vector.broadcast %57 : vector<10x18x1xf32> to vector<10x18x2xf32>
    %61 = vector.broadcast %59 : vector<1x1x2xf32> to vector<10x18x2xf32>
    %62 = arith.mulf %60, %61 : vector<10x18x2xf32>
    %63 = arith.addf %56, %62 : vector<10x18x2xf32>
    %64 = tpu.iota {dimensions = array<i32: 0>} : vector<10x18x1xi32>
    %c8_i32 = arith.constant 8 : i32
    %65 = arith.muli %arg1, %c8_i32 : i32
    %c1_i32 = arith.constant 1 : i32
    %66 = arith.subi %65, %c1_i32 : i32
    %67 = vector.broadcast %66 : i32 to vector<10x18x1xi32>
    %68 = arith.addi %64, %67 : vector<10x18x1xi32>
    %69 = tpu.iota {dimensions = array<i32: 1>} : vector<10x18x1xi32>
    %c1_i32_8 = arith.constant 1 : i32
    %70 = vector.broadcast %c1_i32_8 : i32 to vector<10x18x1xi32>
    %71 = arith.subi %69, %70 : vector<10x18x1xi32>
    %c0_i32 = arith.constant 0 : i32
    %72 = vector.broadcast %c0_i32 : i32 to vector<10x18x1xi32>
    %73 = arith.cmpi sge, %68, %72 : vector<10x18x1xi32>
    %c16_i32 = arith.constant 16 : i32
    %74 = vector.broadcast %c16_i32 : i32 to vector<10x18x1xi32>
    %75 = arith.cmpi slt, %68, %74 : vector<10x18x1xi32>
    %76 = arith.andi %73, %75 : vector<10x18x1xi1>
    %c0_i32_9 = arith.constant 0 : i32
    %77 = vector.broadcast %c0_i32_9 : i32 to vector<10x18x1xi32>
    %78 = arith.cmpi sge, %71, %77 : vector<10x18x1xi32>
    %79 = arith.andi %76, %78 : vector<10x18x1xi1>
    %c16_i32_10 = arith.constant 16 : i32
    %80 = vector.broadcast %c16_i32_10 : i32 to vector<10x18x1xi32>
    %81 = arith.cmpi slt, %71, %80 : vector<10x18x1xi32>
    %82 = arith.andi %79, %81 : vector<10x18x1xi1>
    %cst_11 = arith.constant 0.000000e+00 : f32
    %83 = vector.shape_cast %82 : vector<10x18x1xi1> to vector<10x18x1xi1>
    %84 = vector.broadcast %83 : vector<10x18x1xi1> to vector<10x18x2xi1>
    %85 = vector.broadcast %cst_11 : f32 to vector<10x18x2xf32>
    %86 = arith.select %84, %63, %85 : vector<10x18x2xi1>, vector<10x18x2xf32>
    %c0_12 = arith.constant 0 : index
    %c0_13 = arith.constant 0 : index
    %87 = vector.load %arg5[%c0_12, %c0_13] : memref<9x2xf32, #tpu.memory_space<vmem>>, vector<9x2xf32>
    %cst_14 = arith.constant 0.000000e+00 : f32
    %88 = vector.broadcast %cst_14 : f32 to vector<8x16x2xf32>
    %c0_15 = arith.constant 0 : index
    %c0_16 = arith.constant 0 : index
    %89 = vector.load %arg6[%c0_15, %c0_16] : memref<1x2xf32, #tpu.memory_space<vmem>>, vector<1x2xf32>
    %90 = vector.shape_cast %89 : vector<1x2xf32> to vector<1x1x2xf32>
    %91 = vector.broadcast %90 : vector<1x1x2xf32> to vector<8x16x2xf32>
    %92 = arith.addf %88, %91 : vector<8x16x2xf32>
    %93 = vector.extract_strided_slice %86 {offsets = [0, 0, 0], sizes = [8, 16, 2], strides = [1, 1, 1]} : vector<10x18x2xf32> to vector<8x16x2xf32>
    %94 = vector.extract_strided_slice %87 {offsets = [0, 0], sizes = [1, 2], strides = [1, 1]} : vector<9x2xf32> to vector<1x2xf32>
    %95 = vector.shape_cast %94 : vector<1x2xf32> to vector<1x1x2xf32>
    %96 = vector.broadcast %95 : vector<1x1x2xf32> to vector<8x16x2xf32>
    %97 = arith.mulf %93, %96 : vector<8x16x2xf32>
    %98 = arith.addf %92, %97 : vector<8x16x2xf32>
    %99 = vector.extract_strided_slice %86 {offsets = [0, 1, 0], sizes = [8, 16, 2], strides = [1, 1, 1]} : vector<10x18x2xf32> to vector<8x16x2xf32>
    %100 = vector.extract_strided_slice %87 {offsets = [1, 0], sizes = [1, 2], strides = [1, 1]} : vector<9x2xf32> to vector<1x2xf32>
    %101 = vector.shape_cast %100 : vector<1x2xf32> to vector<1x1x2xf32>
    %102 = vector.broadcast %101 : vector<1x1x2xf32> to vector<8x16x2xf32>
    %103 = arith.mulf %99, %102 : vector<8x16x2xf32>
    %104 = arith.addf %98, %103 : vector<8x16x2xf32>
    %105 = vector.extract_strided_slice %86 {offsets = [0, 2, 0], sizes = [8, 16, 2], strides = [1, 1, 1]} : vector<10x18x2xf32> to vector<8x16x2xf32>
    %106 = vector.extract_strided_slice %87 {offsets = [2, 0], sizes = [1, 2], strides = [1, 1]} : vector<9x2xf32> to vector<1x2xf32>
    %107 = vector.shape_cast %106 : vector<1x2xf32> to vector<1x1x2xf32>
    %108 = vector.broadcast %107 : vector<1x1x2xf32> to vector<8x16x2xf32>
    %109 = arith.mulf %105, %108 : vector<8x16x2xf32>
    %110 = arith.addf %104, %109 : vector<8x16x2xf32>
    %111 = vector.extract_strided_slice %86 {offsets = [1, 0, 0], sizes = [8, 16, 2], strides = [1, 1, 1]} : vector<10x18x2xf32> to vector<8x16x2xf32>
    %112 = vector.extract_strided_slice %87 {offsets = [3, 0], sizes = [1, 2], strides = [1, 1]} : vector<9x2xf32> to vector<1x2xf32>
    %113 = vector.shape_cast %112 : vector<1x2xf32> to vector<1x1x2xf32>
    %114 = vector.broadcast %113 : vector<1x1x2xf32> to vector<8x16x2xf32>
    %115 = arith.mulf %111, %114 : vector<8x16x2xf32>
    %116 = arith.addf %110, %115 : vector<8x16x2xf32>
    %117 = vector.extract_strided_slice %86 {offsets = [1, 1, 0], sizes = [8, 16, 2], strides = [1, 1, 1]} : vector<10x18x2xf32> to vector<8x16x2xf32>
    %118 = vector.extract_strided_slice %87 {offsets = [4, 0], sizes = [1, 2], strides = [1, 1]} : vector<9x2xf32> to vector<1x2xf32>
    %119 = vector.shape_cast %118 : vector<1x2xf32> to vector<1x1x2xf32>
    %120 = vector.broadcast %119 : vector<1x1x2xf32> to vector<8x16x2xf32>
    %121 = arith.mulf %117, %120 : vector<8x16x2xf32>
    %122 = arith.addf %116, %121 : vector<8x16x2xf32>
    %123 = vector.extract_strided_slice %86 {offsets = [1, 2, 0], sizes = [8, 16, 2], strides = [1, 1, 1]} : vector<10x18x2xf32> to vector<8x16x2xf32>
    %124 = vector.extract_strided_slice %87 {offsets = [5, 0], sizes = [1, 2], strides = [1, 1]} : vector<9x2xf32> to vector<1x2xf32>
    %125 = vector.shape_cast %124 : vector<1x2xf32> to vector<1x1x2xf32>
    %126 = vector.broadcast %125 : vector<1x1x2xf32> to vector<8x16x2xf32>
    %127 = arith.mulf %123, %126 : vector<8x16x2xf32>
    %128 = arith.addf %122, %127 : vector<8x16x2xf32>
    %129 = vector.extract_strided_slice %86 {offsets = [2, 0, 0], sizes = [8, 16, 2], strides = [1, 1, 1]} : vector<10x18x2xf32> to vector<8x16x2xf32>
    %130 = vector.extract_strided_slice %87 {offsets = [6, 0], sizes = [1, 2], strides = [1, 1]} : vector<9x2xf32> to vector<1x2xf32>
    %131 = vector.shape_cast %130 : vector<1x2xf32> to vector<1x1x2xf32>
    %132 = vector.broadcast %131 : vector<1x1x2xf32> to vector<8x16x2xf32>
    %133 = arith.mulf %129, %132 : vector<8x16x2xf32>
    %134 = arith.addf %128, %133 : vector<8x16x2xf32>
    %135 = vector.extract_strided_slice %86 {offsets = [2, 1, 0], sizes = [8, 16, 2], strides = [1, 1, 1]} : vector<10x18x2xf32> to vector<8x16x2xf32>
    %136 = vector.extract_strided_slice %87 {offsets = [7, 0], sizes = [1, 2], strides = [1, 1]} : vector<9x2xf32> to vector<1x2xf32>
    %137 = vector.shape_cast %136 : vector<1x2xf32> to vector<1x1x2xf32>
    %138 = vector.broadcast %137 : vector<1x1x2xf32> to vector<8x16x2xf32>
    %139 = arith.mulf %135, %138 : vector<8x16x2xf32>
    %140 = arith.addf %134, %139 : vector<8x16x2xf32>
    %141 = vector.extract_strided_slice %86 {offsets = [2, 2, 0], sizes = [8, 16, 2], strides = [1, 1, 1]} : vector<10x18x2xf32> to vector<8x16x2xf32>
    %142 = vector.extract_strided_slice %87 {offsets = [8, 0], sizes = [1, 2], strides = [1, 1]} : vector<9x2xf32> to vector<1x2xf32>
    %143 = vector.shape_cast %142 : vector<1x2xf32> to vector<1x1x2xf32>
    %144 = vector.broadcast %143 : vector<1x1x2xf32> to vector<8x16x2xf32>
    %145 = arith.mulf %141, %144 : vector<8x16x2xf32>
    %146 = arith.addf %140, %145 : vector<8x16x2xf32>
    %c0_17 = arith.constant 0 : index
    %c0_18 = arith.constant 0 : index
    %147 = vector.load %arg7[%c0_17, %c0_18] : memref<2x18xf32, #tpu.memory_space<vmem>>, vector<2x18xf32>
    %cst_19 = arith.constant 0.000000e+00 : f32
    %148 = vector.broadcast %cst_19 : f32 to vector<8x16x18xf32>
    %c0_20 = arith.constant 0 : index
    %c0_21 = arith.constant 0 : index
    %149 = vector.load %arg8[%c0_20, %c0_21] : memref<1x18xf32, #tpu.memory_space<vmem>>, vector<1x18xf32>
    %150 = vector.shape_cast %149 : vector<1x18xf32> to vector<1x1x18xf32>
    %151 = vector.broadcast %150 : vector<1x1x18xf32> to vector<8x16x18xf32>
    %152 = arith.addf %148, %151 : vector<8x16x18xf32>
    %153 = vector.extract_strided_slice %146 {offsets = [0, 0, 0], sizes = [8, 16, 1], strides = [1, 1, 1]} : vector<8x16x2xf32> to vector<8x16x1xf32>
    %154 = vector.extract_strided_slice %147 {offsets = [0, 0], sizes = [1, 18], strides = [1, 1]} : vector<2x18xf32> to vector<1x18xf32>
    %155 = vector.shape_cast %154 : vector<1x18xf32> to vector<1x1x18xf32>
    %156 = vector.broadcast %153 : vector<8x16x1xf32> to vector<8x16x18xf32>
    %157 = vector.broadcast %155 : vector<1x1x18xf32> to vector<8x16x18xf32>
    %158 = arith.mulf %156, %157 : vector<8x16x18xf32>
    %159 = arith.addf %152, %158 : vector<8x16x18xf32>
    %160 = vector.extract_strided_slice %146 {offsets = [0, 0, 1], sizes = [8, 16, 1], strides = [1, 1, 1]} : vector<8x16x2xf32> to vector<8x16x1xf32>
    %161 = vector.extract_strided_slice %147 {offsets = [1, 0], sizes = [1, 18], strides = [1, 1]} : vector<2x18xf32> to vector<1x18xf32>
    %162 = vector.shape_cast %161 : vector<1x18xf32> to vector<1x1x18xf32>
    %163 = vector.broadcast %160 : vector<8x16x1xf32> to vector<8x16x18xf32>
    %164 = vector.broadcast %162 : vector<1x1x18xf32> to vector<8x16x18xf32>
    %165 = arith.mulf %163, %164 : vector<8x16x18xf32>
    %166 = arith.addf %159, %165 : vector<8x16x18xf32>
    %167 = vector.extract_strided_slice %1 {offsets = [0, 0, 0], sizes = [10, 18, 4], strides = [1, 1, 1]} : vector<10x18x8xf32> to vector<10x18x4xf32>
    %cst_22 = arith.constant 0.000000e+00 : f32
    %168 = vector.broadcast %cst_22 : f32 to vector<8x16x4xf32>
    %169 = vector.extract_strided_slice %166 {offsets = [0, 0, 0], sizes = [8, 16, 1], strides = [1, 1, 1]} : vector<8x16x18xf32> to vector<8x16x1xf32>
    %170 = vector.extract_strided_slice %167 {offsets = [0, 0, 0], sizes = [8, 16, 4], strides = [1, 1, 1]} : vector<10x18x4xf32> to vector<8x16x4xf32>
    %171 = vector.broadcast %169 : vector<8x16x1xf32> to vector<8x16x4xf32>
    %172 = arith.mulf %171, %170 : vector<8x16x4xf32>
    %173 = arith.addf %168, %172 : vector<8x16x4xf32>
    %174 = vector.extract_strided_slice %166 {offsets = [0, 0, 1], sizes = [8, 16, 1], strides = [1, 1, 1]} : vector<8x16x18xf32> to vector<8x16x1xf32>
    %175 = vector.extract_strided_slice %167 {offsets = [0, 1, 0], sizes = [8, 16, 4], strides = [1, 1, 1]} : vector<10x18x4xf32> to vector<8x16x4xf32>
    %176 = vector.broadcast %174 : vector<8x16x1xf32> to vector<8x16x4xf32>
    %177 = arith.mulf %176, %175 : vector<8x16x4xf32>
    %178 = arith.addf %173, %177 : vector<8x16x4xf32>
    %179 = vector.extract_strided_slice %166 {offsets = [0, 0, 2], sizes = [8, 16, 1], strides = [1, 1, 1]} : vector<8x16x18xf32> to vector<8x16x1xf32>
    %180 = vector.extract_strided_slice %167 {offsets = [0, 2, 0], sizes = [8, 16, 4], strides = [1, 1, 1]} : vector<10x18x4xf32> to vector<8x16x4xf32>
    %181 = vector.broadcast %179 : vector<8x16x1xf32> to vector<8x16x4xf32>
    %182 = arith.mulf %181, %180 : vector<8x16x4xf32>
    %183 = arith.addf %178, %182 : vector<8x16x4xf32>
    %184 = vector.extract_strided_slice %166 {offsets = [0, 0, 3], sizes = [8, 16, 1], strides = [1, 1, 1]} : vector<8x16x18xf32> to vector<8x16x1xf32>
    %185 = vector.extract_strided_slice %167 {offsets = [1, 0, 0], sizes = [8, 16, 4], strides = [1, 1, 1]} : vector<10x18x4xf32> to vector<8x16x4xf32>
    %186 = vector.broadcast %184 : vector<8x16x1xf32> to vector<8x16x4xf32>
    %187 = arith.mulf %186, %185 : vector<8x16x4xf32>
    %188 = arith.addf %183, %187 : vector<8x16x4xf32>
    %189 = vector.extract_strided_slice %166 {offsets = [0, 0, 4], sizes = [8, 16, 1], strides = [1, 1, 1]} : vector<8x16x18xf32> to vector<8x16x1xf32>
    %190 = vector.extract_strided_slice %167 {offsets = [1, 1, 0], sizes = [8, 16, 4], strides = [1, 1, 1]} : vector<10x18x4xf32> to vector<8x16x4xf32>
    %191 = vector.broadcast %189 : vector<8x16x1xf32> to vector<8x16x4xf32>
    %192 = arith.mulf %191, %190 : vector<8x16x4xf32>
    %193 = arith.addf %188, %192 : vector<8x16x4xf32>
    %194 = vector.extract_strided_slice %166 {offsets = [0, 0, 5], sizes = [8, 16, 1], strides = [1, 1, 1]} : vector<8x16x18xf32> to vector<8x16x1xf32>
    %195 = vector.extract_strided_slice %167 {offsets = [1, 2, 0], sizes = [8, 16, 4], strides = [1, 1, 1]} : vector<10x18x4xf32> to vector<8x16x4xf32>
    %196 = vector.broadcast %194 : vector<8x16x1xf32> to vector<8x16x4xf32>
    %197 = arith.mulf %196, %195 : vector<8x16x4xf32>
    %198 = arith.addf %193, %197 : vector<8x16x4xf32>
    %199 = vector.extract_strided_slice %166 {offsets = [0, 0, 6], sizes = [8, 16, 1], strides = [1, 1, 1]} : vector<8x16x18xf32> to vector<8x16x1xf32>
    %200 = vector.extract_strided_slice %167 {offsets = [2, 0, 0], sizes = [8, 16, 4], strides = [1, 1, 1]} : vector<10x18x4xf32> to vector<8x16x4xf32>
    %201 = vector.broadcast %199 : vector<8x16x1xf32> to vector<8x16x4xf32>
    %202 = arith.mulf %201, %200 : vector<8x16x4xf32>
    %203 = arith.addf %198, %202 : vector<8x16x4xf32>
    %204 = vector.extract_strided_slice %166 {offsets = [0, 0, 7], sizes = [8, 16, 1], strides = [1, 1, 1]} : vector<8x16x18xf32> to vector<8x16x1xf32>
    %205 = vector.extract_strided_slice %167 {offsets = [2, 1, 0], sizes = [8, 16, 4], strides = [1, 1, 1]} : vector<10x18x4xf32> to vector<8x16x4xf32>
    %206 = vector.broadcast %204 : vector<8x16x1xf32> to vector<8x16x4xf32>
    %207 = arith.mulf %206, %205 : vector<8x16x4xf32>
    %208 = arith.addf %203, %207 : vector<8x16x4xf32>
    %209 = vector.extract_strided_slice %166 {offsets = [0, 0, 8], sizes = [8, 16, 1], strides = [1, 1, 1]} : vector<8x16x18xf32> to vector<8x16x1xf32>
    %210 = vector.extract_strided_slice %167 {offsets = [2, 2, 0], sizes = [8, 16, 4], strides = [1, 1, 1]} : vector<10x18x4xf32> to vector<8x16x4xf32>
    %211 = vector.broadcast %209 : vector<8x16x1xf32> to vector<8x16x4xf32>
    %212 = arith.mulf %211, %210 : vector<8x16x4xf32>
    %213 = arith.addf %208, %212 : vector<8x16x4xf32>
    %214 = vector.extract_strided_slice %1 {offsets = [0, 0, 4], sizes = [10, 18, 4], strides = [1, 1, 1]} : vector<10x18x8xf32> to vector<10x18x4xf32>
    %cst_23 = arith.constant 0.000000e+00 : f32
    %215 = vector.broadcast %cst_23 : f32 to vector<8x16x4xf32>
    %216 = vector.extract_strided_slice %166 {offsets = [0, 0, 9], sizes = [8, 16, 1], strides = [1, 1, 1]} : vector<8x16x18xf32> to vector<8x16x1xf32>
    %217 = vector.extract_strided_slice %214 {offsets = [0, 0, 0], sizes = [8, 16, 4], strides = [1, 1, 1]} : vector<10x18x4xf32> to vector<8x16x4xf32>
    %218 = vector.broadcast %216 : vector<8x16x1xf32> to vector<8x16x4xf32>
    %219 = arith.mulf %218, %217 : vector<8x16x4xf32>
    %220 = arith.addf %215, %219 : vector<8x16x4xf32>
    %221 = vector.extract_strided_slice %166 {offsets = [0, 0, 10], sizes = [8, 16, 1], strides = [1, 1, 1]} : vector<8x16x18xf32> to vector<8x16x1xf32>
    %222 = vector.extract_strided_slice %214 {offsets = [0, 1, 0], sizes = [8, 16, 4], strides = [1, 1, 1]} : vector<10x18x4xf32> to vector<8x16x4xf32>
    %223 = vector.broadcast %221 : vector<8x16x1xf32> to vector<8x16x4xf32>
    %224 = arith.mulf %223, %222 : vector<8x16x4xf32>
    %225 = arith.addf %220, %224 : vector<8x16x4xf32>
    %226 = vector.extract_strided_slice %166 {offsets = [0, 0, 11], sizes = [8, 16, 1], strides = [1, 1, 1]} : vector<8x16x18xf32> to vector<8x16x1xf32>
    %227 = vector.extract_strided_slice %214 {offsets = [0, 2, 0], sizes = [8, 16, 4], strides = [1, 1, 1]} : vector<10x18x4xf32> to vector<8x16x4xf32>
    %228 = vector.broadcast %226 : vector<8x16x1xf32> to vector<8x16x4xf32>
    %229 = arith.mulf %228, %227 : vector<8x16x4xf32>
    %230 = arith.addf %225, %229 : vector<8x16x4xf32>
    %231 = vector.extract_strided_slice %166 {offsets = [0, 0, 12], sizes = [8, 16, 1], strides = [1, 1, 1]} : vector<8x16x18xf32> to vector<8x16x1xf32>
    %232 = vector.extract_strided_slice %214 {offsets = [1, 0, 0], sizes = [8, 16, 4], strides = [1, 1, 1]} : vector<10x18x4xf32> to vector<8x16x4xf32>
    %233 = vector.broadcast %231 : vector<8x16x1xf32> to vector<8x16x4xf32>
    %234 = arith.mulf %233, %232 : vector<8x16x4xf32>
    %235 = arith.addf %230, %234 : vector<8x16x4xf32>
    %236 = vector.extract_strided_slice %166 {offsets = [0, 0, 13], sizes = [8, 16, 1], strides = [1, 1, 1]} : vector<8x16x18xf32> to vector<8x16x1xf32>
    %237 = vector.extract_strided_slice %214 {offsets = [1, 1, 0], sizes = [8, 16, 4], strides = [1, 1, 1]} : vector<10x18x4xf32> to vector<8x16x4xf32>
    %238 = vector.broadcast %236 : vector<8x16x1xf32> to vector<8x16x4xf32>
    %239 = arith.mulf %238, %237 : vector<8x16x4xf32>
    %240 = arith.addf %235, %239 : vector<8x16x4xf32>
    %241 = vector.extract_strided_slice %166 {offsets = [0, 0, 14], sizes = [8, 16, 1], strides = [1, 1, 1]} : vector<8x16x18xf32> to vector<8x16x1xf32>
    %242 = vector.extract_strided_slice %214 {offsets = [1, 2, 0], sizes = [8, 16, 4], strides = [1, 1, 1]} : vector<10x18x4xf32> to vector<8x16x4xf32>
    %243 = vector.broadcast %241 : vector<8x16x1xf32> to vector<8x16x4xf32>
    %244 = arith.mulf %243, %242 : vector<8x16x4xf32>
    %245 = arith.addf %240, %244 : vector<8x16x4xf32>
    %246 = vector.extract_strided_slice %166 {offsets = [0, 0, 15], sizes = [8, 16, 1], strides = [1, 1, 1]} : vector<8x16x18xf32> to vector<8x16x1xf32>
    %247 = vector.extract_strided_slice %214 {offsets = [2, 0, 0], sizes = [8, 16, 4], strides = [1, 1, 1]} : vector<10x18x4xf32> to vector<8x16x4xf32>
    %248 = vector.broadcast %246 : vector<8x16x1xf32> to vector<8x16x4xf32>
    %249 = arith.mulf %248, %247 : vector<8x16x4xf32>
    %250 = arith.addf %245, %249 : vector<8x16x4xf32>
    %251 = vector.extract_strided_slice %166 {offsets = [0, 0, 16], sizes = [8, 16, 1], strides = [1, 1, 1]} : vector<8x16x18xf32> to vector<8x16x1xf32>
    %252 = vector.extract_strided_slice %214 {offsets = [2, 1, 0], sizes = [8, 16, 4], strides = [1, 1, 1]} : vector<10x18x4xf32> to vector<8x16x4xf32>
    %253 = vector.broadcast %251 : vector<8x16x1xf32> to vector<8x16x4xf32>
    %254 = arith.mulf %253, %252 : vector<8x16x4xf32>
    %255 = arith.addf %250, %254 : vector<8x16x4xf32>
    %256 = vector.extract_strided_slice %166 {offsets = [0, 0, 17], sizes = [8, 16, 1], strides = [1, 1, 1]} : vector<8x16x18xf32> to vector<8x16x1xf32>
    %257 = vector.extract_strided_slice %214 {offsets = [2, 2, 0], sizes = [8, 16, 4], strides = [1, 1, 1]} : vector<10x18x4xf32> to vector<8x16x4xf32>
    %258 = vector.broadcast %256 : vector<8x16x1xf32> to vector<8x16x4xf32>
    %259 = arith.mulf %258, %257 : vector<8x16x4xf32>
    %260 = arith.addf %255, %259 : vector<8x16x4xf32>
    %261 = tpu.concatenate %213, %260 in 2 : vector<8x16x4xf32>, vector<8x16x4xf32> -> vector<8x16x8xf32>
    %c0_24 = arith.constant 0 : index
    %c0_25 = arith.constant 0 : index
    %c0_26 = arith.constant 0 : index
    %c0_27 = arith.constant 0 : index
    %c0_28 = arith.constant 0 : index
    %262 = vector.load %arg9[%c0_24, %c0_25, %c0_26, %c0_27, %c0_28] : memref<1x1x8x16x8xf32, #tpu.memory_space<vmem>>, vector<1x1x8x16x8xf32>
    %263 = vector.shape_cast %262 : vector<1x1x8x16x8xf32> to vector<8x16x8xf32>
    %264 = vector.shape_cast %261 : vector<8x16x8xf32> to vector<1x1x8x16x8xf32>
    tpu.vector_store %arg9[%c0_24, %c0_25, %c0_26, %c0_27, %c0_28], %264 {strides = array<i32>} : memref<1x1x8x16x8xf32, #tpu.memory_space<vmem>>, vector<1x1x8x16x8xf32>,
    return
  }
  func.func @transform_0(%arg0: i32, %arg1: i32) -> (i32, i32, i32, i32, i32) {
    %c0_i32 = arith.constant 0 : i32
    %c0_i32_0 = arith.constant 0 : i32
    %c0_i32_1 = arith.constant 0 : i32
    %c0_i32_2 = arith.constant 0 : i32
    return %arg0, %arg1, %c0_i32, %c0_i32_0, %c0_i32_1 : i32, i32, i32, i32, i32
  }
  func.func @transform_1(%arg0: i32, %arg1: i32) -> (i32, i32) {
    %c0_i32 = arith.constant 0 : i32
    %c0_i32_0 = arith.constant 0 : i32
    %c0_i32_1 = arith.constant 0 : i32
    return %c0_i32, %c0_i32_0 : i32, i32
  }
  func.func @transform_2(%arg0: i32, %arg1: i32) -> (i32, i32) {
    %c0_i32 = arith.constant 0 : i32
    %c0_i32_0 = arith.constant 0 : i32
    %c0_i32_1 = arith.constant 0 : i32
    return %c0_i32, %c0_i32_0 : i32, i32
  }
  func.func @transform_3(%arg0: i32, %arg1: i32) -> (i32, i32) {
    %c0_i32 = arith.constant 0 : i32
    %c0_i32_0 = arith.constant 0 : i32
    %c0_i32_1 = arith.constant 0 : i32
    return %c0_i32, %c0_i32_0 : i32, i32
  }
  func.func @transform_4(%arg0: i32, %arg1: i32) -> (i32, i32) {
    %c0_i32 = arith.constant 0 : i32
    %c0_i32_0 = arith.constant 0 : i32
    %c0_i32_1 = arith.constant 0 : i32
    return %c0_i32, %c0_i32_0 : i32, i32
  }
  func.func @transform_5(%arg0: i32, %arg1: i32) -> (i32, i32) {
    %c0_i32 = arith.constant 0 : i32
    %c0_i32_0 = arith.constant 0 : i32
    %c0_i32_1 = arith.constant 0 : i32
    return %c0_i32, %c0_i32_0 : i32, i32
  }
  func.func @transform_6(%arg0: i32, %arg1: i32) -> (i32, i32) {
    %c0_i32 = arith.constant 0 : i32
    %c0_i32_0 = arith.constant 0 : i32
    %c0_i32_1 = arith.constant 0 : i32
    return %c0_i32, %c0_i32_0 : i32, i32
  }
  func.func @transform_7(%arg0: i32, %arg1: i32) -> (i32, i32, i32, i32, i32) {
    %c0_i32 = arith.constant 0 : i32
    %c0_i32_0 = arith.constant 0 : i32
    %c0_i32_1 = arith.constant 0 : i32
    %c0_i32_2 = arith.constant 0 : i32
    return %arg0, %arg1, %c0_i32, %c0_i32_0, %c0_i32_1 : i32, i32, i32, i32, i32
  }
}

</mosaic_0001>

<bundles_post_ra>
// kernel: tpu_custom_call.1
= control target key start
LH: loop header
LB: loop body
LE: loop exit
PB: predicated region body
PF: predicated region fallthrough
CT: control target
= control target key end

     0   :  { %s5942_s24 = smov 0   ;;  %s5944_s25 = smov 0   ;;  %s11186_s0 = inlined_call_operand.vmem [shape: f32[2,2,10,18,8], index: 0, kind: input, shape index: {}]   ;;  %s11187_s1 = inlined_call_operand.vmem [shape: f32[8,2], index: 1, kind: input, shape index: {}]   ;;  %s11188_s2 = inlined_call_operand.vmem [shape: f32[1,2], index: 2, kind: input, shape index: {}]   ;;  %s11189_s3 = inlined_call_operand.vmem [shape: f32[9,2], index: 3, kind: input, shape index: {}]   ;;  %s11190_s4 = inlined_call_operand.vmem [shape: f32[1,2], index: 4, kind: input, shape index: {}]   ;;  %s11191_s5 = inlined_call_operand.vmem [shape: f32[2,18], index: 5, kind: input, shape index: {}]   ;;  %s11192_s6 = inlined_call_operand.vmem [shape: f32[1,18], index: 6, kind: input, shape index: {}]   ;;  %s11193_s7 = inlined_call_operand.vmem [shape: f32[2,2,8,16,8], index: 7, kind: output, shape index: {}]  }
   0x1   :  { %s5946_s26 = smov 0   ;;  %s5948_s27 = smov 0  }
   0x2   :  { %s5950_s28 = smov 0  }
   0x3 LB: > { %s26_s29 = sadd.s32 1, %s5872_s26  ;;  %s29_s30 = sadd.s32 1, %s5876_s27  ;;  %s5880_s28 = sphi %s5950_s28, %s17_s28   ;;  %s5876_s27 = sphi %s5948_s27, %s12687_s27   ;;  %s5872_s26 = sphi %s5946_s26, %s12686_s26   ;;  %s5868_s25 = sphi %s5944_s25, %s12685_s25   ;;  %s5864_s24 = sphi %s5942_s24, %s12684_s24  }
   0x4   : > { %p27_p0 = scmp.ge.s32.totalorder %s26_s29, 2  ;;  %p5605_p1 = scmp.ge.s32.totalorder %s5880_s28, 1 }
   0x5   : > { %p257_p2 = scmp.lt.s32.totalorder %s5880_s28, 5 }
   0x6   : > { %s12689_s29 = smov (%p27_p0, %s26_s29), 0  ;;  %s12691_s30 = smov (!%p27_p0, %s29_s30), %s5876_s27 }
   0x7   : > { %p258_p3 = pnand %p5605_p1, %p257_p2  ;;  %p31_p4 = scmp.ge.s32.totalorder %s12691_s30, 2 }
   0x9   : > { %s12693_s30 = smov (%p31_p4, %s12691_s30), 0  ;;  %261 = sbr.rel (%p258_p3) target bundleno = 2703 (0xa8f), region = 48 }
   0xe   : > { %p297_p5 = scmp.lt.s32.totalorder %s5868_s25, 1  ;;  %p299_p6 = scmp.lt.s32.totalorder %s5864_s24, 1  ;;  %v11196_v0 = vmov 0   ;;  %v11198_v31 = vmov 1   ;;  %v11194_v32 = vmov 2   ;;  %v11200_v51 = vmov 3  }
   0xf   : > { %5681 = vset.pattern.permute.xlu2 %v11196_v0  ;;  %5680 = vset.pattern.permute.xlu1 %v11196_v0  ;;  %s5610_s20 = sshll.u32 %s5864_s24, 3  ;;  %s5894_s22 = smov 4  }
  0x10   : > { %5679 = vset.pattern.permute.xlu0 %v11196_v0  ;;  %s12695_s25 = smov (!%p297_p5, %s5868_s25), 1  ;;  %s5611_s21 = sadd.s32 4294967295, %s5610_s20 }
  0x11   : > { %s5981_s8 = scalar_select %p299_p6, %s5864_s24, 1 }
  0x12   : > { %s5618_s9 = smul.u32 60, %s12695_s25  ;;  %s5608_s24 = sshll.u32 %s12695_s25, 5 }
  0x13   : > { %s5617_s10 = smul.u32 30, %s5981_s8  ;;  %s5607_s23 = sshll.u32 %s5981_s8, 4 }
  0x14   : > { %s312_s25 = sadd.s32 %s5608_s24, %s5607_s23 }
  0x15   : > { %s303_s11 = sadd.s32 %s5618_s9, %s5617_s10  ;;  %s5609_s8 = sshll.u32 %s312_s25, 3 }
  0x16   : > { %s5606_s12 = sshll.u32 %s303_s11, 3  ;;  %s10922_s11 = scalar_lea.vmem %s11193_s7, %s5609_s8 }
  0x17   : > { %s5988_s15 = scalar_lea.vmem %s11186_s0, %s5606_s12 }
  0x18   : > { %v5991_v1 = vld [vmem:[%s5988_s15 + $0x20] sm:$0xff]  ;;  %v5994_v2 = vld [vmem:[%s5988_s15 + $0x10] sm:$0x3]  ;;  %v6003_v4 = vld [vmem:[%s5988_s15 + $0x28] sm:$0x3] }
  0x19   : > { %v5997_v3 = vld [vmem:[%s5988_s15] sm:$0xff]  ;;  %373 = vperm.xlu2 %5681, %v5991_v1   ;;  %363 = vperm.xlu1 %5680, %v5994_v2   ;;  %v6006_v5 = vld [vmem:[%s5988_s15 + $0x18] sm:$0xff]  ;;  %v6009_v6 = vld [vmem:[%s5988_s15 + $0x8] sm:$0xff] }
  0x1a   : > { %353 = vperm.xlu0 %5679, %v5997_v3   ;;  %v6015_v7 = vld [vmem:[%s5988_s15 + $0x40] sm:$0x3]  ;;  %v6018_v8 = vld [vmem:[%s5988_s15 + $0x38] sm:$0xff]  ;;  %v6021_v9 = vld [vmem:[%s5988_s15 + $0x30] sm:$0xff] }
  0x1b   : > { %v6027_v10 = vld [vmem:[%s5988_s15 + $0x58] sm:$0x3]  ;;  %v6030_v11 = vld [vmem:[%s5988_s15 + $0x50] sm:$0xff]  ;;  %v6033_v12 = vld [vmem:[%s5988_s15 + $0x48] sm:$0xff] }
  0x1c   : > { %v6039_v13 = vld [vmem:[%s5988_s15 + $0x70] sm:$0x3]  ;;  %v6042_v14 = vld [vmem:[%s5988_s15 + $0x68] sm:$0xff]  ;;  %v6045_v15 = vld [vmem:[%s5988_s15 + $0x60] sm:$0xff] }
  0x1d   : > { %v6051_v16 = vld [vmem:[%s5988_s15 + $0x88] sm:$0x3]  ;;  %v6054_v17 = vld [vmem:[%s5988_s15 + $0x80] sm:$0xff]  ;;  %v6057_v18 = vld [vmem:[%s5988_s15 + $0x78] sm:$0xff] }
  0x1e   : > { %v6063_v19 = vld [vmem:[%s5988_s15 + $0xa0] sm:$0x3]  ;;  %v6066_v20 = vld [vmem:[%s5988_s15 + $0x98] sm:$0xff]  ;;  %v6069_v21 = vld [vmem:[%s5988_s15 + $0x90] sm:$0xff] }
  0x1f   : > { %v6075_v22 = vld [vmem:[%s5988_s15 + $0xb8] sm:$0x3]  ;;  %v6078_v23 = vld [vmem:[%s5988_s15 + $0xb0] sm:$0xff]  ;;  %v6081_v24 = vld [vmem:[%s5988_s15 + $0xa8] sm:$0xff] }
  0x20   : > { %v6087_v25 = vld [vmem:[%s5988_s15 + $0xd0] sm:$0x3]  ;;  %v6090_v26 = vld [vmem:[%s5988_s15 + $0xc8] sm:$0xff]  ;;  %v6093_v27 = vld [vmem:[%s5988_s15 + $0xc0] sm:$0xff] }
  0x21   : > { %378 = vperm.xlu2 %5681, %v6003_v4   ;;  %368 = vperm.xlu1 %5680, %v6006_v5   ;;  %v6099_v28 = vld [vmem:[%s5988_s15 + $0xe8] sm:$0x3]  ;;  %v6102_v29 = vld [vmem:[%s5988_s15 + $0xe0] sm:$0xff]  ;;  %v6105_v30 = vld [vmem:[%s5988_s15 + $0xd8] sm:$0xff] }
  0x22   : > { %358 = vperm.xlu0 %5679, %v6009_v6  }
  0x29   : > { %393 = vperm.xlu2 %5681, %v6015_v7   ;;  %388 = vperm.xlu1 %5680, %v6018_v8  }
  0x2a   : > { %383 = vperm.xlu0 %5679, %v6021_v9  }
  0x31   : > { %408 = vperm.xlu2 %5681, %v6027_v10   ;;  %403 = vperm.xlu1 %5680, %v6030_v11  }
  0x32   : > { %398 = vperm.xlu0 %5679, %v6033_v12  }
  0x39   : > { %423 = vperm.xlu2 %5681, %v6039_v13   ;;  %418 = vperm.xlu1 %5680, %v6042_v14  }
  0x3a   : > { %413 = vperm.xlu0 %5679, %v6045_v15  }
  0x41   : > { %438 = vperm.xlu2 %5681, %v6051_v16   ;;  %433 = vperm.xlu1 %5680, %v6054_v17  }
  0x42   : > { %428 = vperm.xlu0 %5679, %v6057_v18  }
  0x49   : > { %453 = vperm.xlu2 %5681, %v6063_v19   ;;  %448 = vperm.xlu1 %5680, %v6066_v20  }
  0x4a   : > { %443 = vperm.xlu0 %5679, %v6069_v21  }
  0x51   : > { %468 = vperm.xlu2 %5681, %v6075_v22   ;;  %463 = vperm.xlu1 %5680, %v6078_v23  }
  0x52   : > { %458 = vperm.xlu0 %5679, %v6081_v24  }
  0x59   : > { %483 = vperm.xlu2 %5681, %v6087_v25   ;;  %478 = vperm.xlu1 %5680, %v6090_v26  }
  0x5a   : > { %473 = vperm.xlu0 %5679, %v6093_v27  }
  0x61   : > { %498 = vperm.xlu2 %5681, %v6099_v28   ;;  %493 = vperm.xlu1 %5680, %v6102_v29  }
  0x62   : > { %488 = vperm.xlu0 %5679, %v6105_v30  }
  0x69   : > { %5683 = vset.pattern.permute.xlu2 %v11198_v31  ;;  %5682 = vset.pattern.permute.xlu1 %v11198_v31 }
  0x6a   : > { %5686 = vset.pattern.permute.xlu0 %v11194_v32  ;;  %571 = vperm.xlu2 %5683, %v5994_v2  }
  0x6b   : > { %567 = vperm.xlu1 %5682, %v6009_v6   ;;  %752 = vperm.xlu0 %5686, %v5994_v2  }
  0x72   : > { %579 = vperm.xlu2 %5683, %v5991_v1  }
  0x73   : > { %575 = vperm.xlu1 %5682, %v6006_v5   ;;  %772 = vperm.xlu0 %5686, %v6018_v8   ;;  %v6119_v33 = vpop.permute.xlu2 %373 }
  0x7a   : > { %591 = vperm.xlu2 %5683, %v6018_v8  }
  0x7b   : > { %587 = vperm.xlu1 %5682, %v6021_v9   ;;  %784 = vperm.xlu0 %5686, %v6030_v11   ;;  %v6124_v34 = vpop.permute.xlu2 %378 }
  0x82   : > { %603 = vperm.xlu2 %5683, %v6030_v11  }
  0x83   : > { %599 = vperm.xlu1 %5682, %v6033_v12   ;;  %796 = vperm.xlu0 %5686, %v6042_v14   ;;  %v6129_v35 = vpop.permute.xlu2 %393 }
  0x8a   : > { %615 = vperm.xlu2 %5683, %v6042_v14  }
  0x8b   : > { %611 = vperm.xlu1 %5682, %v6045_v15   ;;  %808 = vperm.xlu0 %5686, %v6054_v17   ;;  %v6134_v36 = vpop.permute.xlu2 %408  ;;  %v6136_v37 = vpop.permute.xlu1 %363 }
  0x8c   : > { %v6138_v38 = vpop.permute.xlu0 %353 }
  0x92   : > { %627 = vperm.xlu2 %5683, %v6054_v17  }
  0x93   : > { %623 = vperm.xlu1 %5682, %v6057_v18   ;;  %820 = vperm.xlu0 %5686, %v6066_v20   ;;  %v6143_v39 = vpop.permute.xlu2 %423  ;;  %v6145_v40 = vpop.permute.xlu1 %368 }
  0x94   : > { %v6147_v41 = vpop.permute.xlu0 %358 }
  0x9a   : > { %639 = vperm.xlu2 %5683, %v6066_v20  }
  0x9b   : > { %635 = vperm.xlu1 %5682, %v6069_v21   ;;  %832 = vperm.xlu0 %5686, %v6078_v23   ;;  %v6152_v42 = vpop.permute.xlu2 %438  ;;  %v6154_v43 = vpop.permute.xlu1 %388 }
  0x9c   : > { %v6156_v44 = vpop.permute.xlu0 %383 }
  0xa2   : > { %651 = vperm.xlu2 %5683, %v6078_v23  }
  0xa3   : > { %647 = vperm.xlu1 %5682, %v6081_v24   ;;  %844 = vperm.xlu0 %5686, %v6090_v26   ;;  %v6161_v45 = vpop.permute.xlu2 %453  ;;  %v6163_v46 = vpop.permute.xlu1 %403 }
  0xa4   : > { %v6165_v47 = vpop.permute.xlu0 %398 }
  0xaa   : > { %663 = vperm.xlu2 %5683, %v6090_v26  }
  0xab   : > { %659 = vperm.xlu1 %5682, %v6093_v27   ;;  %856 = vperm.xlu0 %5686, %v6102_v29   ;;  %v6170_v48 = vpop.permute.xlu2 %468  ;;  %v6172_v49 = vpop.permute.xlu1 %418 }
  0xac   : > { %v6174_v50 = vpop.permute.xlu0 %413 }
  0xb2   : > { %675 = vperm.xlu2 %5683, %v6102_v29  }
  0xb3   : > { %671 = vperm.xlu1 %5682, %v6105_v30   ;;  %5688 = vset.pattern.permute.xlu0 %v11200_v51  ;;  %v6179_v52 = vpop.permute.xlu2 %483  ;;  %v6181_v53 = vpop.permute.xlu1 %433 }
  0xb4   : > { %929 = vperm.xlu0 %5688, %v6009_v6   ;;  %v6184_v54 = vpop.permute.xlu0 %428 }
  0xba   : > { %5685 = vset.pattern.permute.xlu2 %v11194_v32 }
  0xbb   : > { %5684 = vset.pattern.permute.xlu1 %v11194_v32  ;;  %v6188_v55 = vpop.permute.xlu2 %498  ;;  %v6190_v56 = vpop.permute.xlu1 %448  ;;  %748 = vperm.xlu2 %5685, %v6009_v6  }
  0xbc   : > { %744 = vperm.xlu1 %5684, %v5997_v3   ;;  %949 = vperm.xlu0 %5688, %v6021_v9   ;;  %v6195_v57 = vpop.permute.xlu0 %443 }
  0xc3   : > { %v6197_v58 = vpop.permute.xlu1 %463  ;;  %760 = vperm.xlu2 %5685, %v5991_v1  }
  0xc4   : > { %756 = vperm.xlu1 %5684, %v6006_v5   ;;  %961 = vperm.xlu0 %5688, %v6033_v12   ;;  %v6202_v59 = vpop.permute.xlu0 %458  ;;  %v6204_v60 = vpop.permute.xlu2 %571 }
  0xcb   : > { %v6206_v61 = vpop.permute.xlu1 %478  ;;  %768 = vperm.xlu2 %5685, %v6021_v9  }
  0xcc   : > { %11421 = vst [vmem:[#allocation2_spill] sm:$0xff] %v6206_v61  ;;  %764 = vperm.xlu1 %5684, %v6003_v4   ;;  %973 = vperm.xlu0 %5688, %v6045_v15   ;;  %v6211_v62 = vpop.permute.xlu0 %473  ;;  %v6213_v63 = vpop.permute.xlu2 %579 }
  0xcd   : > { %11422 = vst [vmem:[#allocation3_spill] sm:$0xff] %v6211_v62 }
  0xce   : > { %11423 = vst [vmem:[#allocation4_spill] sm:$0xff] %v6213_v63 }
  0xd3   : > { %v6215_v32 = vpop.permute.xlu1 %493  ;;  %780 = vperm.xlu2 %5685, %v6033_v12  }
  0xd4   : > { %11424 = vst [vmem:[#allocation5_spill] sm:$0xff] %v6215_v32  ;;  %776 = vperm.xlu1 %5684, %v6015_v7   ;;  %985 = vperm.xlu0 %5688, %v6057_v18   ;;  %v6220_v0 = vpop.permute.xlu0 %488  ;;  %v6222_v31 = vpop.permute.xlu2 %591 }
  0xd5   : > { %11425 = vst [vmem:[#allocation6_spill] sm:$0xff] %v6220_v0 }
  0xd6   : > { %11426 = vst [vmem:[#allocation7_spill] sm:$0xff] %v6222_v31 }
  0xdb   : > { %792 = vperm.xlu2 %5685, %v6045_v15  }
  0xdc   : > { %788 = vperm.xlu1 %5684, %v6027_v10   ;;  %997 = vperm.xlu0 %5688, %v6069_v21   ;;  %v6227_v51 = vpop.permute.xlu2 %603 }
  0xdd   : > { %11427 = vst [vmem:[#allocation8_spill] sm:$0xff] %v6227_v51  ;;  %v6229_v63 = vpop.permute.xlu1 %567  ;;  %v6231_v32 = vpop.permute.xlu0 %752 }
  0xde   : > { %11428 = vst [vmem:[#allocation9_spill] sm:$0xff] %v6229_v63 }
  0xdf   : > { %11429 = vst [vmem:[#allocation10_spill] sm:$0xff] %v6231_v32 }
  0xe3   : > { %804 = vperm.xlu2 %5685, %v6057_v18  }
  0xe4   : > { %800 = vperm.xlu1 %5684, %v6039_v13   ;;  %1009 = vperm.xlu0 %5688, %v6081_v24   ;;  %v6236_v0 = vpop.permute.xlu2 %615 }
  0xe5   : > { %11430 = vst [vmem:[#allocation11_spill] sm:$0xff] %v6236_v0  ;;  %v6238_v31 = vpop.permute.xlu1 %575  ;;  %v6240_v62 = vpop.permute.xlu0 %772 }
  0xe6   : > { %11431 = vst [vmem:[#allocation12_spill] sm:$0xff] %v6238_v31 }
  0xe7   : > { %11432 = vst [vmem:[#allocation13_spill] sm:$0xff] %v6240_v62 }
  0xeb   : > { %816 = vperm.xlu2 %5685, %v6069_v21  }
  0xec   : > { %812 = vperm.xlu1 %5684, %v6051_v16   ;;  %1021 = vperm.xlu0 %5688, %v6093_v27   ;;  %v6245_v63 = vpop.permute.xlu2 %627 }
  0xed   : > { %11433 = vst [vmem:[#allocation14_spill] sm:$0xff] %v6245_v63  ;;  %v6247_v32 = vpop.permute.xlu1 %587  ;;  %v6249_v51 = vpop.permute.xlu0 %784  ;;  %v11202_v63 = vmov 4  }
  0xee   : > { %11434 = vst [vmem:[#allocation15_spill] sm:$0xff] %v6247_v32 }
  0xef   : > { %11435 = vst [vmem:[#allocation16_spill] sm:$0xff] %v6249_v51 }
  0xf3   : > { %828 = vperm.xlu2 %5685, %v6081_v24  }
  0xf4   : > { %824 = vperm.xlu1 %5684, %v6063_v19   ;;  %1033 = vperm.xlu0 %5688, %v6105_v30   ;;  %v6254_v31 = vpop.permute.xlu2 %639 }
  0xf5   : > { %11436 = vst [vmem:[#allocation17_spill] sm:$0xff] %v6254_v31  ;;  %v6256_v62 = vpop.permute.xlu1 %599  ;;  %v6258_v0 = vpop.permute.xlu0 %796 }
  0xf6   : > { %11437 = vst [vmem:[#allocation18_spill] sm:$0xff] %v6256_v62 }
  0xf7   : > { %11438 = vst [vmem:[#allocation19_spill] sm:$0xff] %v6258_v0 }
  0xfb   : > { %840 = vperm.xlu2 %5685, %v6093_v27  }
  0xfc   : > { %836 = vperm.xlu1 %5684, %v6075_v22   ;;  %5690 = vset.pattern.permute.xlu0 %v11202_v63  ;;  %v6263_v51 = vpop.permute.xlu2 %651  ;;  %v11445_v63 = vmov 3  }
  0xfd   : > { %11439 = vst [vmem:[#allocation20_spill] sm:$0xff] %v6263_v51  ;;  %v6265_v32 = vpop.permute.xlu1 %611  ;;  %1106 = vperm.xlu0 %5690, %v5997_v3   ;;  %v6268_v61 = vpop.permute.xlu0 %808 }
  0xfe   : > { %11440 = vst [vmem:[#allocation21_spill] sm:$0xff] %v6265_v32 }
  0xff   : > { %11441 = vst [vmem:[#allocation22_spill] sm:$0xff] %v6268_v61 }
 0x103   : > { %852 = vperm.xlu2 %5685, %v6105_v30  }
 0x104   : > { %848 = vperm.xlu1 %5684, %v6087_v25   ;;  %v6272_v0 = vpop.permute.xlu2 %663 }
 0x105   : > { %11442 = vst [vmem:[#allocation23_spill] sm:$0xff] %v6272_v0  ;;  %v6274_v62 = vpop.permute.xlu1 %623  ;;  %1126 = vperm.xlu0 %5690, %v6003_v4   ;;  %v6277_v31 = vpop.permute.xlu0 %820 }
 0x106   : > { %11443 = vst [vmem:[#allocation24_spill] sm:$0xff] %v6274_v62 }
 0x107   : > { %11444 = vst [vmem:[#allocation25_spill] sm:$0xff] %v6277_v31 }
 0x10b   : > { %5687 = vset.pattern.permute.xlu2 %v11445_v63 }
 0x10c   : > { %860 = vperm.xlu1 %5684, %v6099_v28   ;;  %v6281_v32 = vpop.permute.xlu2 %675  ;;  %925 = vperm.xlu2 %5687, %v5997_v3  }
 0x10d   : > { %11446 = vst [vmem:[#allocation26_spill] sm:$0xff] %v6281_v32  ;;  %v6284_v61 = vpop.permute.xlu1 %635  ;;  %1138 = vperm.xlu0 %5690, %v6015_v7   ;;  %v6287_v51 = vpop.permute.xlu0 %832 }
 0x10e   : > { %11447 = vst [vmem:[#allocation27_spill] sm:$0xff] %v6284_v61 }
 0x10f   : > { %11448 = vst [vmem:[#allocation28_spill] sm:$0xff] %v6287_v51 }
 0x114   : > { %5689 = vset.pattern.permute.xlu1 %v11445_v63  ;;  %937 = vperm.xlu2 %5687, %v6006_v5  }
 0x115   : > { %v6291_v62 = vpop.permute.xlu1 %647  ;;  %933 = vperm.xlu1 %5689, %v5994_v2   ;;  %1150 = vperm.xlu0 %5690, %v6027_v10   ;;  %v6295_v31 = vpop.permute.xlu0 %844 }
 0x116   : > { %11449 = vst [vmem:[#allocation29_spill] sm:$0xff] %v6291_v62  ;;  %v6297_v32 = vpop.permute.xlu2 %748 }
 0x117   : > { %11450 = vst [vmem:[#allocation30_spill] sm:$0xff] %v6295_v31 }
 0x118   : > { %11451 = vst [vmem:[#allocation31_spill] sm:$0xff] %v6297_v32 }
 0x11c   : > { %945 = vperm.xlu2 %5687, %v6003_v4  }
 0x11d   : > { %v6300_v61 = vpop.permute.xlu1 %659  ;;  %941 = vperm.xlu1 %5689, %v5991_v1   ;;  %1162 = vperm.xlu0 %5690, %v6039_v13   ;;  %v6304_v63 = vpop.permute.xlu0 %856 }
 0x11e   : > { %11452 = vst [vmem:[#allocation32_spill] sm:$0xff] %v6300_v61  ;;  %v6306_v51 = vpop.permute.xlu2 %760 }
 0x11f   : > { %11453 = vst [vmem:[#allocation33_spill] sm:$0xff] %v6304_v63 }
 0x120   : > { %11454 = vst [vmem:[#allocation34_spill] sm:$0xff] %v6306_v51 }
 0x124   : > { %957 = vperm.xlu2 %5687, %v6015_v7  }
 0x125   : > { %v6309_v62 = vpop.permute.xlu1 %671  ;;  %953 = vperm.xlu1 %5689, %v6018_v8   ;;  %1174 = vperm.xlu0 %5690, %v6051_v16  }
 0x126   : > { %11455 = vst [vmem:[#allocation35_spill] sm:$0xff] %v6309_v62  ;;  %v6313_v32 = vpop.permute.xlu2 %768  ;;  %v6315_v31 = vpop.permute.xlu0 %929 }
 0x127   : > { %11456 = vst [vmem:[#allocation36_spill] sm:$0xff] %v6313_v32 }
 0x128   : > { %11457 = vst [vmem:[#allocation37_spill] sm:$0xff] %v6315_v31 }
 0x12c   : > { %969 = vperm.xlu2 %5687, %v6027_v10  }
 0x12d   : > { %965 = vperm.xlu1 %5689, %v6030_v11   ;;  %1186 = vperm.xlu0 %5690, %v6063_v19  }
 0x12e   : > { %v6320_v63 = vpop.permute.xlu2 %780  ;;  %v6322_v51 = vpop.permute.xlu1 %744 }
 0x12f   : > { %11458 = vst [vmem:[#allocation38_spill] sm:$0xff] %v6320_v63  ;;  %v6324_v61 = vpop.permute.xlu0 %949 }
 0x130   : > { %11459 = vst [vmem:[#allocation39_spill] sm:$0xff] %v6322_v51 }
 0x131   : > { %11460 = vst [vmem:[#allocation40_spill] sm:$0xff] %v6324_v61 }
 0x134   : > { %981 = vperm.xlu2 %5687, %v6039_v13  }
 0x135   : > { %977 = vperm.xlu1 %5689, %v6042_v14   ;;  %1198 = vperm.xlu0 %5690, %v6075_v22  }
 0x136   : > { %v6329_v32 = vpop.permute.xlu2 %792  ;;  %v6331_v31 = vpop.permute.xlu1 %756 }
 0x137   : > { %11461 = vst [vmem:[#allocation41_spill] sm:$0xff] %v6329_v32  ;;  %v6333_v62 = vpop.permute.xlu0 %961 }
 0x138   : > { %11462 = vst [vmem:[#allocation42_spill] sm:$0xff] %v6331_v31 }
 0x139   : > { %11463 = vst [vmem:[#allocation43_spill] sm:$0xff] %v6333_v62 }
 0x13c   : > { %993 = vperm.xlu2 %5687, %v6051_v16  }
 0x13d   : > { %989 = vperm.xlu1 %5689, %v6054_v17   ;;  %1210 = vperm.xlu0 %5690, %v6087_v25  }
 0x13e   : > { %v6338_v51 = vpop.permute.xlu2 %804  ;;  %v6340_v61 = vpop.permute.xlu1 %764 }
 0x13f   : > { %11464 = vst [vmem:[#allocation44_spill] sm:$0xff] %v6338_v51  ;;  %v6342_v63 = vpop.permute.xlu0 %973  ;;  %v11205_v51 = vmov 5  }
 0x140   : > { %11465 = vst [vmem:[#allocation45_spill] sm:$0xff] %v6340_v61 }
 0x141   : > { %11466 = vst [vmem:[#allocation46_spill] sm:$0xff] %v6342_v63 }
 0x144   : > { %1005 = vperm.xlu2 %5687, %v6063_v19  }
 0x145   : > { %1001 = vperm.xlu1 %5689, %v6066_v20   ;;  %1222 = vperm.xlu0 %5690, %v6099_v28  }
 0x146   : > { %v6347_v31 = vpop.permute.xlu2 %816  ;;  %v6349_v62 = vpop.permute.xlu1 %776 }
 0x147   : > { %11467 = vst [vmem:[#allocation47_spill] sm:$0xff] %v6347_v31  ;;  %v6351_v32 = vpop.permute.xlu0 %985 }
 0x148   : > { %11468 = vst [vmem:[#allocation48_spill] sm:$0xff] %v6349_v62 }
 0x149   : > { %11469 = vst [vmem:[#allocation49_spill] sm:$0xff] %v6351_v32 }
 0x14c   : > { %1017 = vperm.xlu2 %5687, %v6075_v22  }
 0x14d   : > { %1013 = vperm.xlu1 %5689, %v6078_v23   ;;  %5695 = vset.pattern.permute.xlu0 %v11205_v51 }
 0x14e   : > { %v6356_v61 = vpop.permute.xlu2 %828  ;;  %v6358_v63 = vpop.permute.xlu1 %788  ;;  %1295 = vperm.xlu0 %5695, %v5994_v2  }
 0x14f   : > { %11470 = vst [vmem:[#allocation50_spill] sm:$0xff] %v6356_v61  ;;  %v6361_v0 = vpop.permute.xlu0 %997  ;;  %v11479_v61 = vmov 4  }
 0x150   : > { %11471 = vst [vmem:[#allocation51_spill] sm:$0xff] %v6358_v63 }
 0x151   : > { %11472 = vst [vmem:[#allocation52_spill] sm:$0xff] %v6361_v0 }
 0x154   : > { %1029 = vperm.xlu2 %5687, %v6087_v25  }
 0x155   : > { %1025 = vperm.xlu1 %5689, %v6090_v26  }
 0x156   : > { %v6365_v62 = vpop.permute.xlu2 %840  ;;  %v6367_v32 = vpop.permute.xlu1 %800  ;;  %1315 = vperm.xlu0 %5695, %v6018_v8  }
 0x157   : > { %11473 = vst [vmem:[#allocation53_spill] sm:$0xff] %v6365_v62  ;;  %v6370_v31 = vpop.permute.xlu0 %1009 }
 0x158   : > { %11474 = vst [vmem:[#allocation54_spill] sm:$0xff] %v6367_v32 }
 0x159   : > { %11475 = vst [vmem:[#allocation55_spill] sm:$0xff] %v6370_v31 }
 0x15c   : > { %1041 = vperm.xlu2 %5687, %v6099_v28  }
 0x15d   : > { %1037 = vperm.xlu1 %5689, %v6102_v29  }
 0x15e   : > { %v6374_v51 = vpop.permute.xlu2 %852  ;;  %v6376_v63 = vpop.permute.xlu1 %812  ;;  %1327 = vperm.xlu0 %5695, %v6030_v11  }
 0x15f   : > { %11476 = vst [vmem:[#allocation56_spill] sm:$0xff] %v6374_v51  ;;  %v6379_v0 = vpop.permute.xlu0 %1021 }
 0x160   : > { %11477 = vst [vmem:[#allocation57_spill] sm:$0xff] %v6376_v63 }
 0x161   : > { %11478 = vst [vmem:[#allocation58_spill] sm:$0xff] %v6379_v0 }
 0x164   : > { %5692 = vset.pattern.permute.xlu2 %v11479_v61 }
 0x165   : > { %5691 = vset.pattern.permute.xlu1 %v11479_v61  ;;  %1114 = vperm.xlu2 %5692, %v5994_v2  }
 0x166   : > { %1110 = vperm.xlu1 %5691, %v6009_v6   ;;  %v6385_v32 = vpop.permute.xlu1 %824  ;;  %1339 = vperm.xlu0 %5695, %v6042_v14   ;;  %v6388_v31 = vpop.permute.xlu2 %925 }
 0x167   : > { %11480 = vst [vmem:[#allocation59_spill] sm:$0xff] %v6385_v32  ;;  %v6390_v51 = vpop.permute.xlu0 %1033 }
 0x168   : > { %11481 = vst [vmem:[#allocation60_spill] sm:$0xff] %v6388_v31 }
 0x169   : > { %11482 = vst [vmem:[#allocation61_spill] sm:$0xff] %v6390_v51 }
 0x16d   : > { %1122 = vperm.xlu2 %5692, %v5991_v1  }
 0x16e   : > { %1118 = vperm.xlu1 %5691, %v6006_v5   ;;  %v6394_v63 = vpop.permute.xlu1 %836  ;;  %1351 = vperm.xlu0 %5695, %v6054_v17   ;;  %v6397_v61 = vpop.permute.xlu2 %937 }
 0x16f   : > { %11483 = vst [vmem:[#allocation62_spill] sm:$0xff] %v6394_v63  ;;  %v6399_v0 = vpop.permute.xlu0 %1106 }
 0x170   : > { %11484 = vst [vmem:[#allocation63_spill] sm:$0xff] %v6397_v61 }
 0x171   : > { %11485 = vst [vmem:[#allocation64_spill] sm:$0xff] %v6399_v0 }
 0x175   : > { %1134 = vperm.xlu2 %5692, %v6018_v8  }
 0x176   : > { %1130 = vperm.xlu1 %5691, %v6021_v9   ;;  %v6403_v32 = vpop.permute.xlu1 %848  ;;  %1363 = vperm.xlu0 %5695, %v6066_v20   ;;  %v6406_v31 = vpop.permute.xlu2 %945 }
 0x177   : > { %11486 = vst [vmem:[#allocation65_spill] sm:$0xff] %v6403_v32  ;;  %v6408_v51 = vpop.permute.xlu0 %1126 }
 0x178   : > { %11487 = vst [vmem:[#allocation66_spill] sm:$0xff] %v6406_v31 }
 0x179   : > { %11488 = vst [vmem:[#allocation67_spill] sm:$0xff] %v6408_v51 }
 0x17d   : > { %1146 = vperm.xlu2 %5692, %v6030_v11  }
 0x17e   : > { %1142 = vperm.xlu1 %5691, %v6033_v12   ;;  %v6412_v63 = vpop.permute.xlu1 %860  ;;  %1375 = vperm.xlu0 %5695, %v6078_v23   ;;  %v6415_v0 = vpop.permute.xlu2 %957 }
 0x17f   : > { %11489 = vst [vmem:[#allocation68_spill] sm:$0xff] %v6412_v63  ;;  %v6417_v61 = vpop.permute.xlu0 %1138 }
 0x180   : > { %11490 = vst [vmem:[#allocation69_spill] sm:$0xff] %v6415_v0 }
 0x181   : > { %11491 = vst [vmem:[#allocation70_spill] sm:$0xff] %v6417_v61 }
 0x185   : > { %1158 = vperm.xlu2 %5692, %v6042_v14  }
 0x186   : > { %1154 = vperm.xlu1 %5691, %v6045_v15   ;;  %1387 = vperm.xlu0 %5695, %v6090_v26   ;;  %v6422_v31 = vpop.permute.xlu2 %969 }
 0x187   : > { %11492 = vst [vmem:[#allocation71_spill] sm:$0xff] %v6422_v31  ;;  %v6424_v51 = vpop.permute.xlu1 %933  ;;  %v6426_v32 = vpop.permute.xlu0 %1150  ;;  %v11208_v31 = vmov 6  }
 0x188   : > { %11493 = vst [vmem:[#allocation72_spill] sm:$0xff] %v6424_v51 }
 0x189   : > { %11494 = vst [vmem:[#allocation73_spill] sm:$0xff] %v6426_v32 }
 0x18d   : > { %1170 = vperm.xlu2 %5692, %v6054_v17  }
 0x18e   : > { %1166 = vperm.xlu1 %5691, %v6057_v18   ;;  %1399 = vperm.xlu0 %5695, %v6102_v29   ;;  %v6431_v0 = vpop.permute.xlu2 %981 }
 0x18f   : > { %11495 = vst [vmem:[#allocation74_spill] sm:$0xff] %v6431_v0  ;;  %v6433_v61 = vpop.permute.xlu1 %941  ;;  %v6435_v63 = vpop.permute.xlu0 %1162 }
 0x190   : > { %11496 = vst [vmem:[#allocation75_spill] sm:$0xff] %v6433_v61 }
 0x191   : > { %11497 = vst [vmem:[#allocation76_spill] sm:$0xff] %v6435_v63 }
 0x195   : > { %1182 = vperm.xlu2 %5692, %v6066_v20  }
 0x196   : > { %1178 = vperm.xlu1 %5691, %v6069_v21   ;;  %5697 = vset.pattern.permute.xlu0 %v11208_v31  ;;  %v6440_v32 = vpop.permute.xlu2 %993 }
 0x197   : > { %11498 = vst [vmem:[#allocation77_spill] sm:$0xff] %v6440_v32  ;;  %v6442_v51 = vpop.permute.xlu1 %953  ;;  %1472 = vperm.xlu0 %5697, %v6009_v6   ;;  %v6445_v62 = vpop.permute.xlu0 %1174 }
 0x198   : > { %11499 = vst [vmem:[#allocation78_spill] sm:$0xff] %v6442_v51  ;;  %v11509_v51 = vmov 5  }
 0x199   : > { %11500 = vst [vmem:[#allocation79_spill] sm:$0xff] %v6445_v62 }
 0x19d   : > { %1194 = vperm.xlu2 %5692, %v6078_v23  }
 0x19e   : > { %1190 = vperm.xlu1 %5691, %v6081_v24   ;;  %v6449_v63 = vpop.permute.xlu2 %1005 }
 0x19f   : > { %11501 = vst [vmem:[#allocation80_spill] sm:$0xff] %v6449_v63  ;;  %v6451_v0 = vpop.permute.xlu1 %965  ;;  %1492 = vperm.xlu0 %5697, %v6021_v9   ;;  %v6454_v61 = vpop.permute.xlu0 %1186 }
 0x1a0   : > { %11502 = vst [vmem:[#allocation81_spill] sm:$0xff] %v6451_v0 }
 0x1a1   : > { %11503 = vst [vmem:[#allocation82_spill] sm:$0xff] %v6454_v61 }
 0x1a5   : > { %1206 = vperm.xlu2 %5692, %v6090_v26  }
 0x1a6   : > { %1202 = vperm.xlu1 %5691, %v6093_v27   ;;  %v6458_v31 = vpop.permute.xlu2 %1017 }
 0x1a7   : > { %11504 = vst [vmem:[#allocation83_spill] sm:$0xff] %v6458_v31  ;;  %v6460_v32 = vpop.permute.xlu1 %977  ;;  %1504 = vperm.xlu0 %5697, %v6033_v12   ;;  %v6463_v62 = vpop.permute.xlu0 %1198 }
 0x1a8   : > { %11505 = vst [vmem:[#allocation84_spill] sm:$0xff] %v6463_v62 }
 0x1ad   : > { %1218 = vperm.xlu2 %5692, %v6102_v29  }
 0x1ae   : > { %1214 = vperm.xlu1 %5691, %v6105_v30   ;;  %v6467_v63 = vpop.permute.xlu2 %1029 }
 0x1af   : > { %11506 = vst [vmem:[#allocation85_spill] sm:$0xff] %v6467_v63  ;;  %v6469_v0 = vpop.permute.xlu1 %989  ;;  %1516 = vperm.xlu0 %5697, %v6045_v15   ;;  %v6472_v61 = vpop.permute.xlu0 %1210 }
 0x1b0   : > { %11507 = vst [vmem:[#allocation86_spill] sm:$0xff] %v6469_v0 }
 0x1b1   : > { %11508 = vst [vmem:[#allocation87_spill] sm:$0xff] %v6472_v61 }
 0x1b5   : > { %5694 = vset.pattern.permute.xlu2 %v11509_v51 }
 0x1b6   : > { %5693 = vset.pattern.permute.xlu1 %v11509_v51  ;;  %1291 = vperm.xlu2 %5694, %v6009_v6   ;;  %v6477_v31 = vpop.permute.xlu2 %1041 }
 0x1b7   : > { %11510 = vst [vmem:[#allocation88_spill] sm:$0xff] %v6477_v31  ;;  %1287 = vperm.xlu1 %5693, %v5997_v3   ;;  %v6480_v62 = vpop.permute.xlu1 %1001  ;;  %1528 = vperm.xlu0 %5697, %v6057_v18   ;;  %v6483_v63 = vpop.permute.xlu0 %1222 }
 0x1b8   : > { %11511 = vst [vmem:[#allocation89_spill] sm:$0xff] %v6480_v62 }
 0x1b9   : > { %11512 = vst [vmem:[#allocation90_spill] sm:$0xff] %v6483_v63 }
 0x1be   : > { %1303 = vperm.xlu2 %5694, %v5991_v1  }
 0x1bf   : > { %1299 = vperm.xlu1 %5693, %v6006_v5   ;;  %v6487_v61 = vpop.permute.xlu1 %1013  ;;  %1540 = vperm.xlu0 %5697, %v6069_v21   ;;  %v6490_v51 = vpop.permute.xlu2 %1114 }
 0x1c0   : > { %11513 = vst [vmem:[#allocation91_spill] sm:$0xff] %v6487_v61  ;;  %v6492_v0 = vpop.permute.xlu0 %1295 }
 0x1c1   : > { %11514 = vst [vmem:[#allocation92_spill] sm:$0xff] %v6492_v0 }
 0x1c6   : > { %1311 = vperm.xlu2 %5694, %v6021_v9  }
 0x1c7   : > { %1307 = vperm.xlu1 %5693, %v6003_v4   ;;  %v6496_v31 = vpop.permute.xlu1 %1025  ;;  %1552 = vperm.xlu0 %5697, %v6081_v24   ;;  %v6499_v63 = vpop.permute.xlu2 %1122 }
 0x1c8   : > { %11515 = vst [vmem:[#allocation93_spill] sm:$0xff] %v6496_v31  ;;  %v6501_v62 = vpop.permute.xlu0 %1315 }
 0x1c9   : > { %11516 = vst [vmem:[#allocation94_spill] sm:$0xff] %v6499_v63 }
 0x1ca   : > { %11517 = vst [vmem:[#allocation95_spill] sm:$0xff] %v6501_v62 }
 0x1ce   : > { %1323 = vperm.xlu2 %5694, %v6033_v12  }
 0x1cf   : > { %1319 = vperm.xlu1 %5693, %v6015_v7   ;;  %v6505_v61 = vpop.permute.xlu1 %1037  ;;  %1564 = vperm.xlu0 %5697, %v6093_v27   ;;  %v6508_v0 = vpop.permute.xlu2 %1134 }
 0x1d0   : > { %11518 = vst [vmem:[#allocation96_spill] sm:$0xff] %v6505_v61  ;;  %v6510_v9 = vpop.permute.xlu0 %1327  ;;  %v11211_v61 = vmov 7  }
 0x1d1   : > { %11519 = vst [vmem:[#allocation97_spill] sm:$0xff] %v6510_v9 }
 0x1d6   : > { %1335 = vperm.xlu2 %5694, %v6045_v15  }
 0x1d7   : > { %1331 = vperm.xlu1 %5693, %v6027_v10   ;;  %1576 = vperm.xlu0 %5697, %v6105_v30   ;;  %v6515_v63 = vpop.permute.xlu2 %1146 }
 0x1d8   : > { %v6517_v62 = vpop.permute.xlu1 %1110  ;;  %v6519_v12 = vpop.permute.xlu0 %1339 }
 0x1d9   : > { %11520 = vst [vmem:[#allocation98_spill] sm:$0xff] %v6517_v62 }
 0x1da   : > { %11521 = vst [vmem:[#allocation99_spill] sm:$0xff] %v6519_v12 }
 0x1de   : > { %1347 = vperm.xlu2 %5694, %v6057_v18  }
 0x1df   : > { %1343 = vperm.xlu1 %5693, %v6039_v13   ;;  %5699 = vset.pattern.permute.xlu0 %v11211_v61  ;;  %v6524_v9 = vpop.permute.xlu2 %1158 }
 0x1e0   : > { %v6526_v15 = vpop.permute.xlu1 %1118  ;;  %1649 = vperm.xlu0 %5699, %v5997_v3   ;;  %v6529_v31 = vpop.permute.xlu0 %1351 }
 0x1e1   : > { %11522 = vst [vmem:[#allocation100_spill] sm:$0xff] %v6526_v15 }
 0x1e2   : > { %11523 = vst [vmem:[#allocation101_spill] sm:$0xff] %v6529_v31 }
 0x1e6   : > { %1359 = vperm.xlu2 %5694, %v6069_v21  }
 0x1e7   : > { %1355 = vperm.xlu1 %5693, %v6051_v16   ;;  %v6533_v12 = vpop.permute.xlu2 %1170 }
 0x1e8   : > { %v6535_v18 = vpop.permute.xlu1 %1130  ;;  %1669 = vperm.xlu0 %5699, %v6003_v4   ;;  %v6538_v62 = vpop.permute.xlu0 %1363 }
 0x1e9   : > { %11524 = vst [vmem:[#allocation102_spill] sm:$0xff] %v6535_v18 }
 0x1ea   : > { %11525 = vst [vmem:[#allocation103_spill] sm:$0xff] %v6538_v62 }
 0x1ee   : > { %1371 = vperm.xlu2 %5694, %v6081_v24  }
 0x1ef   : > { %1367 = vperm.xlu1 %5693, %v6063_v19   ;;  %v6542_v61 = vpop.permute.xlu2 %1182 }
 0x1f0   : > { %v6544_v15 = vpop.permute.xlu1 %1142  ;;  %1681 = vperm.xlu0 %5699, %v6015_v7   ;;  %v6547_v21 = vpop.permute.xlu0 %1375 }
 0x1f1   : > { %11526 = vst [vmem:[#allocation104_spill] sm:$0xff] %v6544_v15 }
 0x1f2   : > { %11527 = vst [vmem:[#allocation105_spill] sm:$0xff] %v6547_v21  ;;  %v11533_v21 = vmov 6  }
 0x1f6   : > { %1383 = vperm.xlu2 %5694, %v6093_v27  }
 0x1f7   : > { %1379 = vperm.xlu1 %5693, %v6075_v22   ;;  %v6551_v31 = vpop.permute.xlu2 %1194 }
 0x1f8   : > { %v6553_v18 = vpop.permute.xlu1 %1154  ;;  %1693 = vperm.xlu0 %5699, %v6027_v10   ;;  %v6556_v24 = vpop.permute.xlu0 %1387 }
 0x1f9   : > { %11528 = vst [vmem:[#allocation106_spill] sm:$0xff] %v6553_v18 }
 0x1fa   : > { %11529 = vst [vmem:[#allocation107_spill] sm:$0xff] %v6556_v24 }
 0x1fe   : > { %1395 = vperm.xlu2 %5694, %v6105_v30  }
 0x1ff   : > { %1391 = vperm.xlu1 %5693, %v6087_v25   ;;  %v6560_v62 = vpop.permute.xlu2 %1206 }
 0x200   : > { %11530 = vst [vmem:[#allocation108_spill] sm:$0xff] %v6560_v62  ;;  %v6562_v15 = vpop.permute.xlu1 %1166  ;;  %1705 = vperm.xlu0 %5699, %v6039_v13   ;;  %v6565_v27 = vpop.permute.xlu0 %1399 }
 0x201   : > { %11531 = vst [vmem:[#allocation109_spill] sm:$0xff] %v6562_v15 }
 0x202   : > { %11532 = vst [vmem:[#allocation110_spill] sm:$0xff] %v6565_v27 }
 0x206   : > { %5696 = vset.pattern.permute.xlu2 %v11533_v21 }
 0x207   : > { %1403 = vperm.xlu1 %5693, %v6099_v28   ;;  %1468 = vperm.xlu2 %5696, %v5997_v3   ;;  %v6570_v18 = vpop.permute.xlu2 %1218 }
 0x208   : > { %v6572_v24 = vpop.permute.xlu1 %1178  ;;  %1717 = vperm.xlu0 %5699, %v6051_v16  }
 0x209   : > { %11534 = vst [vmem:[#allocation111_spill] sm:$0xff] %v6572_v24  ;;  %v6575_v30 = vpop.permute.xlu0 %1472 }
 0x20a   : > { %11535 = vst [vmem:[#allocation112_spill] sm:$0xff] %v6575_v30 }
 0x20f   : > { %5698 = vset.pattern.permute.xlu1 %v11533_v21  ;;  %1480 = vperm.xlu2 %5696, %v6006_v5  }
 0x210   : > { %1476 = vperm.xlu1 %5698, %v5994_v2   ;;  %v6580_v27 = vpop.permute.xlu1 %1190  ;;  %1729 = vperm.xlu0 %5699, %v6063_v19   ;;  %v6583_v15 = vpop.permute.xlu2 %1291 }
 0x211   : > { %11536 = vst [vmem:[#allocation113_spill] sm:$0xff] %v6580_v27  ;;  %v6585_v62 = vpop.permute.xlu0 %1492 }
 0x212   : > { %11537 = vst [vmem:[#allocation114_spill] sm:$0xff] %v6585_v62 }
 0x217   : > { %1488 = vperm.xlu2 %5696, %v6003_v4  }
 0x218   : > { %1484 = vperm.xlu1 %5698, %v5991_v1   ;;  %v6589_v24 = vpop.permute.xlu1 %1202  ;;  %1741 = vperm.xlu0 %5699, %v6075_v22   ;;  %v6592_v21 = vpop.permute.xlu2 %1303 }
 0x219   : > { %11538 = vst [vmem:[#allocation115_spill] sm:$0xff] %v6592_v21  ;;  %v6594_v5 = vpop.permute.xlu0 %1504 }
 0x21a   : > { %11539 = vst [vmem:[#allocation116_spill] sm:$0xff] %v6594_v5 }
 0x21f   : > { %1500 = vperm.xlu2 %5696, %v6015_v7  }
 0x220   : > { %1496 = vperm.xlu1 %5698, %v6018_v8   ;;  %v6598_v27 = vpop.permute.xlu1 %1214  ;;  %1753 = vperm.xlu0 %5699, %v6087_v25   ;;  %v6601_v62 = vpop.permute.xlu2 %1311  ;;  %v11544_v8 = vmov 1  }
 0x221   : > { %11540 = vst [vmem:[#allocation117_spill] sm:$0xff] %v6598_v27  ;;  %v6603_v30 = vpop.permute.xlu0 %1516 }
 0x222   : > { %11541 = vst [vmem:[#allocation118_spill] sm:$0xff] %v6603_v30 }
 0x227   : > { %1512 = vperm.xlu2 %5696, %v6027_v10  }
 0x228   : > { %1508 = vperm.xlu1 %5698, %v6030_v11   ;;  %1765 = vperm.xlu0 %5699, %v6099_v28   ;;  %v6608_v1 = vpop.permute.xlu2 %1323 }
 0x229   : > { %v6610_v5 = vpop.permute.xlu1 %1287  ;;  %v6612_v21 = vpop.permute.xlu0 %1528 }
 0x22a   : > { %11542 = vst [vmem:[#allocation119_spill] sm:$0xff] %v6610_v5 }
 0x22b   : > { %11543 = vst [vmem:[#allocation120_spill] sm:$0xff] %v6612_v21 }
 0x22f   : > { %1524 = vperm.xlu2 %5696, %v6039_v13  }
 0x230   : > { %1520 = vperm.xlu1 %5698, %v6042_v14   ;;  %5702 = vset.pattern.permute.xlu0 %v11544_v8  ;;  %v6617_v27 = vpop.permute.xlu2 %1335 }
 0x231   : > { %v6619_v30 = vpop.permute.xlu1 %1299  ;;  %563 = vperm.xlu0 %5702, %v5997_v3   ;;  %v6622_v11 = vpop.permute.xlu0 %1540 }
 0x232   : > { %11545 = vst [vmem:[#allocation121_spill] sm:$0xff] %v6622_v11 }
 0x237   : > { %1536 = vperm.xlu2 %5696, %v6051_v16  }
 0x238   : > { %1532 = vperm.xlu1 %5698, %v6054_v17   ;;  %v6626_v5 = vpop.permute.xlu2 %1347 }
 0x239   : > { %v6628_v21 = vpop.permute.xlu1 %1307  ;;  %583 = vperm.xlu0 %5702, %v6003_v4   ;;  %v6631_v14 = vpop.permute.xlu0 %1552 }
 0x23a   : > { %11546 = vst [vmem:[#allocation122_spill] sm:$0xff] %v6628_v21  ;;  %v11592_v21 = vld [vmem:[#allocation19_spill] sm:$0xff] }
 0x23b   : > { %11547 = vst [vmem:[#allocation123_spill] sm:$0xff] %v6631_v14 }
 0x23f   : > { %1548 = vperm.xlu2 %5696, %v6063_v19  }
 0x240   : > { %1544 = vperm.xlu1 %5698, %v6066_v20   ;;  %v6635_v8 = vpop.permute.xlu2 %1359  ;;  %v6654_v20 = vld [vmem:[%s11187_s1] sm:$0xff] }
 0x241   : > { %v6637_v3 = vpop.permute.xlu1 %1319  ;;  %595 = vperm.xlu0 %5702, %v6015_v7   ;;  %v6640_v11 = vpop.permute.xlu0 %1564 }
 0x242   : > { %11548 = vst [vmem:[#allocation124_spill] sm:$0xff] %v6637_v3 }
 0x243   : > { %11549 = vst [vmem:[#allocation125_spill] sm:$0xff] %v6640_v11 }
 0x247   : > { %1560 = vperm.xlu2 %5696, %v6075_v22  }
 0x248   : > { %1556 = vperm.xlu1 %5698, %v6078_v23   ;;  %v6644_v17 = vpop.permute.xlu2 %1371  ;;  %v6661_v23 = vperm.slane %v6654_v20, 0 }
 0x249   : > { %v6646_v4 = vpop.permute.xlu1 %1331  ;;  %607 = vperm.xlu0 %5702, %v6027_v10   ;;  %v6649_v14 = vpop.permute.xlu0 %1576 }
 0x24a   : > { %11550 = vst [vmem:[#allocation126_spill] sm:$0xff] %v6646_v4  ;;  %v510_v4 = vmul.f32 %v6661_v23, %v6129_v35  ;;  %v503_v35 = vmul.f32 %v6661_v23, %v6147_v41 }
 0x24b   : > { %11551 = vst [vmem:[#allocation127_spill] sm:$0xff] %v6649_v14  ;;  %v6671_v14 = vld [vmem:[%s11188_s2] ss:$0 sm:$0xff] }
 0x24c   : > { %v6711_v41 = vadd.f32 %v6671_v14, %v510_v4  ;;  %v525_v4 = vmul.f32 %v6661_v23, %v6170_v48 }
 0x24e   : > { %11558 = vst [vmem:[#allocation134_spill] sm:$0xff] %v6711_v41  ;;  %v11577_v41 = vld [vmem:[#allocation7_spill] sm:$0xff] }
 0x24f   : > { %1572 = vperm.xlu2 %5696, %v6087_v25   ;;  %v506_v25 = vmul.f32 %v6661_v23, %v6119_v33  ;;  %v516_v33 = vmul.f32 %v6661_v23, %v6143_v39  ;;  %v508_v39 = vmul.f32 %v6661_v23, %v6156_v44 }
 0x250   : > { %1568 = vperm.xlu1 %5698, %v6090_v26   ;;  %v6658_v7 = vpop.permute.xlu2 %1383  ;;  %v507_v26 = vmul.f32 %v6661_v23, %v6124_v34  ;;  %v505_v34 = vmul.f32 %v6661_v23, %v6145_v40 }
 0x251   : > { %11552 = vst [vmem:[#allocation128_spill] sm:$0xff] %v6658_v7  ;;  %v6663_v11 = vpop.permute.xlu1 %1343  ;;  %619 = vperm.xlu0 %5702, %v6039_v13   ;;  %v504_v13 = vmul.f32 %v6661_v23, %v6136_v37  ;;  %v6696_v37 = vadd.f32 %v6671_v14, %v506_v25  ;;  %v522_v25 = vmul.f32 %v6661_v23, %v6161_v45  ;;  %v11594_v7 = vld [vmem:[#allocation21_spill] sm:$0xff] }
 0x252   : > { %11553 = vst [vmem:[#allocation129_spill] sm:$0xff] %v6663_v11  ;;  %v6666_v10 = vpop.permute.xlu0 %1649  ;;  %v513_v11 = vmul.f32 %v6661_v23, %v6134_v36  ;;  %v6731_v45 = vadd.f32 %v6671_v14, %v516_v33  ;;  %v6746_v48 = vadd.f32 %v6671_v14, %v508_v39  ;;  %v6765_v39 = vadd.f32 %v6671_v14, %v525_v4 }
 0x253   : > { %11554 = vst [vmem:[#allocation130_spill] sm:$0xff] %v6666_v10  ;;  %v502_v10 = vmul.f32 %v6661_v23, %v6138_v38  ;;  %v509_v38 = vmul.f32 %v6661_v23, %v6154_v43  ;;  %v6752_v33 = vadd.f32 %v6671_v14, %v522_v25  ;;  %v518_v25 = vmul.f32 %v6661_v23, %v6181_v53 }
 0x254   : > { %v6720_v44 = vadd.f32 %v6671_v14, %v513_v11  ;;  %11562 = vst [vmem:[#allocation138_spill] sm:$0xff] %v6731_v45  ;;  %v6737_v11 = vadd.f32 %v6671_v14, %v503_v35  ;;  %v515_v35 = vmul.f32 %v6661_v23, %v6172_v49  ;;  %v517_v49 = vmul.f32 %v6661_v23, %v6184_v54 }
 0x255   : > { %11564 = vst [vmem:[#allocation140_spill] sm:$0xff] %v6752_v33  ;;  %v524_v53 = vmul.f32 %v6661_v23, %v6197_v58  ;;  %v523_v4 = vmul.f32 %v6661_v23, %v6202_v59  ;;  %v11569_v58 = vld [vmem:[#allocation2_spill] sm:$0xff] }
 0x256   : > { %11560 = vst [vmem:[#allocation136_spill] sm:$0xff] %v6720_v44  ;;  %v6811_v45 = vadd.f32 %v6671_v14, %v517_v49 }
 0x257   : > { %1584 = vperm.xlu2 %5696, %v6099_v28   ;;  %v519_v28 = vmul.f32 %v6661_v23, %v6152_v42  ;;  %v512_v42 = vmul.f32 %v6661_v23, %v6163_v46  ;;  %v6734_v46 = vadd.f32 %v6671_v14, %v505_v34  ;;  %11565 = vst [vmem:[#allocation141_spill] sm:$0xff] %v6765_v39  ;;  %v11572_v39 = vld [vmem:[#allocation3_spill] sm:$0xff] }
 0x258   : > { %1580 = vperm.xlu1 %5698, %v6102_v29   ;;  %v6693_v36 = vpop.permute.xlu2 %1395  ;;  %v6708_v29 = vadd.f32 %v6671_v14, %v507_v26  ;;  %v6728_v26 = vadd.f32 %v6671_v14, %v502_v10  ;;  %v6749_v10 = vperm.slane %v6654_v20, 1  ;;  %v526_v33 = vmul.f32 %v6661_v23, %v11572_v39 }
 0x259   : > { %11555 = vst [vmem:[#allocation131_spill] sm:$0xff] %v6693_v36  ;;  %v6704_v40 = vpop.permute.xlu1 %1355  ;;  %631 = vperm.xlu0 %5702, %v6051_v16   ;;  %v511_v16 = vmul.f32 %v6661_v23, %v6165_v47  ;;  %v6743_v47 = vadd.f32 %v6671_v14, %v509_v38  ;;  %v6755_v34 = vadd.f32 %v6671_v14, %v512_v42  ;;  %v11566_v42 = vmov 7  }
 0x25a   : > { %11556 = vst [vmem:[#allocation132_spill] sm:$0xff] %v6704_v40  ;;  %v6717_v43 = vpop.permute.xlu0 %1669  ;;  %v534_v40 = vadd.f32 %v6671_v14, %v504_v13  ;;  %v6740_v13 = vadd.f32 %v6671_v14, %v519_v28  ;;  %v514_v28 = vmul.f32 %v6661_v23, %v6174_v50  ;;  %v531_v50 = vmul.f32 %v6661_v23, %v6188_v55 }
 0x25b   : > { %11557 = vst [vmem:[#allocation133_spill] sm:$0xff] %v6708_v29  ;;  %v6762_v38 = vadd.f32 %v6671_v14, %v511_v16  ;;  %v521_v16 = vmul.f32 %v6661_v23, %v6190_v56  ;;  %v545_v56 = vadd.f32 %v6671_v14, %v515_v35  ;;  %v11573_v35 = vld [vmem:[#allocation4_spill] sm:$0xff]  ;;  %v6827_v49 = vadd.f32 %v6671_v14, %v523_v4 }
 0x25c   : > { %11559 = vst [vmem:[#allocation135_spill] sm:$0xff] %v6717_v43  ;;  %v6837_v29 = vadd.f32 %v6671_v14, %v526_v33  ;;  %v11582_v33 = vld [vmem:[#allocation12_spill] sm:$0xff]  ;;  %v11585_v43 = vld [vmem:[#allocation15_spill] sm:$0xff] }
 0x25d   : > { %11561 = vst [vmem:[#allocation137_spill] sm:$0xff] %v6728_v26  ;;  %v5766_v26 = vld [vmem:[%s5988_s15 + $0x18] sm:$0xff] }
 0x25e   : > { %11563 = vst [vmem:[#allocation139_spill] sm:$0xff] %v6740_v13  ;;  %v528_v13 = vmul.f32 %v6661_v23, %v6179_v52  ;;  %v520_v52 = vmul.f32 %v6661_v23, %v6195_v57  ;;  %v685_v57 = vmul.f32 %v6749_v10, %v6204_v60  ;;  %v6814_v60 = vadd.f32 %v6671_v14, %v531_v50 }
 0x25f   : > { %5701 = vset.pattern.permute.xlu2 %v11566_v42 }
 0x260   : > { %5700 = vset.pattern.permute.xlu1 %v11566_v42  ;;  %1657 = vperm.xlu2 %5701, %v5994_v2   ;;  %v6794_v2 = vadd.f32 %v6671_v14, %v514_v28  ;;  %v527_v42 = vmul.f32 %v6661_v23, %v11569_v58  ;;  %v687_v28 = vmul.f32 %v6749_v10, %v11573_v35  ;;  %v11575_v58 = vld [vmem:[#allocation5_spill] sm:$0xff] }
 0x261   : > { %1653 = vperm.xlu1 %5700, %v6009_v6   ;;  %v6787_v54 = vpop.permute.xlu1 %1367  ;;  %643 = vperm.xlu0 %5702, %v6063_v19   ;;  %v6790_v55 = vpop.permute.xlu2 %1468  ;;  %v6803_v6 = vadd.f32 %v6671_v14, %v528_v13  ;;  %v548_v19 = vadd.f32 %v6671_v14, %v518_v25  ;;  %11574 = vst [vmem:[#allocation3_spill] sm:$0xff] %v6814_v60  ;;  %v6819_v13 = vperm.slane %v6654_v20, 2  ;;  %v11576_v60 = vld [vmem:[#allocation6_spill] sm:$0xff] }
 0x262   : > { %11567 = vst [vmem:[#allocation142_spill] sm:$0xff] %v6787_v54  ;;  %v6800_v59 = vpop.permute.xlu0 %1681  ;;  %v530_v44 = vmul.f32 %v6661_v23, %v11575_v58  ;;  %v551_v25 = vadd.f32 %v6671_v14, %v521_v16  ;;  %v6823_v39 = vadd.f32 %v6671_v14, %v520_v52  ;;  %v554_v35 = vadd.f32 %v6671_v14, %v524_v53  ;;  %v11578_v53 = vld [vmem:[#allocation8_spill] sm:$0xff]  ;;  %v11584_v54 = vld [vmem:[#allocation14_spill] sm:$0xff] }
 0x263   : > { %11568 = vst [vmem:[#allocation143_spill] sm:$0xff] %v6790_v55  ;;  %v6830_v50 = vadd.f32 %v6671_v14, %v527_v42  ;;  %v529_v58 = vmul.f32 %v6661_v23, %v11576_v60  ;;  %v690_v16 = vmul.f32 %v6749_v10, %v11577_v41  ;;  %v6840_v52 = vadd.f32 %v687_v28, %v6696_v37  ;;  %v11581_v60 = vld [vmem:[#allocation11_spill] sm:$0xff]  ;;  %v5765_v37 = vld [vmem:[%s5988_s15 + $0x20] sm:$0xff]  ;;  %v11583_v28 = vld [vmem:[#allocation13_spill] sm:$0xff] }
 0x264   : > { %11570 = vst [vmem:[#allocation2_spill] sm:$0xff] %v6800_v59  ;;  %v693_v4 = vmul.f32 %v6749_v10, %v11578_v53  ;;  %v11580_v59 = vld [vmem:[#allocation10_spill] sm:$0xff]  ;;  %v696_v41 = vmul.f32 %v6749_v10, %v11581_v60  ;;  %v686_v55 = vmul.f32 %v6749_v10, %v11582_v33  ;;  %v871_v53 = vmul.f32 %v6819_v13, %v11583_v28  ;;  %v11588_v28 = vld [vmem:[#allocation16_spill] sm:$0xff] }
 0x265   : > { %11571 = vst [vmem:[#allocation144_spill] sm:$0xff] %v6803_v6  ;;  %v715_v6 = vadd.f32 %v685_v57, %v534_v40  ;;  %v11579_v40 = vld [vmem:[#allocation9_spill] sm:$0xff]  ;;  %v6847_v57 = vadd.f32 %v6671_v14, %v530_v44  ;;  %v866_v23 = vmul.f32 %v6819_v13, %v11580_v59  ;;  %v689_v44 = vmul.f32 %v6749_v10, %v11585_v43 }
 0x266   : > { %v684_v42 = vmul.f32 %v6749_v10, %v11579_v40  ;;  %v699_v40 = vmul.f32 %v6749_v10, %v11584_v54  ;;  %v6869_v33 = vadd.f32 %v6671_v14, %v529_v58  ;;  %v874_v36 = vmul.f32 %v6819_v13, %v11588_v28  ;;  %v11589_v54 = vld [vmem:[#allocation17_spill] sm:$0xff] }
 0x267   : > { %v702_v3 = vmul.f32 %v6749_v10, %v11589_v54  ;;  %v877_v14 = vmul.f32 %v6819_v13, %v11592_v21  ;;  %v6884_v58 = vadd.f32 %v866_v23, %v715_v6  ;;  %v695_v54 = vmul.f32 %v6749_v10, %v11594_v7  ;;  %v11595_v6 = vld [vmem:[#allocation22_spill] sm:$0xff]  ;;  %v11596_v23 = vld [vmem:[#allocation23_spill] sm:$0xff] }
 0x268   : > { %1665 = vperm.xlu2 %5701, %v5765_v37   ;;  %v720_v37 = vadd.f32 %v690_v16, %v6743_v47  ;;  %v726_v47 = vadd.f32 %v696_v41, %v545_v56  ;;  %v11593_v16 = vld [vmem:[#allocation20_spill] sm:$0xff]  ;;  %v880_v56 = vmul.f32 %v6819_v13, %v11595_v6  ;;  %v708_v41 = vmul.f32 %v6749_v10, %v11596_v23 }
 0x269   : > { %1661 = vperm.xlu1 %5700, %v5766_v26   ;;  %v6863_v59 = vpop.permute.xlu1 %1379  ;;  %655 = vperm.xlu0 %5702, %v6075_v22   ;;  %v6866_v60 = vpop.permute.xlu2 %1480  ;;  %v723_v26 = vadd.f32 %v693_v4, %v6755_v34  ;;  %v11591_v22 = vld [vmem:[#allocation18_spill] sm:$0xff]  ;;  %v705_v28 = vmul.f32 %v6749_v10, %v11593_v16  ;;  %v729_v34 = vadd.f32 %v699_v40, %v548_v19 }
 0x26a   : > { %11586 = vst [vmem:[#allocation4_spill] sm:$0xff] %v6863_v59  ;;  %v6876_v43 = vpop.permute.xlu0 %1693  ;;  %v714_v59 = vadd.f32 %v684_v42, %v6737_v11  ;;  %v6893_v11 = vadd.f32 %v871_v53, %v720_v37  ;;  %v719_v4 = vadd.f32 %v689_v44, %v6746_v48  ;;  %v732_v21 = vadd.f32 %v702_v3, %v551_v25  ;;  %v11598_v53 = vld [vmem:[#allocation25_spill] sm:$0xff]  ;;  %v11599_v25 = vld [vmem:[#allocation26_spill] sm:$0xff]  ;;  %v11600_v44 = vld [vmem:[#allocation27_spill] sm:$0xff] }
 0x26b   : > { %11587 = vst [vmem:[#allocation5_spill] sm:$0xff] %v6866_v60  ;;  %v692_v60 = vmul.f32 %v6749_v10, %v11591_v22  ;;  %v6896_v42 = vadd.f32 %v874_v36, %v723_v26  ;;  %v883_v36 = vmul.f32 %v6819_v13, %v11598_v53  ;;  %v735_v48 = vadd.f32 %v705_v28, %v554_v35  ;;  %v5767_v26 = vld [vmem:[%s5988_s15 + $0x38] sm:$0xff]  ;;  %v11606_v53 = vld [vmem:[#allocation31_spill] sm:$0xff] }
 0x26c   : > { %11590 = vst [vmem:[#allocation6_spill] sm:$0xff] %v6876_v43  ;;  %v6891_v43 = vadd.f32 %v686_v55, %v6734_v46  ;;  %v6903_v46 = vadd.f32 %v877_v14, %v726_v47  ;;  %v11597_v55 = vld [vmem:[#allocation24_spill] sm:$0xff]  ;;  %v725_v3 = vadd.f32 %v695_v54, %v6794_v2  ;;  %v711_v40 = vmul.f32 %v6749_v10, %v11599_v25  ;;  %v11602_v22 = vld [vmem:[#allocation29_spill] sm:$0xff]  ;;  %v11603_v47 = vld [vmem:[#allocation30_spill] sm:$0xff] }
 0x26d   : > { %v722_v7 = vadd.f32 %v692_v60, %v6762_v38  ;;  %v698_v19 = vmul.f32 %v6749_v10, %v11597_v55  ;;  %v701_v37 = vmul.f32 %v6749_v10, %v11600_v44  ;;  %v11601_v38 = vld [vmem:[#allocation28_spill] sm:$0xff]  ;;  %v704_v14 = vmul.f32 %v6749_v10, %v11602_v22 }
 0x26e   : > { %v886_v60 = vmul.f32 %v6819_v13, %v11601_v38  ;;  %v889_v16 = vmul.f32 %v6819_v13, %v11603_v47  ;;  %v6922_v35 = vperm.slane %v6654_v20, 3  ;;  %v5768_v2 = vld [vmem:[%s5988_s15 + $0x30] sm:$0xff]  ;;  %v6930_v23 = vadd.f32 %v880_v56, %v729_v34 }
 0x26f   : > { %v5769_v54 = vld [vmem:[%s5988_s15 + $0xd0] sm:$0x3]  ;;  %v738_v55 = vadd.f32 %v708_v41, %v6830_v50  ;;  %v865_v25 = vmul.f32 %v6819_v13, %v11606_v53  ;;  %v728_v22 = vadd.f32 %v698_v19, %v6811_v45  ;;  %v6940_v47 = vadd.f32 %v883_v36, %v732_v21  ;;  %v11611_v41 = vld [vmem:[#allocation35_spill] sm:$0xff]  ;;  %v11613_v19 = vld [vmem:[#allocation37_spill] sm:$0xff] }
 0x270   : > { %1677 = vperm.xlu2 %5701, %v5767_v26   ;;  %v11607_v44 = vld [vmem:[#allocation32_spill] sm:$0xff]  ;;  %v741_v50 = vadd.f32 %v711_v40, %v6847_v57  ;;  %v731_v56 = vadd.f32 %v701_v37, %v6823_v39  ;;  %v710_v53 = vmul.f32 %v6749_v10, %v11611_v41  ;;  %v734_v45 = vadd.f32 %v704_v14, %v6827_v49  ;;  %v11614_v39 = vld [vmem:[#allocation38_spill] sm:$0xff] }
 0x271   : > { %1673 = vperm.xlu1 %5700, %v5768_v2   ;;  %v6925_v28 = vpop.permute.xlu1 %1391  ;;  %667 = vperm.xlu0 %5702, %v5769_v54   ;;  %v6928_v6 = vpop.permute.xlu2 %1488  ;;  %v707_v26 = vmul.f32 %v6749_v10, %v11607_v44  ;;  %v11609_v2 = vld [vmem:[#allocation33_spill] sm:$0xff]  ;;  %v11612_v44 = vld [vmem:[#allocation36_spill] sm:$0xff]  ;;  %v6955_v21 = vadd.f32 %v889_v16, %v738_v55  ;;  %v1046_v36 = vmul.f32 %v6922_v35, %v11613_v19  ;;  %v11617_v16 = vld [vmem:[#allocation42_spill] sm:$0xff] }
 0x272   : > { %11604 = vst [vmem:[#allocation7_spill] sm:$0xff] %v6925_v28  ;;  %v6937_v38 = vpop.permute.xlu0 %1705  ;;  %v892_v54 = vmul.f32 %v6819_v13, %v11609_v2  ;;  %v6952_v28 = vadd.f32 %v886_v60, %v735_v48  ;;  %v873_v40 = vmul.f32 %v6819_v13, %v11614_v39  ;;  %v11615_v37 = vld [vmem:[#allocation40_spill] sm:$0xff]  ;;  %v11616_v60 = vld [vmem:[#allocation41_spill] sm:$0xff]  ;;  %v11621_v19 = vld [vmem:[#allocation46_spill] sm:$0xff] }
 0x273   : > { %11605 = vst [vmem:[#allocation8_spill] sm:$0xff] %v6928_v6  ;;  %v11610_v6 = vld [vmem:[#allocation34_spill] sm:$0xff]  ;;  %v737_v57 = vadd.f32 %v707_v26, %v6837_v29  ;;  %v1051_v2 = vmul.f32 %v6922_v35, %v11615_v37  ;;  %v876_v14 = vmul.f32 %v6819_v13, %v11616_v60  ;;  %v740_v29 = vadd.f32 %v710_v53, %v6869_v33  ;;  %v11619_v41 = vld [vmem:[#allocation44_spill] sm:$0xff]  ;;  %v5771_v37 = vld [vmem:[%s5988_s15 + $0x48] sm:$0xff] }
 0x274   : > { %11608 = vst [vmem:[#allocation9_spill] sm:$0xff] %v6937_v38  ;;  %v868_v34 = vmul.f32 %v6819_v13, %v11610_v6  ;;  %v870_v38 = vmul.f32 %v6819_v13, %v11612_v44  ;;  %v895_v6 = vadd.f32 %v865_v25, %v714_v59  ;;  %v6964_v48 = vadd.f32 %v892_v54, %v741_v50  ;;  %v11618_v25 = vld [vmem:[#allocation43_spill] sm:$0xff]  ;;  %v5770_v50 = vld [vmem:[%s5988_s15 + $0x50] sm:$0xff] }
 0x275   : > { %v867_v59 = vmul.f32 %v6819_v13, %v11617_v16  ;;  %v1054_v26 = vmul.f32 %v6922_v35, %v11618_v25  ;;  %v879_v54 = vmul.f32 %v6819_v13, %v11619_v41  ;;  %v1057_v39 = vmul.f32 %v6922_v35, %v11621_v19  ;;  %v11625_v16 = vld [vmem:[#allocation49_spill] sm:$0xff]  ;;  %v11627_v19 = vld [vmem:[#allocation50_spill] sm:$0xff] }
 0x276   : > { %v6967_v49 = vadd.f32 %v868_v34, %v6840_v52  ;;  %v900_v55 = vadd.f32 %v870_v38, %v719_v4  ;;  %v6979_v44 = vadd.f32 %v1046_v36, %v895_v6  ;;  %v11620_v52 = vld [vmem:[#allocation39_spill] sm:$0xff]  ;;  %v903_v53 = vadd.f32 %v873_v40, %v722_v7 }
 0x277   : > { %v6983_v34 = vmul.f32 %v6819_v13, %v11620_v52  ;;  %v5772_v4 = vld [vmem:[%s5988_s15 + $0xe8] sm:$0x3]  ;;  %v1060_v25 = vmul.f32 %v6922_v35, %v11625_v16  ;;  %v897_v52 = vadd.f32 %v867_v59, %v6891_v43  ;;  %v909_v40 = vadd.f32 %v879_v54, %v728_v22  ;;  %v11635_v54 = vld [vmem:[#allocation48_spill] sm:$0xff] }
 0x278   : > { %1689 = vperm.xlu2 %5701, %v5770_v50   ;;  %v6993_v60 = vadd.f32 %v1051_v2, %v900_v55  ;;  %v11624_v36 = vld [vmem:[#allocation47_spill] sm:$0xff]  ;;  %v906_v50 = vadd.f32 %v876_v14, %v725_v3  ;;  %v7006_v7 = vadd.f32 %v1054_v26, %v903_v53  ;;  %v11629_v2 = vld [vmem:[#allocation52_spill] sm:$0xff]  ;;  %v7024_v53 = vmul.f32 %v6819_v13, %v11635_v54 }
 0x279   : > { %1685 = vperm.xlu1 %5700, %v5771_v37   ;;  %v6988_v33 = vpop.permute.xlu1 %1403  ;;  %679 = vperm.xlu0 %5702, %v5772_v4   ;;  %v6991_v38 = vpop.permute.xlu2 %1500  ;;  %v882_v6 = vmul.f32 %v6819_v13, %v11624_v36  ;;  %v885_v37 = vmul.f32 %v6819_v13, %v11627_v19  ;;  %v11628_v4 = vld [vmem:[#allocation53_spill] sm:$0xff]  ;;  %v1063_v55 = vmul.f32 %v6922_v35, %v11629_v2  ;;  %v11630_v36 = vld [vmem:[#allocation56_spill] sm:$0xff]  ;;  %v11633_v14 = vld [vmem:[#allocation55_spill] sm:$0xff] }
 0x27a   : > { %11622 = vst [vmem:[#allocation10_spill] sm:$0xff] %v6988_v33  ;;  %v6999_v41 = vpop.permute.xlu0 %1717  ;;  %v891_v16 = vmul.f32 %v6819_v13, %v11630_v36  ;;  %v11631_v33 = vld [vmem:[#allocation45_spill] sm:$0xff]  ;;  %v7016_v43 = vadd.f32 %v1057_v39, %v906_v50  ;;  %v1066_v59 = vmul.f32 %v6922_v35, %v11633_v14  ;;  %v11634_v19 = vld [vmem:[#allocation58_spill] sm:$0xff]  ;;  %v11638_v50 = vld [vmem:[#allocation63_spill] sm:$0xff]  ;;  %v7033_v14 = vperm.slane %v6654_v20, 4 }
 0x27b   : > { %11623 = vst [vmem:[#allocation11_spill] sm:$0xff] %v6991_v38  ;;  %v888_v38 = vmul.f32 %v6819_v13, %v11628_v4  ;;  %v7014_v3 = vmul.f32 %v6819_v13, %v11631_v33  ;;  %v1069_v26 = vmul.f32 %v6922_v35, %v11634_v19  ;;  %v912_v22 = vadd.f32 %v882_v6, %v731_v56  ;;  %v11637_v2 = vld [vmem:[#allocation61_spill] sm:$0xff]  ;;  %v11639_v19 = vld [vmem:[#allocation51_spill] sm:$0xff] }
 0x27c   : > { %11626 = vst [vmem:[#allocation12_spill] sm:$0xff] %v6999_v41  ;;  %v7026_v4 = vadd.f32 %v1060_v25, %v909_v40  ;;  %v1072_v33 = vmul.f32 %v6922_v35, %v11637_v2  ;;  %v915_v36 = vadd.f32 %v885_v37, %v734_v45  ;;  %v7037_v56 = vmul.f32 %v6819_v13, %v11639_v19  ;;  %v11641_v25 = vld [vmem:[#allocation54_spill] sm:$0xff]  ;;  %v5773_v2 = vld [vmem:[%s5988_s15 + $0x68] sm:$0xff] }
 0x27d   : > { %11632 = vst [vmem:[#allocation13_spill] sm:$0xff] %v7014_v3  ;;  %v918_v39 = vadd.f32 %v888_v38, %v737_v57  ;;  %v1048_v3 = vmul.f32 %v6922_v35, %v11638_v50  ;;  %v7039_v6 = vadd.f32 %v1063_v55, %v912_v22  ;;  %v7043_v40 = vmul.f32 %v6819_v13, %v11641_v25  ;;  %v11643_v57 = vld [vmem:[#allocation57_spill] sm:$0xff]  ;;  %v11645_v50 = vld [vmem:[#allocation59_spill] sm:$0xff]  ;;  %v5774_v55 = vld [vmem:[%s5988_s15 + $0x60] sm:$0xff] }
 0x27e   : > { %11636 = vst [vmem:[#allocation14_spill] sm:$0xff] %v7024_v53  ;;  %v921_v54 = vadd.f32 %v891_v16, %v740_v29  ;;  %v7046_v45 = vadd.f32 %v1066_v59, %v915_v36  ;;  %v7050_v38 = vmul.f32 %v6819_v13, %v11643_v57  ;;  %v7056_v19 = vmul.f32 %v6819_v13, %v11645_v50  ;;  %v11648_v29 = vld [vmem:[#allocation60_spill] sm:$0xff]  ;;  %v11649_v59 = vld [vmem:[#allocation62_spill] sm:$0xff]  ;;  %v11668_v53 = vld [vmem:[#allocation71_spill] sm:$0xff] }
 0x27f   : > { %11640 = vst [vmem:[#allocation15_spill] sm:$0xff] %v7037_v56  ;;  %v7052_v37 = vadd.f32 %v1069_v26, %v918_v39  ;;  %v7065_v16 = vmul.f32 %v6922_v35, %v11648_v29  ;;  %v7069_v36 = vmul.f32 %v6819_v13, %v11649_v59  ;;  %v11651_v26 = vld [vmem:[#allocation72_spill] sm:$0xff]  ;;  %v7077_v50 = vadd.f32 %v1048_v3, %v897_v52 }
 0x280   : > { %11642 = vst [vmem:[#allocation16_spill] sm:$0xff] %v7043_v40  ;;  %1701 = vperm.xlu2 %5701, %v5773_v2   ;;  %v7061_v25 = vadd.f32 %v1072_v33, %v921_v54  ;;  %v1047_v39 = vmul.f32 %v6922_v35, %v11651_v26  ;;  %v11654_v54 = vld [vmem:[#allocation65_spill] sm:$0xff]  ;;  %v11661_v52 = vld [vmem:[#allocation68_spill] sm:$0xff] }
 0x281   : > { %11644 = vst [vmem:[#allocation17_spill] sm:$0xff] %v7050_v38  ;;  %1697 = vperm.xlu1 %5700, %v5774_v55   ;;  %v7059_v22 = vpop.permute.xlu2 %1512  ;;  %v11653_v55 = vld [vmem:[#allocation64_spill] sm:$0xff]  ;;  %v7085_v29 = vmul.f32 %v6819_v13, %v11654_v54  ;;  %v11659_v38 = vld [vmem:[#allocation67_spill] sm:$0xff]  ;;  %v7099_v3 = vmul.f32 %v6819_v13, %v11661_v52  ;;  %v11664_v54 = vld [vmem:[#allocation69_spill] sm:$0xff] }
 0x282   : > { %11646 = vst [vmem:[#allocation18_spill] sm:$0xff] %v7056_v19  ;;  %v7073_v2 = vpop.permute.xlu1 %1476  ;;  %v7075_v57 = vpop.permute.xlu0 %1729  ;;  %v7081_v33 = vmul.f32 %v7033_v14, %v11653_v55  ;;  %v11656_v19 = vld [vmem:[#allocation75_spill] sm:$0xff]  ;;  %v7095_v40 = vmul.f32 %v7033_v14, %v11659_v38  ;;  %v11663_v55 = vld [vmem:[#allocation78_spill] sm:$0xff]  ;;  %v7113_v38 = vmul.f32 %v6922_v35, %v11668_v53  ;;  %v1077_v52 = vadd.f32 %v1047_v39, %v6884_v58  ;;  %v11677_v39 = vld [vmem:[#allocation77_spill] sm:$0xff] }
 0x283   : > { %11647 = vst [vmem:[#allocation19_spill] sm:$0xff] %v7059_v22  ;;  %v1049_v59 = vmul.f32 %v6922_v35, %v11656_v19  ;;  %v1052_v56 = vmul.f32 %v6922_v35, %v11663_v55  ;;  %v11666_v19 = vld [vmem:[#allocation70_spill] sm:$0xff]  ;;  %v1228_v58 = vmul.f32 %v7033_v14, %v6490_v51 }
 0x284   : > { %11650 = vst [vmem:[#allocation20_spill] sm:$0xff] %v7069_v36  ;;  %v11657_v36 = vld [vmem:[#allocation66_spill] sm:$0xff] }
 0x285   : > { %11652 = vst [vmem:[#allocation21_spill] sm:$0xff] %v7075_v57  ;;  %v7091_v26 = vmul.f32 %v6922_v35, %v11657_v36  ;;  %v7109_v36 = vmul.f32 %v7033_v14, %v11666_v19  ;;  %v1058_v19 = vmul.f32 %v6922_v35, %v6460_v32  ;;  %v1079_v53 = vadd.f32 %v1049_v59, %v6967_v49  ;;  %v11681_v49 = vld [vmem:[#allocation86_spill] sm:$0xff]  ;;  %v11708_v57 = vld [vmem:[#allocation97_spill] sm:$0xff] }
 0x286   : > { %11655 = vst [vmem:[#allocation22_spill] sm:$0xff] %v7085_v29  ;;  %v7105_v29 = vmul.f32 %v6922_v35, %v11664_v54  ;;  %v11673_v54 = vld [vmem:[#allocation74_spill] sm:$0xff]  ;;  %v1061_v59 = vmul.f32 %v6922_v35, %v11681_v49  ;;  %v11688_v49 = vld [vmem:[#allocation83_spill] sm:$0xff] }
 0x287   : > { %11658 = vst [vmem:[#allocation23_spill] sm:$0xff] %v7091_v26  ;;  %v11684_v26 = vld [vmem:[#allocation82_spill] sm:$0xff] }
 0x288   : > { %11660 = vst [vmem:[#allocation24_spill] sm:$0xff] %v7095_v40  ;;  %v11670_v40 = vld [vmem:[#allocation81_spill] sm:$0xff] }
 0x289   : > { %11662 = vst [vmem:[#allocation25_spill] sm:$0xff] %v7099_v3  ;;  %v1055_v13 = vmul.f32 %v6922_v35, %v11670_v40  ;;  %v11671_v3 = vld [vmem:[#allocation73_spill] sm:$0xff]  ;;  %v7136_v40 = vperm.slane %v6654_v20, 5 }
 0x28a   : > { %11665 = vst [vmem:[#allocation26_spill] sm:$0xff] %v7105_v29  ;;  %v7120_v55 = vmul.f32 %v7033_v14, %v11671_v3  ;;  %v7124_v29 = vmul.f32 %v6922_v35, %v11673_v54  ;;  %v7140_v3 = vmul.f32 %v6922_v35, %v11677_v39  ;;  %v1082_v54 = vadd.f32 %v1052_v56, %v6893_v11  ;;  %v11686_v11 = vld [vmem:[#allocation89_spill] sm:$0xff] }
 0x28b   : > { %11667 = vst [vmem:[#allocation27_spill] sm:$0xff] %v7109_v36  ;;  %v7157_v39 = vmul.f32 %v7033_v14, %v11684_v26  ;;  %v1064_v56 = vmul.f32 %v6922_v35, %v11686_v11  ;;  %v1233_v26 = vmul.f32 %v7033_v14, %v6508_v0  ;;  %v7177_v11 = vpop.permute.xlu0 %1741 }
 0x28c   : > { %11669 = vst [vmem:[#allocation28_spill] sm:$0xff] %v7113_v38  ;;  %v11675_v38 = vld [vmem:[#allocation76_spill] sm:$0xff] }
 0x28d   : > { %11672 = vst [vmem:[#allocation29_spill] sm:$0xff] %v7120_v55  ;;  %v7131_v36 = vmul.f32 %v7033_v14, %v11675_v38  ;;  %v5775_v38 = vld [vmem:[%s5988_s15 + $0x80] sm:$0xff]  ;;  %v1085_v55 = vadd.f32 %v1055_v13, %v6896_v42  ;;  %v7175_v13 = vpop.permute.xlu1 %1484 }
 0x28e   : > { %11674 = vst [vmem:[#allocation30_spill] sm:$0xff] %v7124_v29  ;;  %v11679_v29 = vld [vmem:[#allocation79_spill] sm:$0xff]  ;;  %1713 = vperm.xlu2 %5701, %v5775_v38   ;;  %v7166_v38 = vmul.f32 %v6922_v35, %v11688_v49 }
 0x28f   : > { %11676 = vst [vmem:[#allocation31_spill] sm:$0xff] %v7131_v36  ;;  %v7145_v32 = vmul.f32 %v7033_v14, %v11679_v29  ;;  %v11682_v36 = vld [vmem:[#allocation80_spill] sm:$0xff]  ;;  %v5776_v29 = vld [vmem:[%s5988_s15 + $0x78] sm:$0xff] }
 0x290   : > { %11678 = vst [vmem:[#allocation32_spill] sm:$0xff] %v7140_v3  ;;  %v7152_v51 = vmul.f32 %v6922_v35, %v11682_v36  ;;  %1709 = vperm.xlu1 %5700, %v5776_v29   ;;  %v1088_v36 = vadd.f32 %v1058_v19, %v6903_v46  ;;  %v11693_v29 = vld [vmem:[#allocation85_spill] sm:$0xff]  ;;  %v11695_v3 = vld [vmem:[#allocation91_spill] sm:$0xff]  ;;  %v11696_v46 = vld [vmem:[#allocation92_spill] sm:$0xff] }
 0x291   : > { %11680 = vst [vmem:[#allocation33_spill] sm:$0xff] %v7145_v32  ;;  %v7162_v32 = vpop.permute.xlu2 %1524  ;;  %v1067_v49 = vmul.f32 %v6922_v35, %v11695_v3  ;;  %v1409_v19 = vmul.f32 %v7136_v40, %v11696_v46  ;;  %v11701_v3 = vld [vmem:[#allocation90_spill] sm:$0xff]  ;;  %v11705_v46 = vld [vmem:[#allocation95_spill] sm:$0xff] }
 0x292   : > { %11683 = vst [vmem:[#allocation34_spill] sm:$0xff] %v7152_v51  ;;  %v11690_v51 = vld [vmem:[#allocation84_spill] sm:$0xff] }
 0x293   : > { %11685 = vst [vmem:[#allocation35_spill] sm:$0xff] %v7157_v39  ;;  %v7171_v42 = vmul.f32 %v7033_v14, %v11690_v51  ;;  %v7181_v39 = vmul.f32 %v6922_v35, %v11693_v29  ;;  %v1091_v51 = vadd.f32 %v1061_v59, %v6930_v23  ;;  %v1236_v29 = vmul.f32 %v7033_v14, %v6515_v63  ;;  %v11706_v63 = vld [vmem:[#allocation96_spill] sm:$0xff] }
 0x294   : > { %11687 = vst [vmem:[#allocation36_spill] sm:$0xff] %v7162_v32  ;;  %v11699_v32 = vld [vmem:[#allocation88_spill] sm:$0xff]  ;;  %v1239_v59 = vmul.f32 %v7033_v14, %v6524_v9  ;;  %v1242_v9 = vmul.f32 %v7033_v14, %v6533_v12  ;;  %v1248_v12 = vmul.f32 %v7033_v14, %v6551_v31  ;;  %v11712_v31 = vld [vmem:[#allocation101_spill] sm:$0xff] }
 0x295   : > { %11689 = vst [vmem:[#allocation37_spill] sm:$0xff] %v7166_v38  ;;  %v1258_v38 = vadd.f32 %v1228_v58, %v1077_v52  ;;  %v7201_v52 = vmul.f32 %v7033_v14, %v11701_v3  ;;  %v11703_v58 = vld [vmem:[#allocation93_spill] sm:$0xff]  ;;  %v1097_v3 = vadd.f32 %v1067_v49, %v6952_v28  ;;  %v1266_v22 = vadd.f32 %v1236_v29, %v1085_v55 }
 0x296   : > { %11691 = vst [vmem:[#allocation38_spill] sm:$0xff] %v7171_v42  ;;  %v11697_v42 = vld [vmem:[#allocation87_spill] sm:$0xff]  ;;  %v1070_v23 = vmul.f32 %v6922_v35, %v11703_v58  ;;  %v1269_v49 = vadd.f32 %v1239_v59, %v1088_v36  ;;  %v1423_v59 = vmul.f32 %v7136_v40, %v11712_v31  ;;  %v5779_v31 = vld [vmem:[%s5988_s15 + $0xb0] sm:$0xff] }
 0x297   : > { %11692 = vst [vmem:[#allocation40_spill] sm:$0xff] %v7177_v11  ;;  %v7190_v0 = vmul.f32 %v7033_v14, %v11697_v42  ;;  %v7194_v11 = vmul.f32 %v6922_v35, %v11699_v32  ;;  %v11704_v42 = vld [vmem:[#allocation94_spill] sm:$0xff] }
 0x298   : > { %11694 = vst [vmem:[#allocation41_spill] sm:$0xff] %v7181_v39  ;;  %v1094_v39 = vadd.f32 %v1064_v56, %v6940_v47  ;;  %v1230_v32 = vmul.f32 %v7033_v14, %v11704_v42  ;;  %v1073_v47 = vmul.f32 %v6922_v35, %v11706_v63  ;;  %v1263_v56 = vadd.f32 %v1233_v26, %v1082_v54  ;;  %v5777_v54 = vld [vmem:[%s5988_s15 + $0x98] sm:$0xff]  ;;  %v7240_v63 = vpop.permute.xlu1 %1496 }
 0x299   : > { %11698 = vst [vmem:[#allocation42_spill] sm:$0xff] %v7190_v0  ;;  %v11707_v0 = vld [vmem:[#allocation98_spill] sm:$0xff]  ;;  %v1417_v42 = vmul.f32 %v7136_v40, %v11708_v57  ;;  %v1245_v35 = vmul.f32 %v7033_v14, %v6542_v61  ;;  %1725 = vperm.xlu2 %5701, %v5777_v54   ;;  %v1100_v28 = vadd.f32 %v1070_v23, %v6955_v21  ;;  %v7233_v57 = vpop.permute.xlu2 %1536  ;;  %v7244_v23 = vpop.permute.xlu0 %1753  ;;  %v11713_v54 = vld [vmem:[#allocation104_spill] sm:$0xff] }
 0x29a   : > { %11700 = vst [vmem:[#allocation43_spill] sm:$0xff] %v7194_v11  ;;  %v1414_v11 = vmul.f32 %v7136_v40, %v11705_v46  ;;  %v1227_v58 = vmul.f32 %v7033_v14, %v11707_v0  ;;  %v11709_v46 = vld [vmem:[#allocation100_spill] sm:$0xff]  ;;  %v7235_v55 = vadd.f32 %v1230_v32, %v1079_v53  ;;  %v1103_v0 = vadd.f32 %v1073_v47, %v6964_v48  ;;  %v11711_v61 = vld [vmem:[#allocation102_spill] sm:$0xff] }
 0x29b   : > { %11702 = vst [vmem:[#allocation44_spill] sm:$0xff] %v7201_v52  ;;  %v7214_v52 = vadd.f32 %v1409_v19, %v1258_v38  ;;  %v1229_v41 = vmul.f32 %v7033_v14, %v11709_v46  ;;  %v11710_v38 = vld [vmem:[#allocation99_spill] sm:$0xff]  ;;  %v5778_v19 = vld [vmem:[%s5988_s15 + $0x90] sm:$0xff]  ;;  %v1232_v29 = vmul.f32 %v7033_v14, %v11711_v61  ;;  %v1272_v46 = vadd.f32 %v1242_v9, %v1091_v51  ;;  %v11714_v47 = vld [vmem:[#allocation106_spill] sm:$0xff] }
 0x29c   : > { %v1420_v26 = vmul.f32 %v7136_v40, %v11710_v38  ;;  %1721 = vperm.xlu1 %5700, %v5778_v19   ;;  %v7242_v21 = vadd.f32 %v1414_v11, %v1263_v56  ;;  %v1257_v36 = vadd.f32 %v1227_v58, %v6979_v44  ;;  %v1235_v53 = vmul.f32 %v7033_v14, %v11713_v54  ;;  %v11715_v56 = vld [vmem:[#allocation103_spill] sm:$0xff]  ;;  %v11716_v19 = vld [vmem:[#allocation108_spill] sm:$0xff] }
 0x29d   : > { %v7252_v48 = vadd.f32 %v1229_v41, %v7077_v50  ;;  %v1275_v32 = vadd.f32 %v1245_v35, %v1094_v39  ;;  %v1238_v38 = vmul.f32 %v7033_v14, %v11714_v47  ;;  %v7256_v11 = vadd.f32 %v1417_v42, %v1266_v22  ;;  %v11718_v35 = vld [vmem:[#allocation109_spill] sm:$0xff]  ;;  %v11720_v54 = vld [vmem:[#allocation111_spill] sm:$0xff] }
 0x29e   : > { %v1426_v44 = vmul.f32 %v7136_v40, %v11715_v56  ;;  %v1278_v58 = vadd.f32 %v1248_v12, %v1097_v3  ;;  %v1251_v51 = vmul.f32 %v7033_v14, %v11716_v19  ;;  %v7262_v9 = vadd.f32 %v1420_v26, %v1269_v49  ;;  %v11717_v3 = vld [vmem:[#allocation105_spill] sm:$0xff]  ;;  %v11721_v56 = vld [vmem:[#allocation112_spill] sm:$0xff] }
 0x29f   : > { %v1262_v61 = vadd.f32 %v1232_v29, %v6993_v60  ;;  %v1254_v41 = vmul.f32 %v7033_v14, %v6570_v18  ;;  %v7268_v50 = vperm.slane %v6654_v20, 6  ;;  %v1408_v22 = vmul.f32 %v7136_v40, %v6583_v15  ;;  %v11719_v18 = vld [vmem:[#allocation107_spill] sm:$0xff]  ;;  %v11722_v19 = vld [vmem:[#allocation113_spill] sm:$0xff] }
 0x2a0   : > { %v1265_v39 = vadd.f32 %v1235_v53, %v7006_v7  ;;  %v1429_v42 = vmul.f32 %v7136_v40, %v11717_v3  ;;  %v1241_v26 = vmul.f32 %v7033_v14, %v11718_v35  ;;  %v7277_v49 = vadd.f32 %v1423_v59, %v1272_v46  ;;  %v5780_v46 = vld [vmem:[%s5988_s15 + $0xa8] sm:$0xff]  ;;  %v11723_v3 = vld [vmem:[#allocation110_spill] sm:$0xff] }
 0x2a1   : > { %v1268_v60 = vadd.f32 %v1238_v38, %v7016_v43  ;;  %v1432_v12 = vmul.f32 %v7136_v40, %v11719_v18  ;;  %v1413_v29 = vmul.f32 %v7136_v40, %v6601_v62  ;;  %1737 = vperm.xlu2 %5701, %v5779_v31   ;;  %v7285_v15 = vadd.f32 %v1426_v44, %v1275_v32  ;;  %v7292_v43 = vpop.permute.xlu2 %1548  ;;  %v7300_v44 = vpop.permute.xlu1 %1508  ;;  %v11725_v18 = vld [vmem:[#allocation115_spill] sm:$0xff] }
 0x2a2   : > { %v1281_v7 = vadd.f32 %v1251_v51, %v1100_v28  ;;  %v1244_v53 = vmul.f32 %v7033_v14, %v11720_v54  ;;  %v1416_v59 = vmul.f32 %v7136_v40, %v6608_v1  ;;  %v7294_v47 = vadd.f32 %v1429_v42, %v1278_v58  ;;  %v7302_v51 = vpop.permute.xlu0 %1765 }
 0x2a3   : > { %v1284_v38 = vadd.f32 %v1254_v41, %v1103_v0  ;;  %v1589_v62 = vmul.f32 %v7268_v50, %v11721_v56  ;;  %v1247_v32 = vmul.f32 %v7033_v14, %v11722_v19  ;;  %v1438_v28 = vadd.f32 %v1408_v22, %v1257_v36  ;;  %v11724_v41 = vld [vmem:[#allocation114_spill] sm:$0xff]  ;;  %v11726_v22 = vld [vmem:[#allocation117_spill] sm:$0xff] }
 0x2a4   : > { %1733 = vperm.xlu1 %5700, %v5780_v46   ;;  %v1271_v1 = vadd.f32 %v1241_v26, %v7026_v4  ;;  %v1435_v35 = vmul.f32 %v7136_v40, %v11723_v3  ;;  %v1250_v58 = vmul.f32 %v7033_v14, %v6589_v24  ;;  %v1419_v0 = vmul.f32 %v7136_v40, %v6617_v27  ;;  %v11727_v26 = vld [vmem:[#allocation116_spill] sm:$0xff] }
 0x2a5   : > { %v1594_v42 = vmul.f32 %v7268_v50, %v11724_v41  ;;  %v1411_v36 = vmul.f32 %v7136_v40, %v11725_v18  ;;  %v1253_v31 = vmul.f32 %v7033_v14, %v11726_v22  ;;  %v1443_v54 = vadd.f32 %v1413_v29, %v1262_v61  ;;  %v11728_v61 = vld [vmem:[#allocation118_spill] sm:$0xff]  ;;  %v11736_v22 = vld [vmem:[#allocation123_spill] sm:$0xff] }
 0x2a6   : > { %v1274_v4 = vadd.f32 %v1244_v53, %v7039_v6  ;;  %v1597_v46 = vmul.f32 %v7268_v50, %v11727_v26  ;;  %v1446_v24 = vadd.f32 %v1416_v59, %v1265_v39  ;;  %v7320_v56 = vadd.f32 %v1432_v12, %v1281_v7  ;;  %v5781_v7 = vld [vmem:[%s5988_s15 + $0xc8] sm:$0xff]  ;;  %v11735_v18 = vld [vmem:[#allocation122_spill] sm:$0xff] }
 0x2a7   : > { %v1277_v27 = vadd.f32 %v1247_v32, %v7046_v45  ;;  %v1410_v19 = vmul.f32 %v7136_v40, %v6619_v30  ;;  %v7325_v3 = vadd.f32 %v1435_v35, %v1284_v38  ;;  %v7327_v41 = vadd.f32 %v1589_v62, %v1438_v28  ;;  %v11733_v32 = vld [vmem:[#allocation121_spill] sm:$0xff]  ;;  %v11734_v35 = vld [vmem:[#allocation128_spill] sm:$0xff] }
 0x2a8   : > { %v1280_v14 = vadd.f32 %v1250_v58, %v7052_v37  ;;  %v1600_v6 = vmul.f32 %v7268_v50, %v11728_v61  ;;  %v1449_v29 = vadd.f32 %v1419_v0, %v1268_v60  ;;  %v1422_v39 = vmul.f32 %v7136_v40, %v6626_v5  ;;  %v11730_v37 = vld [vmem:[#allocation119_spill] sm:$0xff]  ;;  %v11731_v60 = vld [vmem:[#allocation120_spill] sm:$0xff]  ;;  %v11740_v61 = vld [vmem:[#allocation125_spill] sm:$0xff] }
 0x2a9   : > { %v7335_v12 = vadd.f32 %v1411_v36, %v7235_v55  ;;  %v1283_v45 = vadd.f32 %v1253_v31, %v7061_v25  ;;  %v1425_v30 = vmul.f32 %v7136_v40, %v6635_v8  ;;  %1749 = vperm.xlu2 %5701, %v5781_v7   ;;  %v7341_v53 = vadd.f32 %v1594_v42, %v1443_v54  ;;  %v5782_v55 = vld [vmem:[%s5988_s15 + $0xc0] sm:$0xff]  ;;  %v7352_v25 = vpop.permute.xlu2 %1560  ;;  %v7364_v42 = vpop.permute.xlu1 %1520 }
 0x2aa   : > { %v7345_v59 = vmul.f32 %v7136_v40, %v11730_v37  ;;  %v1603_v38 = vmul.f32 %v7268_v50, %v11731_v60  ;;  %v1428_v5 = vmul.f32 %v7136_v40, %v6644_v17  ;;  %v7354_v62 = vadd.f32 %v1597_v46, %v1446_v24  ;;  %v11738_v46 = vld [vmem:[#allocation124_spill] sm:$0xff]  ;;  %v11741_v37 = vld [vmem:[#allocation126_spill] sm:$0xff]  ;;  %v11743_v60 = vld [vmem:[#allocation129_spill] sm:$0xff] }
 0x2ab   : > { %11729 = vst [vmem:[#allocation39_spill] sm:$0xff] %v7341_v53  ;;  %v1440_v8 = vadd.f32 %v1410_v19, %v7252_v48  ;;  %v1606_v28 = vmul.f32 %v7268_v50, %v11733_v32  ;;  %v1431_v58 = vmul.f32 %v7136_v40, %v11734_v35  ;;  %v7362_v0 = vperm.slane %v6654_v20, 7  ;;  %v564_v48 = vpop.permute.xlu0 %563  ;;  %v11739_v20 = vld [vmem:[#allocation131_spill] sm:$0xff]  ;;  %v11744_v32 = vld [vmem:[#allocation5_spill] sm:$0xff] }
 0x2ac   : > { %1745 = vperm.xlu1 %5700, %v5782_v55   ;;  %11732 = vst [vmem:[#allocation46_spill] sm:$0xff] %v7354_v62  ;;  %v1452_v17 = vadd.f32 %v1422_v39, %v1271_v1  ;;  %v7368_v36 = vmul.f32 %v7136_v40, %v11735_v18  ;;  %v1609_v31 = vmul.f32 %v7268_v50, %v11736_v22  ;;  %v11745_v18 = vld [vmem:[#allocation137_spill] sm:$0xff] }
 0x2ad   : > { %v7372_v54 = vadd.f32 %v1600_v6, %v1449_v29  ;;  %v1455_v26 = vadd.f32 %v1425_v30, %v1274_v4  ;;  %v7376_v24 = vmul.f32 %v7136_v40, %v11738_v46  ;;  %v1434_v19 = vmul.f32 %v7136_v40, %v11739_v20  ;;  %v11742_v4 = vld [vmem:[#allocation127_spill] sm:$0xff] }
 0x2ae   : > { %v683_v1 = vmul.f32 %v6749_v10, %v564_v48  ;;  %v7383_v39 = vmul.f32 %v7268_v50, %v11740_v61  ;;  %v1458_v7 = vadd.f32 %v1428_v5, %v1277_v27  ;;  %v7387_v6 = vmul.f32 %v7136_v40, %v11741_v37  ;;  %v11746_v27 = vld [vmem:[#allocation130_spill] sm:$0xff]  ;;  %v11747_v48 = vld [vmem:[#allocation132_spill] sm:$0xff]  ;;  %v11749_v61 = vld [vmem:[#allocation135_spill] sm:$0xff] }
 0x2af   : > { %11737 = vst [vmem:[#allocation47_spill] sm:$0xff] %v7372_v54  ;;  %v7391_v29 = vmul.f32 %v7268_v50, %v11742_v4  ;;  %v1461_v30 = vadd.f32 %v1431_v58, %v1280_v14  ;;  %v7395_v55 = vmul.f32 %v7136_v40, %v11743_v60  ;;  %v1591_v35 = vmul.f32 %v7268_v50, %v11744_v32  ;;  %v5783_v4 = vld [vmem:[%s5988_s15 + $0xe0] sm:$0xff] }
 0x2b0   : > { %v713_v22 = vadd.f32 %v683_v1, %v11745_v18  ;;  %v7402_v5 = vmul.f32 %v7362_v0, %v11746_v27  ;;  %v7406_v46 = vmul.f32 %v7136_v40, %v11747_v48  ;;  %v1841_v20 = vlaneseq  ;;  %v11751_v32 = vld [vmem:[#allocation142_spill] sm:$0xff]  ;;  %v11753_v27 = vld [vmem:[#allocation143_spill] sm:$0xff] }
 0x2b1   : > { %v7408_v14 = vadd.f32 %v1603_v38, %v1452_v17  ;;  %v7410_v58 = vadd.f32 %v1434_v19, %v1283_v45  ;;  %v7414_v37 = vmul.f32 %v7362_v0, %v11749_v61  ;;  %1761 = vperm.xlu2 %5701, %v5783_v4   ;;  %v7419_v60 = vadd.f32 %v1606_v28, %v1455_v26  ;;  %v11754_v45 = vld [vmem:[#allocation2_spill] sm:$0xff]  ;;  %v11755_v19 = vld [vmem:[#allocation4_spill] sm:$0xff]  ;;  %v11759_v4 = vld [vmem:[#allocation7_spill] sm:$0xff] }
 0x2b2   : > { %v894_v1 = vadd.f32 %v6983_v34, %v713_v22  ;;  %v7423_v18 = vmul.f32 %v7136_v40, %v11751_v32  ;;  %v1588_v38 = vmul.f32 %v7268_v50, %v11753_v27  ;;  %v7429_v17 = vmul.f32 %v7362_v0, %v11754_v45  ;;  %v5784_v34 = vld [vmem:[%s5988_s15 + $0xd8] sm:$0xff]  ;;  %v7436_v22 = vpop.permute.xlu2 %1572  ;;  %v11758_v26 = vld [vmem:[#allocation6_spill] sm:$0xff]  ;;  %v7449_v45 = vpop.permute.xlu1 %1532 }
 0x2b3   : > { %11748 = vst [vmem:[#allocation49_spill] sm:$0xff] %v7408_v14  ;;  %v7433_v48 = vmul.f32 %v7136_v40, %v11755_v19  ;;  %v7438_v28 = vadd.f32 %v1591_v35, %v1440_v8  ;;  %v7442_v61 = vmul.f32 %v7362_v0, %v11758_v26  ;;  %v7446_v32 = vmul.f32 %v7136_v40, %v11759_v4  ;;  %v11761_v19 = vld [vmem:[#allocation8_spill] sm:$0xff]  ;;  %v584_v35 = vpop.permute.xlu0 %583 }
 0x2b4   : > { %11750 = vst [vmem:[#allocation50_spill] sm:$0xff] %v7419_v60  ;;  %1757 = vperm.xlu1 %5700, %v5784_v34   ;;  %v1075_v27 = vadd.f32 %v7065_v16, %v894_v1  ;;  %v1593_v60 = vmul.f32 %v7268_v50, %v11761_v19  ;;  %v11762_v34 = vld [vmem:[#allocation9_spill] sm:$0xff]  ;;  %v1590_v8 = vmul.f32 %v7268_v50, %v7073_v2  ;;  %v1842_v26 = vshrl.u32 %v1841_v20, 7  ;;  %v11764_v19 = vld [vmem:[#allocation10_spill] sm:$0xff]  ;;  %v11767_v2 = vld [vmem:[#allocation12_spill] sm:$0xff] }
 0x2b5   : > { %11752 = vst [vmem:[#allocation53_spill] sm:$0xff] %v7423_v18  ;;  %v7455_v14 = vmul.f32 %v7362_v0, %v11762_v34  ;;  %v1592_v4 = vmul.f32 %v7268_v50, %v7175_v13  ;;  %v688_v1 = vmul.f32 %v6749_v10, %v584_v35  ;;  %v7463_v54 = vadd.f32 %v1609_v31, %v1458_v7  ;;  %v11766_v34 = vld [vmem:[#allocation11_spill] sm:$0xff] }
 0x2b6   : > { %11756 = vst [vmem:[#allocation52_spill] sm:$0xff] %v7433_v48  ;;  %v1256_v16 = vadd.f32 %v7081_v33, %v1075_v27  ;;  %v7471_v62 = vmul.f32 %v7268_v50, %v11766_v34  ;;  %v7475_v20 = vmul.f32 %v7362_v0, %v11767_v2  ;;  %v11769_v48 = vld [vmem:[#allocation19_spill] sm:$0xff]  ;;  %v11770_v33 = vld [vmem:[#allocation21_spill] sm:$0xff]  ;;  %v7487_v35 = vstv %s5611_s21  ;;  %v11773_v34 = vld [vmem:[#allocation36_spill] sm:$0xff]  ;;  %s5893_s21 = smov 124  }
 0x2b7   : > { %11757 = vst [vmem:[#allocation56_spill] sm:$0xff] %v7438_v28  ;;  %v7479_v13 = vmul.f32 %v7268_v50, %v11769_v48  ;;  %v7483_v31 = vmul.f32 %v7362_v0, %v11770_v33  ;;  %v7494_v2 = vmul.f32 %v7268_v50, %v11773_v34  ;;  %v7496_v48 = vadd.s32 4294967295, %v1842_v26  ;;  %v11774_v33 = vld [vmem:[#allocation40_spill] sm:$0xff]  ;;  %v11780_v34 = vld [vmem:[#allocation23_spill] sm:$0xff] }
 0x2b8   : > { %11760 = vst [vmem:[#allocation45_spill] sm:$0xff] %v7446_v32  ;;  %v7467_v32 = vmul.f32 %v7136_v40, %v11764_v19  ;;  %v1437_v7 = vadd.f32 %v7345_v59, %v1256_v16  ;;  %v11772_v40 = vld [vmem:[#allocation133_spill] sm:$0xff]  ;;  %v7490_v19 = vadd.f32 %v1590_v8, %v7214_v52  ;;  %v7503_v59 = vmul.f32 %v7362_v0, %v11774_v33  ;;  %v7511_v8 = vld [vmem:[%s11189_s3] sm:$0xff] }
 0x2b9   : > { %11763 = vst [vmem:[#allocation55_spill] sm:$0xff] %v7463_v54  ;;  %v718_v27 = vadd.f32 %v688_v1, %v11772_v40  ;;  %v1844_v54 = vadd.s32 16, %v1842_v26  ;;  %v1595_v16 = vmul.f32 %v7268_v50, %v7240_v63  ;;  %v11776_v1 = vld [vmem:[#allocation13_spill] sm:$0xff]  ;;  %v11777_v40 = vmov 0  }
 0x2ba   : > { %11765 = vst [vmem:[#allocation58_spill] sm:$0xff] %v7467_v32  ;;  %v7499_v32 = vadd.f32 %v1592_v4, %v7335_v12  ;;  %5704 = vset.pattern.permute.xlu2 %v11777_v40  ;;  %v7516_v12 = vmul.f32 %v7268_v50, %v7233_v57  ;;  %v7518_v26 = vpop.permute.xlu2 %1584  ;;  %vm1848_vm0 = vcmp.ge.s32.totalorder %v7487_v35, 0  ;;  %vm1858_vm1 = vcmp.lt.s32.totalorder %v7487_v35, 16  ;;  %v1545_v57 = vpop.permute.xlu1 %1544 }
 0x2bb   : > { %11768 = vst [vmem:[#allocation48_spill] sm:$0xff] %v7475_v20  ;;  %v899_v52 = vadd.f32 %v11776_v1, %v718_v27  ;;  %v7524_v63 = vadd.f32 %v7383_v39, %v1461_v30  ;;  %v7528_v4 = vmul.f32 %v7362_v0, %v7244_v23  ;;  %v1618_v27 = vadd.f32 %v1588_v38, %v1437_v7  ;;  %v11781_v30 = vld [vmem:[#allocation24_spill] sm:$0xff]  ;;  %vm7550_vm3 = vmand %vm1848_vm0, %vm1858_vm1 }
 0x2bc   : > { %11771 = vst [vmem:[#allocation61_spill] sm:$0xff] %v7483_v31  ;;  %5703 = vset.pattern.permute.xlu1 %v11777_v40  ;;  %v1832_v1 = vadd.s32 1, %v7487_v35  ;;  %v7532_v53 = vadd.s32 4294967295, %v1844_v54  ;;  %vm1878_vm2 = vcmp.ge.s32.totalorder %v7496_v48, 0  ;;  %v7536_v40 = vperm.slane %v7511_v8, 0 }
 0x2bd   : > { %11775 = vst [vmem:[#allocation63_spill] sm:$0xff] %v7503_v59  ;;  %v1080_v33 = vadd.f32 %v11780_v34, %v899_v52  ;;  %v596_v59 = vpop.permute.xlu0 %595  ;;  %v7539_v39 = vperm.slane %v7511_v8, 1  ;;  %v7542_v23 = vadd.f32 %v1595_v16, %v7242_v21  ;;  %v7555_v52 = vperm.slane %v7511_v8, 2  ;;  %vm1881_vm5 = vmand %vm7550_vm3, %vm1878_vm2 }
 0x2be   : > { %11778 = vst [vmem:[#allocation51_spill] sm:$0xff] %v7524_v63  ;;  %v691_v7 = vmul.f32 %v6749_v10, %v596_v59  ;;  %v7559_v34 = vmul.f32 %v7268_v50, %v7292_v43  ;;  %v1598_v21 = vmul.f32 %v7268_v50, %v7300_v44  ;;  %v1833_v59 = vadd.s32 2, %v7487_v35 }
 0x2bf   : > { %11779 = vst [vmem:[#allocation54_spill] sm:$0xff] %v7528_v4  ;;  %v1261_v38 = vadd.f32 %v11781_v30, %v1080_v33  ;;  %v7566_v16 = vadd.f32 %v7391_v29, %v7410_v58  ;;  %v11786_v30 = vld [vmem:[#allocation134_spill] sm:$0xff]  ;;  %v1799_v4 = vadd.f32 %v7402_v5, %v1618_v27  ;;  %vm1849_vm4 = vcmp.ge.s32.totalorder %v1832_v1, 0 }
 0x2c0   : > { %11784 = vst [vmem:[#allocation57_spill] sm:$0xff] %v7559_v34  ;;  %v721_v63 = vadd.f32 %v691_v7, %v11786_v30  ;;  %v7573_v43 = vmul.f32 %v7362_v0, %v7302_v51  ;;  %v1601_v44 = vmul.f32 %v7268_v50, %v7364_v42  ;;  %vm1913_vm6 = vcmp.lt.s32.totalorder %v7532_v53, 16  ;;  %v11788_v29 = vld [vmem:[#allocation14_spill] sm:$0xff] }
 0x2c1   : > { %11785 = vst [vmem:[#allocation59_spill] sm:$0xff] %v7566_v16  ;;  %v1442_v33 = vadd.f32 %v7368_v36, %v1261_v38  ;;  %vm1859_vm7 = vcmp.lt.s32.totalorder %v1832_v1, 16  ;;  %v7584_v5 = vperm.slane %v7511_v8, 4  ;;  %v7587_v51 = vperm.slane %v7511_v8, 5  ;;  %v11794_v16 = vld [vmem:[#allocation27_spill] sm:$0xff]  ;;  %vm1916_vm14 = vmand %vm7550_vm3, %vm1913_vm6 }
 0x2c2   : > { %11787 = vst [vmem:[#allocation60_spill] sm:$0xff] %v7573_v43  ;;  %v902_v58 = vadd.f32 %v11788_v29, %v721_v63  ;;  %v7590_v27 = vadd.f32 %v1598_v21, %v7256_v11  ;;  %v7594_v42 = vmul.f32 %v7268_v50, %v7352_v25  ;;  %v7597_v38 = vperm.slane %v7511_v8, 7  ;;  %v1557_v63 = vpop.permute.xlu1 %1556  ;;  %vm7601_vm9 = vmand %vm1849_vm4, %vm1859_vm7 }
 0x2c3   : > { %v1623_v36 = vadd.f32 %v1593_v60, %v1442_v33  ;;  %11789 = vst [vmem:[#allocation62_spill] sm:$0xff] %v7587_v51  ;;  %vm1850_vm8 = vcmp.ge.s32.totalorder %v1833_v59, 0  ;;  %v11791_v60 = vld [vmem:[#allocation26_spill] sm:$0xff]  ;;  %v1658_v33 = vpop.permute.xlu2 %1657  ;;  %v2004_v30 = vsel %vm1881_vm5, %v1799_v4, 0.0  ;;  %vm1860_vm10 = vcmp.lt.s32.totalorder %v1833_v59, 16  ;;  %vm1919_vm11 = vmand %vm7601_vm9, %vm1913_vm6  ;;  %v11803_v59 = vld [vmem:[#allocation15_spill] sm:$0xff] }
 0x2c4   : > { %11790 = vst [vmem:[#allocation72_spill] sm:$0xff] %v7594_v42  ;;  %v1083_v7 = vadd.f32 %v11791_v60, %v902_v58  ;;  %v7606_v11 = vadd.s32 3, %v7487_v35  ;;  %v7609_v25 = vadd.f32 %v1601_v44, %v7262_v9  ;;  %v1604_v21 = vmul.f32 %v7268_v50, %v7449_v45  ;;  %vm7646_vm12 = vmand %vm1850_vm8, %vm1860_vm10 }
 0x2c5   : > { %v1771_v58 = vmul.f32 %v7362_v0, %v1658_v33  ;;  %v608_v60 = vpop.permute.xlu0 %607  ;;  %v7615_v4 = vperm.slane %v7511_v8, 3  ;;  %v1607_v1 = vmul.f32 %v7268_v50, %v1545_v57  ;;  %v1804_v31 = vadd.f32 %v7414_v37, %v1623_v36  ;;  %v7639_v37 = vld [vmem:[%s11190_s4] ss:$0 sm:$0xff]  ;;  %vm7678_vm0 = vmand %vm7646_vm12, %vm1913_vm6 }
 0x2c6   : > { %v1264_v43 = vadd.f32 %v11794_v16, %v1083_v7  ;;  %v694_v42 = vmul.f32 %v6749_v10, %v608_v60  ;;  %v7623_v9 = vmul.f32 %v7268_v50, %v7436_v22  ;;  %v2042_v45 = vmul.f32 %v7536_v40, %v2004_v30  ;;  %v11797_v16 = vld [vmem:[#allocation136_spill] sm:$0xff] }
 0x2c7   : > { %v7627_v44 = vmul.f32 %v7539_v39, %v2004_v30  ;;  %v7630_v33 = vmul.f32 %v7555_v52, %v2004_v30  ;;  %v1801_v57 = vadd.f32 %v1771_v58, %v7490_v19  ;;  %vm1851_vm13 = vcmp.ge.s32.totalorder %v7606_v11, 0 }
 0x2c8   : > { %11795 = vst [vmem:[#allocation64_spill] sm:$0xff] %v7623_v9  ;;  %v1445_v22 = vadd.f32 %v7376_v24, %v1264_v43  ;;  %v724_v36 = vadd.f32 %v694_v42, %v11797_v16  ;;  %v7652_v30 = vadd.f32 %v1604_v21, %v7277_v49  ;;  %v7656_v60 = vmul.f32 %v7268_v50, %v7518_v26  ;;  %v11808_v9 = vld [vmem:[#allocation29_spill] sm:$0xff] }
 0x2c9   : > { %11796 = vst [vmem:[#allocation65_spill] sm:$0xff] %v7630_v33  ;;  %vm1861_vm15 = vcmp.lt.s32.totalorder %v7606_v11, 16  ;;  %v7664_v24 = vadd.s32 4, %v7487_v35  ;;  %v7667_v19 = vadd.f32 %v1607_v1, %v7285_v15  ;;  %v2009_v42 = vsel %vm1919_vm11, %v1804_v31, 0.0  ;;  %v11807_v1 = vld [vmem:[#allocation28_spill] sm:$0xff]  ;;  %v11818_v11 = vld [vmem:[#allocation30_spill] sm:$0xff] }
 0x2ca   : > { %11800 = vst [vmem:[#allocation75_spill] sm:$0xff] %v7652_v30  ;;  %v1626_v49 = vadd.f32 %v7471_v62, %v1445_v22  ;;  %v905_v43 = vadd.f32 %v11803_v59, %v724_v36  ;;  %v1610_v26 = vmul.f32 %v7268_v50, %v1557_v63  ;;  %v7683_v15 = vadd.f32 %v7639_v37, %v2042_v45  ;;  %v1569_v22 = vpop.permute.xlu1 %1568  ;;  %vm7751_vm8 = vmand %vm1851_vm13, %vm1861_vm15 }
 0x2cb   : > { %11801 = vst [vmem:[#allocation66_spill] sm:$0xff] %v7656_v60  ;;  %v2006_v62 = vsel %vm1916_vm14, %v1801_v57, 0.0  ;;  %v1666_v63 = vpop.permute.xlu2 %1665  ;;  %v7688_v59 = vperm.slane %v7511_v8, 6  ;;  %v2080_v21 = vmul.f32 %v7539_v39, %v2009_v42  ;;  %v7693_v60 = vmul.f32 %v7555_v52, %v2009_v42  ;;  %vm1925_vm10 = vmand %vm7751_vm8, %vm1913_vm6 }
 0x2cc   : > { %11802 = vst [vmem:[#allocation67_spill] sm:$0xff] %v7667_v19  ;;  %v1086_v31 = vadd.f32 %v11807_v1, %v905_v43  ;;  %v1807_v36 = vadd.f32 %v7429_v17, %v1626_v49  ;;  %v1773_v58 = vmul.f32 %v7362_v0, %v1666_v63  ;;  %v7696_v45 = vmul.f32 %v7584_v5, %v2009_v42 }
 0x2cd   : > { %11806 = vst [vmem:[#allocation68_spill] sm:$0xff] %v7683_v15  ;;  %v620_v57 = vpop.permute.xlu0 %619  ;;  %vm2123_vm1 = vcmask 1046528   ;;  %v7700_v1 = vmul.f32 %v7587_v51, %v2009_v42  ;;  %v7708_v49 = vadd.f32 %v1610_v26, %v7294_v47  ;;  %v7711_v63 = vmul.f32 %v7539_v39, %v2006_v62 }
 0x2ce   : > { %v1267_v43 = vadd.f32 %v11808_v9, %v1086_v31  ;;  %v697_v17 = vmul.f32 %v6749_v10, %v620_v57  ;;  %v7705_v8 = vsel %vm7678_vm0, %v1807_v36, 0.0  ;;  %v1803_v19 = vadd.f32 %v1773_v58, %v7499_v32  ;;  %v11811_v36 = vld [vmem:[#allocation138_spill] sm:$0xff] }
 0x2cf   : > { %11809 = vst [vmem:[#allocation78_spill] sm:$0xff] %v7708_v49  ;;  %v7715_v9 = vadd.s32 5, %v7487_v35  ;;  %v7718_v42 = vmul.f32 %v7555_v52, %v2006_v62  ;;  %v1613_v16 = vmul.f32 %v7268_v50, %v1569_v22  ;;  %vm2245_vm4 = vcmask 1045504  }
 0x2d0   : > { %v1448_v31 = vadd.f32 %v7387_v6, %v1267_v43  ;;  %v727_v57 = vadd.f32 %v697_v17, %v11811_v36  ;;  %vm1852_vm5 = vcmp.ge.s32.totalorder %v7664_v24, 0  ;;  %vm1862_vm7 = vcmp.lt.s32.totalorder %v7664_v24, 16  ;;  %v11814_v17 = vld [vmem:[#allocation16_spill] sm:$0xff] }
 0x2d1   : > { %11810 = vst [vmem:[#allocation69_spill] sm:$0xff] %v7718_v42  ;;  %v2008_v47 = vsel %vm7601_vm9, %v1803_v19, 0.0  ;;  %v2132_v32 = vrot.slane %v2080_v21, 1  ;;  %v2254_v26 = vrot.slane %v7693_v60, 2  ;;  %v7730_v58 = vmul.f32 %v7539_v39, %v7705_v8  ;;  %vm7827_vm11 = vmand %vm1852_vm5, %vm1862_vm7 }
 0x2d2   : > { %v7733_v6 = vmul.f32 %v7539_v39, %v2008_v47  ;;  %v7739_v43 = vmul.f32 %v7555_v52, %v7705_v8  ;;  %v1629_v21 = vadd.f32 %v7479_v13, %v1448_v31  ;;  %v7744_v60 = vmul.f32 %v7555_v52, %v2008_v47  ;;  %v1581_v31 = vpop.permute.xlu1 %1580  ;;  %vm1928_vm15 = vmand %vm7827_vm11, %vm1913_vm6 }
 0x2d3   : > { %11812 = vst [vmem:[#allocation70_spill] sm:$0xff] %v7730_v58  ;;  %v908_v36 = vadd.f32 %v11814_v17, %v727_v57  ;;  %v7757_v49 = vadd.f32 %v1613_v16, %v7320_v56  ;;  %v2045_v13 = vmul.f32 %v7536_v40, %v2008_v47  ;;  %v1678_v19 = vpop.permute.xlu2 %1677  ;;  %v7762_v57 = vmul.f32 %v7584_v5, %v7705_v8  ;;  %v7774_v56 = vld [vmem:[%s11189_s3 + $0x8] ss:$0 sm:$0xff]  ;;  %vm1884_vm7 = vmand %vm7601_vm9, %vm1878_vm2 }
 0x2d4   : > { %11813 = vst [vmem:[#allocation71_spill] sm:$0xff] %v7739_v43  ;;  %v7769_v22 = vmul.f32 %v7597_v38, %v7705_v8  ;;  %v7777_v16 = vmul.f32 %v7584_v5, %v2008_v47  ;;  %v7788_v34 = vmul.f32 %v7587_v51, %v2008_v47  ;;  %v11819_v58 = vld [vmem:[#allocation31_spill] sm:$0xff]  ;;  %v1810_v42 = vadd.f32 %v7442_v61, %v1629_v21 }
 0x2d5   : > { %11817 = vst [vmem:[#allocation81_spill] sm:$0xff] %v7757_v49  ;;  %v1089_v30 = vadd.f32 %v11818_v11, %v908_v36  ;;  %v632_v33 = vpop.permute.xlu0 %631  ;;  %v1776_v49 = vmul.f32 %v7362_v0, %v1678_v19  ;;  %v2061_v19 = vadd.f32 %v7639_v37, %v2045_v13  ;;  %v1616_v17 = vmul.f32 %v7268_v50, %v1581_v31  ;;  %v11820_v43 = vld [vmem:[#allocation139_spill] sm:$0xff] }
 0x2d6   : > { %v700_v36 = vmul.f32 %v6749_v10, %v632_v33  ;;  %v11821_v20 = vrot.slane %v7733_v6, 1  ;;  %v7800_v51 = vsel %vm1925_vm10, %v1810_v42, 0.0  ;;  %v7807_v61 = vmul.f32 %v7615_v4, %v2008_v47 }
 0x2d7   : > { %v1270_v18 = vadd.f32 %v11819_v58, %v1089_v30  ;;  %v1806_v33 = vadd.f32 %v1776_v49, %v7542_v23  ;;  %11822 = vst [vmem:[#allocation73_spill] sm:$0xff] %v7800_v51  ;;  %v7804_v30 = vmul.f32 %v7774_v56, %v7705_v8  ;;  %v11823_v49 = vld [vmem:[#allocation17_spill] sm:$0xff]  ;;  %v11223_v42 = vrot.slane %v7788_v34, 2 }
 0x2d8   : > { %v730_v15 = vadd.f32 %v700_v36, %v11820_v43  ;;  %v2133_v28 = vsel %vm2123_vm1, %v11821_v20, %v2132_v32  ;;  %v11824_v20 = vrot.slane %v7744_v60, 2  ;;  %v7834_v43 = vadd.f32 %v1616_v17, %v7325_v3 }
 0x2d9   : > { %v1451_v11 = vadd.f32 %v7395_v55, %v1270_v18  ;;  %v7811_v50 = vsel %vm7646_vm12, %v1806_v33, 0.0  ;;  %v11222_v18 = vrot.slane %v7777_v16, 1  ;;  %v7839_v31 = vmul.f32 %v7539_v39, %v7800_v51 }
 0x2da   : > { %v911_v58 = vadd.f32 %v11823_v49, %v730_v15  ;;  %v7818_v55 = vsel %vm2245_vm4, %v11824_v20, %v2254_v26  ;;  %v7831_v15 = vadd.f32 %v2133_v28, %v2061_v19  ;;  %11827 = vst [vmem:[#allocation74_spill] sm:$0xff] %v7834_v43  ;;  %v11828_v26 = vld [vmem:[#allocation32_spill] sm:$0xff]  ;;  %vm1853_vm13 = vcmp.ge.s32.totalorder %v7715_v9, 0  ;;  %v1654_v24 = vpop.permute.xlu1 %1653 }
 0x2db   : > { %v1632_v47 = vadd.f32 %v7494_v2, %v1451_v11  ;;  %v1690_v13 = vpop.permute.xlu2 %1689  ;;  %11829 = vst [vmem:[#allocation76_spill] sm:$0xff] %v7839_v31  ;;  %vm1863_vm14 = vcmp.lt.s32.totalorder %v7715_v9, 16  ;;  %v7845_v2 = vmul.f32 %v7539_v39, %v7811_v50  ;;  %v7850_v3 = vmul.f32 %v7555_v52, %v7800_v51  ;;  %v11832_v11 = vld [vmem:[#allocation33_spill] sm:$0xff] }
 0x2dc   : > { %v1092_v21 = vadd.f32 %v11828_v26, %v911_v58  ;;  %v1779_v28 = vmul.f32 %v7362_v0, %v1690_v13  ;;  %v7856_v33 = vmul.f32 %v7584_v5, %v7800_v51  ;;  %v1770_v49 = vmul.f32 %v7362_v0, %v1654_v24  ;;  %v11838_v24 = vld [vmem:[#allocation18_spill] sm:$0xff]  ;;  %vm7941_vm5 = vmand %vm1853_vm13, %vm1863_vm14 }
 0x2dd   : > { %11830 = vst [vmem:[#allocation77_spill] sm:$0xff] %v7845_v2  ;;  %v644_v17 = vpop.permute.xlu0 %643  ;;  %v1813_v36 = vadd.f32 %v7455_v14, %v1632_v47  ;;  %v7866_v26 = vadd.s32 6, %v7487_v35  ;;  %v11834_v14 = vrot.slane %v7696_v45, 1  ;;  %vm1931_vm9 = vmand %vm7941_vm5, %vm1913_vm6 }
 0x2de   : > { %11831 = vst [vmem:[#allocation79_spill] sm:$0xff] %v7850_v3  ;;  %v1273_v19 = vadd.f32 %v11832_v11, %v1092_v21  ;;  %v703_v58 = vmul.f32 %v6749_v10, %v644_v17  ;;  %v1809_v20 = vadd.f32 %v1779_v28, %v7590_v27  ;;  %v11835_v21 = vrot.slane %v7700_v1, 2  ;;  %v11836_v28 = vld [vmem:[#allocation140_spill] sm:$0xff]  ;;  %vm1887_vm14 = vmand %vm7646_vm12, %vm1878_vm2 }
 0x2df   : > { %11833 = vst [vmem:[#allocation86_spill] sm:$0xff] %v7856_v33  ;;  %v7873_v47 = vsel %vm2123_vm1, %v11222_v18, %v11834_v14  ;;  %v1800_v27 = vadd.f32 %v1770_v49, %v7327_v41  ;;  %v7889_v1 = vsel %vm1928_vm15, %v1813_v36, 0.0  ;;  %v7897_v41 = vmul.f32 %v7688_v59, %v7811_v50  ;;  %v11853_v33 = vld [vmem:[#allocation69_spill] sm:$0xff]  ;;  %vm1890_vm12 = vmand %vm7751_vm8, %vm1878_vm2 }
 0x2e0   : > { %v7880_v13 = vsel %vm2245_vm4, %v11223_v42, %v11835_v21  ;;  %v733_v17 = vadd.f32 %v703_v58, %v11836_v28  ;;  %v1454_v14 = vadd.f32 %v7406_v46, %v1273_v19  ;;  %11837 = vst [vmem:[#allocation80_spill] sm:$0xff] %v7889_v1  ;;  %v7901_v49 = vsel %vm7751_vm8, %v1809_v20, 0.0  ;;  %v11839_v58 = vld [vmem:[#allocation34_spill] sm:$0xff] }
 0x2e1   : > { %v2005_v21 = vsel %vm7550_vm3, %v1800_v27, 0.0  ;;  %v7913_v27 = vmul.f32 %v7555_v52, %v7889_v1  ;;  %v7917_v20 = vmul.f32 %v7597_v38, %v7811_v50  ;;  %v7924_v11 = vmul.f32 %v7539_v39, %v7901_v49 }
 0x2e2   : > { %v914_v42 = vadd.f32 %v11838_v24, %v733_v17  ;;  %v2043_v46 = vmul.f32 %v7536_v40, %v2005_v21  ;;  %v2076_v36 = vmul.f32 %v7539_v39, %v2005_v21  ;;  %v2198_v19 = vmul.f32 %v7555_v52, %v2005_v21 }
 0x2e3   : > { %v1702_v54 = vpop.permute.xlu2 %1701  ;;  %v7909_v24 = vmul.f32 %v7539_v39, %v7889_v1  ;;  %11841 = vst [vmem:[#allocation89_spill] sm:$0xff] %v7913_v27  ;;  %v1635_v17 = vadd.f32 %v7516_v12, %v1454_v14  ;;  %vm1854_vm3 = vcmp.ge.s32.totalorder %v7866_v26, 0  ;;  %vm1864_vm0 = vcmp.lt.s32.totalorder %v7866_v26, 16 }
 0x2e4   : > { %v1095_v28 = vadd.f32 %v11839_v58, %v914_v42  ;;  %v2059_v23 = vadd.f32 %v7639_v37, %v2043_v46  ;;  %v2125_v21 = vrot.slane %v2076_v36, 1  ;;  %v1782_v42 = vmul.f32 %v7362_v0, %v1702_v54  ;;  %v1662_v58 = vpop.permute.xlu1 %1661  ;;  %11842 = vst [vmem:[#allocation83_spill] sm:$0xff] %v7924_v11  ;;  %v11845_v54 = vld [vmem:[#allocation35_spill] sm:$0xff]  ;;  %vm8022_vm10 = vmand %vm1854_vm3, %vm1864_vm0 }
 0x2e5   : > { %11840 = vst [vmem:[#allocation82_spill] sm:$0xff] %v7909_v24  ;;  %v656_v18 = vpop.permute.xlu0 %655  ;;  %v2247_v45 = vrot.slane %v2198_v19, 2  ;;  %v1772_v3 = vmul.f32 %v7362_v0, %v1662_v58  ;;  %v11843_v12 = vrot.slane %v7627_v44, 1  ;;  %v11844_v46 = vrot.slane %v7711_v63, 1  ;;  %v11852_v24 = vld [vmem:[#allocation68_spill] sm:$0xff]  ;;  %vm1934_vm13 = vmand %vm8022_vm10, %vm1913_vm6 }
 0x2e6   : > { %v706_v31 = vmul.f32 %v6749_v10, %v656_v18  ;;  %v1276_v43 = vadd.f32 %v11845_v54, %v1095_v28  ;;  %v7947_v19 = vmul.f32 %v7774_v56, %v7811_v50  ;;  %v7952_v63 = vmul.f32 %v7584_v5, %v7889_v1 }
 0x2e7   : > { %v2126_v14 = vsel %vm2123_vm1, %v11843_v12, %v2125_v21  ;;  %v2128_v36 = vsel %vm2123_vm1, %v2125_v21, %v11844_v46  ;;  %v11238_v9 = vrot.slane %v7917_v20, 1  ;;  %v1812_v28 = vadd.f32 %v1782_v42, %v7609_v25  ;;  %v11849_v21 = vld [vmem:[#allocation56_spill] sm:$0xff]  ;;  %v11850_v46 = vld [vmem:[#allocation141_spill] sm:$0xff] }
 0x2e8   : > { %v2181_v44 = vadd.f32 %v2128_v36, %v2059_v23  ;;  %11848 = vst [vmem:[#allocation84_spill] sm:$0xff] %v7952_v63  ;;  %v1802_v12 = vadd.f32 %v1772_v3, %v11849_v21  ;;  %v736_v54 = vadd.f32 %v706_v31, %v11850_v46  ;;  %v11851_v23 = vld [vmem:[#allocation48_spill] sm:$0xff]  ;;  %v2180_v1 = vadd.f32 %v2126_v14, %v11852_v24  ;;  %v11855_v3 = vld [vmem:[#allocation53_spill] sm:$0xff] }
 0x2e9   : > { %v1816_v36 = vadd.f32 %v11851_v23, %v1635_v17  ;;  %v11854_v2 = vrot.slane %v11853_v33, 2  ;;  %v1457_v31 = vadd.f32 %v11855_v3, %v1276_v43  ;;  %v11856_v17 = vld [vmem:[#allocation20_spill] sm:$0xff]  ;;  %v11857_v23 = vld [vmem:[#allocation65_spill] sm:$0xff] }
 0x2ea   : > { %v2007_v42 = vsel %vm1884_vm7, %v1802_v12, 0.0  ;;  %v917_v21 = vadd.f32 %v11856_v17, %v736_v54  ;;  %v11858_v29 = vrot.slane %v11857_v23, 2  ;;  %v11860_v54 = vrot.slane %v7769_v22, 1  ;;  %vm1893_vm7 = vmand %vm7827_vm11, %vm1878_vm2 }
 0x2eb   : > { %v2250_v51 = vsel %vm2245_vm4, %v2247_v45, %v11854_v2  ;;  %v2044_v24 = vmul.f32 %v7536_v40, %v2007_v42  ;;  %v2078_v33 = vmul.f32 %v7539_v39, %v2007_v42  ;;  %v2200_v2 = vmul.f32 %v7555_v52, %v2007_v42  ;;  %v1714_v14 = vpop.permute.xlu2 %1713 }
 0x2ec   : > { %v2303_v25 = vadd.f32 %v2250_v51, %v2181_v44  ;;  %v2248_v58 = vsel %vm2245_vm4, %v11858_v29, %v2247_v45  ;;  %v7984_v51 = vsel %vm7827_vm11, %v1812_v28, 0.0  ;;  %v7986_v43 = vsel %vm1931_vm9, %v1816_v36, 0.0  ;;  %v1674_v44 = vpop.permute.xlu1 %1673  ;;  %v11861_v45 = vld [vmem:[#allocation37_spill] sm:$0xff] }
 0x2ed   : > { %11859 = vst [vmem:[#allocation85_spill] sm:$0xff] %v7986_v43  ;;  %v668_v12 = vpop.permute.xlu0 %667  ;;  %v7993_v3 = vsel %vm2123_vm1, %v11238_v9, %v11860_v54  ;;  %v2060_v17 = vadd.f32 %v7639_v37, %v2044_v24  ;;  %v2129_v23 = vrot.slane %v2078_v33, 1  ;;  %v2251_v46 = vrot.slane %v2200_v2, 2  ;;  %v11862_v36 = vld [vmem:[#allocation57_spill] sm:$0xff] }
 0x2ee   : > { %v1098_v29 = vadd.f32 %v11861_v45, %v917_v21  ;;  %v2302_v63 = vadd.f32 %v2248_v58, %v2180_v1  ;;  %v2336_v28 = vadd.f32 %v7807_v61, %v2303_v25  ;;  %v1638_v27 = vadd.f32 %v11862_v36, %v1457_v31  ;;  %v11868_v25 = vld [vmem:[#allocation38_spill] sm:$0xff]  ;;  %v11869_v21 = vld [vmem:[#allocation75_spill] sm:$0xff] }
 0x2ef   : > { %v1785_v11 = vmul.f32 %v7362_v0, %v1714_v14  ;;  %v8002_v22 = vmul.f32 %v7539_v39, %v7984_v51  ;;  %v11864_v54 = vrot.slane %v7733_v6, 1  ;;  %v11865_v24 = vrot.slane %v7744_v60, 2  ;;  %v11872_v60 = vld [vmem:[#allocation62_spill] sm:$0xff] }
 0x2f0   : > { %v2319_v1 = vmul.f32 %v7615_v4, %v2007_v42  ;;  %v2352_v58 = vmul.f32 %v7584_v5, %v2007_v42  ;;  %v1279_v31 = vadd.f32 %v11868_v25, %v1098_v29  ;;  %v1775_v14 = vmul.f32 %v7362_v0, %v1674_v44  ;;  %v11876_v44 = vld [vmem:[#allocation144_spill] sm:$0xff]  ;;  %v11881_v29 = vld [vmem:[#allocation41_spill] sm:$0xff] }
 0x2f1   : > { %11863 = vst [vmem:[#allocation91_spill] sm:$0xff] %v8002_v22  ;;  %v2131_v9 = vsel %vm2123_vm1, %v2129_v23, %v11864_v54  ;;  %v8010_v33 = vsel %vm2245_vm4, %v2251_v46, %v11865_v24  ;;  %v1815_v2 = vadd.f32 %v1785_v11, %v11869_v21  ;;  %v2473_v46 = vmul.f32 %v11872_v60, %v2007_v42  ;;  %v11874_v23 = vld [vmem:[#allocation61_spill] sm:$0xff]  ;;  %v11875_v54 = vld [vmem:[#allocation39_spill] sm:$0xff]  ;;  %v11882_v22 = vld [vmem:[#allocation72_spill] sm:$0xff] }
 0x2f2   : > { %11866 = vst [vmem:[#allocation92_spill] sm:$0xff] %v8010_v33  ;;  %v8013_v61 = vadd.f32 %v2131_v9, %v2060_v17  ;;  %v8029_v9 = vmul.f32 %v7539_v39, %v7986_v43  ;;  %v709_v17 = vmul.f32 %v6749_v10, %v668_v12  ;;  %v8039_v26 = vmul.f32 %v7555_v52, %v7986_v43 }
 0x2f3   : > { %v8035_v11 = vsel %vm7941_vm5, %v1815_v2, 0.0  ;;  %v1819_v45 = vadd.f32 %v11874_v23, %v1638_v27  ;;  %v2457_v42 = vadd.f32 %v7873_v47, %v2336_v28  ;;  %v2335_v36 = vadd.f32 %v2319_v1, %v2302_v63  ;;  %v1726_v12 = vpop.permute.xlu2 %1725  ;;  %v11877_v2 = vld [vmem:[#allocation52_spill] sm:$0xff] }
 0x2f4   : > { %11867 = vst [vmem:[#allocation87_spill] sm:$0xff] %v8013_v61  ;;  %v1805_v24 = vadd.f32 %v1775_v14, %v11875_v54  ;;  %v739_v25 = vadd.f32 %v709_v17, %v11876_v44  ;;  %v2400_v21 = vrot.slane %v2352_v58, 1  ;;  %v1460_v33 = vadd.f32 %v11877_v2, %v1279_v31  ;;  %v1686_v63 = vpop.permute.xlu1 %1685  ;;  %v11878_v31 = vld [vmem:[#allocation22_spill] sm:$0xff]  ;;  %v11879_v54 = vld [vmem:[#allocation67_spill] sm:$0xff] }
 0x2f5   : > { %11873 = vst [vmem:[#allocation88_spill] sm:$0xff] %v8039_v26  ;;  %v8053_v27 = vmul.f32 %v7584_v5, %v7986_v43  ;;  %v1788_v47 = vmul.f32 %v7362_v0, %v1726_v12  ;;  %v680_v28 = vpop.permute.xlu0 %679  ;;  %v2521_v1 = vrot.slane %v2473_v46, 2  ;;  %v8062_v14 = vmul.f32 %v7539_v39, %v8035_v11 }
 0x2f6   : > { %v920_v17 = vadd.f32 %v11878_v31, %v739_v25  ;;  %v8068_v2 = vsel %vm1934_vm13, %v1819_v45, 0.0  ;;  %v2578_v7 = vadd.f32 %v7880_v13, %v2457_v42  ;;  %v8071_v12 = vsel %vm1887_vm14, %v1805_v24, 0.0  ;;  %v11883_v42 = vld [vmem:[#allocation42_spill] sm:$0xff]  ;;  %v11915_v25 = vld [vmem:[#allocation77_spill] sm:$0xff] }
 0x2f7   : > { %v1818_v44 = vadd.f32 %v1788_v47, %v11879_v54  ;;  %11880 = vst [vmem:[#allocation90_spill] sm:$0xff] %v8071_v12  ;;  %v1778_v61 = vmul.f32 %v7362_v0, %v1686_v63  ;;  %v712_v43 = vmul.f32 %v6749_v10, %v680_v28  ;;  %v1641_v58 = vadd.f32 %v11882_v22, %v1460_v33  ;;  %v11885_v47 = vld [vmem:[#allocation3_spill] sm:$0xff]  ;;  %v11886_v33 = vld [vmem:[#allocation46_spill] sm:$0xff] }
 0x2f8   : > { %v1101_v46 = vadd.f32 %v11881_v29, %v920_v17  ;;  %v2797_v45 = vrot.slane %v7947_v19, 2  ;;  %v8087_v29 = vmul.f32 %v7539_v39, %v8068_v2  ;;  %v8092_v22 = vmul.f32 %v7539_v39, %v8071_v12 }
 0x2f9   : > { %v8080_v31 = vsel %vm8022_vm10, %v1818_v44, 0.0  ;;  %v742_v10 = vadd.f32 %v712_v43, %v11885_v47  ;;  %v1808_v63 = vadd.f32 %v1778_v61, %v11886_v33  ;;  %v2611_v28 = vadd.f32 %v7897_v41, %v2578_v7  ;;  %v11890_v43 = vld [vmem:[#allocation25_spill] sm:$0xff] }
 0x2fa   : > { %v1282_v24 = vadd.f32 %v11883_v42, %v1101_v46  ;;  %11884 = vst [vmem:[#allocation93_spill] sm:$0xff] %v8087_v29  ;;  %v11887_v19 = vrot.slane %v7777_v16, 1  ;;  %v8101_v54 = vmul.f32 %v7539_v39, %v8080_v31  ;;  %v8105_v44 = vmul.f32 %v7584_v5, %v8068_v2  ;;  %v11891_v16 = vld [vmem:[#allocation45_spill] sm:$0xff] }
 0x2fb   : > { %v923_v61 = vadd.f32 %v11890_v43, %v742_v10  ;;  %v2799_v41 = vrot.slane %v7804_v30, 2  ;;  %v11892_v42 = vrot.slane %v7788_v34, 2  ;;  %v1738_v33 = vpop.permute.xlu2 %1737  ;;  %v2594_v62 = vmul.f32 %v7688_v59, %v8071_v12 }
 0x2fc   : > { %v2402_v17 = vsel %vm2123_vm1, %v2400_v21, %v11887_v19  ;;  %11888 = vst [vmem:[#allocation94_spill] sm:$0xff] %v8101_v54  ;;  %v1463_v7 = vadd.f32 %v11891_v16, %v1282_v24  ;;  %v2732_v21 = vadd.f32 %v7993_v3, %v2611_v28  ;;  %v11893_v19 = vld [vmem:[#allocation43_spill] sm:$0xff]  ;;  %v2627_v30 = vmul.f32 %v7597_v38, %v8071_v12  ;;  %v1698_v10 = vpop.permute.xlu1 %1697 }
 0x2fd   : > { %11889 = vst [vmem:[#allocation95_spill] sm:$0xff] %v8105_v44  ;;  %v2456_v46 = vadd.f32 %v2402_v17, %v2335_v36  ;;  %v2523_v47 = vsel %vm2245_vm4, %v2521_v1, %v11892_v42  ;;  %v1104_v23 = vadd.f32 %v11893_v19, %v923_v61  ;;  %v2800_v13 = vsel %vm2245_vm4, %v2797_v45, %v2799_v41  ;;  %v11895_v1 = vld [vmem:[#allocation44_spill] sm:$0xff]  ;;  %v11896_v42 = vld [vmem:[#allocation63_spill] sm:$0xff] }
 0x2fe   : > { %v8124_v24 = vsel %vm1890_vm12, %v1808_v63, 0.0  ;;  %v8126_v3 = vadd.f32 %v2800_v13, %v2732_v21  ;;  %v2748_v34 = vmul.f32 %v7774_v56, %v8071_v12  ;;  %v2675_v17 = vrot.slane %v2627_v30, 1  ;;  %vm1896_vm12 = vmand %vm7941_vm5, %vm1878_vm2 }
 0x2ff   : > { %v2577_v36 = vadd.f32 %v2523_v47, %v2456_v46  ;;  %v1285_v28 = vadd.f32 %v11895_v1, %v1104_v23  ;;  %v1838_v43 = vadd.s32 7, %v7487_v35  ;;  %v1791_v61 = vmul.f32 %v7362_v0, %v1738_v33  ;;  %v11898_v47 = vld [vmem:[#allocation58_spill] sm:$0xff] }
 0x300   : > { %11894 = vst [vmem:[#allocation96_spill] sm:$0xff] %v8126_v3  ;;  %2881 = vperm.xlu2 %5704, %v8126_v3   ;;  %v2796_v16 = vrot.slane %v2748_v34, 2  ;;  %v1822_v63 = vadd.f32 %v11896_v42, %v1641_v58  ;;  %v1781_v13 = vmul.f32 %v7362_v0, %v1698_v10  ;;  %v8138_v21 = vmul.f32 %v7539_v39, %v8124_v24  ;;  %v11901_v58 = vld [vmem:[#allocation78_spill] sm:$0xff] }
 0x301   : > { %v2610_v41 = vadd.f32 %v2594_v62, %v2577_v36  ;;  %v11897_v46 = vrot.slane %v7917_v20, 1  ;;  %vm1855_vm8 = vcmp.ge.s32.totalorder %v1838_v43, 0  ;;  %vm1865_vm15 = vcmp.lt.s32.totalorder %v1838_v43, 16  ;;  %v11902_v20 = vld [vmem:[#allocation47_spill] sm:$0xff] }
 0x302   : > { %v1466_v33 = vadd.f32 %v11898_v47, %v1285_v28  ;;  %v2798_v62 = vsel %vm2245_vm4, %v2796_v16, %v2797_v45  ;;  %vm8145_vm3 = vmand %vm1855_vm8, %vm1865_vm15  ;;  %v1821_v10 = vadd.f32 %v1791_v61, %v11901_v58  ;;  %v1811_v36 = vadd.f32 %v1781_v13, %v11902_v20 }
 0x303   : > { %v2677_v23 = vsel %vm2123_vm1, %v2675_v17, %v11897_v46  ;;  %vm1937_vm0 = vmand %vm8145_vm3, %vm1913_vm6  ;;  %v2305_v34 = vadd.f32 %v7818_v55, %v7831_v15  ;;  %v2322_v1 = vmul.f32 %v7615_v4, %v7811_v50  ;;  %v8161_v45 = vmul.f32 %v7584_v5, %v7811_v50  ;;  %v11906_v55 = vld [vmem:[#allocation64_spill] sm:$0xff] }
 0x304   : > { %v2731_v19 = vadd.f32 %v2677_v23, %v2610_v41  ;;  %v8166_v17 = vmul.f32 %v7555_v52, %v8068_v2  ;;  %v8168_v61 = vsel %vm1937_vm0, %v1822_v63, 0.0  ;;  %v8175_v15 = vadd.f32 %v11906_v55, %v1463_v7  ;;  %v11908_v7 = vld [vmem:[#allocation66_spill] sm:$0xff] }
 0x305   : > { %11903 = vst [vmem:[#allocation98_spill] sm:$0xff] %v8161_v45  ;;  %v2338_v13 = vadd.f32 %v2322_v1, %v2305_v34  ;;  %v11243_v63 = vrot.slane %v8161_v45, 1  ;;  %v8183_v46 = vmul.f32 %v11872_v60, %v7811_v50  ;;  %v2478_v32 = vmul.f32 %v11872_v60, %v7705_v8  ;;  %v11913_v41 = vld [vmem:[#allocation70_spill] sm:$0xff] }
 0x306   : > { %11904 = vst [vmem:[#allocation97_spill] sm:$0xff] %v8166_v17  ;;  %v2852_v43 = vadd.f32 %v2798_v62, %v2731_v19  ;;  %v8188_v23 = vadd.f32 %v11908_v7, %v1466_v33  ;;  %v8192_v47 = vsel %vm8145_vm3, %v1821_v10, 0.0  ;;  %v8196_v19 = vmul.f32 %v7539_v39, %v8168_v61 }
 0x307   : > { %11905 = vst [vmem:[#allocation100_spill] sm:$0xff] %v8168_v61  ;;  %v8198_v62 = vsel %vm1893_vm7, %v1811_v36, 0.0  ;;  %v11909_v58 = vrot.slane %v7762_v57, 1  ;;  %v11244_v8 = vrot.slane %v8183_v46, 2  ;;  %v2529_v33 = vrot.slane %v2478_v32, 2  ;;  %vm1902_vm7 = vmand %vm8145_vm3, %vm1878_vm2 }
 0x308   : > { %2988 = vperm.xlu0 %5702, %v2852_v43   ;;  %2876 = vperm.xlu1 %5703, %v2852_v43   ;;  %11907 = vst [vmem:[#allocation99_spill] sm:$0xff] %v8183_v46  ;;  %v2597_v34 = vmul.f32 %v7688_v59, %v7901_v49  ;;  %v8210_v1 = vmul.f32 %v7597_v38, %v7901_v49  ;;  %v11911_v43 = vld [vmem:[#allocation73_spill] sm:$0xff]  ;;  %v11914_v16 = vrot.slane %v11913_v41, 1  ;;  %v11916_v42 = vrot.slane %v11915_v25, 1 }
 0x309   : > { %v2409_v20 = vsel %vm2123_vm1, %v11243_v63, %v11909_v58  ;;  %v2632_v36 = vmul.f32 %v7597_v38, %v11911_v43  ;;  %v8216_v57 = vmul.f32 %v7774_v56, %v7901_v49  ;;  %v8220_v55 = vmul.f32 %v7555_v52, %v8168_v61 }
 0x30a   : > { %v2459_v10 = vadd.f32 %v2409_v20, %v2338_v13  ;;  %11910 = vst [vmem:[#allocation102_spill] sm:$0xff] %v8210_v1  ;;  %v2530_v32 = vsel %vm2245_vm4, %v11244_v8, %v2529_v33  ;;  %v2753_v13 = vmul.f32 %v7774_v56, %v11911_v43  ;;  %v2047_v7 = vmul.f32 %v7536_v40, %v7811_v50 }
 0x30b   : > { %11912 = vst [vmem:[#allocation101_spill] sm:$0xff] %v8216_v57  ;;  %v11245_v20 = vrot.slane %v8210_v1, 1  ;;  %v2683_v63 = vrot.slane %v2632_v36, 1  ;;  %v2138_v28 = vsel %vm2123_vm1, %v11916_v42, %v11914_v16  ;;  %v8237_v17 = vmul.f32 %v7584_v5, %v8168_v61 }
 0x30c   : > { %v2580_v58 = vadd.f32 %v2530_v32, %v2459_v10  ;;  %v2063_v8 = vadd.f32 %v7639_v37, %v2047_v7  ;;  %v8243_v10 = vmul.f32 %v7555_v52, %v7811_v50  ;;  %v8250_v16 = vmul.f32 %v7584_v5, %v7901_v49 }
 0x30d   : > { %11917 = vst [vmem:[#allocation104_spill] sm:$0xff] %v8237_v17  ;;  %v2684_v41 = vsel %vm2123_vm1, %v11245_v20, %v2683_v63  ;;  %v8254_v42 = vmul.f32 %v11872_v60, %v7901_v49  ;;  %v2804_v36 = vrot.slane %v2753_v13, 2  ;;  %v2481_v50 = vmul.f32 %v11872_v60, %v11911_v43 }
 0x30e   : > { %v2613_v32 = vadd.f32 %v2597_v34, %v2580_v58  ;;  %v2185_v33 = vadd.f32 %v2138_v28, %v2063_v8  ;;  %v8261_v34 = vmul.f32 %v7539_v39, %v8198_v62  ;;  %v2324_v58 = vmul.f32 %v7615_v4, %v7901_v49  ;;  %v11919_v8 = vld [vmem:[#allocation71_spill] sm:$0xff] }
 0x30f   : > { %v11918_v13 = vrot.slane %v8216_v57, 2  ;;  %v11920_v7 = vrot.slane %v11919_v8, 2  ;;  %v11921_v43 = vrot.slane %v8243_v10, 2  ;;  %v8284_v57 = vmul.f32 %v7774_v56, %v7984_v51 }
 0x310   : > { %v2734_v63 = vadd.f32 %v2684_v41, %v2613_v32  ;;  %v8277_v32 = vmul.f32 %v7597_v38, %v7984_v51  ;;  %v1750_v41 = vpop.permute.xlu2 %1749  ;;  %v11925_v1 = vrot.slane %v8250_v16, 1  ;;  %v2599_v46 = vmul.f32 %v7688_v59, %v7984_v51 }
 0x311   : > { %v2805_v28 = vsel %vm2245_vm4, %v11918_v13, %v2804_v36  ;;  %v2260_v29 = vsel %vm2245_vm4, %v11921_v43, %v11920_v7  ;;  %v1710_v36 = vpop.permute.xlu1 %1709  ;;  %v11923_v13 = vld [vmem:[#allocation86_spill] sm:$0xff]  ;;  %v2534_v43 = vrot.slane %v2481_v50, 2  ;;  %v1839_v17 = vadd.s32 8, %v7487_v35 }
 0x312   : > { %v8279_v3 = vadd.f32 %v2805_v28, %v2734_v63  ;;  %v2307_v20 = vadd.f32 %v2260_v29, %v2185_v33  ;;  %v11924_v8 = vrot.slane %v11923_v13, 1  ;;  %v11926_v63 = vld [vmem:[#allocation80_spill] sm:$0xff]  ;;  %v1794_v13 = vmul.f32 %v7362_v0, %v1750_v41  ;;  %v11927_v50 = vld [vmem:[#allocation54_spill] sm:$0xff] }
 0x313   : > { %v2635_v29 = vmul.f32 %v7597_v38, %v11926_v63  ;;  %v2756_v28 = vmul.f32 %v7774_v56, %v11926_v63  ;;  %v1784_v54 = vmul.f32 %v7362_v0, %v1710_v36  ;;  %vm1856_vm11 = vcmp.ge.s32.totalorder %v1839_v17, 0 }
 0x314   : > { %11922 = vst [vmem:[#allocation106_spill] sm:$0xff] %v8279_v3  ;;  %v2414_v7 = vsel %vm2123_vm1, %v11925_v1, %v11924_v8  ;;  %2891 = vperm.xlu1 %5703, %v8279_v3   ;;  %v2340_v33 = vadd.f32 %v2324_v58, %v2307_v20  ;;  %v1825_v8 = vadd.f32 %v11927_v50, %v8175_v15  ;;  %vm1866_vm9 = vcmp.lt.s32.totalorder %v1839_v17, 16  ;;  %v11928_v20 = vld [vmem:[#allocation81_spill] sm:$0xff] }
 0x315   : > { %v1824_v58 = vadd.f32 %v1794_v13, %v11928_v20  ;;  %v11929_v41 = vrot.slane %v8254_v42, 2  ;;  %v2688_v61 = vrot.slane %v2635_v29, 1  ;;  %vm8311_vm13 = vmand %vm1856_vm11, %vm1866_vm9  ;;  %v2809_v36 = vrot.slane %v2756_v28, 2 }
 0x316   : > { %v2461_v44 = vadd.f32 %v2414_v7, %v2340_v33  ;;  %vm1940_vm14 = vmand %vm8311_vm13, %vm1913_vm6  ;;  %v11933_v7 = vld [vmem:[#allocation49_spill] sm:$0xff]  ;;  %v11949_v53 = vrot.slane %v8277_v32, 1  ;;  %v8477_v6 = vmul.f32 %v7555_v52, %v7901_v49  ;;  %v8633_v1 = vmul.f32 %v7555_v52, %v8035_v11 }
 0x317   : > { %v2535_v45 = vsel %vm2245_vm4, %v11929_v41, %v2534_v43  ;;  %v8321_v17 = vsel %vm8311_vm13, %v1824_v58, 0.0  ;;  %v1814_v33 = vadd.f32 %v1784_v54, %v11933_v7  ;;  %v11934_v43 = vrot.slane %v8277_v32, 1 }
 0x318   : > { %v2582_v15 = vadd.f32 %v2535_v45, %v2461_v44  ;;  %11932 = vst [vmem:[#allocation103_spill] sm:$0xff] %v8321_v17  ;;  %v8327_v13 = vsel %vm1940_vm14, %v1825_v8, 0.0  ;;  %v2046_v44 = vmul.f32 %v7536_v40, %v8071_v12  ;;  %v2203_v45 = vmul.f32 %v7555_v52, %v8071_v12 }
 0x319   : > { %v2689_v29 = vsel %vm2123_vm1, %v11934_v43, %v2688_v61  ;;  %11935 = vst [vmem:[#allocation108_spill] sm:$0xff] %v8327_v13  ;;  %v11936_v54 = vrot.slane %v8284_v57, 2  ;;  %v8342_v61 = vmul.f32 %v7584_v5, %v8321_v17  ;;  %v8346_v8 = vmul.f32 %v11872_v60, %v8321_v17 }
 0x31a   : > { %v2615_v28 = vadd.f32 %v2599_v46, %v2582_v15  ;;  %v8350_v18 = vmul.f32 %v7615_v4, %v8321_v17  ;;  %v2375_v20 = vmul.f32 %v7584_v5, %v8327_v13  ;;  %v11937_v46 = vrot.slane %v11915_v25, 1  ;;  %11959 = vst [vmem:[#allocation111_spill] sm:$0xff] %v8477_v6 }
 0x31b   : > { %v2810_v50 = vsel %vm2245_vm4, %v11936_v54, %v2809_v36  ;;  %v11938_v58 = vrot.slane %v8092_v22, 1  ;;  %v2323_v15 = vmul.f32 %v7615_v4, %v8124_v24  ;;  %v2496_v7 = vmul.f32 %v11872_v60, %v8327_v13 }
 0x31c   : > { %v2736_v36 = vadd.f32 %v2689_v29, %v2615_v28  ;;  %v8365_v43 = vmul.f32 %v7597_v38, %v8321_v17  ;;  %v8367_v54 = vsel %vm1896_vm12, %v1814_v33, 0.0  ;;  %v2062_v63 = vadd.f32 %v7639_v37, %v2046_v44 }
 0x31d   : > { %v2136_v41 = vsel %vm2123_vm1, %v11938_v58, %v11937_v46  ;;  %11940 = vst [vmem:[#allocation109_spill] sm:$0xff] %v8367_v54  ;;  %v2256_v25 = vrot.slane %v2203_v45, 2  ;;  %v2358_v22 = vmul.f32 %v7584_v5, %v8124_v24  ;;  %v2479_v46 = vmul.f32 %v11872_v60, %v8124_v24  ;;  %v1762_v58 = vpop.permute.xlu2 %1761 }
 0x31e   : > { %11939 = vst [vmem:[#allocation105_spill] sm:$0xff] %v8365_v43  ;;  %v2857_v29 = vadd.f32 %v2810_v50, %v2736_v36  ;;  %v2633_v13 = vmul.f32 %v7597_v38, %v8198_v62  ;;  %v2438_v33 = vrot.slane %v2375_v20, 1  ;;  %v8380_v44 = vmul.f32 %v7539_v39, %v8367_v54 }
 0x31f   : > { %v2184_v45 = vadd.f32 %v2136_v41, %v2062_v63  ;;  %v2410_v12 = vrot.slane %v2358_v22, 1  ;;  %v11942_v17 = vrot.slane %v8243_v10, 2  ;;  %v2754_v50 = vmul.f32 %v7774_v56, %v8198_v62  ;;  %v11944_v10 = vld [vmem:[#allocation60_spill] sm:$0xff] }
 0x320   : > { %11941 = vst [vmem:[#allocation107_spill] sm:$0xff] %v8380_v44  ;;  %3008 = vperm.xlu0 %5702, %v2857_v29   ;;  %2901 = vperm.xlu1 %5703, %v2857_v29   ;;  %v1840_v36 = vadd.s32 9, %v7487_v35  ;;  %v1797_v3 = vmul.f32 %v7362_v0, %v1762_v58  ;;  %v11943_v28 = vrot.slane %v8250_v16, 1  ;;  %v2531_v63 = vrot.slane %v2479_v46, 2  ;;  %v11947_v35 = vld [vmem:[#allocation74_spill] sm:$0xff] }
 0x321   : > { %v2258_v43 = vsel %vm2245_vm4, %v2256_v25, %v11942_v17  ;;  %v2685_v41 = vrot.slane %v2633_v13, 1  ;;  %v2806_v22 = vrot.slane %v2754_v50, 2  ;;  %v1828_v17 = vadd.f32 %v11944_v10, %v8188_v23  ;;  %v1722_v50 = vpop.permute.xlu1 %1721 }
 0x322   : > { %v2306_v20 = vadd.f32 %v2258_v43, %v2184_v45  ;;  %v2412_v26 = vsel %vm2123_vm1, %v2410_v12, %v11943_v28  ;;  %vm1857_vm5 = vcmp.ge.s32.totalorder %v1840_v36, 0  ;;  %vm1867_vm8 = vcmp.lt.s32.totalorder %v1840_v36, 16 }
 0x323   : > { %vm8394_vm15 = vmand %vm1857_vm5, %vm1867_vm8  ;;  %v1827_v58 = vadd.f32 %v1797_v3, %v11947_v35  ;;  %v2057_v16 = vmul.f32 %v7536_v40, %v8192_v47  ;;  %v8403_v12 = vmul.f32 %v7539_v39, %v8192_v47  ;;  %v2559_v13 = vrot.slane %v2496_v7, 2 }
 0x324   : > { %v2339_v25 = vadd.f32 %v2323_v15, %v2306_v20  ;;  %v2598_v23 = vmul.f32 %v7688_v59, %v8198_v62  ;;  %vm1943_vm0 = vmand %vm8394_vm15, %vm1913_vm6  ;;  %v8414_v3 = vmul.f32 %v7555_v52, %v8192_v47  ;;  %v11948_v46 = vrot.slane %v8254_v42, 2 }
 0x325   : > { %v2032_v7 = vsel %vm8394_vm15, %v1827_v58, 0.0  ;;  %v2073_v45 = vadd.f32 %v7639_v37, %v2057_v16  ;;  %v2687_v36 = vsel %vm2123_vm1, %v2685_v41, %v11949_v53  ;;  %v2033_v20 = vsel %vm1943_vm0, %v1828_v17, 0.0  ;;  %vm1899_vm6 = vmand %vm8022_vm10, %vm1878_vm2 }
 0x326   : > { %v2460_v15 = vadd.f32 %v2412_v26, %v2339_v25  ;;  %v2533_v28 = vsel %vm2245_vm4, %v2531_v63, %v11948_v46  ;;  %v11268_v10 = vrot.slane %v8403_v12, 1  ;;  %v11266_v35 = vrot.slane %v8414_v3, 2  ;;  %vm1905_vm10 = vmand %vm8311_vm13, %vm1878_vm2 }
 0x327   : > { %v11950_v42 = vrot.slane %v8284_v57, 2  ;;  %v11951_v25 = vrot.slane %v8342_v61, 1  ;;  %v11952_v16 = vrot.slane %v8346_v8, 2  ;;  %v11953_v41 = vrot.slane %v8196_v19, 1  ;;  %vm1908_vm3 = vmand %vm8394_vm15, %vm1878_vm2 }
 0x328   : > { %v2581_v26 = vadd.f32 %v2533_v28, %v2460_v15  ;;  %v8444_v15 = vmul.f32 %v7688_v59, %v2032_v7  ;;  %v8447_v57 = vmul.f32 %v7597_v38, %v2032_v7  ;;  %v8451_v28 = vmul.f32 %v7597_v38, %v2033_v20 }
 0x329   : > { %v2808_v63 = vsel %vm2245_vm4, %v2806_v22, %v11950_v42  ;;  %v2439_v58 = vsel %vm2123_vm1, %v11951_v25, %v2438_v33  ;;  %v8436_v32 = vsel %vm2245_vm4, %v11952_v16, %v2559_v13  ;;  %v2163_v17 = vsel %vm2123_vm1, %v11268_v10, %v11953_v41 }
 0x32a   : > { %v1787_v22 = vmul.f32 %v7362_v0, %v1722_v50  ;;  %v2614_v33 = vadd.f32 %v2598_v23, %v2581_v26  ;;  %v2195_v46 = vadd.f32 %v2163_v17, %v2073_v45  ;;  %v8454_v13 = vmul.f32 %v7774_v56, %v2032_v7  ;;  %v11955_v50 = vld [vmem:[#allocation50_spill] sm:$0xff]  ;;  %v11956_v26 = vld [vmem:[#allocation83_spill] sm:$0xff] }
 0x32b   : > { %v11954_v19 = vrot.slane %v8220_v55, 2  ;;  %v2048_v45 = vmul.f32 %v7536_v40, %v8124_v24  ;;  %v11957_v42 = vrot.slane %v11956_v26, 1  ;;  %v11958_v7 = vrot.slane %v8138_v21, 1 }
 0x32c   : > { %v1817_v23 = vadd.f32 %v1787_v22, %v11955_v50  ;;  %v2735_v25 = vadd.f32 %v2687_v36, %v2614_v33  ;;  %v2206_v41 = vmul.f32 %v7555_v52, %v8124_v24  ;;  %v8481_v22 = vmul.f32 %v7774_v56, %v2033_v20 }
 0x32d   : > { %v2285_v53 = vsel %vm2245_vm4, %v11266_v35, %v11954_v19  ;;  %v2141_v55 = vsel %vm2123_vm1, %v11958_v7, %v11957_v42  ;;  %v2064_v19 = vadd.f32 %v7639_v37, %v2048_v45  ;;  %v2361_v21 = vmul.f32 %v7584_v5, %v8198_v62 }
 0x32e   : > { %v2317_v16 = vadd.f32 %v2285_v53, %v2195_v46  ;;  %v8486_v50 = vadd.f32 %v2808_v63, %v2735_v25  ;;  %v8489_v33 = vsel %vm1899_vm6, %v1817_v23, 0.0  ;;  %v2261_v46 = vrot.slane %v2206_v41, 2 }
 0x32f   : > { %v2186_v53 = vadd.f32 %v2141_v55, %v2064_v19  ;;  %v11267_v42 = vrot.slane %v8477_v6, 2  ;;  %v8494_v7 = vmul.f32 %v7584_v5, %v7984_v51  ;;  %v2415_v20 = vrot.slane %v2361_v21, 1 }
 0x330   : > { %11960 = vst [vmem:[#allocation112_spill] sm:$0xff] %v8486_v50  ;;  %2896 = vperm.xlu2 %5704, %v8486_v50   ;;  %v2350_v45 = vadd.f32 %v8350_v18, %v2317_v16  ;;  %v2325_v63 = vmul.f32 %v7615_v4, %v8198_v62  ;;  %v2482_v23 = vmul.f32 %v11872_v60, %v8198_v62  ;;  %vm5472_vm2 = vcmask 31744  }
 0x331   : > { %11961 = vst [vmem:[#allocation113_spill] sm:$0xff] %v8494_v7  ;;  %v8504_v55 = vmul.f32 %v11872_v60, %v7984_v51  ;;  %v8508_v25 = vmul.f32 %v7539_v39, %v8489_v33  ;;  %v2263_v41 = vsel %vm2245_vm4, %v2261_v46, %v11267_v42  ;;  %v11270_v18 = vrot.slane %v8494_v7, 1 }
 0x332   : > { %v2636_v16 = vmul.f32 %v7597_v38, %v8367_v54  ;;  %v2308_v43 = vadd.f32 %v2263_v41, %v2186_v53  ;;  %v2536_v36 = vrot.slane %v2482_v23, 2  ;;  %v8524_v46 = vmul.f32 %v7597_v38, %v8035_v11  ;;  %v1734_v23 = vpop.permute.xlu1 %1733 }
 0x333   : > { %11962 = vst [vmem:[#allocation110_spill] sm:$0xff] %v8504_v55  ;;  %v2417_v17 = vsel %vm2123_vm1, %v2415_v20, %v11270_v18  ;;  %v11273_v35 = vrot.slane %v8504_v55, 2  ;;  %v2757_v42 = vmul.f32 %v7774_v56, %v8367_v54  ;;  %v2471_v10 = vadd.f32 %v2439_v58, %v2350_v45  ;;  %v11965_v45 = vld [vmem:[#allocation91_spill] sm:$0xff] }
 0x334   : > { %11963 = vst [vmem:[#allocation114_spill] sm:$0xff] %v8524_v46  ;;  %v2341_v50 = vadd.f32 %v2325_v63, %v2308_v43  ;;  %v2690_v19 = vrot.slane %v2636_v16, 1  ;;  %v8530_v53 = vmul.f32 %v7774_v56, %v8035_v11  ;;  %v2600_v18 = vmul.f32 %v7688_v59, %v8367_v54 }
 0x335   : > { %v2538_v20 = vsel %vm2245_vm4, %v2536_v36, %v11273_v35  ;;  %v2050_v21 = vmul.f32 %v7536_v40, %v8198_v62  ;;  %v11276_v43 = vrot.slane %v8524_v46, 1  ;;  %v11966_v63 = vrot.slane %v11965_v45, 1 }
 0x336   : > { %11964 = vst [vmem:[#allocation115_spill] sm:$0xff] %v8530_v53  ;;  %v2462_v58 = vadd.f32 %v2417_v17, %v2341_v50  ;;  %v11967_v16 = vrot.slane %v8261_v34, 1  ;;  %v2209_v41 = vmul.f32 %v7555_v52, %v8198_v62  ;;  %v2811_v55 = vrot.slane %v2757_v42, 2 }
 0x337   : > { %v1790_v36 = vmul.f32 %v7362_v0, %v1734_v23  ;;  %v2066_v35 = vadd.f32 %v7639_v37, %v2050_v21  ;;  %v2210_v7 = vmul.f32 %v7555_v52, %v7984_v51  ;;  %v2692_v50 = vsel %vm2123_vm1, %v2690_v19, %v11276_v43 }
 0x338   : > { %v2146_v44 = vsel %vm2123_vm1, %v11967_v16, %v11966_v63  ;;  %v2583_v17 = vadd.f32 %v2538_v20, %v2462_v58  ;;  %v11281_v34 = vrot.slane %v8530_v53, 2  ;;  %v2266_v6 = vrot.slane %v2209_v41, 2 }
 0x339   : > { %v2188_v63 = vadd.f32 %v2146_v44, %v2066_v35  ;;  %v2267_v16 = vrot.slane %v2210_v7, 2  ;;  %v2327_v62 = vmul.f32 %v7615_v4, %v8367_v54  ;;  %v2364_v42 = vmul.f32 %v7584_v5, %v8367_v54 }
 0x33a   : > { %v2616_v37 = vadd.f32 %v2600_v18, %v2583_v17  ;;  %v2365_v21 = vmul.f32 %v7584_v5, %v8035_v11  ;;  %v2485_v23 = vmul.f32 %v11872_v60, %v8367_v54  ;;  %v2486_v19 = vmul.f32 %v11872_v60, %v8035_v11 }
 0x33b   : > { %v2813_v44 = vsel %vm2245_vm4, %v2811_v55, %v11281_v34  ;;  %v2268_v35 = vsel %vm2245_vm4, %v2266_v6, %v2267_v16  ;;  %v2420_v7 = vrot.slane %v2364_v42, 1  ;;  %v2639_v41 = vmul.f32 %v7597_v38, %v8489_v33 }
 0x33c   : > { %v2737_v18 = vadd.f32 %v2692_v50, %v2616_v37  ;;  %v2310_v20 = vadd.f32 %v2268_v35, %v2188_v63  ;;  %v2421_v58 = vrot.slane %v2365_v21, 1  ;;  %v2541_v17 = vrot.slane %v2485_v23, 2  ;;  %v11968_v63 = vld [vmem:[#allocation55_spill] sm:$0xff]  ;;  %v11969_v35 = vld [vmem:[#allocation82_spill] sm:$0xff] }
 0x33d   : > { %v2542_v43 = vrot.slane %v2486_v19, 2  ;;  %v2640_v46 = vmul.f32 %v7597_v38, %v8080_v31  ;;  %v2695_v54 = vrot.slane %v2639_v41, 1  ;;  %v2760_v53 = vmul.f32 %v7774_v56, %v8489_v33 }
 0x33e   : > { %v8576_v26 = vadd.f32 %v2813_v44, %v2737_v18  ;;  %v2343_v55 = vadd.f32 %v2327_v62, %v2310_v20  ;;  %v2422_v6 = vsel %vm2123_vm1, %v2420_v7, %v2421_v58  ;;  %v2761_v42 = vmul.f32 %v7774_v56, %v8080_v31  ;;  %v8599_v20 = vld [vmem:[%s11190_s4] ss:$0 sm:$0xff] }
 0x33f   : > { %v8582_v50 = vadd.f32 %v8436_v32, %v2471_v10  ;;  %v1820_v37 = vadd.f32 %v1790_v36, %v11968_v63  ;;  %v2602_v21 = vmul.f32 %v7688_v59, %v8489_v33  ;;  %v2051_v23 = vmul.f32 %v7536_v40, %v7984_v51  ;;  %v1746_v32 = vpop.permute.xlu1 %1745 }
 0x340   : > { %2906 = vperm.xlu2 %5704, %v8576_v26   ;;  %v2464_v19 = vadd.f32 %v2422_v6, %v2343_v55  ;;  %v2543_v62 = vsel %vm2245_vm4, %v2541_v17, %v2542_v43  ;;  %v2696_v44 = vrot.slane %v2640_v46, 1  ;;  %v11970_v7 = vrot.slane %v11969_v35, 1  ;;  %v11972_v55 = vld [vmem:[#allocation89_spill] sm:$0xff] }
 0x341   : > { %v11971_v41 = vrot.slane %v11965_v45, 1  ;;  %v2816_v36 = vrot.slane %v2760_v53, 2  ;;  %v2817_v18 = vrot.slane %v2761_v42, 2  ;;  %v2067_v63 = vadd.f32 %v8599_v20, %v2051_v23 }
 0x342   : > { %v11973_v6 = vrot.slane %v11972_v55, 2  ;;  %v2585_v17 = vadd.f32 %v2543_v62, %v2464_v19  ;;  %v2697_v35 = vsel %vm2123_vm1, %v2695_v54, %v2696_v44  ;;  %v2328_v45 = vmul.f32 %v7615_v4, %v8035_v11 }
 0x343   : > { %v2148_v10 = vsel %vm2123_vm1, %v11971_v41, %v11970_v7  ;;  %v11974_v7 = vld [vmem:[#allocation85_spill] sm:$0xff]  ;;  %v2641_v41 = vmul.f32 %v7597_v38, %v8068_v2  ;;  %v2762_v23 = vmul.f32 %v7774_v56, %v8068_v2  ;;  %v1793_v55 = vmul.f32 %v7362_v0, %v1746_v32 }
 0x344   : > { %v2270_v46 = vsel %vm2245_vm4, %v2267_v16, %v11973_v6  ;;  %v2487_v53 = vmul.f32 %v11872_v60, %v11974_v7  ;;  %v2189_v42 = vadd.f32 %v2148_v10, %v2067_v63  ;;  %v2618_v34 = vadd.f32 %v2602_v21, %v2585_v17  ;;  %v11976_v6 = vld [vmem:[#allocation51_spill] sm:$0xff] }
 0x345   : > { %v11975_v16 = vrot.slane %v8053_v27, 1  ;;  %v2053_v62 = vmul.f32 %v7536_v40, %v8035_v11  ;;  %v2698_v63 = vrot.slane %v2641_v41, 1  ;;  %v1823_v56 = vadd.f32 %v1793_v55, %v11976_v6 }
 0x346   : > { %v2544_v19 = vrot.slane %v2487_v53, 2  ;;  %v2311_v10 = vadd.f32 %v2270_v46, %v2189_v42  ;;  %v11977_v32 = vrot.slane %v8029_v9, 1  ;;  %v11978_v21 = vrot.slane %v8062_v14, 1 }
 0x347   : > { %v2424_v54 = vsel %vm2123_vm1, %v2421_v58, %v11975_v16  ;;  %v2739_v58 = vadd.f32 %v2697_v35, %v2618_v34  ;;  %v2819_v17 = vrot.slane %v2762_v23, 2  ;;  %v2069_v53 = vadd.f32 %v8599_v20, %v2053_v62 }
 0x348   : > { %v2153_v27 = vsel %vm2123_vm1, %v11978_v21, %v11977_v32  ;;  %v2818_v46 = vsel %vm2245_vm4, %v2816_v36, %v2817_v18  ;;  %v2344_v9 = vadd.f32 %v2328_v45, %v2311_v10  ;;  %v2603_v42 = vmul.f32 %v7688_v59, %v8080_v31 }
 0x349   : > { %v8642_v41 = vsel %vm1905_vm10, %v1823_v56, 0.0  ;;  %v2860_v34 = vadd.f32 %v2818_v46, %v2739_v58  ;;  %v2545_v35 = vsel %vm2245_vm4, %v2542_v43, %v2544_v19  ;;  %v2699_v23 = vsel %vm2123_vm1, %v2696_v44, %v2698_v63  ;;  %v11981_v46 = vld [vmem:[#allocation100_spill] sm:$0xff] }
 0x34a   : > { %v2820_v55 = vsel %vm2245_vm4, %v2817_v18, %v2819_v17  ;;  %v2465_v16 = vadd.f32 %v2424_v54, %v2344_v9  ;;  %v2373_v30 = vmul.f32 %v7584_v5, %v8642_v41  ;;  %v2191_v62 = vadd.f32 %v2153_v27, %v2069_v53  ;;  %v11979_v54 = vld [vmem:[#allocation88_spill] sm:$0xff] }
 0x34b   : > { %v11284_v36 = vrot.slane %v8633_v1, 2  ;;  %v8650_v45 = vsel %vm1902_vm7, %v1820_v37, 0.0  ;;  %3020 = vperm.xlu0 %5702, %v2860_v34   ;;  %2916 = vperm.xlu1 %5703, %v2860_v34   ;;  %v8654_v10 = vmul.f32 %v7615_v4, %v8642_v41  ;;  %v2330_v43 = vmul.f32 %v7615_v4, %v8080_v31  ;;  %v1758_v34 = vpop.permute.xlu1 %1757 }
 0x34c   : > { %v8660_v44 = vmul.f32 %v7584_v5, %v8080_v31  ;;  %v2586_v18 = vadd.f32 %v2545_v35, %v2465_v16  ;;  %v11980_v19 = vrot.slane %v11979_v54, 2  ;;  %v8669_v63 = vmul.f32 %v11872_v60, %v8080_v31  ;;  %v11982_v35 = vld [vmem:[#allocation95_spill] sm:$0xff] }
 0x34d   : > { %v2490_v6 = vmul.f32 %v11872_v60, %v8068_v2  ;;  %v8675_v56 = vmul.f32 %v11872_v60, %v8642_v41  ;;  %v8680_v27 = vmul.f32 %v7597_v38, %v8192_v47  ;;  %v2435_v17 = vrot.slane %v2373_v30, 1 }
 0x34e   : > { %v2275_v37 = vsel %vm2245_vm4, %v11284_v36, %v11980_v19  ;;  %v11282_v21 = vrot.slane %v8660_v44, 1  ;;  %v2619_v58 = vadd.f32 %v2603_v42, %v2586_v18  ;;  %v11283_v53 = vrot.slane %v8669_v63, 2  ;;  %v8693_v19 = vld [vmem:[%s11189_s3 + $0x8] ss:$0 sm:$0xff] }
 0x34f   : > { %v2313_v32 = vadd.f32 %v2275_v37, %v2191_v62  ;;  %v2644_v9 = vmul.f32 %v7597_v38, %v11981_v46  ;;  %v11983_v16 = vrot.slane %v11982_v35, 1  ;;  %v2549_v54 = vrot.slane %v2490_v6, 2 }
 0x350   : > { %v8697_v42 = vmul.f32 %v8693_v19, %v8192_v47  ;;  %v2740_v30 = vadd.f32 %v2699_v23, %v2619_v58  ;;  %v11286_v18 = vrot.slane %v8680_v27, 1  ;;  %v2765_v37 = vmul.f32 %v8693_v19, %v11981_v46 }
 0x351   : > { %v2346_v2 = vadd.f32 %v2330_v43, %v2313_v32  ;;  %v2429_v62 = vsel %vm2123_vm1, %v11282_v21, %v11983_v16  ;;  %v2605_v43 = vmul.f32 %v7688_v59, %v8192_v47  ;;  %v2550_v6 = vsel %vm2245_vm4, %v11283_v53, %v2549_v54  ;;  %v11984_v54 = vld [vmem:[#allocation59_spill] sm:$0xff] }
 0x352   : > { %v1796_v35 = vmul.f32 %v7362_v0, %v1758_v34  ;;  %v2056_v16 = vmul.f32 %v7536_v40, %v8650_v45  ;;  %v8710_v21 = vadd.f32 %v2820_v55, %v2740_v30  ;;  %v2703_v23 = vrot.slane %v2644_v9, 1 }
 0x353   : > { %v2467_v32 = vadd.f32 %v2429_v62, %v2346_v2  ;;  %v11285_v58 = vrot.slane %v8697_v42, 2  ;;  %v2096_v2 = vmul.f32 %v7539_v39, %v8650_v45  ;;  %v2218_v55 = vmul.f32 %v7555_v52, %v8650_v45 }
 0x354   : > { %v1826_v53 = vadd.f32 %v1796_v35, %v11984_v54  ;;  %v2072_v0 = vadd.f32 %v8599_v20, %v2056_v16  ;;  %2921 = vperm.xlu2 %5704, %v8710_v21   ;;  %v2645_v9 = vmul.f32 %v7597_v38, %v8642_v41  ;;  %v2704_v48 = vsel %vm2123_vm1, %v11286_v18, %v2703_v23 }
 0x355   : > { %v2588_v62 = vadd.f32 %v2550_v6, %v2467_v32  ;;  %v2824_v29 = vrot.slane %v2765_v37, 2  ;;  %v2159_v34 = vrot.slane %v2096_v2, 1  ;;  %v2281_v32 = vrot.slane %v2218_v55, 2 }
 0x356   : > { %v2031_v30 = vsel %vm1908_vm3, %v1826_v53, 0.0  ;;  %v2054_v6 = vmul.f32 %v7536_v40, %v8489_v33  ;;  %v2556_v35 = vrot.slane %v8675_v56, 2  ;;  %v11985_v54 = vrot.slane %v8403_v12, 1 }
 0x357   : > { %v2621_v39 = vadd.f32 %v2605_v43, %v2588_v62  ;;  %v2825_v16 = vsel %vm2245_vm4, %v11285_v58, %v2824_v29  ;;  %v11986_v23 = vrot.slane %v8342_v61, 1  ;;  %v2608_v2 = vmul.f32 %v7688_v59, %v2031_v30  ;;  %v11988_v58 = vld [vmem:[#allocation94_spill] sm:$0xff] }
 0x358   : > { %v2161_v36 = vsel %vm2123_vm1, %v2159_v34, %v11985_v54  ;;  %v2070_v62 = vadd.f32 %v8599_v20, %v2054_v6  ;;  %v11987_v56 = vrot.slane %v8414_v3, 2  ;;  %v2648_v29 = vmul.f32 %v7597_v38, %v2031_v30 }
 0x359   : > { %v2437_v37 = vsel %vm2123_vm1, %v2435_v17, %v11986_v23  ;;  %v2742_v43 = vadd.f32 %v2704_v48, %v2621_v39  ;;  %v2194_v53 = vadd.f32 %v2161_v36, %v2072_v0  ;;  %v11989_v12 = vrot.slane %v11988_v58, 1 }
 0x35a   : > { %v2283_v55 = vsel %vm2245_vm4, %v2281_v32, %v11987_v56  ;;  %v11990_v34 = vrot.slane %v8508_v25, 1  ;;  %v2215_v17 = vmul.f32 %v7555_v52, %v8489_v33  ;;  %v2769_v48 = vmul.f32 %v8693_v19, %v2031_v30 }
 0x35b   : > { %v2863_v36 = vadd.f32 %v2825_v16, %v2742_v43  ;;  %v2316_v0 = vadd.f32 %v2283_v55, %v2194_v53  ;;  %v8757_v3 = vmul.f32 %v7555_v52, %v8080_v31  ;;  %v2370_v6 = vmul.f32 %v7584_v5, %v8650_v45 }
 0x35c   : > { %v2156_v61 = vsel %vm2123_vm1, %v11990_v34, %v11989_v12  ;;  %v2276_v32 = vrot.slane %v2215_v17, 2  ;;  %v8763_v25 = vmul.f32 %v7584_v5, %v8192_v47  ;;  %v2491_v30 = vmul.f32 %v11872_v60, %v8650_v45 }
 0x35d   : > { %v2192_v39 = vadd.f32 %v2156_v61, %v2070_v62  ;;  %3032 = vperm.xlu0 %5702, %v2863_v36   ;;  %2931 = vperm.xlu1 %5703, %v2863_v36   ;;  %v2349_v16 = vadd.f32 %v8654_v10, %v2316_v0  ;;  %v2277_v54 = vrot.slane %v8757_v3, 2  ;;  %v8771_v23 = vmul.f32 %v11872_v60, %v8192_v47 }
 0x35e   : > { %v2710_v43 = vrot.slane %v2648_v29, 1  ;;  %v2331_v53 = vmul.f32 %v7615_v4, %v8650_v45  ;;  %v2430_v62 = vrot.slane %v2370_v6, 1  ;;  %v11287_v56 = vrot.slane %v8763_v25, 1 }
 0x35f   : > { %v2470_v55 = vadd.f32 %v2437_v37, %v2349_v16  ;;  %v2278_v10 = vsel %vm2245_vm4, %v2276_v32, %v2277_v54  ;;  %v2551_v12 = vrot.slane %v2491_v30, 2  ;;  %v2705_v34 = vrot.slane %v2645_v9, 1  ;;  %v11992_v16 = vld [vmem:[#allocation105_spill] sm:$0xff]  ;;  %v11993_v30 = vld [vmem:[#allocation103_spill] sm:$0xff] }
 0x360   : > { %v11991_v61 = vrot.slane %v8346_v8, 2  ;;  %v2831_v36 = vrot.slane %v2769_v48, 2  ;;  %v2314_v0 = vadd.f32 %v2278_v10, %v2192_v39  ;;  %v2766_v29 = vmul.f32 %v8693_v19, %v8642_v41 }
 0x361   : > { %v2432_v37 = vsel %vm2123_vm1, %v2430_v62, %v11287_v56  ;;  %v11289_v6 = vrot.slane %v8771_v23, 2  ;;  %v11288_v32 = vrot.slane %v11992_v16, 1  ;;  %v2625_v9 = vadd.f32 %v8444_v15, %v8582_v50  ;;  %v11997_v56 = vld [vmem:[#allocation90_spill] sm:$0xff] }
 0x362   : > { %v2558_v17 = vsel %vm2245_vm4, %v2556_v35, %v11991_v61  ;;  %v2347_v8 = vadd.f32 %v2331_v53, %v2314_v0  ;;  %v8793_v35 = vmul.f32 %v8693_v19, %v11993_v30  ;;  %v11994_v48 = vrot.slane %v8447_v57, 1  ;;  %v11995_v61 = vld [vmem:[#allocation87_spill] sm:$0xff] }
 0x363   : > { %v2591_v18 = vadd.f32 %v2558_v17, %v2470_v55  ;;  %v2553_v62 = vsel %vm2245_vm4, %v2551_v12, %v11289_v6  ;;  %v2606_v10 = vmul.f32 %v7688_v59, %v8642_v41  ;;  %v2707_v15 = vsel %vm2123_vm1, %v2705_v34, %v11288_v32  ;;  %v11996_v17 = vld [vmem:[#allocation92_spill] sm:$0xff] }
 0x364   : > { %v2712_v39 = vsel %vm2123_vm1, %v2710_v43, %v11994_v48  ;;  %v2468_v50 = vadd.f32 %v2432_v37, %v2347_v8  ;;  %v2826_v53 = vrot.slane %v2766_v29, 2  ;;  %v2304_v0 = vadd.f32 %v11996_v17, %v11995_v61 }
 0x365   : > { %v2624_v55 = vadd.f32 %v2608_v2, %v2591_v18  ;;  %v2321_v43 = vmul.f32 %v7615_v4, %v11997_v56  ;;  %v11998_v2 = vrot.slane %v8454_v13, 2  ;;  %v2355_v41 = vmul.f32 %v7584_v5, %v11997_v56 }
 0x366   : > { %v2476_v48 = vmul.f32 %v11872_v60, %v11997_v56  ;;  %v2589_v34 = vadd.f32 %v2553_v62, %v2468_v50  ;;  %v2827_v29 = vrot.slane %v8793_v35, 2  ;;  %v11999_v37 = vrot.slane %v8451_v28, 1  ;;  %v12003_v50 = vld [vmem:[#allocation98_spill] sm:$0xff] }
 0x367   : > { %v2745_v18 = vadd.f32 %v2712_v39, %v2624_v55  ;;  %v2833_v12 = vsel %vm2245_vm4, %v2831_v36, %v11998_v2  ;;  %v12000_v8 = vrot.slane %v8447_v57, 1  ;;  %v2337_v39 = vadd.f32 %v2321_v43, %v2304_v0 }
 0x368   : > { %v2405_v17 = vrot.slane %v2355_v41, 1  ;;  %v2526_v32 = vrot.slane %v2476_v48, 2  ;;  %v2630_v36 = vmul.f32 %v7597_v38, %v8124_v24  ;;  %v2622_v2 = vadd.f32 %v2606_v10, %v2589_v34 }
 0x369   : > { %v2714_v61 = vsel %vm2123_vm1, %v12000_v8, %v11999_v37  ;;  %v2866_v55 = vadd.f32 %v2833_v12, %v2745_v18  ;;  %v12001_v6 = vrot.slane %v8481_v22, 2  ;;  %v12002_v56 = vrot.slane %v8454_v13, 2  ;;  %v12005_v18 = vld [vmem:[#allocation76_spill] sm:$0xff]  ;;  %v12007_v12 = vld [vmem:[#allocation83_spill] sm:$0xff] }
 0x36a   : > { %v2751_v28 = vmul.f32 %v8693_v19, %v8124_v24  ;;  %v2049_v57 = vmul.f32 %v7536_v40, %v7901_v49  ;;  %v12004_v0 = vrot.slane %v12003_v50, 1  ;;  %v2596_v10 = vmul.f32 %v7688_v59, %v8124_v24 }
 0x36b   : > { %v2835_v62 = vsel %vm2245_vm4, %v12002_v56, %v12001_v6  ;;  %3044 = vperm.xlu0 %5702, %v2866_v55   ;;  %2946 = vperm.xlu1 %5703, %v2866_v55   ;;  %v2680_v22 = vrot.slane %v2630_v36, 1  ;;  %v12006_v13 = vrot.slane %v12005_v18, 1  ;;  %v12008_v6 = vrot.slane %v12007_v12, 1  ;;  %v12011_v36 = vld [vmem:[#allocation80_spill] sm:$0xff] }
 0x36c   : > { %v2407_v43 = vsel %vm2123_vm1, %v2405_v17, %v12004_v0  ;;  %v2743_v48 = vadd.f32 %v2707_v15, %v2622_v2  ;;  %v2801_v37 = vrot.slane %v2751_v28, 2  ;;  %v2065_v49 = vadd.f32 %v8599_v20, %v2049_v57  ;;  %v12009_v17 = vld [vmem:[#allocation99_spill] sm:$0xff]  ;;  %v12012_v2 = vld [vmem:[#allocation102_spill] sm:$0xff] }
 0x36d   : > { %v2143_v41 = vsel %vm2123_vm1, %v12008_v6, %v12006_v13  ;;  %v2458_v34 = vadd.f32 %v2407_v43, %v2337_v39  ;;  %v2828_v8 = vsel %vm2245_vm4, %v2826_v53, %v2827_v29  ;;  %v2746_v55 = vadd.f32 %v2714_v61, %v2625_v9  ;;  %v12014_v53 = vld [vmem:[#allocation101_spill] sm:$0xff]  ;;  %v12016_v43 = vld [vmem:[#allocation79_spill] sm:$0xff] }
 0x36e   : > { %v12010_v56 = vrot.slane %v12009_v17, 2  ;;  %v2484_v50 = vmul.f32 %v11872_v60, %v12011_v36  ;;  %v8853_v0 = vadd.f32 %v2828_v8, %v2743_v48  ;;  %v2187_v15 = vadd.f32 %v2143_v41, %v2065_v49  ;;  %v12018_v13 = vld [vmem:[#allocation111_spill] sm:$0xff]  ;;  %v12020_v48 = vld [vmem:[#allocation84_spill] sm:$0xff]  ;;  %v12022_v41 = vld [vmem:[#allocation113_spill] sm:$0xff] }
 0x36f   : > { %v2326_v39 = vmul.f32 %v7615_v4, %v7984_v51  ;;  %v12013_v28 = vrot.slane %v12012_v2, 1  ;;  %v12015_v9 = vrot.slane %v12014_v53, 2  ;;  %v12019_v12 = vrot.slane %v12018_v13, 2  ;;  %v12030_v13 = vld [vmem:[#allocation110_spill] sm:$0xff] }
 0x370   : > { %v2528_v24 = vsel %vm2245_vm4, %v2526_v32, %v12010_v56  ;;  %v12017_v32 = vrot.slane %v12016_v43, 2  ;;  %v12023_v49 = vrot.slane %v12022_v41, 1  ;;  %2936 = vperm.xlu2 %5704, %v8853_v0   ;;  %v2539_v17 = vrot.slane %v2484_v50, 2  ;;  %v12024_v56 = vld [vmem:[#allocation109_spill] sm:$0xff] }
 0x371   : > { %v2579_v18 = vadd.f32 %v2528_v24, %v2458_v34  ;;  %v2682_v57 = vsel %vm2123_vm1, %v2680_v22, %v12013_v28  ;;  %v2803_v61 = vsel %vm2245_vm4, %v2801_v37, %v12015_v9  ;;  %v12021_v34 = vrot.slane %v12020_v48, 1  ;;  %v12026_v28 = vld [vmem:[#allocation107_spill] sm:$0xff] }
 0x372   : > { %v2265_v6 = vsel %vm2245_vm4, %v12019_v12, %v12017_v32  ;;  %v2052_v37 = vmul.f32 %v7536_v40, %v12024_v56  ;;  %v2601_v24 = vmul.f32 %v7688_v59, %v8035_v11  ;;  %v2638_v36 = vmul.f32 %v7597_v38, %v11974_v7 }
 0x373   : > { %v2419_v51 = vsel %vm2123_vm1, %v12023_v49, %v12021_v34  ;;  %v2612_v8 = vadd.f32 %v2596_v10, %v2579_v18  ;;  %v2309_v22 = vadd.f32 %v2265_v6, %v2187_v15  ;;  %v12025_v2 = vrot.slane %v8062_v14, 1 }
 0x374   : > { %v12027_v53 = vrot.slane %v12026_v28, 1  ;;  %v2212_v10 = vmul.f32 %v7555_v52, %v12024_v56  ;;  %v2759_v15 = vmul.f32 %v8693_v19, %v11974_v7  ;;  %v2068_v43 = vadd.f32 %v8599_v20, %v2052_v37  ;;  %v12034_v37 = vld [vmem:[#allocation93_spill] sm:$0xff]  ;;  %v12035_v28 = vld [vmem:[#allocation114_spill] sm:$0xff] }
 0x375   : > { %v2733_v18 = vadd.f32 %v2682_v57, %v2612_v8  ;;  %v2342_v50 = vadd.f32 %v2326_v39, %v2309_v22  ;;  %v12028_v11 = vmov 0   ;;  %v12029_v32 = vmov 1   ;;  %v12032_v57 = vld [vmem:[#allocation96_spill] sm:$0xff] }
 0x376   : > { %v2151_v9 = vsel %vm2123_vm1, %v12027_v53, %v12025_v2  ;;  %5707 = vset.pattern.permute.xlu0 %v12028_v11  ;;  %5705 = vset.pattern.permute.xlu1 %v12029_v32  ;;  %v12031_v14 = vrot.slane %v12030_v13, 2  ;;  %v2271_v6 = vrot.slane %v2212_v10, 2  ;;  %v2329_v48 = vmul.f32 %v7615_v4, %v8489_v33  ;;  %v12039_v13 = vld [vmem:[#allocation104_spill] sm:$0xff] }
 0x377   : > { %v2367_v52 = vmul.f32 %v7584_v5, %v8489_v33  ;;  %v2854_v39 = vadd.f32 %v2803_v61, %v2733_v18  ;;  %2992 = vperm.xlu1 %5705, %v12032_v57   ;;  %v2463_v7 = vadd.f32 %v2419_v51, %v2342_v50  ;;  %v2190_v34 = vadd.f32 %v2151_v9, %v2068_v43  ;;  %v12038_v18 = vld [vmem:[#allocation97_spill] sm:$0xff] }
 0x378   : > { %v2540_v12 = vsel %vm2245_vm4, %v12031_v14, %v2539_v17  ;;  %v2488_v41 = vmul.f32 %v11872_v60, %v8489_v33  ;;  %v2693_v49 = vrot.slane %v2638_v36, 1  ;;  %v12033_v8 = vrot.slane %v8633_v1, 2 }
 0x379   : > { %v2425_v17 = vrot.slane %v2367_v52, 1  ;;  %v2642_v56 = vmul.f32 %v7597_v38, %v8650_v45  ;;  %v2157_v2 = vrot.slane %v12034_v37, 1  ;;  %v8908_v5 = vadd.f32 %v2835_v62, %v2746_v55  ;;  %2886 = vperm.xlu0 %5707, %v2854_v39  }
 0x37a   : > { %v2273_v22 = vsel %vm2245_vm4, %v2271_v6, %v12033_v8  ;;  %v2584_v61 = vadd.f32 %v2540_v12, %v2463_v7  ;;  %v12036_v53 = vrot.slane %v12035_v28, 1  ;;  %v12037_v36 = vrot.slane %v8660_v44, 1  ;;  %v12041_v7 = vld [vmem:[#allocation115_spill] sm:$0xff]  ;;  %v12044_v8 = vld [vmem:[#allocation106_spill] sm:$0xff] }
 0x37b   : > { %v2312_v51 = vadd.f32 %v2273_v22, %v2190_v34  ;;  %v2546_v9 = vrot.slane %v2488_v41, 2  ;;  %v2055_v10 = vmul.f32 %v7536_v40, %v8080_v31  ;;  %v2279_v50 = vrot.slane %v12038_v18, 2  ;;  %2951 = vperm.xlu2 %5704, %v8908_v5  }
 0x37c   : > { %v2694_v33 = vsel %vm2123_vm1, %v12036_v53, %v2693_v49  ;;  %v2427_v1 = vsel %vm2123_vm1, %v2425_v17, %v12037_v36  ;;  %v2617_v62 = vadd.f32 %v2601_v24, %v2584_v61  ;;  %v2814_v55 = vrot.slane %v2759_v15, 2  ;;  %v12047_v61 = vld [vmem:[#allocation108_spill] sm:$0xff] }
 0x37d   : > { %v2345_v43 = vadd.f32 %v2329_v48, %v2312_v51  ;;  %v2433_v14 = vrot.slane %v12039_v13, 1  ;;  %v2700_v12 = vrot.slane %v2642_v56, 1  ;;  %v2071_v6 = vadd.f32 %v8599_v20, %v2055_v10 }
 0x37e   : > { %v12040_v44 = vrot.slane %v11988_v58, 1  ;;  %v2738_v57 = vadd.f32 %v2694_v33, %v2617_v62  ;;  %v12042_v34 = vrot.slane %v12041_v7, 2  ;;  %v2604_v24 = vmul.f32 %v7688_v59, %v8650_v45 }
 0x37f   : > { %v2466_v31 = vadd.f32 %v2427_v1, %v2345_v43  ;;  %v12043_v15 = vrot.slane %v8669_v63, 2  ;;  %v2763_v20 = vmul.f32 %v8693_v19, %v8650_v45  ;;  %v2332_v58 = vmul.f32 %v7615_v4, %v8192_v47  ;;  %3000 = vperm.xlu1 %5705, %v12044_v8  }
 0x380   : > { %v2158_v52 = vsel %vm2123_vm1, %v12040_v44, %v2157_v2  ;;  %v2815_v40 = vsel %vm2245_vm4, %v12042_v34, %v2814_v55  ;;  %v2280_v17 = vsel %vm2245_vm4, %v2277_v54, %v2279_v50  ;;  %v2493_v63 = vmul.f32 %v11872_v60, %v11981_v46 }
 0x381   : > { %v2548_v48 = vsel %vm2245_vm4, %v2546_v9, %v12043_v15  ;;  %v2193_v41 = vadd.f32 %v2158_v52, %v2071_v6  ;;  %v2859_v49 = vadd.f32 %v2815_v40, %v2738_v57  ;;  %v12045_v56 = vrot.slane %v8680_v27, 1 }
 0x382   : > { %v2587_v22 = vadd.f32 %v2548_v48, %v2466_v31  ;;  %v12046_v4 = vrot.slane %v8763_v25, 1  ;;  %v2647_v51 = vmul.f32 %v7597_v38, %v12047_v61  ;;  %v2821_v3 = vrot.slane %v2763_v20, 2 }
 0x383   : > { %v2702_v37 = vsel %vm2123_vm1, %v2700_v12, %v12045_v56  ;;  %v2315_v45 = vadd.f32 %v2280_v17, %v2193_v41  ;;  %2911 = vperm.xlu0 %5707, %v2859_v49   ;;  %5706 = vset.pattern.permute.xlu2 %v12029_v32  ;;  %v2554_v60 = vrot.slane %v2493_v63, 2  ;;  %v2607_v46 = vmul.f32 %v7688_v59, %v11993_v30  ;;  %v12051_v30 = vld [vmem:[#allocation112_spill] sm:$0xff] }
 0x384   : > { %v2620_v2 = vadd.f32 %v2604_v24, %v2587_v22  ;;  %v2434_v47 = vsel %vm2123_vm1, %v12046_v4, %v2433_v14  ;;  %2996 = vperm.xlu2 %5706, %v2854_v39   ;;  %v12048_v53 = vrot.slane %v8771_v23, 2  ;;  %v12049_v33 = vrot.slane %v8697_v42, 2 }
 0x385   : > { %v2348_v28 = vadd.f32 %v2332_v58, %v2315_v45  ;;  %v2708_v1 = vrot.slane %v2647_v51, 1  ;;  %v12050_v39 = vrot.slane %v11992_v16, 1  ;;  %v2768_v59 = vmul.f32 %v8693_v19, %v12047_v61  ;;  %v2868_v19 = vld [vmem:[%s11191_s5] sm:$0x3]  ;;  %v2877_v16 = vpop.permute.xlu1 %2876 }
 0x386   : > { %v2741_v54 = vadd.f32 %v2702_v37, %v2620_v2  ;;  %v2555_v25 = vsel %vm2245_vm4, %v12048_v53, %v2554_v60  ;;  %v2823_v36 = vsel %vm2245_vm4, %v2821_v3, %v12049_v33  ;;  %v8975_v62 = vperm.slane %v2868_v19, 0 }
 0x387   : > { %v2469_v27 = vadd.f32 %v2434_v47, %v2348_v28  ;;  %3012 = vperm.xlu1 %5705, %v8576_v26   ;;  %v2709_v18 = vsel %vm2123_vm1, %v12050_v39, %v2708_v1  ;;  %v2829_v42 = vrot.slane %v2768_v59, 2 }
 0x388   : > { %v2862_v9 = vadd.f32 %v2823_v36, %v2741_v54  ;;  %v2955_v35 = vmul.f32 %v8975_v62, %v2877_v16 }
 0x389   : > { %v2590_v38 = vadd.f32 %v2555_v25, %v2469_v27  ;;  %v2830_v50 = vsel %vm2245_vm4, %v2827_v29, %v2829_v42  ;;  %v8984_v29 = vperm.slane %v2868_v19, 1 }
 0x38b   : > { %v2623_v10 = vadd.f32 %v2607_v46, %v2590_v38  ;;  %2926 = vperm.xlu0 %5707, %v2862_v9  }
 0x38c   : > { %3004 = vperm.xlu2 %5706, %v12051_v30  }
 0x38d   : > { %v2744_v23 = vadd.f32 %v2709_v18, %v2623_v10  ;;  %v2892_v12 = vpop.permute.xlu1 %2891 }
 0x38e   : > { %v2958_v37 = vmul.f32 %v8975_v62, %v2892_v12 }
 0x38f   : > { %3024 = vperm.xlu1 %5705, %v8710_v21   ;;  %v2865_v26 = vadd.f32 %v2830_v50, %v2744_v23  ;;  %v8982_v21 = vld [vmem:[%s11192_s6] ss:$0 sm:$0xff] }
 0x390   : > { %v2971_v55 = vadd.f32 %v8982_v21, %v2955_v35  ;;  %v2974_v51 = vadd.f32 %v8982_v21, %v2958_v37 }
 0x393   : > { %2941 = vperm.xlu0 %5707, %v2865_v26  }
 0x394   : > { %3016 = vperm.xlu2 %5706, %v2859_v49  }
 0x395   : > { %v2902_v44 = vpop.permute.xlu1 %2901 }
 0x396   : > { %v2960_v54 = vmul.f32 %v8975_v62, %v2902_v44 }
 0x397   : > { %3036 = vperm.xlu1 %5705, %v8853_v0   ;;  %v2989_v0 = vpop.permute.xlu0 %2988 }
 0x398   : > { %v3052_v43 = vmul.f32 %v8984_v29, %v2989_v0  ;;  %v2976_v33 = vadd.f32 %v8982_v21, %v2960_v54 }
 0x39a   : > { %v8989_v13 = vadd.f32 %v3052_v43, %v2971_v55 }
 0x39c   : > { %3028 = vperm.xlu2 %5706, %v2862_v9   ;;  %12052 = vst [vmem:[#allocation117_spill] sm:$0xff] %v8989_v13 }
 0x39f   : > { %3048 = vperm.xlu1 %5705, %v8908_v5   ;;  %v2882_v5 = vpop.permute.xlu2 %2881  ;;  %v3009_v57 = vpop.permute.xlu0 %3008 }
 0x3a0   : > { %v2956_v41 = vmul.f32 %v8975_v62, %v2882_v5  ;;  %v3057_v10 = vmul.f32 %v8984_v29, %v3009_v57 }
 0x3a2   : > { %v2972_v49 = vadd.f32 %v8982_v21, %v2956_v41  ;;  %v9034_v59 = vadd.f32 %v3057_v10, %v2976_v33 }
 0x3a4   : > { %3040 = vperm.xlu2 %5706, %v2865_v26   ;;  %12056 = vst [vmem:[#allocation120_spill] sm:$0xff] %v9034_v59 }
 0x3a7   : > { %5709 = vset.pattern.permute.xlu1 %v12028_v11  ;;  %v2897_v14 = vpop.permute.xlu2 %2896 }
 0x3a8   : > { %v2959_v61 = vmul.f32 %v8975_v62, %v2897_v14 }
 0x3aa   : > { %v2975_v46 = vadd.f32 %v8982_v21, %v2959_v61 }
 0x3ac   : > { %5708 = vset.pattern.permute.xlu2 %v12028_v11 }
 0x3ad   : > { %3086 = vperm.xlu2 %5708, %v8989_v13  }
 0x3af   : > { %v2907_v6 = vpop.permute.xlu2 %2906 }
 0x3b0   : > { %v2961_v53 = vmul.f32 %v8975_v62, %v2907_v6 }
 0x3b2   : > { %v2977_v9 = vadd.f32 %v8982_v21, %v2961_v53 }
 0x3b7   : > { %v2922_v52 = vpop.permute.xlu2 %2921 }
 0x3b8   : > { %v2964_v50 = vmul.f32 %v8975_v62, %v2922_v52 }
 0x3ba   : > { %v2980_v43 = vadd.f32 %v8982_v21, %v2964_v50 }
 0x3bd   : > { %v2917_v7 = vpop.permute.xlu1 %2916  ;;  %v3021_v40 = vpop.permute.xlu0 %3020 }
 0x3be   : > { %v2963_v23 = vmul.f32 %v8975_v62, %v2917_v7  ;;  %v3060_v5 = vmul.f32 %v8984_v29, %v3021_v40 }
 0x3c0   : > { %v2979_v19 = vadd.f32 %v8982_v21, %v2963_v23 }
 0x3c2   : > { %v9052_v12 = vadd.f32 %v3060_v5, %v2979_v19 }
 0x3c4   : > { %12059 = vst [vmem:[#allocation122_spill] sm:$0xff] %v9052_v12 }
 0x3ca   : > { %v8993_v34 = vpop.permute.xlu2 %2936 }
 0x3cb   : > { %v2967_v7 = vmul.f32 %v8975_v62, %v8993_v34 }
 0x3cf   : > { %v2932_v31 = vpop.permute.xlu1 %2931  ;;  %v8997_v15 = vpop.permute.xlu0 %3032 }
 0x3d0   : > { %v2966_v6 = vmul.f32 %v8975_v62, %v2932_v31 }
 0x3d2   : > { %v2982_v40 = vadd.f32 %v8982_v21, %v2966_v6 }
 0x3d5   : > { %v8995_v24 = vpop.permute.xlu2 %2951 }
 0x3dd   : > { %v8999_v48 = vpop.permute.xlu1 %2946  ;;  %v9001_v11 = vpop.permute.xlu0 %3044 }
 0x3de   : > { %v2997_v20 = vpop.permute.xlu2 %2996 }
 0x3df   : > { %v3054_v45 = vmul.f32 %v8984_v29, %v2997_v20 }
 0x3e6   : > { %v3005_v56 = vpop.permute.xlu2 %3004 }
 0x3e7   : > { %v3056_v60 = vmul.f32 %v8984_v29, %v3005_v56  ;;  %v2969_v56 = vmul.f32 %v8975_v62, %v8999_v48 }
 0x3e9   : > { %v2993_v58 = vpop.permute.xlu1 %2992  ;;  %v9027_v36 = vadd.f32 %v3056_v60, %v2975_v46 }
 0x3ea   : > { %v3053_v8 = vmul.f32 %v8984_v29, %v2993_v58 }
 0x3eb   : > { %v2887_v22 = vpop.permute.xlu0 %2886  ;;  %12055 = vst [vmem:[#allocation119_spill] sm:$0xff] %v9027_v36 }
 0x3ec   : > { %v9006_v17 = vadd.f32 %v3053_v8, %v2972_v49  ;;  %v2957_v63 = vmul.f32 %v8975_v62, %v2887_v22  ;;  %v2983_v49 = vadd.f32 %v8982_v21, %v2967_v7  ;;  %v3063_v8 = vmul.f32 %v8984_v29, %v8997_v15 }
 0x3ed   : > { %v2985_v15 = vadd.f32 %v8982_v21, %v2969_v56 }
 0x3ee   : > { %12053 = vst [vmem:[#allocation116_spill] sm:$0xff] %v9006_v17  ;;  %v2973_v2 = vadd.f32 %v8982_v21, %v2957_v63  ;;  %3091 = vperm.xlu0 %5707, %v9006_v17   ;;  %v3017_v25 = vpop.permute.xlu2 %3016  ;;  %v9072_v63 = vadd.f32 %v3063_v8, %v2982_v40  ;;  %v12103_v8 = vmov 5  }
 0x3ef   : > { %v3059_v26 = vmul.f32 %v8984_v29, %v3017_v25  ;;  %v12075_v25 = vmov 3  }
 0x3f0   : > { %v9013_v4 = vadd.f32 %v3054_v45, %v2973_v2  ;;  %12062 = vst [vmem:[#allocation131_spill] sm:$0xff] %v9072_v63  ;;  %v2970_v2 = vmul.f32 %v8975_v62, %v8995_v24 }
 0x3f1   : > { %v3001_v47 = vpop.permute.xlu1 %3000 }
 0x3f2   : > { %3096 = vperm.xlu1 %5709, %v9013_v4   ;;  %v3055_v3 = vmul.f32 %v8984_v29, %v3001_v47  ;;  %v2986_v48 = vadd.f32 %v8982_v21, %v2970_v2 }
 0x3f4   : > { %v9021_v27 = vadd.f32 %v3055_v3, %v2974_v51  ;;  %v3066_v3 = vmul.f32 %v8984_v29, %v9001_v11 }
 0x3f5   : > { %v2912_v28 = vpop.permute.xlu0 %2911 }
 0x3f6   : > { %12054 = vst [vmem:[#allocation118_spill] sm:$0xff] %v9021_v27  ;;  %3101 = vperm.xlu2 %5708, %v9021_v27   ;;  %v2962_v38 = vmul.f32 %v8975_v62, %v2912_v28  ;;  %v3029_v0 = vpop.permute.xlu2 %3028  ;;  %v9092_v24 = vadd.f32 %v3066_v3, %v2985_v15 }
 0x3f7   : > { %v3062_v20 = vmul.f32 %v8984_v29, %v3029_v0 }
 0x3f8   : > { %v2978_v30 = vadd.f32 %v8982_v21, %v2962_v38  ;;  %12065 = vst [vmem:[#allocation127_spill] sm:$0xff] %v9092_v24 }
 0x3f9   : > { %v3013_v1 = vpop.permute.xlu1 %3012 }
 0x3fa   : > { %3106 = vperm.xlu1 %5709, %v9027_v36   ;;  %v3058_v39 = vmul.f32 %v8984_v29, %v3013_v1  ;;  %v9045_v16 = vadd.f32 %v3059_v26, %v2978_v30 }
 0x3fc   : > { %v9038_v42 = vadd.f32 %v3058_v39, %v2977_v9  ;;  %12058 = vst [vmem:[#allocation128_spill] sm:$0xff] %v9045_v16 }
 0x3fd   : > { %v2927_v18 = vpop.permute.xlu0 %2926 }
 0x3fe   : > { %12057 = vst [vmem:[#allocation121_spill] sm:$0xff] %v9038_v42  ;;  %3116 = vperm.xlu0 %5707, %v9038_v42   ;;  %3111 = vperm.xlu2 %5708, %v9034_v59   ;;  %v2965_v35 = vmul.f32 %v8975_v62, %v2927_v18  ;;  %v3041_v22 = vpop.permute.xlu2 %3040 }
 0x3ff   : > { %v3065_v47 = vmul.f32 %v8984_v29, %v3041_v22 }
 0x400   : > { %v2981_v44 = vadd.f32 %v8982_v21, %v2965_v35 }
 0x401   : > { %v3025_v55 = vpop.permute.xlu1 %3024 }
 0x402   : > { %3121 = vperm.xlu1 %5709, %v9045_v16   ;;  %v3061_v14 = vmul.f32 %v8984_v29, %v3025_v55  ;;  %v9064_v41 = vadd.f32 %v3062_v20, %v2981_v44  ;;  %v12090_v55 = vmov 4  }
 0x404   : > { %v9056_v52 = vadd.f32 %v3061_v14, %v2980_v43  ;;  %12061 = vst [vmem:[#allocation124_spill] sm:$0xff] %v9064_v41 }
 0x405   : > { %v2942_v57 = vpop.permute.xlu0 %2941 }
 0x406   : > { %12060 = vst [vmem:[#allocation123_spill] sm:$0xff] %v9056_v52  ;;  %3131 = vperm.xlu0 %5707, %v9056_v52   ;;  %3126 = vperm.xlu2 %5708, %v9052_v12   ;;  %v2968_v31 = vmul.f32 %v8975_v62, %v2942_v57 }
 0x408   : > { %v2984_v37 = vadd.f32 %v8982_v21, %v2968_v31  ;;  %v9119_v21 = vpop.permute.xlu2 %3086 }
 0x409   : > { %v3037_v58 = vpop.permute.xlu1 %3036  ;;  %12068 = vst [vmem:[#allocation5_spill] sm:$0xff] %v9119_v21 }
 0x40a   : > { %3136 = vperm.xlu1 %5709, %v9064_v41   ;;  %v3064_v34 = vmul.f32 %v8984_v29, %v3037_v58  ;;  %v9085_v61 = vadd.f32 %v3065_v47, %v2984_v37 }
 0x40c   : > { %v9077_v45 = vadd.f32 %v3064_v34, %v2983_v49  ;;  %12064 = vst [vmem:[#allocation126_spill] sm:$0xff] %v9085_v61 }
 0x40e   : > { %12063 = vst [vmem:[#allocation125_spill] sm:$0xff] %v9077_v45  ;;  %3146 = vperm.xlu0 %5707, %v9077_v45   ;;  %3141 = vperm.xlu2 %5708, %v9072_v63  }
 0x411   : > { %v3049_v51 = vpop.permute.xlu1 %3048 }
 0x412   : > { %3151 = vperm.xlu1 %5709, %v9085_v61   ;;  %v3067_v62 = vmul.f32 %v8984_v29, %v3049_v51 }
 0x414   : > { %v9094_v28 = vadd.f32 %v3067_v62, %v2986_v48 }
 0x416   : > { %12066 = vst [vmem:[#allocation129_spill] sm:$0xff] %v9094_v28  ;;  %3161 = vperm.xlu0 %5707, %v9094_v28   ;;  %3156 = vperm.xlu2 %5708, %v9092_v24  }
 0x41a   : > { %5710 = vset.pattern.permute.xlu1 %v12029_v32 }
 0x41b   : > { %3197 = vperm.xlu1 %5710, %v8989_v13  }
 0x41e   : > { %5712 = vset.pattern.permute.xlu0 %v12029_v32  ;;  %5711 = vset.pattern.permute.xlu2 %v12029_v32  ;;  %v12067_v32 = vmov 2  }
 0x41f   : > { %3201 = vperm.xlu2 %5711, %v9006_v17   ;;  %3205 = vperm.xlu0 %5712, %v9013_v4  }
 0x423   : > { %3209 = vperm.xlu1 %5710, %v9021_v27  }
 0x427   : > { %3213 = vperm.xlu2 %5711, %v9027_v36   ;;  %3225 = vperm.xlu0 %5712, %v9045_v16  }
 0x42b   : > { %3217 = vperm.xlu1 %5710, %v9034_v59  }
 0x42f   : > { %3221 = vperm.xlu2 %5711, %v9038_v42   ;;  %3237 = vperm.xlu0 %5712, %v9064_v41  }
 0x433   : > { %3229 = vperm.xlu1 %5710, %v9052_v12  }
 0x437   : > { %3233 = vperm.xlu2 %5711, %v9056_v52   ;;  %3249 = vperm.xlu0 %5712, %v9085_v61  }
 0x43b   : > { %3241 = vperm.xlu1 %5710, %v9072_v63  }
 0x43f   : > { %3245 = vperm.xlu2 %5711, %v9077_v45   ;;  %5713 = vset.pattern.permute.xlu0 %v12067_v32 }
 0x440   : > { %3349 = vperm.xlu0 %5713, %v8989_v13  }
 0x443   : > { %3253 = vperm.xlu1 %5710, %v9092_v24  }
 0x447   : > { %3257 = vperm.xlu2 %5711, %v9094_v28  }
 0x448   : > { %3369 = vperm.xlu0 %5713, %v9034_v59  }
 0x44b   : > { %5714 = vset.pattern.permute.xlu1 %v12067_v32 }
 0x44c   : > { %3353 = vperm.xlu1 %5714, %v9006_v17  }
 0x44f   : > { %5715 = vset.pattern.permute.xlu2 %v12067_v32 }
 0x450   : > { %v9125_v29 = vpop.permute.xlu2 %3101  ;;  %3357 = vperm.xlu2 %5715, %v9013_v4   ;;  %3381 = vperm.xlu0 %5713, %v9052_v12  }
 0x451   : > { %12069 = vst [vmem:[#allocation137_spill] sm:$0xff] %v9125_v29 }
 0x454   : > { %3361 = vperm.xlu1 %5714, %v9021_v27  }
 0x458   : > { %v9130_v11 = vpop.permute.xlu2 %3111  ;;  %3365 = vperm.xlu2 %5715, %v9027_v36   ;;  %3393 = vperm.xlu0 %5713, %v9072_v63  }
 0x459   : > { %12070 = vst [vmem:[#allocation130_spill] sm:$0xff] %v9130_v11 }
 0x45c   : > { %3373 = vperm.xlu1 %5714, %v9038_v42  }
 0x460   : > { %v9135_v54 = vpop.permute.xlu2 %3126  ;;  %3377 = vperm.xlu2 %5715, %v9045_v16   ;;  %3405 = vperm.xlu0 %5713, %v9092_v24   ;;  %v9142_v46 = vpop.permute.xlu0 %3091 }
 0x461   : > { %12071 = vst [vmem:[#allocation132_spill] sm:$0xff] %v9135_v54 }
 0x462   : > { %12073 = vst [vmem:[#allocation142_spill] sm:$0xff] %v9142_v46 }
 0x464   : > { %v9139_v60 = vpop.permute.xlu1 %3096  ;;  %3385 = vperm.xlu1 %5714, %v9056_v52  }
 0x465   : > { %12072 = vst [vmem:[#allocation135_spill] sm:$0xff] %v9139_v60 }
 0x468   : > { %v9144_v53 = vpop.permute.xlu2 %3141  ;;  %3389 = vperm.xlu2 %5715, %v9064_v41   ;;  %5717 = vset.pattern.permute.xlu0 %v12075_v25 }
 0x469   : > { %12074 = vst [vmem:[#allocation143_spill] sm:$0xff] %v9144_v53  ;;  %3505 = vperm.xlu0 %5717, %v9006_v17   ;;  %v9758_v53 = vld [vmem:[%s5988_s15 + $0x88] sm:$0x3] }
 0x46a   : > { %v3288_v60 = vrot.slane %v9758_v53, 1 }
 0x46c   : > { %v9149_v33 = vpop.permute.xlu1 %3106  ;;  %3397 = vperm.xlu1 %5714, %v9077_v45  }
 0x46d   : > { %12076 = vst [vmem:[#allocation2_spill] sm:$0xff] %v9149_v33 }
 0x470   : > { %v9152_v38 = vpop.permute.xlu2 %3156  ;;  %3401 = vperm.xlu2 %5715, %v9085_v61   ;;  %v9155_v1 = vpop.permute.xlu0 %3116 }
 0x471   : > { %12077 = vst [vmem:[#allocation4_spill] sm:$0xff] %v9152_v38  ;;  %3525 = vperm.xlu0 %5717, %v9038_v42  }
 0x472   : > { %12078 = vst [vmem:[#allocation6_spill] sm:$0xff] %v9155_v1  ;;  %v9742_v1 = vld [vmem:[%s5988_s15 + $0x80] sm:$0xff] }
 0x474   : > { %v9158_v9 = vpop.permute.xlu1 %3121  ;;  %3409 = vperm.xlu1 %5714, %v9094_v28  }
 0x475   : > { %12079 = vst [vmem:[#allocation7_spill] sm:$0xff] %v9158_v9 }
 0x478   : > { %5716 = vset.pattern.permute.xlu2 %v12075_v25  ;;  %v9162_v10 = vpop.permute.xlu0 %3131 }
 0x479   : > { %12080 = vst [vmem:[#allocation8_spill] sm:$0xff] %v9162_v10  ;;  %v9164_v39 = vpop.permute.xlu2 %3201  ;;  %3501 = vperm.xlu2 %5716, %v8989_v13   ;;  %3537 = vperm.xlu0 %5717, %v9056_v52  }
 0x47a   : > { %12081 = vst [vmem:[#allocation9_spill] sm:$0xff] %v9164_v39 }
 0x47c   : > { %v9168_v18 = vpop.permute.xlu1 %3136  ;;  %5718 = vset.pattern.permute.xlu1 %v12075_v25 }
 0x47d   : > { %12082 = vst [vmem:[#allocation10_spill] sm:$0xff] %v9168_v18  ;;  %3509 = vperm.xlu1 %5718, %v9013_v4  }
 0x480   : > { %v9172_v23 = vpop.permute.xlu0 %3146 }
 0x481   : > { %12083 = vst [vmem:[#allocation11_spill] sm:$0xff] %v9172_v23  ;;  %v9174_v30 = vpop.permute.xlu2 %3213  ;;  %3513 = vperm.xlu2 %5716, %v9021_v27   ;;  %3549 = vperm.xlu0 %5717, %v9077_v45  }
 0x482   : > { %12084 = vst [vmem:[#allocation12_spill] sm:$0xff] %v9174_v30  ;;  %v9784_v30 = vld [vmem:[%s5988_s15 + $0xa8] sm:$0xff] }
 0x483   : > { %v3295_v11 = vrot.slane %v9784_v30, 1 }
 0x484   : > { %v9178_v50 = vpop.permute.xlu1 %3151 }
 0x485   : > { %12085 = vst [vmem:[#allocation19_spill] sm:$0xff] %v9178_v50  ;;  %3517 = vperm.xlu1 %5718, %v9027_v36  }
 0x488   : > { %v9181_v26 = vpop.permute.xlu0 %3161 }
 0x489   : > { %12086 = vst [vmem:[#allocation21_spill] sm:$0xff] %v9181_v26  ;;  %v9183_v19 = vpop.permute.xlu2 %3221  ;;  %3521 = vperm.xlu2 %5716, %v9034_v59   ;;  %3561 = vperm.xlu0 %5717, %v9094_v28  }
 0x48a   : > { %12087 = vst [vmem:[#allocation133_spill] sm:$0xff] %v9183_v19  ;;  %v9728_v19 = vld [vmem:[%s5988_s15 + $0x60] sm:$0xff] }
 0x48d   : > { %3529 = vperm.xlu1 %5718, %v9045_v16   ;;  %v9188_v35 = vpop.permute.xlu1 %3197 }
 0x48e   : > { %12088 = vst [vmem:[#allocation36_spill] sm:$0xff] %v9188_v35 }
 0x491   : > { %v9190_v0 = vpop.permute.xlu2 %3233  ;;  %3533 = vperm.xlu2 %5716, %v9052_v12   ;;  %5721 = vset.pattern.permute.xlu0 %v12090_v55  ;;  %v9194_v43 = vpop.permute.xlu0 %3205 }
 0x492   : > { %12089 = vst [vmem:[#allocation40_spill] sm:$0xff] %v9190_v0  ;;  %3605 = vperm.xlu0 %5721, %v9013_v4  }
 0x493   : > { %12091 = vst [vmem:[#allocation13_spill] sm:$0xff] %v9194_v43  ;;  %v9682_v43 = vld [vmem:[%s5988_s15 + $0x30] sm:$0xff] }
 0x494   : > { %v3270_v26 = vrot.slane %v9682_v43, 1 }
 0x495   : > { %3541 = vperm.xlu1 %5718, %v9064_v41   ;;  %v9198_v5 = vpop.permute.xlu1 %3209 }
 0x496   : > { %12092 = vst [vmem:[#allocation23_spill] sm:$0xff] %v9198_v5 }
 0x499   : > { %v9200_v14 = vpop.permute.xlu2 %3245  ;;  %3545 = vperm.xlu2 %5716, %v9072_v63   ;;  %v9203_v6 = vpop.permute.xlu0 %3225 }
 0x49a   : > { %12093 = vst [vmem:[#allocation24_spill] sm:$0xff] %v9200_v14  ;;  %3625 = vperm.xlu0 %5721, %v9045_v16  }
 0x49b   : > { %12094 = vst [vmem:[#allocation134_spill] sm:$0xff] %v9203_v6 }
 0x49d   : > { %3553 = vperm.xlu1 %5718, %v9085_v61   ;;  %v9207_v44 = vpop.permute.xlu1 %3217 }
 0x49e   : > { %12095 = vst [vmem:[#allocation14_spill] sm:$0xff] %v9207_v44  ;;  %v9606_v44 = vld [vmem:[%s5988_s15 + $0xb8] sm:$0x3] }
 0x4a1   : > { %v9209_v57 = vpop.permute.xlu2 %3257  ;;  %3557 = vperm.xlu2 %5716, %v9092_v24   ;;  %v9212_v7 = vpop.permute.xlu0 %3237 }
 0x4a2   : > { %12096 = vst [vmem:[#allocation26_spill] sm:$0xff] %v9209_v57  ;;  %3637 = vperm.xlu0 %5721, %v9064_v41  }
 0x4a3   : > { %12097 = vst [vmem:[#allocation27_spill] sm:$0xff] %v9212_v7  ;;  %v9602_v7 = vld [vmem:[%s5988_s15 + $0xb0] sm:$0xff] }
 0x4a4   : > { %v11299_v57 = vrot.slane %v9602_v7, 1 }
 0x4a5   : > { %5719 = vset.pattern.permute.xlu1 %v12090_v55  ;;  %v9216_v20 = vpop.permute.xlu1 %3229 }
 0x4a6   : > { %12098 = vst [vmem:[#allocation136_spill] sm:$0xff] %v9216_v20  ;;  %3597 = vperm.xlu1 %5719, %v8989_v13   ;;  %v9583_v20 = vld [vmem:[%s5988_s15 + $0x98] sm:$0xff] }
 0x4a9   : > { %5720 = vset.pattern.permute.xlu2 %v12090_v55  ;;  %v9220_v40 = vpop.permute.xlu0 %3249 }
 0x4aa   : > { %12099 = vst [vmem:[#allocation15_spill] sm:$0xff] %v9220_v40  ;;  %v9222_v31 = vpop.permute.xlu2 %3357  ;;  %3601 = vperm.xlu2 %5720, %v9006_v17   ;;  %3649 = vperm.xlu0 %5721, %v9085_v61   ;;  %v9579_v40 = vld [vmem:[%s5988_s15 + $0x90] sm:$0xff] }
 0x4ab   : > { %12100 = vst [vmem:[#allocation28_spill] sm:$0xff] %v9222_v31 }
 0x4ad   : > { %v9226_v58 = vpop.permute.xlu1 %3241 }
 0x4ae   : > { %12101 = vst [vmem:[#allocation29_spill] sm:$0xff] %v9226_v58  ;;  %3609 = vperm.xlu1 %5719, %v9021_v27   ;;  %v9514_v58 = vld [vmem:[%s5988_s15 + $0x28] sm:$0x3] }
 0x4b2   : > { %v9229_v49 = vpop.permute.xlu2 %3365  ;;  %3613 = vperm.xlu2 %5720, %v9027_v36   ;;  %5722 = vset.pattern.permute.xlu0 %v12103_v8  ;;  %v9233_v34 = vpop.permute.xlu0 %3349 }
 0x4b3   : > { %12102 = vst [vmem:[#allocation138_spill] sm:$0xff] %v9229_v49  ;;  %3700 = vperm.xlu0 %5722, %v8989_v13  }
 0x4b4   : > { %12104 = vst [vmem:[#allocation16_spill] sm:$0xff] %v9233_v34 }
 0x4b5   : > { %v9236_v22 = vpop.permute.xlu1 %3253 }
 0x4b6   : > { %12105 = vst [vmem:[#allocation30_spill] sm:$0xff] %v9236_v22  ;;  %3617 = vperm.xlu1 %5719, %v9034_v59   ;;  %v12119_v22 = vmov 6  }
 0x4ba   : > { %v9239_v56 = vpop.permute.xlu2 %3377  ;;  %3621 = vperm.xlu2 %5720, %v9038_v42   ;;  %v9242_v37 = vpop.permute.xlu0 %3369 }
 0x4bb   : > { %12106 = vst [vmem:[#allocation31_spill] sm:$0xff] %v9239_v56  ;;  %3720 = vperm.xlu0 %5722, %v9034_v59   ;;  %v9539_v56 = vld [vmem:[%s5988_s15 + $0x50] sm:$0xff] }
 0x4bc   : > { %12107 = vst [vmem:[#allocation139_spill] sm:$0xff] %v9242_v37  ;;  %v12237_v10 = vrot.slane %v9539_v56, 1 }
 0x4be   : > { %3629 = vperm.xlu1 %5719, %v9052_v12   ;;  %v9246_v2 = vpop.permute.xlu1 %3353 }
 0x4bf   : > { %12108 = vst [vmem:[#allocation17_spill] sm:$0xff] %v9246_v2 }
 0x4c2   : > { %v9248_v47 = vpop.permute.xlu2 %3389  ;;  %3633 = vperm.xlu2 %5720, %v9056_v52   ;;  %v9251_v15 = vpop.permute.xlu0 %3381 }
 0x4c3   : > { %12109 = vst [vmem:[#allocation32_spill] sm:$0xff] %v9248_v47  ;;  %3732 = vperm.xlu0 %5722, %v9052_v12  }
 0x4c4   : > { %12110 = vst [vmem:[#allocation33_spill] sm:$0xff] %v9251_v15 }
 0x4c6   : > { %3641 = vperm.xlu1 %5719, %v9072_v63   ;;  %v9255_v51 = vpop.permute.xlu1 %3361 }
 0x4c7   : > { %12111 = vst [vmem:[#allocation140_spill] sm:$0xff] %v9255_v51  ;;  %v9535_v51 = vld [vmem:[%s5988_s15 + $0x48] sm:$0xff] }
 0x4c8   : > { %v3275_v2 = vrot.slane %v9535_v51, 1 }
 0x4ca   : > { %3645 = vperm.xlu2 %5720, %v9077_v45   ;;  %v9258_v48 = vpop.permute.xlu2 %3401  ;;  %v9260_v3 = vpop.permute.xlu0 %3393 }
 0x4cb   : > { %12112 = vst [vmem:[#allocation18_spill] sm:$0xff] %v9258_v48  ;;  %3744 = vperm.xlu0 %5722, %v9072_v63  }
 0x4cc   : > { %12113 = vst [vmem:[#allocation34_spill] sm:$0xff] %v9260_v3 }
 0x4ce   : > { %3653 = vperm.xlu1 %5719, %v9092_v24   ;;  %v9264_v62 = vpop.permute.xlu1 %3373 }
 0x4cf   : > { %12114 = vst [vmem:[#allocation35_spill] sm:$0xff] %v9264_v62 }
 0x4d2   : > { %3657 = vperm.xlu2 %5720, %v9094_v28   ;;  %v9267_v32 = vpop.permute.xlu0 %3405 }
 0x4d3   : > { %12115 = vst [vmem:[#allocation56_spill] sm:$0xff] %v9267_v32  ;;  %v9269_v25 = vpop.permute.xlu2 %3501  ;;  %3756 = vperm.xlu0 %5722, %v9092_v24  }
 0x4d4   : > { %12116 = vst [vmem:[#allocation141_spill] sm:$0xff] %v9269_v25 }
 0x4d6   : > { %5723 = vset.pattern.permute.xlu1 %v12103_v8  ;;  %v9273_v55 = vpop.permute.xlu1 %3385 }
 0x4d7   : > { %12117 = vst [vmem:[#allocation48_spill] sm:$0xff] %v9273_v55  ;;  %3704 = vperm.xlu1 %5723, %v9006_v17  }
 0x4da   : > { %5724 = vset.pattern.permute.xlu2 %v12103_v8 }
 0x4db   : > { %3708 = vperm.xlu2 %5724, %v9013_v4   ;;  %v9278_v38 = vpop.permute.xlu2 %3513  ;;  %5726 = vset.pattern.permute.xlu0 %v12119_v22  ;;  %v9281_v3 = vpop.permute.xlu0 %3505 }
 0x4dc   : > { %12118 = vst [vmem:[#allocation68_spill] sm:$0xff] %v9278_v38  ;;  %3807 = vperm.xlu0 %5726, %v9006_v17  }
 0x4dd   : > { %12120 = vst [vmem:[#allocation69_spill] sm:$0xff] %v9281_v3 }
 0x4de   : > { %v9284_v32 = vpop.permute.xlu1 %3397 }
 0x4df   : > { %12121 = vst [vmem:[#allocation53_spill] sm:$0xff] %v9284_v32  ;;  %3712 = vperm.xlu1 %5723, %v9021_v27  }
 0x4e3   : > { %3716 = vperm.xlu2 %5724, %v9027_v36   ;;  %v9288_v48 = vpop.permute.xlu2 %3521  ;;  %v9290_v15 = vpop.permute.xlu0 %3525 }
 0x4e4   : > { %12122 = vst [vmem:[#allocation20_spill] sm:$0xff] %v9288_v48  ;;  %3827 = vperm.xlu0 %5726, %v9038_v42  }
 0x4e5   : > { %12123 = vst [vmem:[#allocation65_spill] sm:$0xff] %v9290_v15 }
 0x4e6   : > { %v9293_v8 = vpop.permute.xlu1 %3409 }
 0x4e7   : > { %12124 = vst [vmem:[#allocation37_spill] sm:$0xff] %v9293_v8  ;;  %3724 = vperm.xlu1 %5723, %v9038_v42  }
 0x4eb   : > { %3728 = vperm.xlu2 %5724, %v9045_v16   ;;  %v9297_v3 = vpop.permute.xlu2 %3533  ;;  %v9299_v37 = vpop.permute.xlu0 %3537 }
 0x4ec   : > { %12125 = vst [vmem:[#allocation57_spill] sm:$0xff] %v9297_v3  ;;  %3839 = vperm.xlu0 %5726, %v9056_v52  }
 0x4ed   : > { %12126 = vst [vmem:[#allocation38_spill] sm:$0xff] %v9299_v37 }
 0x4ef   : > { %3736 = vperm.xlu1 %5723, %v9056_v52   ;;  %v9303_v32 = vpop.permute.xlu1 %3509 }
 0x4f0   : > { %12127 = vst [vmem:[#allocation75_spill] sm:$0xff] %v9303_v32 }
 0x4f3   : > { %3740 = vperm.xlu2 %5724, %v9064_v41   ;;  %v9306_v48 = vpop.permute.xlu2 %3545  ;;  %v9308_v15 = vpop.permute.xlu0 %3549 }
 0x4f4   : > { %12128 = vst [vmem:[#allocation62_spill] sm:$0xff] %v9306_v48  ;;  %3851 = vperm.xlu0 %5726, %v9077_v45  }
 0x4f5   : > { %12129 = vst [vmem:[#allocation61_spill] sm:$0xff] %v9308_v15  ;;  %v12135_v15 = vmov 7  }
 0x4f7   : > { %3748 = vperm.xlu1 %5723, %v9077_v45   ;;  %v9312_v8 = vpop.permute.xlu1 %3517 }
 0x4f8   : > { %12130 = vst [vmem:[#allocation39_spill] sm:$0xff] %v9312_v8 }
 0x4fb   : > { %3752 = vperm.xlu2 %5724, %v9085_v61   ;;  %v9315_v3 = vpop.permute.xlu2 %3557  ;;  %v9317_v37 = vpop.permute.xlu0 %3561 }
 0x4fc   : > { %12131 = vst [vmem:[#allocation144_spill] sm:$0xff] %v9315_v3  ;;  %3863 = vperm.xlu0 %5726, %v9094_v28  }
 0x4fd   : > { %12132 = vst [vmem:[#allocation52_spill] sm:$0xff] %v9317_v37 }
 0x4ff   : > { %3760 = vperm.xlu1 %5723, %v9094_v28   ;;  %v9321_v32 = vpop.permute.xlu1 %3529 }
 0x500   : > { %12133 = vst [vmem:[#allocation22_spill] sm:$0xff] %v9321_v32 }
 0x503   : > { %5725 = vset.pattern.permute.xlu2 %v12119_v22 }
 0x504   : > { %3803 = vperm.xlu2 %5725, %v8989_v13   ;;  %v9325_v48 = vpop.permute.xlu2 %3601  ;;  %5730 = vset.pattern.permute.xlu0 %v12135_v15  ;;  %v9328_v8 = vpop.permute.xlu0 %3605 }
 0x505   : > { %12134 = vst [vmem:[#allocation67_spill] sm:$0xff] %v9325_v48  ;;  %3907 = vperm.xlu0 %5730, %v9013_v4  }
 0x506   : > { %12136 = vst [vmem:[#allocation41_spill] sm:$0xff] %v9328_v8 }
 0x507   : > { %5727 = vset.pattern.permute.xlu1 %v12119_v22  ;;  %v9332_v3 = vpop.permute.xlu1 %3541 }
 0x508   : > { %12137 = vst [vmem:[#allocation72_spill] sm:$0xff] %v9332_v3  ;;  %3811 = vperm.xlu1 %5727, %v9013_v4  }
 0x50c   : > { %3815 = vperm.xlu2 %5725, %v9021_v27   ;;  %v9336_v37 = vpop.permute.xlu2 %3613  ;;  %v9338_v32 = vpop.permute.xlu0 %3625 }
 0x50d   : > { %12138 = vst [vmem:[#allocation42_spill] sm:$0xff] %v9336_v37  ;;  %3927 = vperm.xlu0 %5730, %v9045_v16  }
 0x50e   : > { %12139 = vst [vmem:[#allocation3_spill] sm:$0xff] %v9338_v32 }
 0x50f   : > { %v9341_v48 = vpop.permute.xlu1 %3553 }
 0x510   : > { %12140 = vst [vmem:[#allocation46_spill] sm:$0xff] %v9341_v48  ;;  %3819 = vperm.xlu1 %5727, %v9027_v36  }
 0x514   : > { %3823 = vperm.xlu2 %5725, %v9034_v59   ;;  %v9345_v8 = vpop.permute.xlu2 %3621  ;;  %v9347_v22 = vpop.permute.xlu0 %3637 }
 0x515   : > { %12141 = vst [vmem:[#allocation25_spill] sm:$0xff] %v9345_v8  ;;  %3939 = vperm.xlu0 %5730, %v9064_v41   ;;  %v5890_v8 = vmov 8  }
 0x516   : > { %12142 = vst [vmem:[#allocation45_spill] sm:$0xff] %v9347_v22 }
 0x518   : > { %3831 = vperm.xlu1 %5727, %v9045_v16   ;;  %v9351_v3 = vpop.permute.xlu1 %3597 }
 0x519   : > { %12143 = vst [vmem:[#allocation43_spill] sm:$0xff] %v9351_v3  ;;  %v9560_v3 = vld [vmem:[%s5988_s15 + $0x70] sm:$0x3] }
 0x51c   : > { %3835 = vperm.xlu2 %5725, %v9052_v12   ;;  %v9354_v32 = vpop.permute.xlu2 %3633  ;;  %v9356_v37 = vpop.permute.xlu0 %3649 }
 0x51d   : > { %12144 = vst [vmem:[#allocation44_spill] sm:$0xff] %v9354_v32  ;;  %3951 = vperm.xlu0 %5730, %v9085_v61  }
 0x51e   : > { %12145 = vst [vmem:[#allocation63_spill] sm:$0xff] %v9356_v37 }
 0x520   : > { %3843 = vperm.xlu1 %5727, %v9064_v41   ;;  %v9360_v48 = vpop.permute.xlu1 %3609 }
 0x521   : > { %12146 = vst [vmem:[#allocation58_spill] sm:$0xff] %v9360_v48 }
 0x524   : > { %3847 = vperm.xlu2 %5725, %v9072_v63   ;;  %v9363_v22 = vpop.permute.xlu2 %3645 }
 0x525   : > { %12147 = vst [vmem:[#allocation78_spill] sm:$0xff] %v9363_v22  ;;  %5731 = vset.pattern.permute.xlu0 %v5890_v8  ;;  %v9365_v38 = vpop.permute.xlu0 %3700 }
 0x526   : > { %12148 = vst [vmem:[#allocation47_spill] sm:$0xff] %v9365_v38  ;;  %4002 = vperm.xlu0 %5731, %v8989_v13   ;;  %v11294_v38 = vrot.slane %v9539_v56, 1 }
 0x528   : > { %3855 = vperm.xlu1 %5727, %v9085_v61   ;;  %v9369_v32 = vpop.permute.xlu1 %3617 }
 0x529   : > { %12149 = vst [vmem:[#allocation64_spill] sm:$0xff] %v9369_v32 }
 0x52c   : > { %3859 = vperm.xlu2 %5725, %v9092_v24   ;;  %v9372_v37 = vpop.permute.xlu2 %3657 }
 0x52d   : > { %12150 = vst [vmem:[#allocation66_spill] sm:$0xff] %v9372_v37  ;;  %v9374_v55 = vpop.permute.xlu0 %3720 }
 0x52e   : > { %12151 = vst [vmem:[#allocation73_spill] sm:$0xff] %v9374_v55  ;;  %4022 = vperm.xlu0 %5731, %v9034_v59  }
 0x530   : > { %5728 = vset.pattern.permute.xlu1 %v12135_v15  ;;  %v9378_v22 = vpop.permute.xlu1 %3629 }
 0x531   : > { %12152 = vst [vmem:[#allocation70_spill] sm:$0xff] %v9378_v22  ;;  %3899 = vperm.xlu1 %5728, %v8989_v13  }
 0x534   : > { %5729 = vset.pattern.permute.xlu2 %v12135_v15 }
 0x535   : > { %3903 = vperm.xlu2 %5729, %v9006_v17   ;;  %v9383_v48 = vpop.permute.xlu2 %3708  ;;  %v9385_v32 = vpop.permute.xlu0 %3732 }
 0x536   : > { %12153 = vst [vmem:[#allocation77_spill] sm:$0xff] %v9383_v48  ;;  %4034 = vperm.xlu0 %5731, %v9052_v12  }
 0x537   : > { %12154 = vst [vmem:[#allocation71_spill] sm:$0xff] %v9385_v32 }
 0x538   : > { %v9388_v37 = vpop.permute.xlu1 %3641 }
 0x539   : > { %12155 = vst [vmem:[#allocation86_spill] sm:$0xff] %v9388_v37  ;;  %3911 = vperm.xlu1 %5728, %v9021_v27  }
 0x53d   : > { %3915 = vperm.xlu2 %5729, %v9027_v36   ;;  %v9392_v55 = vpop.permute.xlu2 %3716  ;;  %v9394_v22 = vpop.permute.xlu0 %3744 }
 0x53e   : > { %12156 = vst [vmem:[#allocation54_spill] sm:$0xff] %v9392_v55  ;;  %4046 = vperm.xlu0 %5731, %v9072_v63   ;;  %v5891_v55 = vmov 9  }
 0x53f   : > { %12157 = vst [vmem:[#allocation81_spill] sm:$0xff] %v9394_v22 }
 0x540   : > { %v9397_v15 = vpop.permute.xlu1 %3653 }
 0x541   : > { %12158 = vst [vmem:[#allocation49_spill] sm:$0xff] %v9397_v15  ;;  %3919 = vperm.xlu1 %5728, %v9034_v59  }
 0x545   : > { %3923 = vperm.xlu2 %5729, %v9038_v42   ;;  %v9401_v32 = vpop.permute.xlu2 %3728  ;;  %v9403_v48 = vpop.permute.xlu0 %3756 }
 0x546   : > { %12159 = vst [vmem:[#allocation60_spill] sm:$0xff] %v9401_v32  ;;  %4058 = vperm.xlu0 %5731, %v9092_v24  }
 0x547   : > { %12160 = vst [vmem:[#allocation74_spill] sm:$0xff] %v9403_v48 }
 0x549   : > { %3931 = vperm.xlu1 %5728, %v9052_v12   ;;  %v9407_v37 = vpop.permute.xlu1 %3704 }
 0x54a   : > { %12161 = vst [vmem:[#allocation50_spill] sm:$0xff] %v9407_v37 }
 0x54d   : > { %3935 = vperm.xlu2 %5729, %v9056_v52   ;;  %v9410_v22 = vpop.permute.xlu2 %3740 }
 0x54e   : > { %12162 = vst [vmem:[#allocation91_spill] sm:$0xff] %v9410_v22  ;;  %5735 = vset.pattern.permute.xlu0 %v5891_v55  ;;  %v9412_v15 = vpop.permute.xlu0 %3807 }
 0x54f   : > { %12163 = vst [vmem:[#allocation55_spill] sm:$0xff] %v9412_v15  ;;  %4109 = vperm.xlu0 %5735, %v9006_v17  }
 0x551   : > { %3943 = vperm.xlu1 %5728, %v9072_v63   ;;  %v9416_v32 = vpop.permute.xlu1 %3712 }
 0x552   : > { %12164 = vst [vmem:[#allocation82_spill] sm:$0xff] %v9416_v32 }
 0x555   : > { %3947 = vperm.xlu2 %5729, %v9077_v45   ;;  %v9419_v48 = vpop.permute.xlu2 %3752 }
 0x556   : > { %12165 = vst [vmem:[#allocation89_spill] sm:$0xff] %v9419_v48  ;;  %v9421_v62 = vpop.permute.xlu0 %3827 }
 0x557   : > { %12166 = vst [vmem:[#allocation85_spill] sm:$0xff] %v9421_v62  ;;  %4129 = vperm.xlu0 %5735, %v9038_v42  }
 0x559   : > { %3955 = vperm.xlu1 %5728, %v9092_v24   ;;  %v9425_v22 = vpop.permute.xlu1 %3724 }
 0x55a   : > { %12167 = vst [vmem:[#allocation51_spill] sm:$0xff] %v9425_v22 }
 0x55d   : > { %3959 = vperm.xlu2 %5729, %v9094_v28  }
 0x55e   : > { %v9428_v15 = vpop.permute.xlu2 %3803  ;;  %v9430_v37 = vpop.permute.xlu0 %3839 }
 0x55f   : > { %12168 = vst [vmem:[#allocation88_spill] sm:$0xff] %v9428_v15  ;;  %4141 = vperm.xlu0 %5735, %v9056_v52   ;;  %v3268_v15 = vrot.slane %v9514_v58, 1 }
 0x560   : > { %12169 = vst [vmem:[#allocation100_spill] sm:$0xff] %v9430_v37 }
 0x561   : > { %5732 = vset.pattern.permute.xlu1 %v5890_v8  ;;  %v9433_v32 = vpop.permute.xlu1 %3736 }
 0x562   : > { %12170 = vst [vmem:[#allocation95_spill] sm:$0xff] %v9433_v32  ;;  %4006 = vperm.xlu1 %5732, %v9006_v17  }
 0x565   : > { %5733 = vset.pattern.permute.xlu2 %v5890_v8 }
 0x566   : > { %4010 = vperm.xlu2 %5733, %v9013_v4   ;;  %v9437_v48 = vpop.permute.xlu2 %3815  ;;  %v9439_v62 = vpop.permute.xlu0 %3851 }
 0x567   : > { %12171 = vst [vmem:[#allocation59_spill] sm:$0xff] %v9437_v48  ;;  %4153 = vperm.xlu0 %5735, %v9077_v45   ;;  %v11290_v48 = vmov 10  }
 0x568   : > { %12172 = vst [vmem:[#allocation94_spill] sm:$0xff] %v9439_v62 }
 0x569   : > { %v9442_v22 = vpop.permute.xlu1 %3748 }
 0x56a   : > { %12173 = vst [vmem:[#allocation105_spill] sm:$0xff] %v9442_v22  ;;  %4014 = vperm.xlu1 %5732, %v9021_v27  }
 0x56e   : > { %4018 = vperm.xlu2 %5733, %v9027_v36   ;;  %v9446_v37 = vpop.permute.xlu2 %3823  ;;  %v9448_v32 = vpop.permute.xlu0 %3863 }
 0x56f   : > { %12174 = vst [vmem:[#allocation103_spill] sm:$0xff] %v9446_v37  ;;  %4165 = vperm.xlu0 %5735, %v9094_v28  }
 0x570   : > { %12175 = vst [vmem:[#allocation87_spill] sm:$0xff] %v9448_v32 }
 0x571   : > { %v9451_v8 = vpop.permute.xlu1 %3760 }
 0x572   : > { %12176 = vst [vmem:[#allocation92_spill] sm:$0xff] %v9451_v8  ;;  %4026 = vperm.xlu1 %5732, %v9038_v42  }
 0x576   : > { %4030 = vperm.xlu2 %5733, %v9045_v16   ;;  %v9455_v62 = vpop.permute.xlu2 %3835 }
 0x577   : > { %12177 = vst [vmem:[#allocation90_spill] sm:$0xff] %v9455_v62  ;;  %5739 = vset.pattern.permute.xlu0 %v11290_v48  ;;  %v9458_v22 = vpop.permute.xlu0 %3907 }
 0x578   : > { %12178 = vst [vmem:[#allocation98_spill] sm:$0xff] %v9458_v22  ;;  %4209 = vperm.xlu0 %5739, %v9013_v4  }
 0x57a   : > { %4038 = vperm.xlu1 %5732, %v9056_v52   ;;  %v9462_v32 = vpop.permute.xlu1 %3811 }
 0x57b   : > { %12179 = vst [vmem:[#allocation76_spill] sm:$0xff] %v9462_v32 }
 0x57e   : > { %4042 = vperm.xlu2 %5733, %v9064_v41   ;;  %v9465_v8 = vpop.permute.xlu2 %3847 }
 0x57f   : > { %12180 = vst [vmem:[#allocation83_spill] sm:$0xff] %v9465_v8  ;;  %v9467_v37 = vpop.permute.xlu0 %3927 }
 0x580   : > { %12181 = vst [vmem:[#allocation99_spill] sm:$0xff] %v9467_v37  ;;  %4229 = vperm.xlu0 %5739, %v9045_v16  }
 0x582   : > { %4050 = vperm.xlu1 %5732, %v9077_v45   ;;  %v9471_v48 = vpop.permute.xlu1 %3819 }
 0x583   : > { %12182 = vst [vmem:[#allocation80_spill] sm:$0xff] %v9471_v48 }
 0x586   : > { %4054 = vperm.xlu2 %5733, %v9085_v61   ;;  %v9474_v62 = vpop.permute.xlu2 %3859 }
 0x587   : > { %12183 = vst [vmem:[#allocation102_spill] sm:$0xff] %v9474_v62  ;;  %v9476_v22 = vpop.permute.xlu0 %3939 }
 0x588   : > { %12184 = vst [vmem:[#allocation101_spill] sm:$0xff] %v9476_v22  ;;  %4241 = vperm.xlu0 %5739, %v9064_v41   ;;  %v9491_v22 = vld [vmem:[%s5988_s15] sm:$0xff] }
 0x589   : > { %v3260_v48 = vrot.slane %v9491_v22, 1 }
 0x58a   : > { %4062 = vperm.xlu1 %5732, %v9094_v28   ;;  %v9480_v8 = vpop.permute.xlu1 %3831 }
 0x58b   : > { %12185 = vst [vmem:[#allocation79_spill] sm:$0xff] %v9480_v8  ;;  %v9496_v8 = vld [vmem:[%s5988_s15 + $0x8] sm:$0xff] }
 0x58c   : > { %v11292_v47 = vrot.slane %v9496_v8, 1  ;;  %v12226_v34 = vrot.slane %v9496_v8, 1 }
 0x58e   : > { %5734 = vset.pattern.permute.xlu2 %v5891_v55 }
 0x58f   : > { %4105 = vperm.xlu2 %5734, %v8989_v13   ;;  %v9483_v37 = vpop.permute.xlu2 %3903  ;;  %v9485_v32 = vpop.permute.xlu0 %3951 }
 0x590   : > { %12186 = vst [vmem:[#allocation111_spill] sm:$0xff] %v9483_v37  ;;  %4253 = vperm.xlu0 %5739, %v9085_v61  }
 0x591   : > { %12187 = vst [vmem:[#allocation84_spill] sm:$0xff] %v9485_v32  ;;  %v9502_v32 = vsel %vm2123_vm1, %v3260_v48, %v11292_v47  ;;  %v9519_v48 = vld [vmem:[%s5988_s15 + $0x20] sm:$0xff] }
 0x592   : > { %5736 = vset.pattern.permute.xlu1 %v5891_v55  ;;  %v9488_v62 = vpop.permute.xlu1 %3843  ;;  %12189 = vst [vmem:[#allocation109_spill] sm:$0xff] %v9502_v32  ;;  %v11293_v47 = vrot.slane %v9519_v48, 1 }
 0x593   : > { %12188 = vst [vmem:[#allocation113_spill] sm:$0xff] %v9488_v62  ;;  %4113 = vperm.xlu1 %5736, %v9013_v4  }
 0x597   : > { %4117 = vperm.xlu2 %5734, %v9021_v27   ;;  %v9505_v55 = vpop.permute.xlu2 %3915 }
 0x598   : > { %12190 = vst [vmem:[#allocation107_spill] sm:$0xff] %v9505_v55  ;;  %v9507_v62 = vpop.permute.xlu0 %4002  ;;  %4264 = vrot.lane.b32.xlu0 %v9502_v32, %s5893_s21  ;;  %v9525_v55 = vsel %vm2123_vm1, %v11293_v47, %v3268_v15  ;;  %v9548_v47 = vsel %vm2123_vm1, %v3275_v2, %v11294_v38  ;;  %v9704_v32 = vld [vmem:[%s5988_s15 + $0x40] sm:$0x3] }
 0x599   : > { %12191 = vst [vmem:[#allocation110_spill] sm:$0xff] %v9507_v62  ;;  %v3273_v35 = vrot.slane %v9704_v32, 1 }
 0x59a   : > { %v9511_v37 = vpop.permute.xlu1 %3855  ;;  %12193 = vst [vmem:[#allocation93_spill] sm:$0xff] %v9525_v55 }
 0x59b   : > { %12192 = vst [vmem:[#allocation96_spill] sm:$0xff] %v9511_v37  ;;  %4121 = vperm.xlu1 %5736, %v9027_v36  }
 0x59c   : > { %12197 = vst [vmem:[#allocation115_spill] sm:$0xff] %v9548_v47 }
 0x59f   : > { %4125 = vperm.xlu2 %5734, %v9034_v59   ;;  %v9528_v37 = vpop.permute.xlu2 %3923 }
 0x5a0   : > { %12194 = vst [vmem:[#allocation114_spill] sm:$0xff] %v9528_v37  ;;  %4270 = vrot.lane.b32.xlu0 %v9525_v55, %s5893_s21  ;;  %v9532_v62 = vpop.permute.xlu0 %4022  ;;  %v9556_v37 = vld [vmem:[%s5988_s15 + $0x68] sm:$0xff] }
 0x5a1   : > { %12195 = vst [vmem:[#allocation97_spill] sm:$0xff] %v9532_v62  ;;  %v11295_v49 = vrot.slane %v9556_v37, 1 }
 0x5a3   : > { %4133 = vperm.xlu1 %5736, %v9045_v16   ;;  %v9543_v15 = vpop.permute.xlu1 %3899 }
 0x5a4   : > { %12196 = vst [vmem:[#allocation104_spill] sm:$0xff] %v9543_v15  ;;  %v3283_v15 = vrot.slane %v9560_v3, 1 }
 0x5a7   : > { %4137 = vperm.xlu2 %5734, %v9052_v12   ;;  %v9551_v62 = vpop.permute.xlu2 %3935 }
 0x5a8   : > { %12198 = vst [vmem:[#allocation106_spill] sm:$0xff] %v9551_v62  ;;  %4276 = vrot.lane.b32.xlu0 %v9548_v47, %s5893_s21  ;;  %v9566_v38 = vpop.permute.xlu0 %4034  ;;  %v9571_v62 = vsel %vm2123_vm1, %v11295_v49, %v3283_v15 }
 0x5a9   : > { %12200 = vst [vmem:[#allocation112_spill] sm:$0xff] %v9566_v38  ;;  %v11296_v38 = vrot.slane %v9583_v20, 1 }
 0x5aa   : > { %12201 = vst [vmem:[#allocation145_spill] sm:$0xff] %v9571_v62 }
 0x5ab   : > { %4145 = vperm.xlu1 %5736, %v9064_v41   ;;  %v9564_v2 = vpop.permute.xlu1 %3911 }
 0x5ac   : > { %12199 = vst [vmem:[#allocation108_spill] sm:$0xff] %v9564_v2  ;;  %v3290_v2 = vrot.slane %v9579_v40, 1 }
 0x5af   : > { %4149 = vperm.xlu2 %5734, %v9072_v63   ;;  %v9574_v31 = vpop.permute.xlu2 %3947 }
 0x5b0   : > { %12202 = vst [vmem:[#allocation146_spill] sm:$0xff] %v9574_v31  ;;  %4282 = vrot.lane.b32.xlu0 %v9571_v62, %s5893_s21  ;;  %v9589_v49 = vpop.permute.xlu0 %4046  ;;  %v9594_v31 = vsel %vm2123_vm1, %v3290_v2, %v11296_v38  ;;  %v9686_v62 = vld [vmem:[%s5988_s15 + $0x38] sm:$0xff] }
 0x5b1   : > { %12204 = vst [vmem:[#allocation148_spill] sm:$0xff] %v9589_v49  ;;  %v3298_v49 = vrot.slane %v9606_v44, 1  ;;  %v3271_v0 = vrot.slane %v9686_v62, 1 }
 0x5b2   : > { %12205 = vst [vmem:[#allocation149_spill] sm:$0xff] %v9594_v31 }
 0x5b3   : > { %4157 = vperm.xlu1 %5736, %v9085_v61   ;;  %v9587_v15 = vpop.permute.xlu1 %3919  ;;  %v9616_v2 = vsel %vm2123_vm1, %v11299_v57, %v3298_v49  ;;  %v9701_v23 = vsel %vm2123_vm1, %v3270_v26, %v3271_v0  ;;  %v9716_v18 = vsel %vm2123_vm1, %v3271_v0, %v3273_v35  ;;  %v9738_v0 = vld [vmem:[%s5988_s15 + $0x78] sm:$0xff] }
 0x5b4   : > { %12203 = vst [vmem:[#allocation147_spill] sm:$0xff] %v9587_v15  ;;  %v12207_v15 = vmov 10  }
 0x5b5   : > { %12209 = vst [vmem:[#allocation152_spill] sm:$0xff] %v9616_v2 }
 0x5b6   : > { %12233 = vst [vmem:[#allocation174_spill] sm:$0xff] %v9701_v23 }
 0x5b7   : > { %4161 = vperm.xlu2 %5734, %v9092_v24   ;;  %v9597_v25 = vpop.permute.xlu2 %3959  ;;  %12235 = vst [vmem:[#allocation176_spill] sm:$0xff] %v9716_v18 }
 0x5b8   : > { %12206 = vst [vmem:[#allocation150_spill] sm:$0xff] %v9597_v25  ;;  %4288 = vrot.lane.b32.xlu0 %v9594_v31, %s5893_s21  ;;  %v9619_v38 = vpop.permute.xlu0 %4058 }
 0x5b9   : > { %12210 = vst [vmem:[#allocation153_spill] sm:$0xff] %v9619_v38 }
 0x5bb   : > { %5737 = vset.pattern.permute.xlu1 %v12207_v15  ;;  %v9610_v6 = vpop.permute.xlu1 %3931 }
 0x5bc   : > { %12208 = vst [vmem:[#allocation151_spill] sm:$0xff] %v9610_v6  ;;  %4201 = vperm.xlu1 %5737, %v8989_v13  }
 0x5bf   : > { %5738 = vset.pattern.permute.xlu2 %v12207_v15 }
 0x5c0   : > { %4205 = vperm.xlu2 %5738, %v9006_v17   ;;  %v9622_v25 = vpop.permute.xlu2 %4010  ;;  %4294 = vrot.lane.b32.xlu0 %v9616_v2, %s5893_s21  ;;  %v9660_v2 = vld [vmem:[%s5988_s15 + $0x10] sm:$0x3] }
 0x5c1   : > { %12211 = vst [vmem:[#allocation154_spill] sm:$0xff] %v9622_v25  ;;  %v9632_v49 = vpop.permute.xlu0 %4109 }
 0x5c2   : > { %12214 = vst [vmem:[#allocation157_spill] sm:$0xff] %v9632_v49  ;;  %v5895_v49 = vmov 11  }
 0x5c3   : > { %v9626_v31 = vpop.permute.xlu1 %3943  ;;  %5741 = vset.pattern.permute.xlu0 %v5895_v49 }
 0x5c4   : > { %12212 = vst [vmem:[#allocation155_spill] sm:$0xff] %v9626_v31  ;;  %4213 = vperm.xlu1 %5737, %v9021_v27  }
 0x5c8   : > { %4217 = vperm.xlu2 %5738, %v9027_v36   ;;  %v9630_v6 = vpop.permute.xlu2 %4018 }
 0x5c9   : > { %12213 = vst [vmem:[#allocation156_spill] sm:$0xff] %v9630_v6  ;;  %v9640_v38 = vpop.permute.xlu0 %4129 }
 0x5ca   : > { %12217 = vst [vmem:[#allocation160_spill] sm:$0xff] %v9640_v38 }
 0x5cb   : > { %v9634_v15 = vpop.permute.xlu1 %3955 }
 0x5cc   : > { %12215 = vst [vmem:[#allocation158_spill] sm:$0xff] %v9634_v15  ;;  %4221 = vperm.xlu1 %5737, %v9034_v59  }
 0x5d0   : > { %4225 = vperm.xlu2 %5738, %v9038_v42   ;;  %v9638_v57 = vpop.permute.xlu2 %4030 }
 0x5d1   : > { %12216 = vst [vmem:[#allocation159_spill] sm:$0xff] %v9638_v57  ;;  %v9651_v6 = vpop.permute.xlu0 %4141 }
 0x5d2   : > { %12221 = vst [vmem:[#allocation164_spill] sm:$0xff] %v9651_v6 }
 0x5d4   : > { %4233 = vperm.xlu1 %5737, %v9052_v12   ;;  %v9643_v31 = vpop.permute.xlu1 %4006 }
 0x5d5   : > { %12218 = vst [vmem:[#allocation161_spill] sm:$0xff] %v9643_v31 }
 0x5d8   : > { %4237 = vperm.xlu2 %5738, %v9056_v52   ;;  %v9646_v25 = vpop.permute.xlu2 %4042 }
 0x5d9   : > { %12219 = vst [vmem:[#allocation162_spill] sm:$0xff] %v9646_v25  ;;  %v3263_v25 = vrot.slane %v9660_v2, 1  ;;  %v9663_v14 = vpop.permute.xlu0 %4153 }
 0x5da   : > { %12224 = vst [vmem:[#allocation167_spill] sm:$0xff] %v9663_v14 }
 0x5db   : > { %v9671_v55 = vsel %vm2123_vm1, %v12226_v34, %v3263_v25  ;;  %v12229_v34 = vrot.slane %v9519_v48, 1 }
 0x5dc   : > { %4245 = vperm.xlu1 %5737, %v9072_v63   ;;  %v9649_v15 = vpop.permute.xlu1 %4014  ;;  %12227 = vst [vmem:[#allocation169_spill] sm:$0xff] %v9671_v55 }
 0x5dd   : > { %12220 = vst [vmem:[#allocation163_spill] sm:$0xff] %v9649_v15 }
 0x5e0   : > { %4249 = vperm.xlu2 %5738, %v9077_v45   ;;  %v9654_v57 = vpop.permute.xlu2 %4054 }
 0x5e1   : > { %12222 = vst [vmem:[#allocation165_spill] sm:$0xff] %v9654_v57  ;;  %v9674_v57 = vld [vmem:[%s5988_s15 + $0x18] sm:$0xff] }
 0x5e4   : > { %4257 = vperm.xlu1 %5737, %v9092_v24   ;;  %v9657_v31 = vpop.permute.xlu1 %4026 }
 0x5e5   : > { %12223 = vst [vmem:[#allocation166_spill] sm:$0xff] %v9657_v31  ;;  %v3265_v31 = vrot.slane %v9674_v57, 1 }
 0x5e7   : > { %v9692_v25 = vsel %vm2123_vm1, %v3265_v31, %v12229_v34  ;;  %v9712_v34 = vld [vmem:[%s5988_s15 + $0x58] sm:$0x3] }
 0x5e8   : > { %4261 = vperm.xlu2 %5738, %v9094_v28   ;;  %12230 = vst [vmem:[#allocation171_spill] sm:$0xff] %v9692_v25 }
 0x5e9   : > { %v9666_v15 = vpop.permute.xlu2 %4105 }
 0x5ea   : > { %12225 = vst [vmem:[#allocation168_spill] sm:$0xff] %v9666_v15 }
 0x5ec   : > { %4266 = vrot.lane.b32.xlu1 %v9671_v55, %s5893_s21  ;;  %v9679_v5 = vpop.permute.xlu1 %4038 }
 0x5ed   : > { %12228 = vst [vmem:[#allocation170_spill] sm:$0xff] %v9679_v5  ;;  %v9698_v5 = vpop.permute.xlu0 %4165  ;;  %5742 = vset.pattern.permute.xlu1 %v5895_v49 }
 0x5ee   : > { %12232 = vst [vmem:[#allocation173_spill] sm:$0xff] %v9698_v5 }
 0x5f0   : > { %4268 = vrot.lane.b32.xlu2 %v9692_v25, %s5893_s21  ;;  %v3278_v25 = vrot.slane %v9712_v34, 1 }
 0x5f1   : > { %v9696_v50 = vpop.permute.xlu2 %4117  ;;  %5740 = vset.pattern.permute.xlu2 %v5895_v49 }
 0x5f2   : > { %12231 = vst [vmem:[#allocation172_spill] sm:$0xff] %v9696_v50  ;;  %v9725_v47 = vsel %vm2123_vm1, %v12237_v10, %v3278_v25  ;;  %v3286_v10 = vrot.slane %v9742_v1, 1  ;;  %v12240_v25 = vrot.slane %v9556_v37, 1 }
 0x5f3   : > { %12238 = vst [vmem:[#allocation178_spill] sm:$0xff] %v9725_v47 }
 0x5f4   : > { %4272 = vrot.lane.b32.xlu1 %v9701_v23, %s5893_s21  ;;  %v9709_v31 = vpop.permute.xlu1 %4050  ;;  %v12246_v23 = vrot.slane %v9583_v20, 1 }
 0x5f5   : > { %12234 = vst [vmem:[#allocation175_spill] sm:$0xff] %v9709_v31  ;;  %v3280_v31 = vrot.slane %v9728_v19, 1  ;;  %v9731_v9 = vpop.permute.xlu0 %4209 }
 0x5f7   : > { %v9748_v33 = vsel %vm2123_vm1, %v3280_v31, %v12240_v25  ;;  %v9768_v31 = vld [vmem:[%s5988_s15 + $0xa0] sm:$0x3] }
 0x5f8   : > { %4274 = vrot.lane.b32.xlu2 %v9716_v18, %s5893_s21  ;;  %v3285_v18 = vrot.slane %v9738_v0, 1  ;;  %12241 = vst [vmem:[#allocation180_spill] sm:$0xff] %v9748_v33  ;;  %v3293_v25 = vrot.slane %v9768_v31, 1 }
 0x5f9   : > { %v9720_v26 = vpop.permute.xlu2 %4125 }
 0x5fa   : > { %12236 = vst [vmem:[#allocation177_spill] sm:$0xff] %v9720_v26 }
 0x5fc   : > { %4278 = vrot.lane.b32.xlu1 %v9725_v47, %s5893_s21  ;;  %v9735_v35 = vpop.permute.xlu1 %4062 }
 0x5fd   : > { %12239 = vst [vmem:[#allocation179_spill] sm:$0xff] %v9735_v35  ;;  %v9755_v35 = vsel %vm2123_vm1, %v3285_v18, %v3286_v10  ;;  %v9765_v54 = vpop.permute.xlu0 %4229 }
 0x5fe   : > { %12243 = vst [vmem:[#allocation182_spill] sm:$0xff] %v9755_v35 }
 0x600   : > { %4280 = vrot.lane.b32.xlu2 %v9748_v33, %s5893_s21  ;;  %v9772_v33 = vsel %vm2123_vm1, %v3286_v10, %v3288_v60  ;;  %v12249_v60 = vrot.slane %v9602_v7, 1 }
 0x601   : > { %v9752_v47 = vpop.permute.xlu2 %4137  ;;  %12245 = vst [vmem:[#allocation184_spill] sm:$0xff] %v9772_v33 }
 0x602   : > { %12242 = vst [vmem:[#allocation181_spill] sm:$0xff] %v9752_v47  ;;  %v9794_v10 = vsel %vm2123_vm1, %v3295_v11, %v12249_v60 }
 0x603   : > { %12250 = vst [vmem:[#allocation187_spill] sm:$0xff] %v9794_v10 }
 0x604   : > { %4284 = vrot.lane.b32.xlu1 %v9755_v35, %s5893_s21  ;;  %v9781_v35 = vsel %vm2123_vm1, %v12246_v23, %v3293_v25 }
 0x605   : > { %v9763_v46 = vpop.permute.xlu1 %4113  ;;  %12247 = vst [vmem:[#allocation185_spill] sm:$0xff] %v9781_v35 }
 0x606   : > { %12244 = vst [vmem:[#allocation183_spill] sm:$0xff] %v9763_v46 }
 0x608   : > { %4286 = vrot.lane.b32.xlu2 %v9772_v33, %s5893_s21  ;;  %v9796_v33 = vpop.permute.xlu0 %4241 }
 0x609   : > { %v9776_v18 = vpop.permute.xlu2 %4149 }
 0x60c   : > { %4290 = vrot.lane.b32.xlu1 %v9781_v35, %s5893_s21 }
 0x60d   : > { %v9789_v29 = vpop.permute.xlu1 %4121 }
 0x60e   : > { %12248 = vst [vmem:[#allocation186_spill] sm:$0xff] %v9789_v29 }
 0x610   : > { %4292 = vrot.lane.b32.xlu2 %v9794_v10, %s5893_s21  ;;  %v9804_v21 = vpop.permute.xlu0 %4253 }
 0x611   : > { %v9800_v23 = vpop.permute.xlu2 %4161 }
 0x612   : > { %12251 = vst [vmem:[#allocation188_spill] sm:$0xff] %v9800_v23 }
 0x615   : > { %v9802_v25 = vpop.permute.xlu1 %4133 }
 0x616   : > { %12252 = vst [vmem:[#allocation189_spill] sm:$0xff] %v9802_v25 }
 0x618   : > { %v4265_v39 = vpop.permute.xlu0 %4264 }
 0x61a   : > { %v4206_v55 = vpop.permute.xlu2 %4205 }
 0x61d   : > { %v9806_v35 = vpop.permute.xlu1 %4145 }
 0x61e   : > { %12253 = vst [vmem:[#allocation190_spill] sm:$0xff] %v9806_v35 }
 0x620   : > { %v9810_v60 = vpop.permute.xlu0 %4270 }
 0x622   : > { %v4218_v47 = vpop.permute.xlu2 %4217 }
 0x625   : > { %v9808_v5 = vpop.permute.xlu1 %4157 }
 0x626   : > { %12254 = vst [vmem:[#allocation191_spill] sm:$0xff] %v9808_v5 }
 0x628   : > { %v9813_v6 = vpop.permute.xlu0 %4276 }
 0x62a   : > { %v4226_v11 = vpop.permute.xlu2 %4225 }
 0x62b   : > { %v4318_v5 = vmul.f32 %v9813_v6, %v4226_v11 }
 0x62e   : > { %v4202_v26 = vpop.permute.xlu1 %4201 }
 0x62f   : > { %v4312_v14 = vmul.f32 %v4265_v39, %v4202_v26 }
 0x630   : > { %v9818_v29 = vpop.permute.xlu0 %4282 }
 0x631   : > { %4344 = vrot.lane.b32.xlu1 %v4312_v14, %s5894_s22 }
 0x632   : > { %v4238_v10 = vpop.permute.xlu2 %4237 }
 0x633   : > { %v4321_v26 = vmul.f32 %v9818_v29, %v4238_v10 }
 0x636   : > { %v4214_v25 = vpop.permute.xlu1 %4213 }
 0x637   : > { %v4315_v46 = vmul.f32 %v9810_v60, %v4214_v25 }
 0x638   : > { %v9823_v25 = vpop.permute.xlu0 %4288 }
 0x639   : > { %4350 = vrot.lane.b32.xlu1 %v4315_v46, %s5894_s22  ;;  %12255 = vst [vmem:[#allocation192_spill] sm:$0xff] %v9823_v25 }
 0x63a   : > { %v4250_v35 = vpop.permute.xlu2 %4249 }
 0x63b   : > { %v4324_v15 = vmul.f32 %v9823_v25, %v4250_v35 }
 0x63e   : > { %v4222_v38 = vpop.permute.xlu1 %4221 }
 0x640   : > { %v9835_v10 = vpop.permute.xlu0 %4294 }
 0x641   : > { %4356 = vrot.lane.b32.xlu1 %v4318_v5, %s5894_s22  ;;  %12257 = vst [vmem:[#allocation194_spill] sm:$0xff] %v9835_v10 }
 0x642   : > { %v4262_v39 = vpop.permute.xlu2 %4261 }
 0x643   : > { %v4327_v23 = vmul.f32 %v9835_v10, %v4262_v39 }
 0x646   : > { %v4234_v14 = vpop.permute.xlu1 %4233 }
 0x649   : > { %4362 = vrot.lane.b32.xlu1 %v4321_v26, %s5894_s22 }
 0x64a   : > { %v9825_v46 = vpop.permute.xlu2 %4268 }
 0x64b   : > { %v4314_v11 = vmul.f32 %v9825_v46, %v9731_v9 }
 0x64d   : > { %4348 = vrot.lane.b32.xlu0 %v4314_v11, %s5894_s22 }
 0x64e   : > { %v4246_v50 = vpop.permute.xlu1 %4245 }
 0x651   : > { %4368 = vrot.lane.b32.xlu1 %v4324_v15, %s5894_s22 }
 0x652   : > { %v9832_v5 = vpop.permute.xlu2 %4274 }
 0x653   : > { %12256 = vst [vmem:[#allocation193_spill] sm:$0xff] %v9832_v5  ;;  %v4317_v49 = vmul.f32 %v9832_v5, %v4222_v38 }
 0x655   : > { %4354 = vrot.lane.b32.xlu0 %v4317_v49, %s5894_s22 }
 0x656   : > { %v4258_v26 = vpop.permute.xlu1 %4257 }
 0x659   : > { %4374 = vrot.lane.b32.xlu1 %v4327_v23, %s5894_s22 }
 0x65a   : > { %v9840_v9 = vpop.permute.xlu2 %4280 }
 0x65b   : > { %v4320_v11 = vmul.f32 %v9840_v9, %v4234_v14 }
 0x65d   : > { %4360 = vrot.lane.b32.xlu0 %v4320_v11, %s5894_s22 }
 0x65e   : > { %v4267_v15 = vpop.permute.xlu1 %4266 }
 0x65f   : > { %v4313_v35 = vmul.f32 %v4267_v15, %v4206_v55 }
 0x661   : > { %4346 = vrot.lane.b32.xlu2 %v4313_v35, %s5894_s22  ;;  %4417 = vperm.xlu1 %5742, %v9013_v4   ;;  %v3413_v35 = vrot.slane %v9496_v8, 2 }
 0x662   : > { %v9846_v38 = vpop.permute.xlu2 %4286 }
 0x663   : > { %12258 = vst [vmem:[#allocation195_spill] sm:$0xff] %v9846_v38  ;;  %v4323_v49 = vmul.f32 %v9846_v38, %v4246_v50 }
 0x665   : > { %4366 = vrot.lane.b32.xlu0 %v4323_v49, %s5894_s22  ;;  %v3412_v49 = vrot.slane %v9491_v22, 2  ;;  %v3427_v22 = vrot.slane %v9535_v51, 2 }
 0x666   : > { %v9850_v39 = vpop.permute.xlu1 %4272 }
 0x667   : > { %v4316_v23 = vmul.f32 %v9850_v39, %v4218_v47 }
 0x669   : > { %4352 = vrot.lane.b32.xlu2 %v4316_v23, %s5894_s22  ;;  %4425 = vperm.xlu1 %5742, %v9027_v36   ;;  %v3418_v23 = vrot.slane %v9519_v48, 2 }
 0x66a   : > { %v9855_v14 = vpop.permute.xlu2 %4292 }
 0x66b   : > { %12259 = vst [vmem:[#allocation196_spill] sm:$0xff] %v9855_v14  ;;  %v4326_v55 = vmul.f32 %v9855_v14, %v4258_v26 }
 0x66d   : > { %4372 = vrot.lane.b32.xlu0 %v4326_v55, %s5894_s22  ;;  %v3428_v55 = vrot.slane %v9539_v56, 2  ;;  %v3433_v56 = vrot.slane %v9556_v37, 2  ;;  %v3443_v37 = vrot.slane %v9583_v20, 2 }
 0x66e   : > { %v9859_v11 = vpop.permute.xlu1 %4278 }
 0x66f   : > { %v4319_v50 = vmul.f32 %v9859_v11, %v9765_v54 }
 0x671   : > { %4358 = vrot.lane.b32.xlu2 %v4319_v50, %s5894_s22  ;;  %4437 = vperm.xlu1 %5742, %v9045_v16   ;;  %v9902_v50 = vsel %vm2245_vm4, %v3427_v22, %v3428_v55 }
 0x672   : > { %12262 = vst [vmem:[#allocation199_spill] sm:$0xff] %v9902_v50 }
 0x675   : > { %4413 = vperm.xlu0 %5741, %v9006_v17  }
 0x676   : > { %v9866_v47 = vpop.permute.xlu1 %4284 }
 0x677   : > { %v4322_v15 = vmul.f32 %v9866_v47, %v9796_v33  ;;  %v9883_v33 = vsel %vm2245_vm4, %v3412_v49, %v3413_v35 }
 0x678   : > { %12260 = vst [vmem:[#allocation197_spill] sm:$0xff] %v9883_v33 }
 0x679   : > { %4364 = vrot.lane.b32.xlu2 %v4322_v15, %s5894_s22  ;;  %4449 = vperm.xlu1 %5742, %v9064_v41   ;;  %v3435_v15 = vrot.slane %v9560_v3, 2 }
 0x67b   : > { %v9916_v51 = vsel %vm2245_vm4, %v3433_v56, %v3435_v15 }
 0x67c   : > { %12264 = vst [vmem:[#allocation201_spill] sm:$0xff] %v9916_v51 }
 0x67d   : > { %4433 = vperm.xlu0 %5741, %v9038_v42  }
 0x67e   : > { %v9873_v26 = vpop.permute.xlu1 %4290 }
 0x67f   : > { %v4325_v54 = vmul.f32 %v9873_v26, %v9804_v21  ;;  %v3420_v21 = vrot.slane %v9514_v58, 2  ;;  %v3417_v58 = vrot.slane %v9674_v57, 2  ;;  %v3425_v57 = vrot.slane %v9704_v32, 2 }
 0x680   : > { %v3432_v32 = vrot.slane %v9728_v19, 2  ;;  %v3448_v19 = vrot.slane %v9602_v7, 2  ;;  %v3447_v7 = vrot.slane %v9784_v30, 2 }
 0x681   : > { %4370 = vrot.lane.b32.xlu2 %v4325_v54, %s5894_s22  ;;  %4461 = vperm.xlu1 %5742, %v9085_v61   ;;  %v9892_v8 = vsel %vm2245_vm4, %v3418_v23, %v3420_v21  ;;  %v9908_v48 = vsel %vm2245_vm4, %v3417_v58, %v3418_v23  ;;  %v3423_v54 = vrot.slane %v9686_v62, 2  ;;  %v3442_v21 = vrot.slane %v9579_v40, 2 }
 0x682   : > { %12261 = vst [vmem:[#allocation198_spill] sm:$0xff] %v9892_v8  ;;  %v9941_v22 = vsel %vm2245_vm4, %v3432_v32, %v3433_v56  ;;  %v3450_v40 = vrot.slane %v9606_v44, 2  ;;  %v3440_v58 = vrot.slane %v9758_v53, 2  ;;  %v3438_v56 = vrot.slane %v9742_v1, 2 }
 0x683   : > { %12263 = vst [vmem:[#allocation200_spill] sm:$0xff] %v9908_v48  ;;  %v9925_v3 = vsel %vm2245_vm4, %v3423_v54, %v3425_v57  ;;  %v9933_v23 = vsel %vm2245_vm4, %v3442_v21, %v3443_v37  ;;  %v3415_v44 = vrot.slane %v9660_v2, 2  ;;  %v3422_v2 = vrot.slane %v9682_v43, 2 }
 0x684   : > { %12266 = vst [vmem:[#allocation203_spill] sm:$0xff] %v9925_v3  ;;  %v9949_v15 = vsel %vm2245_vm4, %v3448_v19, %v3450_v40  ;;  %v9959_v21 = vsel %vm2245_vm4, %v3438_v56, %v3440_v58  ;;  %v9975_v58 = vsel %vm2245_vm4, %v3447_v7, %v3448_v19  ;;  %v3430_v43 = vrot.slane %v9712_v34, 2 }
 0x685   : > { %4445 = vperm.xlu0 %5741, %v9056_v52   ;;  %12267 = vst [vmem:[#allocation204_spill] sm:$0xff] %v9933_v23  ;;  %v9964_v53 = vsel %vm2245_vm4, %v3413_v35, %v3415_v44  ;;  %v9982_v35 = vsel %vm2245_vm4, %v3422_v2, %v3423_v54  ;;  %v3437_v2 = vrot.slane %v9738_v0, 2 }
 0x686   : > { %12269 = vst [vmem:[#allocation206_spill] sm:$0xff] %v9941_v22  ;;  %v9994_v19 = vsel %vm2245_vm4, %v3428_v55, %v3430_v43  ;;  %v3445_v43 = vrot.slane %v9768_v31, 2 }
 0x687   : > { %12270 = vst [vmem:[#allocation207_spill] sm:$0xff] %v9949_v15 }
 0x688   : > { %12272 = vst [vmem:[#allocation209_spill] sm:$0xff] %v9959_v21 }
 0x689   : > { %4409 = vperm.xlu2 %5740, %v8989_v13   ;;  %4472 = vrot.lane.b32.xlu1 %v9883_v33, %s5893_s21  ;;  %12273 = vst [vmem:[#allocation210_spill] sm:$0xff] %v9964_v53 }
 0x68a   : > { %12276 = vst [vmem:[#allocation213_spill] sm:$0xff] %v9975_v58 }
 0x68b   : > { %12278 = vst [vmem:[#allocation215_spill] sm:$0xff] %v9982_v35 }
 0x68c   : > { %12282 = vst [vmem:[#allocation219_spill] sm:$0xff] %v9994_v19 }
 0x68d   : > { %4457 = vperm.xlu0 %5741, %v9077_v45  }
 0x691   : > { %4421 = vperm.xlu2 %5740, %v9021_v27   ;;  %4478 = vrot.lane.b32.xlu1 %v9892_v8, %s5893_s21 }
 0x695   : > { %4469 = vperm.xlu0 %5741, %v9094_v28  }
 0x699   : > { %4429 = vperm.xlu2 %5740, %v9034_v59   ;;  %4484 = vrot.lane.b32.xlu1 %v9902_v50, %s5893_s21 }
 0x69d   : > { %4476 = vrot.lane.b32.xlu0 %v9908_v48, %s5893_s21 }
 0x6a1   : > { %4441 = vperm.xlu2 %5740, %v9052_v12   ;;  %4490 = vrot.lane.b32.xlu1 %v9916_v51, %s5893_s21  ;;  %v10016_v51 = vsel %vm2245_vm4, %v3443_v37, %v3445_v43 }
 0x6a2   : > { %12288 = vst [vmem:[#allocation225_spill] sm:$0xff] %v10016_v51 }
 0x6a3   : > { %v9922_v49 = vpop.permute.xlu1 %4344 }
 0x6a4   : > { %12265 = vst [vmem:[#allocation202_spill] sm:$0xff] %v9922_v49 }
 0x6a5   : > { %4482 = vrot.lane.b32.xlu0 %v9925_v3, %s5893_s21 }
 0x6a9   : > { %4453 = vperm.xlu2 %5740, %v9072_v63   ;;  %4496 = vrot.lane.b32.xlu1 %v9933_v23, %s5893_s21  ;;  %v10006_v23 = vsel %vm2245_vm4, %v3437_v2, %v3438_v56 }
 0x6aa   : > { %12286 = vst [vmem:[#allocation223_spill] sm:$0xff] %v10006_v23 }
 0x6ab   : > { %v9938_v62 = vpop.permute.xlu1 %4350 }
 0x6ac   : > { %12268 = vst [vmem:[#allocation205_spill] sm:$0xff] %v9938_v62 }
 0x6ad   : > { %4488 = vrot.lane.b32.xlu0 %v9941_v22, %s5893_s21 }
 0x6b1   : > { %4465 = vperm.xlu2 %5740, %v9092_v24   ;;  %4502 = vrot.lane.b32.xlu1 %v9949_v15, %s5893_s21 }
 0x6b3   : > { %v9955_v57 = vpop.permute.xlu1 %4356 }
 0x6b4   : > { %12271 = vst [vmem:[#allocation208_spill] sm:$0xff] %v9955_v57 }
 0x6b5   : > { %4494 = vrot.lane.b32.xlu0 %v9959_v21, %s5893_s21 }
 0x6b9   : > { %4474 = vrot.lane.b32.xlu2 %v9964_v53, %s5893_s21 }
 0x6bb   : > { %v9969_v32 = vpop.permute.xlu2 %4346  ;;  %v9971_v40 = vpop.permute.xlu1 %4362 }
 0x6bc   : > { %12274 = vst [vmem:[#allocation211_spill] sm:$0xff] %v9969_v32 }
 0x6bd   : > { %12275 = vst [vmem:[#allocation212_spill] sm:$0xff] %v9971_v40  ;;  %4500 = vrot.lane.b32.xlu0 %v9975_v58, %s5893_s21 }
 0x6bf   : > { %v9979_v15 = vpop.permute.xlu0 %4348 }
 0x6c0   : > { %12277 = vst [vmem:[#allocation214_spill] sm:$0xff] %v9979_v15  ;;  %v5896_v15 = vmov 12  }
 0x6c1   : > { %4480 = vrot.lane.b32.xlu2 %v9982_v35, %s5893_s21  ;;  %5744 = vset.pattern.permute.xlu1 %v5896_v15 }
 0x6c2   : > { %5745 = vset.pattern.permute.xlu2 %v5896_v15  ;;  %5743 = vset.pattern.permute.xlu0 %v5896_v15 }
 0x6c3   : > { %v9986_v44 = vpop.permute.xlu2 %4352  ;;  %v9988_v21 = vpop.permute.xlu1 %4368 }
 0x6c4   : > { %12279 = vst [vmem:[#allocation216_spill] sm:$0xff] %v9986_v44 }
 0x6c5   : > { %12280 = vst [vmem:[#allocation217_spill] sm:$0xff] %v9988_v21 }
 0x6c7   : > { %v9991_v22 = vpop.permute.xlu0 %4354 }
 0x6c8   : > { %12281 = vst [vmem:[#allocation218_spill] sm:$0xff] %v9991_v22 }
 0x6c9   : > { %4486 = vrot.lane.b32.xlu2 %v9994_v19, %s5893_s21 }
 0x6cb   : > { %v9998_v7 = vpop.permute.xlu2 %4358  ;;  %v10000_v54 = vpop.permute.xlu1 %4374 }
 0x6cc   : > { %12283 = vst [vmem:[#allocation220_spill] sm:$0xff] %v9998_v7 }
 0x6cd   : > { %12284 = vst [vmem:[#allocation221_spill] sm:$0xff] %v10000_v54 }
 0x6cf   : > { %v10003_v58 = vpop.permute.xlu0 %4360 }
 0x6d0   : > { %12285 = vst [vmem:[#allocation222_spill] sm:$0xff] %v10003_v58 }
 0x6d1   : > { %4492 = vrot.lane.b32.xlu2 %v10006_v23, %s5893_s21 }
 0x6d3   : > { %v10010_v34 = vpop.permute.xlu2 %4364  ;;  %v4418_v55 = vpop.permute.xlu1 %4417 }
 0x6d4   : > { %12287 = vst [vmem:[#allocation224_spill] sm:$0xff] %v10010_v34 }
 0x6d7   : > { %v10013_v3 = vpop.permute.xlu0 %4366 }
 0x6d9   : > { %4498 = vrot.lane.b32.xlu2 %v10016_v51, %s5893_s21 }
 0x6db   : > { %v10020_v0 = vpop.permute.xlu2 %4370  ;;  %v4426_v56 = vpop.permute.xlu1 %4425 }
 0x6dc   : > { %12289 = vst [vmem:[#allocation226_spill] sm:$0xff] %v10020_v0 }
 0x6df   : > { %v10022_v2 = vpop.permute.xlu0 %4372 }
 0x6e3   : > { %v4410_v50 = vpop.permute.xlu2 %4409  ;;  %v4438_v23 = vpop.permute.xlu1 %4437 }
 0x6e7   : > { %v4414_v8 = vpop.permute.xlu0 %4413 }
 0x6eb   : > { %v4422_v53 = vpop.permute.xlu2 %4421  ;;  %v4450_v19 = vpop.permute.xlu1 %4449 }
 0x6ef   : > { %v4434_v35 = vpop.permute.xlu0 %4433 }
 0x6f3   : > { %v4430_v31 = vpop.permute.xlu2 %4429  ;;  %v4462_v48 = vpop.permute.xlu1 %4461 }
 0x6f7   : > { %v4446_v33 = vpop.permute.xlu0 %4445 }
 0x6fb   : > { %v4442_v58 = vpop.permute.xlu2 %4441  ;;  %v4473_v37 = vpop.permute.xlu1 %4472 }
 0x6fc   : > { %v4520_v43 = vmul.f32 %v4473_v37, %v4410_v50 }
 0x6fe   : > { %4552 = vrot.lane.b32.xlu2 %v4520_v43, %s5894_s22 }
 0x6ff   : > { %v4458_v51 = vpop.permute.xlu0 %4457 }
 0x703   : > { %v4454_v54 = vpop.permute.xlu2 %4453  ;;  %v10025_v0 = vpop.permute.xlu1 %4478 }
 0x704   : > { %v4523_v22 = vmul.f32 %v10025_v0, %v4422_v53 }
 0x706   : > { %4558 = vrot.lane.b32.xlu2 %v4523_v22, %s5894_s22 }
 0x707   : > { %v4470_v34 = vpop.permute.xlu0 %4469 }
 0x70b   : > { %v4466_v21 = vpop.permute.xlu2 %4465  ;;  %v10029_v7 = vpop.permute.xlu1 %4484 }
 0x70c   : > { %12290 = vst [vmem:[#allocation227_spill] sm:$0xff] %v10029_v7  ;;  %v4526_v40 = vmul.f32 %v10029_v7, %v4434_v35 }
 0x70e   : > { %4564 = vrot.lane.b32.xlu2 %v4526_v40, %s5894_s22 }
 0x70f   : > { %v10033_v50 = vpop.permute.xlu0 %4476 }
 0x710   : > { %v4522_v37 = vmul.f32 %v10033_v50, %v4418_v55 }
 0x712   : > { %4556 = vrot.lane.b32.xlu1 %v4522_v37, %s5894_s22 }
 0x713   : > { %v4475_v53 = vpop.permute.xlu2 %4474  ;;  %v10037_v22 = vpop.permute.xlu1 %4490 }
 0x714   : > { %12291 = vst [vmem:[#allocation228_spill] sm:$0xff] %v10037_v22  ;;  %v4521_v43 = vmul.f32 %v4475_v53, %v4414_v8  ;;  %v4529_v57 = vmul.f32 %v10037_v22, %v4446_v33 }
 0x716   : > { %4554 = vrot.lane.b32.xlu0 %v4521_v43, %s5894_s22  ;;  %4570 = vrot.lane.b32.xlu2 %v4529_v57, %s5894_s22 }
 0x717   : > { %v10042_v35 = vpop.permute.xlu0 %4482 }
 0x718   : > { %12292 = vst [vmem:[#allocation229_spill] sm:$0xff] %v10042_v35  ;;  %v4525_v15 = vmul.f32 %v10042_v35, %v4430_v31 }
 0x71a   : > { %4562 = vrot.lane.b32.xlu1 %v4525_v15, %s5894_s22 }
 0x71b   : > { %v10046_v40 = vpop.permute.xlu2 %4480  ;;  %v10048_v55 = vpop.permute.xlu1 %4496 }
 0x71c   : > { %12293 = vst [vmem:[#allocation230_spill] sm:$0xff] %v10046_v40  ;;  %v4524_v37 = vmul.f32 %v10046_v40, %v4426_v56  ;;  %v4532_v8 = vmul.f32 %v10048_v55, %v4458_v51 }
 0x71d   : > { %12294 = vst [vmem:[#allocation231_spill] sm:$0xff] %v10048_v55 }
 0x71e   : > { %4560 = vrot.lane.b32.xlu0 %v4524_v37, %s5894_s22  ;;  %4576 = vrot.lane.b32.xlu2 %v4532_v8, %s5894_s22 }
 0x71f   : > { %v10054_v33 = vpop.permute.xlu0 %4488 }
 0x720   : > { %12295 = vst [vmem:[#allocation232_spill] sm:$0xff] %v10054_v33  ;;  %v4528_v57 = vmul.f32 %v10054_v33, %v4442_v58 }
 0x722   : > { %4568 = vrot.lane.b32.xlu1 %v4528_v57, %s5894_s22 }
 0x723   : > { %v10058_v31 = vpop.permute.xlu2 %4486  ;;  %v10060_v53 = vpop.permute.xlu1 %4502 }
 0x724   : > { %12296 = vst [vmem:[#allocation233_spill] sm:$0xff] %v10058_v31  ;;  %v4527_v43 = vmul.f32 %v10058_v31, %v4438_v23  ;;  %v4535_v56 = vmul.f32 %v10060_v53, %v4470_v34 }
 0x725   : > { %12297 = vst [vmem:[#allocation234_spill] sm:$0xff] %v10060_v53 }
 0x726   : > { %4566 = vrot.lane.b32.xlu0 %v4527_v43, %s5894_s22  ;;  %4582 = vrot.lane.b32.xlu2 %v4535_v56, %s5894_s22 }
 0x727   : > { %v10066_v51 = vpop.permute.xlu0 %4494 }
 0x728   : > { %12298 = vst [vmem:[#allocation235_spill] sm:$0xff] %v10066_v51  ;;  %v4531_v15 = vmul.f32 %v10066_v51, %v4454_v54 }
 0x72a   : > { %4574 = vrot.lane.b32.xlu1 %v4531_v15, %s5894_s22 }
 0x72b   : > { %v10070_v58 = vpop.permute.xlu2 %4492 }
 0x72c   : > { %12299 = vst [vmem:[#allocation236_spill] sm:$0xff] %v10070_v58  ;;  %v4530_v37 = vmul.f32 %v10070_v58, %v4450_v19 }
 0x72e   : > { %4572 = vrot.lane.b32.xlu0 %v4530_v37, %s5894_s22  ;;  %4625 = vperm.xlu2 %5745, %v9013_v4   ;;  %v10124_v37 = vld [vmem:[%s5988_s15 + $0xc8] sm:$0xff] }
 0x72f   : > { %v10075_v23 = vpop.permute.xlu0 %4500 }
 0x730   : > { %12300 = vst [vmem:[#allocation237_spill] sm:$0xff] %v10075_v23  ;;  %v4534_v34 = vmul.f32 %v10075_v23, %v4466_v21 }
 0x732   : > { %4580 = vrot.lane.b32.xlu1 %v4534_v34, %s5894_s22  ;;  %v3661_v34 = vrot.slane %v10124_v37, 1 }
 0x733   : > { %v10079_v8 = vpop.permute.xlu2 %4498 }
 0x734   : > { %12301 = vst [vmem:[#allocation238_spill] sm:$0xff] %v10079_v8  ;;  %v4533_v54 = vmul.f32 %v10079_v8, %v4462_v48  ;;  %v5897_v48 = vmov 13  }
 0x736   : > { %4578 = vrot.lane.b32.xlu0 %v4533_v54, %s5894_s22  ;;  %4633 = vperm.xlu2 %5745, %v9027_v36   ;;  %v10128_v54 = vld [vmem:[%s5988_s15 + $0xd0] sm:$0x3] }
 0x73a   : > { %4621 = vperm.xlu1 %5744, %v9006_v17  }
 0x73e   : > { %4617 = vperm.xlu0 %5743, %v8989_v13   ;;  %4645 = vperm.xlu2 %5745, %v9045_v16  }
 0x742   : > { %4629 = vperm.xlu1 %5744, %v9021_v27  }
 0x746   : > { %4637 = vperm.xlu0 %5743, %v9034_v59   ;;  %4657 = vperm.xlu2 %5745, %v9064_v41  }
 0x74a   : > { %4641 = vperm.xlu1 %5744, %v9038_v42  }
 0x74e   : > { %4649 = vperm.xlu0 %5743, %v9052_v12   ;;  %4669 = vperm.xlu2 %5745, %v9085_v61  }
 0x752   : > { %4653 = vperm.xlu1 %5744, %v9056_v52  }
 0x756   : > { %4661 = vperm.xlu0 %5743, %v9072_v63   ;;  %5746 = vset.pattern.permute.xlu2 %v5897_v48 }
 0x757   : > { %4713 = vperm.xlu2 %5746, %v8989_v13  }
 0x758   : > { %v10096_v21 = vpop.permute.xlu2 %4552 }
 0x759   : > { %12302 = vst [vmem:[#allocation239_spill] sm:$0xff] %v10096_v21 }
 0x75a   : > { %4665 = vperm.xlu1 %5744, %v9077_v45  }
 0x75e   : > { %4673 = vperm.xlu0 %5743, %v9092_v24  }
 0x75f   : > { %4725 = vperm.xlu2 %5746, %v9021_v27  }
 0x760   : > { %v10101_v19 = vpop.permute.xlu2 %4558 }
 0x761   : > { %12303 = vst [vmem:[#allocation240_spill] sm:$0xff] %v10101_v19  ;;  %v10148_v19 = vld [vmem:[%s5988_s15 + $0xc0] sm:$0xff] }
 0x762   : > { %4677 = vperm.xlu1 %5744, %v9094_v28  }
 0x766   : > { %5747 = vset.pattern.permute.xlu0 %v5897_v48 }
 0x767   : > { %4717 = vperm.xlu0 %5747, %v9006_v17   ;;  %4733 = vperm.xlu2 %5746, %v9034_v59  }
 0x768   : > { %v10106_v57 = vpop.permute.xlu2 %4564 }
 0x769   : > { %12304 = vst [vmem:[#allocation241_spill] sm:$0xff] %v10106_v57 }
 0x76a   : > { %5748 = vset.pattern.permute.xlu1 %v5897_v48  ;;  %v3663_v48 = vrot.slane %v10128_v54, 1 }
 0x76b   : > { %4721 = vperm.xlu1 %5748, %v9013_v4  }
 0x76f   : > { %4737 = vperm.xlu0 %5747, %v9038_v42   ;;  %4745 = vperm.xlu2 %5746, %v9052_v12  }
 0x770   : > { %v10111_v43 = vpop.permute.xlu2 %4570 }
 0x771   : > { %12305 = vst [vmem:[#allocation242_spill] sm:$0xff] %v10111_v43  ;;  %v10135_v43 = vsel %vm2123_vm1, %v3661_v34, %v3663_v48 }
 0x772   : > { %12309 = vst [vmem:[#allocation246_spill] sm:$0xff] %v10135_v43 }
 0x773   : > { %4729 = vperm.xlu1 %5748, %v9027_v36  }
 0x777   : > { %4749 = vperm.xlu0 %5747, %v9056_v52   ;;  %4757 = vperm.xlu2 %5746, %v9072_v63  }
 0x778   : > { %v10116_v56 = vpop.permute.xlu2 %4576 }
 0x779   : > { %12306 = vst [vmem:[#allocation243_spill] sm:$0xff] %v10116_v56 }
 0x77b   : > { %4741 = vperm.xlu1 %5748, %v9045_v16  }
 0x77f   : > { %4761 = vperm.xlu0 %5747, %v9077_v45   ;;  %4769 = vperm.xlu2 %5746, %v9092_v24  }
 0x780   : > { %v10121_v15 = vpop.permute.xlu2 %4582 }
 0x781   : > { %12307 = vst [vmem:[#allocation244_spill] sm:$0xff] %v10121_v15 }
 0x783   : > { %4753 = vperm.xlu1 %5748, %v9064_v41  }
 0x784   : > { %v10132_v56 = vpop.permute.xlu1 %4556 }
 0x785   : > { %12308 = vst [vmem:[#allocation245_spill] sm:$0xff] %v10132_v56  ;;  %v3660_v56 = vrot.slane %v10148_v19, 1 }
 0x787   : > { %4773 = vperm.xlu0 %5747, %v9094_v28   ;;  %4778 = vrot.lane.b32.xlu2 %v10135_v43, %s5893_s21  ;;  %v10156_v62 = vsel %vm2123_vm1, %v3660_v56, %v3661_v34 }
 0x788   : > { %v10140_v15 = vpop.permute.xlu2 %4625  ;;  %v10142_v57 = vpop.permute.xlu0 %4554  ;;  %12315 = vst [vmem:[#allocation252_spill] sm:$0xff] %v10156_v62 }
 0x789   : > { %12310 = vst [vmem:[#allocation247_spill] sm:$0xff] %v10140_v15 }
 0x78a   : > { %12311 = vst [vmem:[#allocation248_spill] sm:$0xff] %v10142_v57 }
 0x78b   : > { %4765 = vperm.xlu1 %5748, %v9085_v61  }
 0x78c   : > { %v10145_v44 = vpop.permute.xlu1 %4562 }
 0x78d   : > { %12312 = vst [vmem:[#allocation249_spill] sm:$0xff] %v10145_v44 }
 0x790   : > { %v10151_v32 = vpop.permute.xlu2 %4633  ;;  %v10153_v48 = vpop.permute.xlu0 %4560 }
 0x791   : > { %12313 = vst [vmem:[#allocation250_spill] sm:$0xff] %v10151_v32 }
 0x792   : > { %12314 = vst [vmem:[#allocation251_spill] sm:$0xff] %v10153_v48 }
 0x793   : > { %4776 = vrot.lane.b32.xlu1 %v10156_v62, %s5893_s21 }
 0x794   : > { %v10160_v43 = vpop.permute.xlu1 %4568 }
 0x795   : > { %12316 = vst [vmem:[#allocation253_spill] sm:$0xff] %v10160_v43 }
 0x798   : > { %v10162_v15 = vpop.permute.xlu2 %4645  ;;  %v10164_v57 = vpop.permute.xlu0 %4566 }
 0x799   : > { %12317 = vst [vmem:[#allocation254_spill] sm:$0xff] %v10162_v15 }
 0x79a   : > { %12318 = vst [vmem:[#allocation255_spill] sm:$0xff] %v10164_v57 }
 0x79c   : > { %v10166_v44 = vpop.permute.xlu1 %4574 }
 0x7a0   : > { %v10168_v21 = vpop.permute.xlu2 %4657  ;;  %v10170_v49 = vpop.permute.xlu0 %4572 }
 0x7a1   : > { %12319 = vst [vmem:[#allocation256_spill] sm:$0xff] %v10168_v21 }
 0x7a2   : > { %12320 = vst [vmem:[#allocation257_spill] sm:$0xff] %v10170_v49 }
 0x7a4   : > { %v10172_v32 = vpop.permute.xlu1 %4580 }
 0x7a8   : > { %v10174_v48 = vpop.permute.xlu2 %4669  ;;  %v10176_v56 = vpop.permute.xlu0 %4578 }
 0x7a9   : > { %12321 = vst [vmem:[#allocation258_spill] sm:$0xff] %v10174_v48 }
 0x7aa   : > { %12322 = vst [vmem:[#allocation259_spill] sm:$0xff] %v10176_v56 }
 0x7ac   : > { %v10178_v34 = vpop.permute.xlu1 %4621 }
 0x7ad   : > { %12323 = vst [vmem:[#allocation260_spill] sm:$0xff] %v10178_v34 }
 0x7b0   : > { %v10180_v62 = vpop.permute.xlu0 %4617 }
 0x7b1   : > { %12324 = vst [vmem:[#allocation261_spill] sm:$0xff] %v10180_v62  ;;  %v4714_v43 = vpop.permute.xlu2 %4713 }
 0x7b2   : > { %v4782_v15 = vmul.f32 %v4714_v43, %v9825_v46 }
 0x7b4   : > { %4814 = vrot.lane.b32.xlu0 %v4782_v15, %s5894_s22  ;;  %v10184_v57 = vpop.permute.xlu1 %4629 }
 0x7b5   : > { %12325 = vst [vmem:[#allocation262_spill] sm:$0xff] %v10184_v57 }
 0x7b8   : > { %v10186_v21 = vpop.permute.xlu0 %4637 }
 0x7b9   : > { %12326 = vst [vmem:[#allocation263_spill] sm:$0xff] %v10186_v21  ;;  %v4726_v49 = vpop.permute.xlu2 %4725 }
 0x7ba   : > { %v4785_v8 = vmul.f32 %v4726_v49, %v9832_v5 }
 0x7bc   : > { %4820 = vrot.lane.b32.xlu0 %v4785_v8, %s5894_s22  ;;  %v10190_v48 = vpop.permute.xlu1 %4641 }
 0x7bd   : > { %12327 = vst [vmem:[#allocation264_spill] sm:$0xff] %v10190_v48  ;;  %v5898_v48 = vmov 14  }
 0x7be   : > { %5751 = vset.pattern.permute.xlu0 %v5898_v48  ;;  %5749 = vset.pattern.permute.xlu1 %v5898_v48 }
 0x7bf   : > { %5750 = vset.pattern.permute.xlu2 %v5898_v48 }
 0x7c0   : > { %v10192_v56 = vpop.permute.xlu0 %4649 }
 0x7c1   : > { %12328 = vst [vmem:[#allocation265_spill] sm:$0xff] %v10192_v56  ;;  %v4734_v15 = vpop.permute.xlu2 %4733 }
 0x7c4   : > { %v10194_v34 = vpop.permute.xlu1 %4653 }
 0x7c5   : > { %12329 = vst [vmem:[#allocation266_spill] sm:$0xff] %v10194_v34 }
 0x7c8   : > { %v10196_v62 = vpop.permute.xlu0 %4661 }
 0x7c9   : > { %v4746_v5 = vpop.permute.xlu2 %4745 }
 0x7ca   : > { %v4790_v48 = vmul.f32 %v4746_v5, %v9866_v47 }
 0x7cc   : > { %v10198_v46 = vpop.permute.xlu1 %4665 }
 0x7cd   : > { %12330 = vst [vmem:[#allocation267_spill] sm:$0xff] %v10198_v46 }
 0x7d0   : > { %v10200_v43 = vpop.permute.xlu0 %4673 }
 0x7d4   : > { %v10202_v57 = vpop.permute.xlu1 %4677 }
 0x7d5   : > { %12331 = vst [vmem:[#allocation268_spill] sm:$0xff] %v10202_v57  ;;  %v4758_v57 = vpop.permute.xlu2 %4757 }
 0x7d9   : > { %v4718_v21 = vpop.permute.xlu0 %4717 }
 0x7da   : > { %v4783_v49 = vmul.f32 %v4718_v21, %v9810_v60  ;;  %v4787_v60 = vmul.f32 %v4734_v15, %v9859_v11 }
 0x7dc   : > { %4816 = vrot.lane.b32.xlu1 %v4783_v49, %s5894_s22 }
 0x7dd   : > { %v4722_v8 = vpop.permute.xlu1 %4721 }
 0x7de   : > { %v4784_v56 = vmul.f32 %v4722_v8, %v9850_v39 }
 0x7e0   : > { %4818 = vrot.lane.b32.xlu2 %v4784_v56, %s5894_s22 }
 0x7e1   : > { %v4738_v34 = vpop.permute.xlu0 %4737 }
 0x7e2   : > { %v4788_v46 = vmul.f32 %v4738_v34, %v9840_v9 }
 0x7e4   : > { %4826 = vrot.lane.b32.xlu0 %v4788_v46, %s5894_s22  ;;  %v4770_v46 = vpop.permute.xlu2 %4769 }
 0x7e5   : > { %v4730_v23 = vpop.permute.xlu1 %4729 }
 0x7e6   : > { %v4786_v21 = vmul.f32 %v4730_v23, %v9813_v6 }
 0x7e8   : > { %4824 = vrot.lane.b32.xlu2 %v4787_v60, %s5894_s22  ;;  %4822 = vrot.lane.b32.xlu1 %v4786_v21, %s5894_s22  ;;  %v4793_v21 = vmul.f32 %v4758_v57, %v9873_v26 }
 0x7e9   : > { %v4750_v56 = vpop.permute.xlu0 %4749 }
 0x7ea   : > { %v4791_v49 = vmul.f32 %v4750_v56, %v9846_v38 }
 0x7ec   : > { %4832 = vrot.lane.b32.xlu0 %v4791_v49, %s5894_s22  ;;  %v10224_v49 = vpop.permute.xlu2 %4778 }
 0x7ed   : > { %v4742_v8 = vpop.permute.xlu1 %4741  ;;  %12332 = vst [vmem:[#allocation269_spill] sm:$0xff] %v10224_v49 }
 0x7ee   : > { %v4789_v34 = vmul.f32 %v4742_v8, %v9818_v29 }
 0x7f0   : > { %4830 = vrot.lane.b32.xlu2 %v4790_v48, %s5894_s22  ;;  %4828 = vrot.lane.b32.xlu1 %v4789_v34, %s5894_s22 }
 0x7f1   : > { %v4762_v23 = vpop.permute.xlu0 %4761 }
 0x7f2   : > { %v4794_v15 = vmul.f32 %v4762_v23, %v9855_v14 }
 0x7f4   : > { %4838 = vrot.lane.b32.xlu0 %v4794_v15, %s5894_s22  ;;  %v3764_v15 = vrot.slane %v10124_v37, 2 }
 0x7f5   : > { %v4754_v60 = vpop.permute.xlu1 %4753 }
 0x7f6   : > { %v4792_v56 = vmul.f32 %v4754_v60, %v9823_v25 }
 0x7f8   : > { %4836 = vrot.lane.b32.xlu2 %v4793_v21, %s5894_s22  ;;  %4834 = vrot.lane.b32.xlu1 %v4792_v56, %s5894_s22  ;;  %v3766_v21 = vrot.slane %v10128_v54, 2 }
 0x7f9   : > { %v4774_v5 = vpop.permute.xlu0 %4773 }
 0x7fa   : > { %v4797_v8 = vmul.f32 %v10224_v49, %v4774_v5  ;;  %v10260_v56 = vsel %vm2245_vm4, %v3764_v15, %v3766_v21 }
 0x7fb   : > { %12334 = vst [vmem:[#allocation271_spill] sm:$0xff] %v10260_v56 }
 0x7fc   : > { %4844 = vrot.lane.b32.xlu0 %v4797_v8, %s5894_s22 }
 0x7fd   : > { %v4766_v48 = vpop.permute.xlu1 %4765 }
 0x7fe   : > { %v4795_v34 = vmul.f32 %v4766_v48, %v9835_v10 }
 0x800   : > { %4840 = vrot.lane.b32.xlu1 %v4795_v34, %s5894_s22 }
 0x804   : > { %4887 = vperm.xlu0 %5751, %v9013_v4  }
 0x805   : > { %v10233_v57 = vpop.permute.xlu1 %4776 }
 0x806   : > { %v4796_v23 = vmul.f32 %v10233_v57, %v4770_v46  ;;  %v3763_v46 = vrot.slane %v10148_v19, 2 }
 0x808   : > { %4842 = vrot.lane.b32.xlu2 %v4796_v23, %s5894_s22  ;;  %4879 = vperm.xlu1 %5749, %v8989_v13   ;;  %v10250_v60 = vsel %vm2245_vm4, %v3763_v46, %v3764_v15  ;;  %v4179_v23 = vmul.f32 %v9742_v1, %v9776_v18  ;;  %v4691_v46 = vmul.f32 %v9583_v20, %v10196_v62  ;;  %v12335_v1 = vld [vmem:[#allocation188_spill] sm:$0xff] }
 0x809   : > { %12333 = vst [vmem:[#allocation270_spill] sm:$0xff] %v10250_v60  ;;  %v4182_v18 = vmul.f32 %v9784_v30, %v12335_v1  ;;  %v4694_v20 = vmul.f32 %v10148_v19, %v10200_v43 }
 0x80a   : > { %v4403_v54 = vadd.f32 %v10013_v3, %v4179_v23 }
 0x80b   : > { %v4406_v3 = vadd.f32 %v10022_v2, %v4182_v18 }
 0x80c   : > { %4907 = vperm.xlu0 %5751, %v9045_v16   ;;  %v4611_v21 = vadd.f32 %v10166_v44, %v4403_v54 }
 0x80d   : > { %v4614_v44 = vadd.f32 %v10172_v32, %v4406_v3  ;;  %v5899_v3 = vmov 15  }
 0x80f   : > { %v4710_v23 = vadd.f32 %v4694_v20, %v4614_v44 }
 0x810   : > { %4883 = vperm.xlu2 %5750, %v9006_v17   ;;  %4891 = vperm.xlu1 %5749, %v9021_v27  }
 0x814   : > { %4919 = vperm.xlu0 %5751, %v9064_v41  }
 0x818   : > { %4895 = vperm.xlu2 %5750, %v9027_v36   ;;  %4899 = vperm.xlu1 %5749, %v9034_v59  }
 0x81c   : > { %4931 = vperm.xlu0 %5751, %v9085_v61  }
 0x820   : > { %4903 = vperm.xlu2 %5750, %v9038_v42   ;;  %4911 = vperm.xlu1 %5749, %v9052_v12  }
 0x824   : > { %4942 = vrot.lane.b32.xlu0 %v10250_v60, %s5893_s21 }
 0x825   : > { %5752 = vset.pattern.permute.xlu0 %v5899_v3 }
 0x826   : > { %v10269_v48 = vpop.permute.xlu0 %4814 }
 0x828   : > { %4915 = vperm.xlu2 %5750, %v9056_v52   ;;  %4923 = vperm.xlu1 %5749, %v9072_v63  }
 0x82e   : > { %v10278_v15 = vpop.permute.xlu0 %4820 }
 0x830   : > { %4927 = vperm.xlu2 %5750, %v9077_v45   ;;  %4935 = vperm.xlu1 %5749, %v9092_v24  }
 0x838   : > { %4939 = vperm.xlu2 %5750, %v9094_v28   ;;  %4944 = vrot.lane.b32.xlu1 %v10260_v56, %s5893_s21  ;;  %v4707_v56 = vadd.f32 %v4691_v46, %v4611_v21 }
 0x839   : > { %5753 = vset.pattern.permute.xlu1 %v5899_v3 }
 0x83a   : > { %v10265_v5 = vpop.permute.xlu2 %4818 }
 0x840   : > { %5754 = vset.pattern.permute.xlu2 %v5899_v3 }
 0x842   : > { %v10267_v8 = vpop.permute.xlu2 %4824 }
 0x84a   : > { %v10271_v34 = vpop.permute.xlu2 %4830 }
 0x84e   : > { %v10281_v60 = vpop.permute.xlu1 %4816 }
 0x852   : > { %v4837_v49 = vpop.permute.xlu2 %4836 }
 0x853   : > { %v10283_v14 = vadd.f32 %v4837_v49, %v4707_v56 }
 0x856   : > { %v10285_v10 = vpop.permute.xlu0 %4826 }
 0x85a   : > { %v10287_v38 = vpop.permute.xlu1 %4822 }
 0x85e   : > { %v10294_v62 = vpop.permute.xlu0 %4832 }
 0x862   : > { %v4843_v54 = vpop.permute.xlu2 %4842  ;;  %v10297_v49 = vpop.permute.xlu1 %4828 }
 0x863   : > { %v10299_v56 = vadd.f32 %v4843_v54, %v4710_v23 }
 0x866   : > { %v10301_v46 = vpop.permute.xlu0 %4838 }
 0x86a   : > { %v4884_v21 = vpop.permute.xlu2 %4883  ;;  %v10303_v25 = vpop.permute.xlu1 %4834 }
 0x86b   : > { %v4949_v30 = vmul.f32 %v4884_v21, %v10025_v0 }
 0x86d   : > { %4982 = vrot.lane.b32.xlu0 %v4949_v30, %s5894_s22 }
 0x86e   : > { %v10307_v2 = vpop.permute.xlu0 %4844 }
 0x872   : > { %v4896_v43 = vpop.permute.xlu2 %4895  ;;  %v10309_v1 = vpop.permute.xlu1 %4840 }
 0x873   : > { %v4952_v32 = vmul.f32 %v4896_v43, %v10029_v7 }
 0x875   : > { %4988 = vrot.lane.b32.xlu0 %v4952_v32, %s5894_s22 }
 0x876   : > { %v4888_v18 = vpop.permute.xlu0 %4887 }
 0x877   : > { %v4950_v20 = vmul.f32 %v4888_v18, %v10046_v40 }
 0x879   : > { %4984 = vrot.lane.b32.xlu1 %v4950_v20, %s5894_s22 }
 0x87a   : > { %v4880_v0 = vpop.permute.xlu1 %4879  ;;  %v4904_v43 = vpop.permute.xlu2 %4903 }
 0x87b   : > { %v4948_v44 = vmul.f32 %v4880_v0, %v10033_v50  ;;  %v4954_v50 = vmul.f32 %v4904_v43, %v10054_v33  ;;  %v12354_v33 = vld [vmem:[#allocation240_spill] sm:$0xff] }
 0x87d   : > { %4980 = vrot.lane.b32.xlu2 %v4948_v44, %s5894_s22 }
 0x87e   : > { %v4908_v23 = vpop.permute.xlu0 %4907 }
 0x87f   : > { %v4955_v54 = vmul.f32 %v4908_v23, %v10037_v22  ;;  %v12347_v22 = vld [vmem:[#allocation172_spill] sm:$0xff] }
 0x881   : > { %4994 = vrot.lane.b32.xlu0 %v4955_v54, %s5894_s22 }
 0x882   : > { %v4892_v21 = vpop.permute.xlu1 %4891  ;;  %v4916_v0 = vpop.permute.xlu2 %4915 }
 0x883   : > { %v4951_v30 = vmul.f32 %v4892_v21, %v10042_v35  ;;  %v4957_v21 = vmul.f32 %v4916_v0, %v10066_v51  ;;  %v12353_v51 = vld [vmem:[#allocation262_spill] sm:$0xff] }
 0x885   : > { %4986 = vrot.lane.b32.xlu2 %v4951_v30, %s5894_s22 }
 0x886   : > { %v4920_v32 = vpop.permute.xlu0 %4919 }
 0x887   : > { %v4958_v18 = vmul.f32 %v4920_v32, %v10048_v55 }
 0x889   : > { %5000 = vrot.lane.b32.xlu0 %v4958_v18, %s5894_s22  ;;  %v12336_v18 = vld [vmem:[#allocation237_spill] sm:$0xff] }
 0x88a   : > { %v4900_v3 = vpop.permute.xlu1 %4899  ;;  %v4928_v43 = vpop.permute.xlu2 %4927 }
 0x88b   : > { %v4953_v20 = vmul.f32 %v4900_v3, %v10058_v31  ;;  %v4960_v3 = vmul.f32 %v4928_v43, %v12336_v18  ;;  %v5900_v43 = vmov 16   ;;  %v12352_v18 = vld [vmem:[#allocation260_spill] sm:$0xff]  ;;  %v10392_v31 = vld [vmem:[%s5988_s15 + $0x38] sm:$0xff] }
 0x88c   : > { %v4683_v40 = vmul.f32 %v10392_v31, %v12353_v51 }
 0x88d   : > { %4992 = vrot.lane.b32.xlu2 %v4954_v50, %s5894_s22  ;;  %4990 = vrot.lane.b32.xlu1 %v4953_v20, %s5894_s22  ;;  %v12337_v50 = vld [vmem:[#allocation238_spill] sm:$0xff] }
 0x88e   : > { %v4932_v44 = vpop.permute.xlu0 %4931 }
 0x88f   : > { %v4961_v23 = vmul.f32 %v4932_v44, %v10060_v53 }
 0x891   : > { %5006 = vrot.lane.b32.xlu0 %v4961_v23, %s5894_s22 }
 0x892   : > { %v4912_v54 = vpop.permute.xlu1 %4911 }
 0x893   : > { %v4956_v30 = vmul.f32 %v4912_v54, %v10070_v58  ;;  %v4940_v54 = vpop.permute.xlu2 %4939 }
 0x895   : > { %4998 = vrot.lane.b32.xlu2 %v4957_v21, %s5894_s22  ;;  %4996 = vrot.lane.b32.xlu1 %v4956_v30, %s5894_s22 }
 0x896   : > { %v10338_v44 = vpop.permute.xlu0 %4942 }
 0x897   : > { %12338 = vst [vmem:[#allocation188_spill] sm:$0xff] %v10338_v44 }
 0x899   : > { %5045 = vperm.xlu0 %5752, %v8989_v13  }
 0x89a   : > { %v4924_v32 = vpop.permute.xlu1 %4923 }
 0x89b   : > { %v4959_v20 = vmul.f32 %v4924_v32, %v12337_v50  ;;  %v10362_v32 = vld [vmem:[%s5988_s15] sm:$0xff] }
 0x89c   : > { %12340 = vst [vmem:[#allocation273_spill] sm:$0xff] %v10362_v32 }
 0x89d   : > { %5004 = vrot.lane.b32.xlu2 %v4960_v3, %s5894_s22  ;;  %5002 = vrot.lane.b32.xlu1 %v4959_v20, %s5894_s22  ;;  %v12341_v3 = vld [vmem:[#allocation168_spill] sm:$0xff] }
 0x89e   : > { %v4168_v20 = vmul.f32 %v10362_v32, %v12341_v3  ;;  %v10382_v3 = vld [vmem:[%s5988_s15 + $0x8] sm:$0xff] }
 0x8a1   : > { %5065 = vperm.xlu0 %5752, %v9034_v59  }
 0x8a2   : > { %v4936_v0 = vpop.permute.xlu1 %4935 }
 0x8a3   : > { %v4962_v23 = vmul.f32 %v10338_v44, %v4936_v0  ;;  %v12342_v0 = vld [vmem:[#allocation202_spill] sm:$0xff]  ;;  %v12345_v44 = vld [vmem:[#allocation239_spill] sm:$0xff] }
 0x8a5   : > { %5008 = vrot.lane.b32.xlu1 %v4962_v23, %s5894_s22  ;;  %v4392_v23 = vadd.f32 %v12342_v0, %v4168_v20  ;;  %v12349_v20 = vld [vmem:[#allocation157_spill] sm:$0xff] }
 0x8a6   : > { %v4169_v0 = vmul.f32 %v10382_v3, %v12349_v20 }
 0x8a7   : > { %v4600_v55 = vadd.f32 %v12345_v44, %v4392_v23  ;;  %v12350_v23 = vld [vmem:[#allocation205_spill] sm:$0xff] }
 0x8a9   : > { %5077 = vperm.xlu0 %5752, %v9052_v12  }
 0x8aa   : > { %v10344_v21 = vpop.permute.xlu1 %4944 }
 0x8ab   : > { %12339 = vst [vmem:[#allocation272_spill] sm:$0xff] %v10344_v21  ;;  %v4963_v30 = vmul.f32 %v10344_v21, %v4940_v54  ;;  %v10368_v54 = vld [vmem:[%s5988_s15 + $0x18] sm:$0xff]  ;;  %v10375_v21 = vld [vmem:[%s5988_s15 + $0x20] sm:$0xff] }
 0x8ac   : > { %12343 = vst [vmem:[#allocation168_spill] sm:$0xff] %v10368_v54  ;;  %v4171_v58 = vmul.f32 %v10375_v21, %v12347_v22  ;;  %v4681_v22 = vmul.f32 %v10375_v21, %v12352_v18 }
 0x8ad   : > { %5010 = vrot.lane.b32.xlu2 %v4963_v30, %s5894_s22  ;;  %5049 = vperm.xlu1 %5753, %v9006_v17   ;;  %v12344_v30 = vld [vmem:[#allocation261_spill] sm:$0xff]  ;;  %12346 = vst [vmem:[#allocation202_spill] sm:$0xff] %v10375_v21 }
 0x8ae   : > { %v4680_v53 = vmul.f32 %v10368_v54, %v12344_v30  ;;  %12348 = vst [vmem:[#allocation261_spill] sm:$0xff] %v10382_v3  ;;  %v12351_v30 = vld [vmem:[#allocation211_spill] sm:$0xff]  ;;  %v12355_v3 = vld [vmem:[#allocation248_spill] sm:$0xff] }
 0x8af   : > { %v4393_v32 = vadd.f32 %v12351_v30, %v4169_v0  ;;  %v12357_v30 = vld [vmem:[#allocation160_spill] sm:$0xff] }
 0x8b0   : > { %v4696_v50 = vadd.f32 %v4680_v53, %v4600_v55  ;;  %v4395_v55 = vadd.f32 %v12350_v23, %v4171_v58  ;;  %v10402_v58 = vld [vmem:[%s5988_s15 + $0x30] sm:$0xff]  ;;  %v10407_v23 = vld [vmem:[%s5988_s15 + $0x48] sm:$0xff] }
 0x8b1   : > { %5089 = vperm.xlu0 %5752, %v9072_v63   ;;  %v4601_v35 = vadd.f32 %v12355_v3, %v4393_v32  ;;  %v4174_v51 = vmul.f32 %v10407_v23, %v12357_v30  ;;  %v10421_v30 = vld [vmem:[%s5988_s15 + $0x60] sm:$0xff] }
 0x8b2   : > { %v4862_v44 = vadd.f32 %v10269_v48, %v4696_v50  ;;  %v4603_v20 = vadd.f32 %v12354_v33, %v4395_v55  ;;  %v12356_v48 = vld [vmem:[#allocation186_spill] sm:$0xff]  ;;  %v12358_v33 = vld [vmem:[#allocation216_spill] sm:$0xff] }
 0x8b3   : > { %v4172_v50 = vmul.f32 %v10402_v58, %v12356_v48  ;;  %v4697_v18 = vadd.f32 %v4681_v22, %v4601_v35  ;;  %v12360_v35 = vld [vmem:[#allocation250_spill] sm:$0xff]  ;;  %v12361_v48 = vld [vmem:[#allocation251_spill] sm:$0xff] }
 0x8b4   : > { %v4699_v0 = vadd.f32 %v4683_v40, %v4603_v20  ;;  %v12359_v40 = vld [vmem:[#allocation208_spill] sm:$0xff] }
 0x8b5   : > { %5053 = vperm.xlu2 %5754, %v9013_v4   ;;  %5057 = vperm.xlu1 %5753, %v9021_v27   ;;  %v4863_v3 = vadd.f32 %v10281_v60, %v4697_v18  ;;  %v4398_v55 = vadd.f32 %v12359_v40, %v4174_v51  ;;  %v12363_v18 = vld [vmem:[#allocation183_spill] sm:$0xff] }
 0x8b6   : > { %v4865_v32 = vadd.f32 %v10278_v15, %v4699_v0  ;;  %v4170_v51 = vmul.f32 %v10368_v54, %v12363_v18  ;;  %v12374_v54 = vld [vmem:[#allocation242_spill] sm:$0xff] }
 0x8b9   : > { %5101 = vperm.xlu0 %5752, %v9092_v24  }
 0x8bd   : > { %5061 = vperm.xlu2 %5754, %v9027_v36   ;;  %5069 = vperm.xlu1 %5753, %v9038_v42  }
 0x8c1   : > { %5756 = vset.pattern.permute.xlu0 %v5900_v43 }
 0x8c2   : > { %5145 = vperm.xlu0 %5756, %v9006_v17  }
 0x8c5   : > { %5073 = vperm.xlu2 %5754, %v9045_v16   ;;  %5081 = vperm.xlu1 %5753, %v9056_v52  }
 0x8ca   : > { %5165 = vperm.xlu0 %5756, %v9038_v42  }
 0x8cd   : > { %5085 = vperm.xlu2 %5754, %v9064_v41   ;;  %5093 = vperm.xlu1 %5753, %v9077_v45  }
 0x8d2   : > { %5177 = vperm.xlu0 %5756, %v9056_v52  }
 0x8d5   : > { %5097 = vperm.xlu2 %5754, %v9085_v61   ;;  %5105 = vperm.xlu1 %5753, %v9094_v28  }
 0x8d7   : > { %v4981_v53 = vpop.permute.xlu2 %4980 }
 0x8d8   : > { %v10396_v7 = vadd.f32 %v4981_v53, %v4862_v44  ;;  %v4396_v44 = vadd.f32 %v12358_v33, %v4172_v50  ;;  %v4684_v53 = vmul.f32 %v10407_v23, %v12360_v35  ;;  %v12362_v50 = vld [vmem:[#allocation264_spill] sm:$0xff]  ;;  %v12364_v33 = vld [vmem:[#allocation241_spill] sm:$0xff]  ;;  %v12365_v35 = vld [vmem:[#allocation214_spill] sm:$0xff] }
 0x8d9   : > { %v4686_v15 = vmul.f32 %v10421_v30, %v12362_v50  ;;  %v4606_v40 = vadd.f32 %v12364_v33, %v4398_v55  ;;  %v4394_v21 = vadd.f32 %v12365_v35, %v4170_v51  ;;  %v10447_v51 = vld [vmem:[%s5988_s15 + $0x50] sm:$0xff]  ;;  %v12370_v33 = vld [vmem:[#allocation189_spill] sm:$0xff] }
 0x8da   : > { %5189 = vperm.xlu0 %5756, %v9077_v45  }
 0x8db   : > { %v4702_v45 = vadd.f32 %v4686_v15, %v4606_v40 }
 0x8dd   : > { %5755 = vset.pattern.permute.xlu2 %v5900_v43  ;;  %5757 = vset.pattern.permute.xlu1 %v5900_v43  ;;  %v4604_v43 = vadd.f32 %v12361_v48, %v4396_v44  ;;  %v12366_v44 = vld [vmem:[#allocation247_spill] sm:$0xff]  ;;  %v4868_v18 = vadd.f32 %v10285_v10, %v4702_v45 }
 0x8de   : > { %5141 = vperm.xlu2 %5755, %v8989_v13   ;;  %5149 = vperm.xlu1 %5757, %v9013_v4   ;;  %v4682_v48 = vmul.f32 %v10402_v58, %v12366_v44  ;;  %v10453_v44 = vld [vmem:[%s5988_s15 + $0x80] sm:$0xff]  ;;  %v12387_v13 = vld [vmem:[#allocation177_spill] sm:$0xff] }
 0x8df   : > { %v4987_v22 = vpop.permute.xlu2 %4986  ;;  %v4983_v20 = vpop.permute.xlu0 %4982  ;;  %v4700_v50 = vadd.f32 %v4684_v53, %v4604_v43  ;;  %v4175_v53 = vmul.f32 %v10447_v51, %v12370_v33  ;;  %v12371_v43 = vld [vmem:[#allocation212_spill] sm:$0xff] }
 0x8e0   : > { %v10425_v60 = vadd.f32 %v4987_v22, %v4865_v32  ;;  %v10427_v0 = vadd.f32 %v4983_v20, %v4863_v3  ;;  %v10437_v32 = vld [vmem:[%s5988_s15 + $0x68] sm:$0xff]  ;;  %v12368_v22 = vld [vmem:[#allocation164_spill] sm:$0xff]  ;;  %v12369_v20 = vld [vmem:[#allocation245_spill] sm:$0xff] }
 0x8e1   : > { %12367 = vst [vmem:[#allocation239_spill] sm:$0xff] %v10437_v32  ;;  %v4177_v3 = vmul.f32 %v10437_v32, %v12368_v22  ;;  %v4602_v52 = vadd.f32 %v12369_v20, %v4394_v21  ;;  %v4866_v55 = vadd.f32 %v10287_v38, %v4700_v50  ;;  %v12372_v21 = vld [vmem:[#allocation266_spill] sm:$0xff]  ;;  %v12373_v22 = vld [vmem:[#allocation220_spill] sm:$0xff] }
 0x8e2   : > { %5201 = vperm.xlu0 %5756, %v9094_v28   ;;  %v4689_v45 = vmul.f32 %v10453_v44, %v12372_v21  ;;  %v4399_v20 = vadd.f32 %v12373_v22, %v4175_v53  ;;  %v12375_v28 = vld [vmem:[#allocation254_spill] sm:$0xff] }
 0x8e3   : > { %v4401_v15 = vadd.f32 %v12371_v43, %v4177_v3  ;;  %v4698_v10 = vadd.f32 %v4682_v48, %v4602_v52  ;;  %v4687_v42 = vmul.f32 %v10437_v32, %v12375_v28  ;;  %v10470_v48 = vld [vmem:[%s5988_s15 + $0x90] sm:$0xff] }
 0x8e4   : > { %12377 = vst [vmem:[#allocation172_spill] sm:$0xff] %v10470_v48 }
 0x8e5   : > { %v4609_v33 = vadd.f32 %v12374_v54, %v4401_v15  ;;  %v4864_v3 = vadd.f32 %v10265_v5, %v4698_v10  ;;  %v10478_v5 = vld [vmem:[%s5988_s15 + $0x78] sm:$0xff]  ;;  %v12379_v54 = vld [vmem:[#allocation190_spill] sm:$0xff] }
 0x8e6   : > { %5153 = vperm.xlu2 %5755, %v9021_v27   ;;  %5157 = vperm.xlu1 %5757, %v9027_v36   ;;  %v12376_v36 = vld [vmem:[#allocation255_spill] sm:$0xff]  ;;  %v4178_v28 = vmul.f32 %v10478_v5, %v12379_v54  ;;  %v12380_v15 = vld [vmem:[#allocation217_spill] sm:$0xff]  ;;  %v12385_v54 = vld [vmem:[#allocation256_spill] sm:$0xff] }
 0x8e7   : > { %v4993_v40 = vpop.permute.xlu2 %4992  ;;  %v4989_v35 = vpop.permute.xlu0 %4988  ;;  %v4607_v27 = vadd.f32 %v12376_v36, %v4399_v20  ;;  %v4705_v21 = vadd.f32 %v4689_v45, %v4609_v33  ;;  %v12382_v45 = vld [vmem:[#allocation267_spill] sm:$0xff]  ;;  %v12383_v20 = vld [vmem:[#allocation224_spill] sm:$0xff] }
 0x8e8   : > { %v10457_v38 = vadd.f32 %v4993_v40, %v4868_v18  ;;  %v10459_v50 = vadd.f32 %v4989_v35, %v4866_v55  ;;  %v12378_v18 = vld [vmem:[#allocation167_spill] sm:$0xff]  ;;  %v4402_v33 = vadd.f32 %v12383_v20, %v4178_v28 }
 0x8e9   : > { %v4180_v55 = vmul.f32 %v10470_v48, %v12378_v18  ;;  %v4871_v53 = vadd.f32 %v10294_v62, %v4705_v21  ;;  %v10484_v35 = vld [vmem:[%s5988_s15 + $0xa8] sm:$0xff]  ;;  %v4703_v22 = vadd.f32 %v4687_v42, %v4607_v27  ;;  %v4173_v27 = vmul.f32 %v10392_v31, %v12387_v13  ;;  %v12392_v13 = vld [vmem:[#allocation226_spill] sm:$0xff] }
 0x8ea   : > { %12381 = vst [vmem:[#allocation157_spill] sm:$0xff] %v10484_v35  ;;  %v4692_v10 = vmul.f32 %v10484_v35, %v12382_v45 }
 0x8eb   : > { %v4985_v43 = vpop.permute.xlu1 %4984  ;;  %v4404_v40 = vadd.f32 %v12380_v15, %v4180_v55  ;;  %v4869_v21 = vadd.f32 %v10297_v49, %v4703_v22  ;;  %v12386_v55 = vld [vmem:[#allocation257_spill] sm:$0xff] }
 0x8ec   : > { %v10467_v52 = vadd.f32 %v4985_v43, %v4864_v3  ;;  %v12384_v3 = vld [vmem:[#allocation243_spill] sm:$0xff]  ;;  %v4610_v15 = vadd.f32 %v12386_v55, %v4402_v33  ;;  %v10504_v49 = vld [vmem:[%s5988_s15 + $0x98] sm:$0xff] }
 0x8ed   : > { %v4612_v43 = vadd.f32 %v12384_v3, %v4404_v40  ;;  %12388 = vst [vmem:[#allocation205_spill] sm:$0xff] %v10504_v49  ;;  %v12390_v40 = vld [vmem:[#allocation218_spill] sm:$0xff] }
 0x8ee   : > { %5161 = vperm.xlu2 %5755, %v9034_v59   ;;  %5169 = vperm.xlu1 %5757, %v9045_v16   ;;  %v4690_v59 = vmul.f32 %v10470_v48, %v12385_v54  ;;  %v4397_v45 = vadd.f32 %v12390_v40, %v4173_v27  ;;  %v12395_v54 = vld [vmem:[#allocation258_spill] sm:$0xff] }
 0x8ef   : > { %v4999_v36 = vpop.permute.xlu2 %4998  ;;  %v4708_v17 = vadd.f32 %v4692_v10, %v4612_v43  ;;  %v12391_v10 = vld [vmem:[#allocation263_spill] sm:$0xff] }
 0x8f0   : > { %v10488_v62 = vadd.f32 %v4999_v36, %v4871_v53  ;;  %v12389_v53 = vld [vmem:[#allocation191_spill] sm:$0xff]  ;;  %v4685_v22 = vmul.f32 %v10447_v51, %v12391_v10  ;;  %v4706_v20 = vadd.f32 %v4690_v59, %v4610_v15  ;;  %v12397_v59 = vld [vmem:[#allocation173_spill] sm:$0xff] }
 0x8f1   : > { %v4874_v42 = vadd.f32 %v10301_v46, %v4708_v17  ;;  %v4181_v28 = vmul.f32 %v10504_v49, %v12389_v53  ;;  %v12393_v46 = vld [vmem:[#allocation249_spill] sm:$0xff]  ;;  %v12396_v53 = vld [vmem:[#allocation259_spill] sm:$0xff] }
 0x8f2   : > { %v4605_v3 = vadd.f32 %v12393_v46, %v4397_v45  ;;  %v4872_v43 = vadd.f32 %v10303_v25, %v4706_v20  ;;  %v12400_v20 = vld [vmem:[#allocation222_spill] sm:$0xff] }
 0x8f3   : > { %v4995_v18 = vpop.permute.xlu0 %4994  ;;  %v4405_v17 = vadd.f32 %v12392_v13, %v4181_v28 }
 0x8f4   : > { %v10496_v16 = vadd.f32 %v4995_v18, %v4869_v21  ;;  %v10517_v18 = vld [vmem:[%s5988_s15 + $0xb0] sm:$0xff]  ;;  %v4701_v40 = vadd.f32 %v4685_v22, %v4605_v3 }
 0x8f5   : > { %12394 = vst [vmem:[#allocation211_spill] sm:$0xff] %v10517_v18  ;;  %v4693_v55 = vmul.f32 %v10517_v18, %v12395_v54  ;;  %v4613_v27 = vadd.f32 %v12396_v53, %v4405_v17  ;;  %v4183_v15 = vmul.f32 %v10517_v18, %v12397_v59  ;;  %v12401_v17 = vld [vmem:[#allocation265_spill] sm:$0xff]  ;;  %v12402_v3 = vld [vmem:[#allocation268_spill] sm:$0xff] }
 0x8f6   : > { %5173 = vperm.xlu2 %5755, %v9052_v12   ;;  %5181 = vperm.xlu1 %5757, %v9064_v41   ;;  %v4867_v25 = vadd.f32 %v10267_v8, %v4701_v40  ;;  %v4688_v46 = vmul.f32 %v10478_v5, %v12401_v17  ;;  %v10540_v53 = vld [vmem:[%s5988_s15 + $0xd8] sm:$0xff]  ;;  %v12403_v40 = vld [vmem:[#allocation244_spill] sm:$0xff] }
 0x8f7   : > { %v5005_v36 = vpop.permute.xlu2 %5004  ;;  %v3962_v8 = vrot.slane %v10540_v53, 1 }
 0x8f8   : > { %v10511_v33 = vadd.f32 %v5005_v36, %v4874_v42  ;;  %v12398_v42 = vld [vmem:[#allocation181_spill] sm:$0xff] }
 0x8f9   : > { %v4176_v28 = vmul.f32 %v10421_v30, %v12398_v42  ;;  %v12399_v36 = vld [vmem:[#allocation221_spill] sm:$0xff] }
 0x8fa   : > { %v4407_v45 = vadd.f32 %v12399_v36, %v4183_v15  ;;  %v12404_v42 = vld [vmem:[#allocation253_spill] sm:$0xff]  ;;  %v10547_v36 = vld [vmem:[%s5988_s15 + $0xe0] sm:$0xff] }
 0x8fb   : > { %v5001_v21 = vpop.permute.xlu0 %5000  ;;  %v4400_v13 = vadd.f32 %v12400_v20, %v4176_v28  ;;  %v3963_v20 = vrot.slane %v10547_v36, 1 }
 0x8fc   : > { %v10522_v10 = vadd.f32 %v5001_v21, %v4872_v43  ;;  %v4695_v43 = vmul.f32 %v10124_v37, %v12402_v3  ;;  %v4709_v21 = vadd.f32 %v4693_v55, %v4613_v27  ;;  %v4615_v59 = vadd.f32 %v12403_v40, %v4407_v45 }
 0x8fd   : > { %v4608_v15 = vadd.f32 %v12404_v42, %v4400_v13 }
 0x8fe   : > { %5185 = vperm.xlu2 %5755, %v9072_v63   ;;  %5193 = vperm.xlu1 %5757, %v9085_v61   ;;  %v4875_v28 = vadd.f32 %v10309_v1, %v4709_v21  ;;  %v4711_v55 = vadd.f32 %v4695_v43, %v4615_v59  ;;  %v10563_v43 = vld [vmem:[%s5988_s15 + $0xe8] sm:$0x3] }
 0x8ff   : > { %v4991_v22 = vpop.permute.xlu1 %4990  ;;  %v4704_v3 = vadd.f32 %v4688_v46, %v4608_v15  ;;  %12407 = vst [vmem:[#allocation240_spill] sm:$0xff] %v10563_v43  ;;  %v3965_v40 = vrot.slane %v10563_v43, 1 }
 0x900   : > { %v10537_v54 = vadd.f32 %v4991_v22, %v4867_v25  ;;  %v10553_v25 = vsel %vm2123_vm1, %v3962_v8, %v3963_v20  ;;  %v4877_v45 = vadd.f32 %v10307_v2, %v4711_v55 }
 0x901   : > { %12405 = vst [vmem:[#allocation260_spill] sm:$0xff] %v10553_v25  ;;  %v4870_v22 = vadd.f32 %v10271_v34, %v4704_v3  ;;  %v10567_v59 = vsel %vm2123_vm1, %v3963_v20, %v3965_v40  ;;  %vm5489_vm1 = vcmask 64512  }
 0x902   : > { %12408 = vst [vmem:[#allocation248_spill] sm:$0xff] %v10567_v59 }
 0x903   : > { %v5007_v17 = vpop.permute.xlu0 %5006 }
 0x904   : > { %v10550_v27 = vadd.f32 %v5007_v17, %v4875_v28 }
 0x906   : > { %5197 = vperm.xlu2 %5755, %v9092_v24   ;;  %5204 = vrot.lane.b32.xlu1 %v10553_v25, %s5893_s21 }
 0x907   : > { %v5011_v1 = vpop.permute.xlu2 %5010  ;;  %v4997_v13 = vpop.permute.xlu1 %4996 }
 0x908   : > { %v10560_v21 = vadd.f32 %v5011_v1, %v4877_v45  ;;  %v5036_v46 = vadd.f32 %v4997_v13, %v4870_v22 }
 0x90a   : > { %12406 = vst [vmem:[#allocation262_spill] sm:$0xff] %v10560_v21 }
 0x90b   : > { %v5046_v8 = vpop.permute.xlu0 %5045 }
 0x90c   : > { %v5108_v63 = vmul.f32 %v10402_v58, %v5046_v8 }
 0x90e   : > { %5206 = vrot.lane.b32.xlu2 %v10567_v59, %s5893_s21 }
 0x90f   : > { %v5054_v34 = vpop.permute.xlu2 %5053  ;;  %v5003_v2 = vpop.permute.xlu1 %5002 }
 0x910   : > { %v10572_v42 = vadd.f32 %v5003_v2, %v10283_v14  ;;  %v12409_v14 = vld [vmem:[#allocation193_spill] sm:$0xff] }
 0x913   : > { %v5066_v15 = vpop.permute.xlu0 %5065 }
 0x917   : > { %v5062_v28 = vpop.permute.xlu2 %5061  ;;  %v5009_v17 = vpop.permute.xlu1 %5008 }
 0x918   : > { %v10575_v3 = vadd.f32 %v5009_v17, %v10299_v56 }
 0x91b   : > { %v5078_v55 = vpop.permute.xlu0 %5077 }
 0x91f   : > { %v5074_v22 = vpop.permute.xlu2 %5073  ;;  %v5050_v45 = vpop.permute.xlu1 %5049 }
 0x923   : > { %v5090_v1 = vpop.permute.xlu0 %5089 }
 0x927   : > { %v5086_v20 = vpop.permute.xlu2 %5085  ;;  %v5058_v13 = vpop.permute.xlu1 %5057 }
 0x92b   : > { %v5102_v40 = vpop.permute.xlu0 %5101 }
 0x92f   : > { %v10577_v25 = vpop.permute.xlu2 %5097  ;;  %v10579_v59 = vpop.permute.xlu1 %5069 }
 0x934   : > { %v5146_v43 = vpop.permute.xlu0 %5145 }
 0x935   : > { %v5211_v2 = vmul.f32 %v5146_v43, %v12409_v14  ;;  %v10593_v43 = vadd.f32 %v5108_v63, %v10396_v7  ;;  %v5110_v14 = vmul.f32 %v10407_v23, %v5054_v34 }
 0x937   : > { %5244 = vrot.lane.b32.xlu1 %v5211_v2, %s5894_s22  ;;  %v10583_v24 = vpop.permute.xlu1 %5081  ;;  %v5113_v2 = vmul.f32 %v10437_v32, %v5066_v15 }
 0x938   : > { %v5142_v56 = vpop.permute.xlu2 %5141 }
 0x939   : > { %v5210_v17 = vmul.f32 %v5142_v56, %v9850_v39 }
 0x93b   : > { %5242 = vrot.lane.b32.xlu0 %v5210_v17, %s5894_s22  ;;  %v10601_v17 = vadd.f32 %v5110_v14, %v10467_v52  ;;  %v5901_v52 = vmov 17  }
 0x93c   : > { %v5166_v21 = vpop.permute.xlu0 %5165  ;;  %5760 = vset.pattern.permute.xlu0 %v5901_v52  ;;  %5758 = vset.pattern.permute.xlu1 %v5901_v52 }
 0x93d   : > { %v5216_v8 = vmul.f32 %v5166_v21, %v9866_v47  ;;  %5759 = vset.pattern.permute.xlu2 %v5901_v52  ;;  %v5115_v21 = vmul.f32 %v10453_v44, %v5074_v22  ;;  %v12413_v52 = vld [vmem:[#allocation196_spill] sm:$0xff] }
 0x93f   : > { %v10588_v12 = vpop.permute.xlu1 %5093 }
 0x940   : > { %v5154_v61 = vpop.permute.xlu2 %5153 }
 0x941   : > { %v5213_v41 = vmul.f32 %v5154_v61, %v9859_v11  ;;  %v10605_v61 = vadd.f32 %v5113_v2, %v10537_v54  ;;  %v5116_v11 = vmul.f32 %v10470_v48, %v5078_v55 }
 0x943   : > { %5248 = vrot.lane.b32.xlu0 %v5213_v41, %s5894_s22  ;;  %v5112_v41 = vmul.f32 %v10421_v30, %v5062_v28  ;;  %v10616_v54 = vadd.f32 %v5116_v11, %v5036_v46  ;;  %v5109_v28 = vmul.f32 %v10392_v31, %v5050_v45  ;;  %v10627_v46 = vadd.f32 %v5115_v21, %v10496_v16 }
 0x944   : > { %v5178_v63 = vpop.permute.xlu0 %5177 }
 0x945   : > { %v5219_v15 = vmul.f32 %v5178_v63, %v9873_v26  ;;  %v10612_v47 = vadd.f32 %v5112_v41, %v10459_v50  ;;  %v5119_v26 = vmul.f32 %v10517_v18, %v5090_v1  ;;  %v12410_v1 = vld [vmem:[#allocation192_spill] sm:$0xff] }
 0x947   : > { %v10597_v39 = vpop.permute.xlu1 %5105  ;;  %v10633_v22 = vadd.f32 %v5119_v26, %v10572_v42 }
 0x948   : > { %v5162_v56 = vpop.permute.xlu2 %5161 }
 0x949   : > { %v5215_v14 = vmul.f32 %v5162_v56, %v9818_v29  ;;  %v5118_v29 = vmul.f32 %v10484_v35, %v5086_v20  ;;  %v5121_v20 = vmul.f32 %v10124_v37, %v10577_v25  ;;  %v5117_v37 = vmul.f32 %v10504_v49, %v10583_v24  ;;  %v12416_v24 = vld [vmem:[#allocation128_spill] sm:$0xff] }
 0x94b   : > { %5254 = vrot.lane.b32.xlu0 %v5216_v8, %s5894_s22  ;;  %v10643_v11 = vadd.f32 %v5118_v29, %v10522_v10  ;;  %v10658_v26 = vadd.f32 %v5121_v20, %v10550_v27  ;;  %v12418_v29 = vld [vmem:[#allocation116_spill] sm:$0xff]  ;;  %v12430_v20 = vld [vmem:[#allocation127_spill] sm:$0xff] }
 0x950   : > { %v5174_v7 = vpop.permute.xlu2 %5173  ;;  %v5150_v34 = vpop.permute.xlu1 %5149 }
 0x951   : > { %v5212_v32 = vmul.f32 %v5150_v34, %v9813_v6  ;;  %v5190_v6 = vpop.permute.xlu0 %5189  ;;  %v5218_v56 = vmul.f32 %v5174_v7, %v12410_v1  ;;  %v12412_v7 = vld [vmem:[#allocation194_spill] sm:$0xff] }
 0x952   : > { %v5222_v8 = vmul.f32 %v5190_v6, %v10233_v57  ;;  %v12411_v57 = vld [vmem:[#allocation195_spill] sm:$0xff]  ;;  %v5133_v6 = vadd.f32 %v5117_v37, %v10488_v62  ;;  %v5123_v62 = vmul.f32 %v10547_v36, %v10597_v39  ;;  %v12426_v1 = vld [vmem:[#allocation122_spill] sm:$0xff] }
 0x953   : > { %5246 = vrot.lane.b32.xlu2 %v5212_v32, %s5894_s22  ;;  %5260 = vrot.lane.b32.xlu0 %v5219_v15, %s5894_s22  ;;  %v10624_v32 = vadd.f32 %v5109_v28, %v10427_v0  ;;  %v5122_v0 = vmul.f32 %v10540_v53, %v5102_v40 }
 0x955   : > { %v10648_v42 = vadd.f32 %v5122_v0, %v10575_v3  ;;  %v4065_v0 = vrot.slane %v10540_v53, 2  ;;  %v12431_v53 = vld [vmem:[#allocation240_spill] sm:$0xff] }
 0x958   : > { %v5186_v55 = vpop.permute.xlu2 %5185  ;;  %v5158_v50 = vpop.permute.xlu1 %5157 }
 0x959   : > { %v5214_v2 = vmul.f32 %v5158_v50, %v9840_v9  ;;  %v5111_v9 = vmul.f32 %v10447_v51, %v5058_v13  ;;  %v5114_v13 = vmul.f32 %v10478_v5, %v10579_v59  ;;  %v5202_v40 = vpop.permute.xlu0 %5201  ;;  %v5221_v34 = vmul.f32 %v5186_v55, %v12412_v7  ;;  %v12414_v59 = vld [vmem:[#allocation269_spill] sm:$0xff] }
 0x95b   : > { %5252 = vrot.lane.b32.xlu2 %v5215_v14, %s5894_s22  ;;  %5250 = vrot.lane.b32.xlu1 %v5214_v2, %s5894_s22  ;;  %v5127_v63 = vadd.f32 %v5111_v9, %v10425_v60  ;;  %v5130_v28 = vadd.f32 %v5114_v13, %v10457_v38  ;;  %v5120_v38 = vmul.f32 %v10148_v19, %v10588_v12  ;;  %v12415_v14 = vld [vmem:[#allocation117_spill] sm:$0xff]  ;;  %v12417_v2 = vld [vmem:[#allocation262_spill] sm:$0xff]  ;;  %v12420_v12 = vld [vmem:[#allocation124_spill] sm:$0xff] }
 0x95c   : > { %5266 = vrot.lane.b32.xlu0 %v5222_v8, %s5894_s22  ;;  %v5139_v8 = vadd.f32 %v5123_v62, %v12417_v2  ;;  %v12421_v19 = vld [vmem:[#allocation119_spill] sm:$0xff]  ;;  %v12423_v9 = vld [vmem:[#allocation126_spill] sm:$0xff] }
 0x95d   : > { %v5136_v50 = vadd.f32 %v5120_v38, %v10511_v33  ;;  %v12422_v33 = vld [vmem:[#allocation120_spill] sm:$0xff] }
 0x960   : > { %v5198_v45 = vpop.permute.xlu2 %5197  ;;  %v5170_v16 = vpop.permute.xlu1 %5169 }
 0x961   : > { %v5217_v41 = vmul.f32 %v5170_v16, %v12411_v57  ;;  %v12425_v16 = vld [vmem:[#allocation121_spill] sm:$0xff]  ;;  %v12428_v57 = vld [vmem:[#allocation131_spill] sm:$0xff] }
 0x963   : > { %5258 = vrot.lane.b32.xlu2 %v5218_v56, %s5894_s22  ;;  %5256 = vrot.lane.b32.xlu1 %v5217_v41, %s5894_s22  ;;  %v12427_v56 = vld [vmem:[#allocation123_spill] sm:$0xff]  ;;  %v12429_v41 = vld [vmem:[#allocation125_spill] sm:$0xff] }
 0x968   : > { %v5207_v60 = vpop.permute.xlu2 %5206  ;;  %v5182_v15 = vpop.permute.xlu1 %5181 }
 0x969   : > { %v5225_v10 = vmul.f32 %v5207_v60, %v5202_v40  ;;  %v5220_v21 = vmul.f32 %v5182_v15, %v12413_v52 }
 0x96b   : > { %5264 = vrot.lane.b32.xlu2 %v5221_v34, %s5894_s22  ;;  %5262 = vrot.lane.b32.xlu1 %v5220_v21, %s5894_s22  ;;  %v12433_v34 = vld [vmem:[#allocation129_spill] sm:$0xff] }
 0x96c   : > { %5272 = vrot.lane.b32.xlu0 %v5225_v10, %s5894_s22 }
 0x970   : > { %v5194_v25 = vpop.permute.xlu1 %5193 }
 0x971   : > { %v5223_v3 = vmul.f32 %v5194_v25, %v12414_v59 }
 0x973   : > { %5268 = vrot.lane.b32.xlu1 %v5223_v3, %s5894_s22 }
 0x974   : > { %5315 = vperm.xlu0 %5760, %v9013_v4   ;;  %v12419_v4 = vld [vmem:[#allocation118_spill] sm:$0xff] }
 0x978   : > { %v5205_v27 = vpop.permute.xlu1 %5204 }
 0x979   : > { %v5224_v55 = vmul.f32 %v5205_v27, %v5198_v45  ;;  %v4066_v45 = vrot.slane %v10547_v36, 2  ;;  %v4068_v36 = vrot.slane %v12431_v53, 2 }
 0x97b   : > { %5270 = vrot.lane.b32.xlu2 %v5224_v55, %s5894_s22  ;;  %5307 = vperm.xlu1 %5758, %v12415_v14   ;;  %v10687_v39 = vsel %vm2245_vm4, %v4065_v0, %v4066_v45  ;;  %v10699_v40 = vsel %vm2245_vm4, %v4066_v45, %v4068_v36  ;;  %v12447_v0 = vld [vmem:[#allocation232_spill] sm:$0xff] }
 0x97c   : > { %5335 = vperm.xlu0 %5760, %v12416_v24   ;;  %12424 = vst [vmem:[#allocation186_spill] sm:$0xff] %v10687_v39 }
 0x97d   : > { %12432 = vst [vmem:[#allocation160_spill] sm:$0xff] %v10699_v40 }
 0x983   : > { %5311 = vperm.xlu2 %5759, %v12418_v29   ;;  %5319 = vperm.xlu1 %5758, %v12419_v4  }
 0x984   : > { %5347 = vperm.xlu0 %5760, %v12420_v12   ;;  %v12444_v12 = vld [vmem:[#allocation229_spill] sm:$0xff] }
 0x98b   : > { %5323 = vperm.xlu2 %5759, %v12421_v19   ;;  %5327 = vperm.xlu1 %5758, %v12422_v33  }
 0x98c   : > { %5359 = vperm.xlu0 %5760, %v12423_v9  }
 0x993   : > { %5331 = vperm.xlu2 %5759, %v12425_v16   ;;  %5339 = vperm.xlu1 %5758, %v12426_v1   ;;  %v12449_v16 = vld [vmem:[#allocation227_spill] sm:$0xff] }
 0x994   : > { %5370 = vrot.lane.b32.xlu0 %v10687_v39, %s5893_s21  ;;  %v12495_v39 = vld [vmem:[#allocation93_spill] sm:$0xff] }
 0x99b   : > { %5343 = vperm.xlu2 %5759, %v12427_v56   ;;  %5351 = vperm.xlu1 %5758, %v12428_v57   ;;  %v12450_v56 = vld [vmem:[#allocation230_spill] sm:$0xff] }
 0x9a3   : > { %5355 = vperm.xlu2 %5759, %v12429_v41   ;;  %5363 = vperm.xlu1 %5758, %v12430_v20   ;;  %v12451_v41 = vld [vmem:[#allocation235_spill] sm:$0xff] }
 0x9a9   : > { %v5245_v13 = vpop.permute.xlu1 %5244 }
 0x9aa   : > { %v10702_v7 = vadd.f32 %v5245_v13, %v10624_v32 }
 0x9ab   : > { %5367 = vperm.xlu2 %5759, %v12433_v34   ;;  %5372 = vrot.lane.b32.xlu1 %v10699_v40, %s5893_s21  ;;  %v12501_v40 = vld [vmem:[#allocation178_spill] sm:$0xff] }
 0x9ad   : > { %v5247_v60 = vpop.permute.xlu2 %5246  ;;  %v5243_v15 = vpop.permute.xlu0 %5242 }
 0x9ae   : > { %v10708_v10 = vadd.f32 %v5247_v60, %v10601_v17  ;;  %v10711_v52 = vadd.f32 %v5243_v15, %v10593_v43  ;;  %v12453_v60 = vld [vmem:[#allocation237_spill] sm:$0xff] }
 0x9b0   : > { %12434 = vst [vmem:[#allocation216_spill] sm:$0xff] %v10708_v10  ;;  %v12513_v10 = vld [vmem:[#allocation28_spill] sm:$0xff] }
 0x9b5   : > { %v5253_v21 = vpop.permute.xlu2 %5252  ;;  %v5249_v37 = vpop.permute.xlu0 %5248 }
 0x9b6   : > { %v10714_v25 = vadd.f32 %v5253_v21, %v10605_v61  ;;  %v10716_v32 = vadd.f32 %v5249_v37, %v5127_v63  ;;  %v12454_v37 = vld [vmem:[#allocation236_spill] sm:$0xff] }
 0x9b8   : > { %12435 = vst [vmem:[#allocation208_spill] sm:$0xff] %v10714_v25  ;;  %v12503_v25 = vld [vmem:[#allocation176_spill] sm:$0xff] }
 0x9bd   : > { %v5259_v59 = vpop.permute.xlu2 %5258  ;;  %v5255_v3 = vpop.permute.xlu0 %5254 }
 0x9be   : > { %v10719_v38 = vadd.f32 %v5259_v59, %v10616_v54  ;;  %v10721_v27 = vadd.f32 %v5255_v3, %v5130_v28  ;;  %v12455_v3 = vld [vmem:[#allocation228_spill] sm:$0xff] }
 0x9c0   : > { %12436 = vst [vmem:[#allocation250_spill] sm:$0xff] %v10719_v38 }
 0x9c1   : > { %12437 = vst [vmem:[#allocation251_spill] sm:$0xff] %v10721_v27 }
 0x9c5   : > { %v5265_v55 = vpop.permute.xlu2 %5264  ;;  %v5261_v17 = vpop.permute.xlu0 %5260 }
 0x9c6   : > { %v10724_v14 = vadd.f32 %v5265_v55, %v10633_v22  ;;  %v10726_v43 = vadd.f32 %v5261_v17, %v5133_v6 }
 0x9c8   : > { %12438 = vst [vmem:[#allocation264_spill] sm:$0xff] %v10724_v14 }
 0x9c9   : > { %12439 = vst [vmem:[#allocation183_spill] sm:$0xff] %v10726_v43  ;;  %v12508_v43 = vld [vmem:[#allocation141_spill] sm:$0xff] }
 0x9cd   : > { %v5251_v24 = vpop.permute.xlu1 %5250 }
 0x9ce   : > { %v10729_v61 = vadd.f32 %v5251_v24, %v10612_v47  ;;  %v5267_v63 = vpop.permute.xlu0 %5266  ;;  %v12456_v24 = vld [vmem:[#allocation272_spill] sm:$0xff] }
 0x9cf   : > { %v10731_v62 = vadd.f32 %v5267_v63, %v5136_v50 }
 0x9d0   : > { %12440 = vst [vmem:[#allocation241_spill] sm:$0xff] %v10729_v61  ;;  %v12514_v61 = vld [vmem:[#allocation200_spill] sm:$0xff] }
 0x9d1   : > { %12441 = vst [vmem:[#allocation214_spill] sm:$0xff] %v10731_v62  ;;  %v12505_v62 = vld [vmem:[#allocation152_spill] sm:$0xff] }
 0x9d5   : > { %v5271_v2 = vpop.permute.xlu2 %5270  ;;  %v5257_v29 = vpop.permute.xlu1 %5256 }
 0x9d6   : > { %v10734_v54 = vadd.f32 %v5271_v2, %v10648_v42  ;;  %v10737_v28 = vadd.f32 %v5257_v29, %v10627_v46 }
 0x9d8   : > { %12442 = vst [vmem:[#allocation247_spill] sm:$0xff] %v10734_v54 }
 0x9d9   : > { %12443 = vst [vmem:[#allocation164_spill] sm:$0xff] %v10737_v28  ;;  %v12506_v28 = vld [vmem:[#allocation27_spill] sm:$0xff] }
 0x9dd   : > { %v5312_v4 = vpop.permute.xlu2 %5311  ;;  %v5263_v22 = vpop.permute.xlu1 %5262 }
 0x9de   : > { %v5377_v6 = vmul.f32 %v5312_v4, %v12444_v12  ;;  %v10741_v19 = vadd.f32 %v5263_v22, %v10643_v11  ;;  %v5273_v47 = vpop.permute.xlu0 %5272  ;;  %v12457_v4 = vld [vmem:[#allocation238_spill] sm:$0xff]  ;;  %v12458_v12 = vld [vmem:[#allocation231_spill] sm:$0xff] }
 0x9df   : > { %v10743_v33 = vadd.f32 %v5273_v47, %v5139_v8 }
 0x9e0   : > { %12445 = vst [vmem:[#allocation245_spill] sm:$0xff] %v10741_v19  ;;  %5410 = vrot.lane.b32.xlu0 %v5377_v6, %s5894_s22  ;;  %v12504_v19 = vld [vmem:[#allocation26_spill] sm:$0xff] }
 0x9e1   : > { %12446 = vst [vmem:[#allocation189_spill] sm:$0xff] %v10743_v33 }
 0x9e5   : > { %v5324_v50 = vpop.permute.xlu2 %5323  ;;  %v5269_v9 = vpop.permute.xlu1 %5268 }
 0x9e6   : > { %v5380_v42 = vmul.f32 %v5324_v50, %v12447_v0  ;;  %v10748_v45 = vadd.f32 %v5269_v9, %v10658_v26  ;;  %v5316_v46 = vpop.permute.xlu0 %5315  ;;  %v12452_v26 = vld [vmem:[#allocation233_spill] sm:$0xff]  ;;  %v12459_v9 = vld [vmem:[#allocation188_spill] sm:$0xff] }
 0x9e7   : > { %v5378_v1 = vmul.f32 %v5316_v46, %v12449_v16 }
 0x9e8   : > { %12448 = vst [vmem:[#allocation212_spill] sm:$0xff] %v10748_v45  ;;  %5416 = vrot.lane.b32.xlu0 %v5380_v42, %s5894_s22  ;;  %v12460_v42 = vld [vmem:[#allocation234_spill] sm:$0xff] }
 0x9e9   : > { %5412 = vrot.lane.b32.xlu1 %v5378_v1, %s5894_s22 }
 0x9ed   : > { %v5308_v11 = vpop.permute.xlu1 %5307  ;;  %v5332_v34 = vpop.permute.xlu2 %5331 }
 0x9ee   : > { %v5376_v8 = vmul.f32 %v5308_v11, %v12450_v56  ;;  %v5336_v57 = vpop.permute.xlu0 %5335  ;;  %v5382_v59 = vmul.f32 %v5332_v34, %v12454_v37  ;;  %v12465_v34 = vld [vmem:[#allocation137_spill] sm:$0xff] }
 0x9ef   : > { %v5383_v20 = vmul.f32 %v5336_v57, %v12451_v41  ;;  %v12461_v41 = vld [vmem:[#allocation9_spill] sm:$0xff] }
 0x9f0   : > { %5408 = vrot.lane.b32.xlu2 %v5376_v8, %s5894_s22 }
 0x9f1   : > { %5422 = vrot.lane.b32.xlu0 %v5383_v20, %s5894_s22  ;;  %v12462_v20 = vld [vmem:[#allocation169_spill] sm:$0xff] }
 0x9f5   : > { %v5320_v53 = vpop.permute.xlu1 %5319  ;;  %v5344_v2 = vpop.permute.xlu2 %5343 }
 0x9f6   : > { %v5379_v36 = vmul.f32 %v5320_v53, %v12452_v26  ;;  %v5348_v13 = vpop.permute.xlu0 %5347  ;;  %v5385_v22 = vmul.f32 %v5344_v2, %v12457_v4  ;;  %v3317_v53 = vmul.f32 %v12462_v20, %v12461_v41  ;;  %v12463_v26 = vld [vmem:[#allocation5_spill] sm:$0xff]  ;;  %v12473_v4 = vld [vmem:[#allocation135_spill] sm:$0xff] }
 0x9f7   : > { %v5386_v15 = vmul.f32 %v5348_v13, %v12453_v60  ;;  %v12466_v60 = vld [vmem:[#allocation202_spill] sm:$0xff]  ;;  %v12472_v2 = vld [vmem:[#allocation261_spill] sm:$0xff] }
 0x9f8   : > { %5414 = vrot.lane.b32.xlu2 %v5379_v36, %s5894_s22  ;;  %v12464_v36 = vld [vmem:[#allocation273_spill] sm:$0xff] }
 0x9f9   : > { %5428 = vrot.lane.b32.xlu0 %v5386_v15, %s5894_s22  ;;  %v3164_v13 = vmul.f32 %v12464_v36, %v12463_v26  ;;  %v3167_v15 = vmul.f32 %v12466_v60, %v12465_v34  ;;  %v12484_v26 = vld [vmem:[#allocation10_spill] sm:$0xff]  ;;  %v12485_v34 = vld [vmem:[#allocation36_spill] sm:$0xff] }
 0x9fa   : > { %v3174_v36 = vmul.f32 %v10478_v5, %v12484_v26  ;;  %v12494_v26 = vld [vmem:[#allocation23_spill] sm:$0xff] }
 0x9fb   : > { %v3319_v14 = vmul.f32 %v12495_v39, %v12494_v26 }
 0x9fd   : > { %v5328_v21 = vpop.permute.xlu1 %5327  ;;  %v5356_v47 = vpop.permute.xlu2 %5355 }
 0x9fe   : > { %v5381_v55 = vmul.f32 %v5328_v21, %v12455_v3  ;;  %v5360_v17 = vpop.permute.xlu0 %5359  ;;  %v5388_v0 = vmul.f32 %v5356_v47, %v12459_v9  ;;  %v12467_v21 = vld [vmem:[#allocation130_spill] sm:$0xff] }
 0x9ff   : > { %v5389_v63 = vmul.f32 %v5360_v17, %v12456_v24  ;;  %v3169_v37 = vmul.f32 %v10392_v31, %v12467_v21  ;;  %v12469_v3 = vld [vmem:[#allocation174_spill] sm:$0xff]  ;;  %v12470_v17 = vld [vmem:[#allocation132_spill] sm:$0xff]  ;;  %v12486_v21 = vld [vmem:[#allocation109_spill] sm:$0xff] }
 0xa00   : > { %5420 = vrot.lane.b32.xlu2 %v5382_v59, %s5894_s22  ;;  %5418 = vrot.lane.b32.xlu1 %v5381_v55, %s5894_s22  ;;  %v12468_v59 = vld [vmem:[#allocation12_spill] sm:$0xff]  ;;  %v3172_v24 = vmul.f32 %v10421_v30, %v12470_v17  ;;  %v12487_v17 = vld [vmem:[#allocation11_spill] sm:$0xff] }
 0xa01   : > { %5434 = vrot.lane.b32.xlu0 %v5389_v63, %s5894_s22  ;;  %v3320_v55 = vmul.f32 %v12469_v3, %v12468_v59  ;;  %v12471_v63 = vld [vmem:[#allocation142_spill] sm:$0xff]  ;;  %v3316_v59 = vmul.f32 %v12486_v21, %v12485_v34  ;;  %v12496_v34 = vld [vmem:[#allocation16_spill] sm:$0xff]  ;;  %v12497_v21 = vld [vmem:[#allocation197_spill] sm:$0xff] }
 0xa02   : > { %v3468_v38 = vmul.f32 %v12497_v21, %v12496_v34  ;;  %v12510_v21 = vld [vmem:[#allocation180_spill] sm:$0xff] }
 0xa05   : > { %v5340_v29 = vpop.permute.xlu1 %5339  ;;  %v5368_v56 = vpop.permute.xlu2 %5367 }
 0xa06   : > { %v5384_v6 = vmul.f32 %v5340_v29, %v12458_v12  ;;  %v5371_v16 = vpop.permute.xlu0 %5370  ;;  %v3165_v29 = vmul.f32 %v12472_v2, %v12471_v63  ;;  %v3176_v63 = vmul.f32 %v10470_v48, %v12487_v17 }
 0xa08   : > { %5426 = vrot.lane.b32.xlu2 %v5385_v22, %s5894_s22  ;;  %5424 = vrot.lane.b32.xlu1 %v5384_v6, %s5894_s22  ;;  %v12474_v22 = vld [vmem:[#allocation168_spill] sm:$0xff]  ;;  %v12475_v6 = vld [vmem:[#allocation143_spill] sm:$0xff]  ;;  %v3333_v20 = vadd.f32 %v3317_v53, %v3165_v29  ;;  %v12492_v53 = vld [vmem:[#allocation13_spill] sm:$0xff] }
 0xa09   : > { %v3166_v12 = vmul.f32 %v12474_v22, %v12473_v4  ;;  %v10795_v47 = vmul.f32 %v10453_v44, %v12475_v6  ;;  %v12488_v4 = vld [vmem:[#allocation19_spill] sm:$0xff]  ;;  %v3564_v34 = vmul.f32 %v12474_v22, %v12508_v43  ;;  %v12517_v43 = vld [vmem:[#allocation138_spill] sm:$0xff] }
 0xa0a   : > { %v3177_v6 = vmul.f32 %v10504_v49, %v12488_v4  ;;  %v12493_v29 = vld [vmem:[#allocation171_spill] sm:$0xff]  ;;  %v12500_v4 = vld [vmem:[#allocation134_spill] sm:$0xff]  ;;  %v12512_v49 = vld [vmem:[#allocation185_spill] sm:$0xff] }
 0xa0b   : > { %12476 = vst [vmem:[#allocation266_spill] sm:$0xff] %v10795_v47  ;;  %v3318_v54 = vmul.f32 %v12493_v29, %v12492_v53  ;;  %v3323_v45 = vmul.f32 %v12501_v40, %v12500_v4  ;;  %v3331_v53 = vmul.f32 %v12505_v62, %v12504_v19  ;;  %v12515_v19 = vld [vmem:[#allocation43_spill] sm:$0xff] }
 0xa0c   : > { %v3667_v62 = vmul.f32 %v12515_v19, %v12493_v29  ;;  %v12518_v22 = vld [vmem:[#allocation215_spill] sm:$0xff]  ;;  %v12537_v19 = vld [vmem:[#allocation48_spill] sm:$0xff] }
 0xa0d   : > { %v5352_v50 = vpop.permute.xlu1 %5351 }
 0xa0e   : > { %v5387_v46 = vmul.f32 %v5352_v50, %v12460_v42  ;;  %v12477_v50 = vld [vmem:[#allocation2_spill] sm:$0xff] }
 0xa0f   : > { %v3168_v9 = vmul.f32 %v10402_v58, %v12477_v50  ;;  %v12489_v50 = vld [vmem:[#allocation40_spill] sm:$0xff] }
 0xa10   : > { %5432 = vrot.lane.b32.xlu2 %v5388_v0, %s5894_s22  ;;  %5430 = vrot.lane.b32.xlu1 %v5387_v46, %s5894_s22  ;;  %v12478_v0 = vld [vmem:[#allocation6_spill] sm:$0xff]  ;;  %v12479_v46 = vld [vmem:[#allocation7_spill] sm:$0xff] }
 0xa11   : > { %v3170_v42 = vmul.f32 %v10407_v23, %v12478_v0  ;;  %v3336_v2 = vadd.f32 %v3320_v55, %v3168_v9  ;;  %v12490_v0 = vld [vmem:[#allocation145_spill] sm:$0xff]  ;;  %v12498_v55 = vld [vmem:[#allocation24_spill] sm:$0xff] }
 0xa12   : > { %v12499_v9 = vld [vmem:[#allocation149_spill] sm:$0xff] }
 0xa13   : > { %v3328_v33 = vmul.f32 %v12499_v9, %v12498_v55  ;;  %v12511_v9 = vld [vmem:[#allocation15_spill] sm:$0xff] }
 0xa14   : > { %v3329_v4 = vmul.f32 %v12512_v49, %v12511_v9 }
 0xa15   : > { %v5364_v1 = vpop.permute.xlu1 %5363 }
 0xa16   : > { %v5390_v11 = vmul.f32 %v5371_v16, %v5364_v1  ;;  %v3171_v16 = vmul.f32 %v10447_v51, %v12479_v46  ;;  %v12480_v1 = vld [vmem:[#allocation133_spill] sm:$0xff]  ;;  %v3325_v46 = vmul.f32 %v12490_v0, %v12489_v50  ;;  %v12502_v50 = vld [vmem:[#allocation14_spill] sm:$0xff] }
 0xa17   : > { %v3321_v47 = vmul.f32 %v12503_v25, %v12502_v50  ;;  %v3470_v50 = vmul.f32 %v12514_v61, %v12513_v10  ;;  %v12520_v10 = vld [vmem:[#allocation47_spill] sm:$0xff] }
 0xa18   : > { %5436 = vrot.lane.b32.xlu1 %v5390_v11, %s5894_s22  ;;  %v12481_v11 = vld [vmem:[#allocation115_spill] sm:$0xff]  ;;  %v3339_v48 = vadd.f32 %v3323_v45, %v3171_v16 }
 0xa19   : > { %v10845_v35 = vadd.f32 %v3321_v47, %v3169_v37  ;;  %v12523_v45 = vld [vmem:[#allocation31_spill] sm:$0xff]  ;;  %v12526_v47 = vld [vmem:[#allocation210_spill] sm:$0xff] }
 0xa1b   : > { %12516 = vst [vmem:[#allocation220_spill] sm:$0xff] %v10845_v35 }
 0xa1d   : > { %v5373_v8 = vpop.permute.xlu1 %5372 }
 0xa1e   : > { %v5391_v57 = vmul.f32 %v5373_v8, %v5368_v56  ;;  %v3322_v56 = vmul.f32 %v12481_v11, %v12480_v1  ;;  %v12482_v8 = vld [vmem:[#allocation8_spill] sm:$0xff]  ;;  %v12491_v1 = vld [vmem:[#allocation21_spill] sm:$0xff] }
 0xa20   : > { %5438 = vrot.lane.b32.xlu2 %v5391_v57, %s5894_s22  ;;  %v12483_v57 = vld [vmem:[#allocation239_spill] sm:$0xff]  ;;  %v3338_v17 = vadd.f32 %v3322_v56, %v3170_v42  ;;  %v12509_v56 = vld [vmem:[#allocation136_spill] sm:$0xff] }
 0xa21   : > { %v3173_v41 = vmul.f32 %v12483_v57, %v12482_v8  ;;  %v3179_v8 = vmul.f32 %v10517_v18, %v12491_v1  ;;  %v3332_v1 = vadd.f32 %v3316_v59, %v3164_v13  ;;  %v12507_v18 = vld [vmem:[#allocation182_spill] sm:$0xff]  ;;  %v3324_v55 = vmul.f32 %v12510_v21, %v12509_v56 }
 0xa22   : > { %v3326_v26 = vmul.f32 %v12507_v18, %v12506_v28  ;;  %v3334_v13 = vadd.f32 %v3318_v54, %v3166_v12  ;;  %v3335_v59 = vadd.f32 %v3319_v14, %v3167_v15  ;;  %v3344_v28 = vadd.f32 %v3328_v33, %v3176_v63  ;;  %v12524_v15 = vld [vmem:[#allocation219_spill] sm:$0xff]  ;;  %v12525_v12 = vld [vmem:[#allocation17_spill] sm:$0xff]  ;;  %v12527_v63 = vld [vmem:[#allocation140_spill] sm:$0xff] }
 0xa23   : > { %v3341_v42 = vadd.f32 %v3325_v46, %v3173_v41  ;;  %v3484_v27 = vadd.f32 %v3468_v38, %v3332_v1  ;;  %v3472_v41 = vmul.f32 %v12518_v22, %v12517_v43  ;;  %v10849_v46 = vadd.f32 %v3331_v53, %v3179_v8  ;;  %v12528_v8 = vld [vmem:[#allocation198_spill] sm:$0xff]  ;;  %v12529_v1 = vld [vmem:[#allocation88_spill] sm:$0xff]  ;;  %v12530_v53 = vld [vmem:[#allocation29_spill] sm:$0xff] }
 0xa24   : > { %v3342_v9 = vadd.f32 %v3326_v26, %v3174_v36  ;;  %v3770_v14 = vmul.f32 %v12520_v10, %v12514_v61  ;;  %v10853_v38 = vadd.f32 %v3324_v55, %v3172_v24  ;;  %v10855_v54 = vadd.f32 %v3329_v4, %v3177_v6  ;;  %v12531_v61 = vld [vmem:[#allocation184_spill] sm:$0xff]  ;;  %v12535_v4 = vld [vmem:[#allocation35_spill] sm:$0xff]  ;;  %v12538_v43 = vld [vmem:[#allocation201_spill] sm:$0xff] }
 0xa25   : > { %12519 = vst [vmem:[#allocation242_spill] sm:$0xff] %v10849_v46  ;;  %v3580_v56 = vadd.f32 %v3564_v34, %v3484_v27  ;;  %v3486_v33 = vadd.f32 %v3470_v50, %v3334_v13  ;;  %v3475_v37 = vmul.f32 %v12524_v15, %v12523_v45  ;;  %v3469_v16 = vmul.f32 %v12526_v47, %v12525_v12  ;;  %v12533_v26 = vld [vmem:[#allocation32_spill] sm:$0xff]  ;;  %v12534_v34 = vld [vmem:[#allocation223_spill] sm:$0xff]  ;;  %v12547_v46 = vld [vmem:[#allocation65_spill] sm:$0xff] }
 0xa26   : > { %12521 = vst [vmem:[#allocation254_spill] sm:$0xff] %v10853_v38  ;;  %v3471_v29 = vmul.f32 %v12528_v8, %v12527_v63  ;;  %v3866_v27 = vmul.f32 %v10402_v58, %v12529_v1  ;;  %v10867_v24 = vmul.f32 %v12531_v61, %v12530_v53  ;;  %v3488_v6 = vadd.f32 %v3472_v41, %v3336_v2  ;;  %v12536_v50 = vld [vmem:[#allocation199_spill] sm:$0xff]  ;;  %v12540_v12 = vld [vmem:[#allocation104_spill] sm:$0xff]  ;;  %v12544_v1 = vld [vmem:[#allocation69_spill] sm:$0xff] }
 0xa27   : > { %12522 = vst [vmem:[#allocation255_spill] sm:$0xff] %v10855_v54  ;;  %v3683_v36 = vadd.f32 %v3667_v62, %v3580_v56  ;;  %v3478_v55 = vmul.f32 %v12534_v34, %v12533_v26  ;;  %v3474_v13 = vmul.f32 %v12536_v50, %v12535_v4  ;;  %v3477_v10 = vmul.f32 %v12538_v43, %v12537_v19  ;;  %v12539_v62 = vld [vmem:[#allocation68_spill] sm:$0xff]  ;;  %v12541_v63 = vld [vmem:[#allocation139_spill] sm:$0xff]  ;;  %v12545_v26 = vld [vmem:[#allocation53_spill] sm:$0xff] }
 0xa28   : > { %12532 = vst [vmem:[#allocation167_spill] sm:$0xff] %v10867_v24  ;;  %v3567_v56 = vmul.f32 %v10392_v31, %v12539_v62  ;;  %v3969_v47 = vmul.f32 %v12540_v12, %v12469_v3  ;;  %v12542_v2 = vld [vmem:[#allocation203_spill] sm:$0xff]  ;;  %v3565_v53 = vmul.f32 %v12466_v60, %v12544_v1  ;;  %v12546_v4 = vld [vmem:[#allocation204_spill] sm:$0xff]  ;;  %v3570_v19 = vmul.f32 %v10421_v30, %v12547_v46  ;;  %v12548_v12 = vld [vmem:[#allocation33_spill] sm:$0xff] }
 0xa29   : > { %v3786_v45 = vadd.f32 %v3770_v14, %v3683_v36  ;;  %v10883_v41 = vmul.f32 %v12542_v2, %v12541_v63  ;;  %v3480_v24 = vmul.f32 %v12546_v4, %v12545_v26  ;;  %v10891_v54 = vadd.f32 %v3475_v37, %v3339_v48  ;;  %v12549_v38 = vld [vmem:[#allocation206_spill] sm:$0xff] }
 0xa2a   : > { %v3485_v62 = vadd.f32 %v3469_v16, %v3333_v20  ;;  %v3487_v14 = vadd.f32 %v3471_v29, %v3335_v59  ;;  %v10895_v35 = vmul.f32 %v12549_v38, %v12548_v12  ;;  %v3490_v63 = vadd.f32 %v3474_v13, %v3338_v17  ;;  %v12551_v1 = vld [vmem:[#allocation58_spill] sm:$0xff]  ;;  %v12561_v12 = vld [vmem:[#allocation25_spill] sm:$0xff] }
 0xa2b   : > { %12543 = vst [vmem:[#allocation190_spill] sm:$0xff] %v10883_v41  ;;  %v3882_v36 = vadd.f32 %v3866_v27, %v3786_v45  ;;  %v12550_v41 = vld [vmem:[#allocation67_spill] sm:$0xff]  ;;  %v3670_v26 = vmul.f32 %v12551_v1, %v12503_v25  ;;  %v10901_v4 = vadd.f32 %v3478_v55, %v3342_v9  ;;  %v3493_v46 = vadd.f32 %v3477_v10, %v3341_v42  ;;  %v12552_v29 = vld [vmem:[#allocation50_spill] sm:$0xff] }
 0xa2c   : > { %v3668_v60 = vmul.f32 %v12550_v41, %v12495_v39  ;;  %v3583_v48 = vadd.f32 %v3567_v56, %v3487_v14  ;;  %v3581_v20 = vadd.f32 %v3565_v53, %v3485_v62  ;;  %v10903_v59 = vadd.f32 %v3480_v24, %v3344_v28  ;;  %v12553_v17 = vld [vmem:[#allocation38_spill] sm:$0xff]  ;;  %v12554_v39 = vld [vmem:[#allocation75_spill] sm:$0xff] }
 0xa2d   : > { %v3985_v37 = vadd.f32 %v3969_v47, %v3882_v36  ;;  %v3586_v16 = vadd.f32 %v3570_v19, %v3490_v63  ;;  %v3771_v27 = vmul.f32 %v12552_v29, %v12528_v8  ;;  %v3573_v13 = vmul.f32 %v10453_v44, %v12553_v17  ;;  %v12555_v9 = vld [vmem:[#allocation82_spill] sm:$0xff]  ;;  %v12557_v24 = vld [vmem:[#allocation55_spill] sm:$0xff] }
 0xa2e   : > { %v3566_v45 = vmul.f32 %v10402_v58, %v12554_v39  ;;  %v3773_v55 = vmul.f32 %v12555_v9, %v12542_v2  ;;  %v12556_v42 = vld [vmem:[#allocation110_spill] sm:$0xff]  ;;  %v3684_v56 = vadd.f32 %v3668_v60, %v3581_v20  ;;  %v3686_v28 = vadd.f32 %v3670_v26, %v3583_v48  ;;  %v12558_v41 = vld [vmem:[#allocation59_spill] sm:$0xff] }
 0xa2f   : > { %v4072_v10 = vmul.f32 %v12556_v42, %v12518_v22  ;;  %v3867_v47 = vmul.f32 %v10392_v31, %v12557_v24  ;;  %v3869_v53 = vmul.f32 %v10447_v51, %v12558_v41  ;;  %v12559_v62 = vld [vmem:[#allocation39_spill] sm:$0xff]  ;;  %v12560_v31 = vld [vmem:[#allocation41_spill] sm:$0xff]  ;;  %v3673_v63 = vmul.f32 %v12561_v12, %v12510_v21  ;;  %v12564_v39 = vld [vmem:[#allocation42_spill] sm:$0xff] }
 0xa30   : > { %v3568_v14 = vmul.f32 %v10407_v23, %v12559_v62  ;;  %v3669_v36 = vmul.f32 %v12560_v31, %v12469_v3  ;;  %v3787_v60 = vadd.f32 %v3771_v27, %v3684_v56  ;;  %v3789_v1 = vadd.f32 %v3773_v55, %v3686_v28  ;;  %v12562_v26 = vld [vmem:[#allocation111_spill] sm:$0xff]  ;;  %v12570_v41 = vld [vmem:[#allocation22_spill] sm:$0xff] }
 0xa31   : > { %v4088_v19 = vadd.f32 %v4072_v10, %v3985_v37  ;;  %v3970_v48 = vmul.f32 %v12562_v26, %v12503_v25  ;;  %v12563_v37 = vld [vmem:[#allocation108_spill] sm:$0xff]  ;;  %v3582_v17 = vadd.f32 %v3566_v45, %v3486_v33  ;;  %v3671_v9 = vmul.f32 %v12564_v39, %v12481_v11  ;;  %v12565_v3 = vld [vmem:[#allocation51_spill] sm:$0xff]  ;;  %v12566_v10 = vld [vmem:[#allocation161_spill] sm:$0xff] }
 0xa32   : > { %v3972_v20 = vmul.f32 %v12563_v37, %v12501_v40  ;;  %v3776_v42 = vmul.f32 %v12565_v3, %v12549_v38  ;;  %v3883_v27 = vadd.f32 %v3867_v47, %v3787_v60  ;;  %v3885_v55 = vadd.f32 %v3869_v53, %v3789_v1  ;;  %v12567_v56 = vld [vmem:[#allocation163_spill] sm:$0xff]  ;;  %v12568_v33 = vld [vmem:[#allocation77_spill] sm:$0xff]  ;;  %v12572_v60 = vld [vmem:[#allocation80_spill] sm:$0xff] }
 0xa33   : > { %v4073_v25 = vmul.f32 %v12566_v10, %v12542_v2  ;;  %v4075_v28 = vmul.f32 %v12567_v56, %v12524_v15  ;;  %v3584_v24 = vadd.f32 %v3568_v14, %v3488_v6  ;;  %v12571_v2 = vld [vmem:[#allocation76_spill] sm:$0xff]  ;;  %v3870_v6 = vmul.f32 %v10421_v30, %v12572_v60  ;;  %v12575_v30 = vld [vmem:[#allocation107_spill] sm:$0xff] }
 0xa34   : > { %v3986_v47 = vadd.f32 %v3970_v48, %v3883_v27  ;;  %v3988_v53 = vadd.f32 %v3972_v20, %v3885_v55  ;;  %v3868_v12 = vmul.f32 %v10407_v23, %v12571_v2  ;;  %v12574_v20 = vld [vmem:[#allocation85_spill] sm:$0xff]  ;;  %v12577_v3 = vld [vmem:[#allocation3_spill] sm:$0xff] }
 0xa35   : > { %v3687_v62 = vadd.f32 %v3671_v9, %v3584_v24  ;;  %v3872_v23 = vmul.f32 %v10478_v5, %v12574_v20  ;;  %v12578_v27 = vld [vmem:[#allocation209_spill] sm:$0xff]  ;;  %v12579_v55 = vld [vmem:[#allocation95_spill] sm:$0xff] }
 0xa36   : > { %v3779_v10 = vmul.f32 %v12579_v55, %v12578_v27  ;;  %v12592_v20 = vld [vmem:[#allocation187_spill] sm:$0xff] }
 0xa4a   : > { %v5409_v8 = vpop.permute.xlu2 %5408 }
 0xa4b   : > { %v5456_v58 = vadd.f32 %v5409_v8, %v10711_v52  ;;  %v3589_v52 = vadd.f32 %v3573_v13, %v3493_v46  ;;  %v3689_v8 = vadd.f32 %v3673_v63, %v3586_v16  ;;  %v3772_v46 = vmul.f32 %v12568_v33, %v12518_v22  ;;  %v12569_v13 = vld [vmem:[#allocation54_spill] sm:$0xff] }
 0xa4c   : > { %v3774_v45 = vmul.f32 %v12569_v13, %v12536_v50  ;;  %v4089_v22 = vadd.f32 %v4073_v25, %v3986_v47  ;;  %v4091_v63 = vadd.f32 %v4075_v28, %v3988_v53  ;;  %v12580_v28 = vld [vmem:[#allocation156_spill] sm:$0xff]  ;;  %v12585_v47 = vld [vmem:[#allocation61_spill] sm:$0xff] }
 0xa4d   : > { %v5473_v29 = vsel %vm5472_vm2, %v4088_v19, %v5456_v58  ;;  %v3571_v19 = vmul.f32 %v12483_v57, %v12570_v41  ;;  %v3685_v58 = vadd.f32 %v3669_v36, %v3582_v17  ;;  %v3792_v31 = vadd.f32 %v3776_v42, %v3689_v8  ;;  %v12573_v36 = vld [vmem:[#allocation44_spill] sm:$0xff]  ;;  %v12576_v17 = vld [vmem:[#allocation114_spill] sm:$0xff]  ;;  %v12586_v53 = vld [vmem:[#allocation157_spill] sm:$0xff] }
 0xa4e   : > { %5490 = vst.msk [vmem:[%s10922_s11] sm:$0xff] %vm5489_vm1, %v5473_v29  ;;  %v3676_v26 = vmul.f32 %v12573_v36, %v12531_v61  ;;  %v3790_v37 = vadd.f32 %v3774_v45, %v3687_v62  ;;  %v3973_v29 = vmul.f32 %v12575_v30, %v12510_v21  ;;  %v3975_v39 = vmul.f32 %v12576_v17, %v12507_v18  ;;  %v12581_v8 = vld [vmem:[#allocation166_spill] sm:$0xff] }
 0xa4f   : > { %v3788_v48 = vadd.f32 %v3772_v46, %v3685_v58  ;;  %v3674_v42 = vmul.f32 %v12577_v3, %v12490_v0  ;;  %v3888_v21 = vadd.f32 %v3872_v23, %v3792_v31  ;;  %v4076_v24 = vmul.f32 %v12580_v28, %v12549_v38  ;;  %v12582_v46 = vld [vmem:[#allocation60_spill] sm:$0xff]  ;;  %v12583_v45 = vld [vmem:[#allocation98_spill] sm:$0xff]  ;;  %v12600_v28 = vld [vmem:[#allocation149_spill] sm:$0xff] }
 0xa50   : > { %v3886_v56 = vadd.f32 %v3870_v6, %v3790_v37  ;;  %v4078_v33 = vmul.f32 %v12581_v8, %v12534_v34  ;;  %v3777_v13 = vmul.f32 %v12582_v46, %v12538_v43  ;;  %v3971_v41 = vmul.f32 %v12583_v45, %v12481_v11  ;;  %v12587_v31 = vld [vmem:[#allocation72_spill] sm:$0xff]  ;;  %v12593_v23 = vld [vmem:[#allocation78_spill] sm:$0xff]  ;;  %v12603_v45 = vld [vmem:[#allocation105_spill] sm:$0xff] }
 0xa51   : > { %v3884_v25 = vadd.f32 %v3868_v12, %v3788_v48  ;;  %v3576_v62 = vmul.f32 %v12586_v53, %v12585_v47  ;;  %v12588_v38 = vld [vmem:[#allocation172_spill] sm:$0xff]  ;;  %v3991_v60 = vadd.f32 %v3975_v39, %v3888_v21  ;;  %v12591_v48 = vld [vmem:[#allocation241_spill] sm:$0xff]  ;;  %v3679_v30 = vmul.f32 %v12593_v23, %v12592_v20  ;;  %v12597_v3 = vld [vmem:[#allocation106_spill] sm:$0xff] }
 0xa52   : > { %v5415_v16 = vpop.permute.xlu2 %5414  ;;  %v5411_v14 = vpop.permute.xlu0 %5410  ;;  %v3574_v2 = vmul.f32 %v12588_v38, %v12587_v31  ;;  %v3989_v12 = vadd.f32 %v3973_v29, %v3886_v56  ;;  %v12594_v39 = vld [vmem:[#allocation216_spill] sm:$0xff]  ;;  %v12599_v56 = vld [vmem:[#allocation225_spill] sm:$0xff] }
 0xa53   : > { %v5459_v1 = vadd.f32 %v5415_v16, %v10716_v32  ;;  %v5457_v57 = vadd.f32 %v5411_v14, %v10702_v7  ;;  %v3587_v7 = vadd.f32 %v3571_v19, %v10891_v54  ;;  %v3692_v54 = vadd.f32 %v3676_v26, %v3589_v52  ;;  %v12584_v19 = vld [vmem:[#allocation154_spill] sm:$0xff]  ;;  %v12589_v52 = vld [vmem:[#allocation79_spill] sm:$0xff]  ;;  %v12605_v38 = vld [vmem:[#allocation204_spill] sm:$0xff] }
 0xa54   : > { %v4074_v58 = vmul.f32 %v12584_v19, %v12536_v50  ;;  %v3873_v14 = vmul.f32 %v10453_v44, %v12589_v52  ;;  %v4092_v11 = vadd.f32 %v4076_v24, %v3989_v12  ;;  %v12590_v50 = vld [vmem:[#allocation251_spill] sm:$0xff]  ;;  %v12595_v44 = vld [vmem:[#allocation100_spill] sm:$0xff]  ;;  %v12601_v24 = vld [vmem:[#allocation45_spill] sm:$0xff]  ;;  %v3592_v46 = vadd.f32 %v3576_v62, %v10903_v59 }
 0xa55   : > { %v5476_v9 = vsel %vm5472_vm2, %v4091_v63, %v5459_v1  ;;  %v5474_v32 = vsel %vm5472_vm2, %v4089_v22, %v5457_v57  ;;  %v3690_v6 = vadd.f32 %v3674_v42, %v3587_v7  ;;  %v3795_v16 = vadd.f32 %v3779_v10, %v3692_v54  ;;  %v12606_v12 = vld [vmem:[#allocation91_spill] sm:$0xff]  ;;  %v12609_v62 = vld [vmem:[#allocation220_spill] sm:$0xff] }
 0xa56   : > { %5493 = vst.msk [vmem:[%s10922_s11 + $0x18] sm:$0xff] %vm5489_vm1, %v5476_v9  ;;  %v3987_v22 = vadd.f32 %v3971_v41, %v3884_v25  ;;  %v4094_v57 = vadd.f32 %v4078_v33, %v3991_v60  ;;  %v3978_v42 = vmul.f32 %v12597_v3, %v12512_v49  ;;  %v12598_v25 = vld [vmem:[#allocation18_spill] sm:$0xff]  ;;  %v3677_v8 = vmul.f32 %v12601_v24, %v12600_v28  ;;  %v12621_v24 = vld [vmem:[#allocation252_spill] sm:$0xff] }
 0xa57   : > { %5491 = vst.msk [vmem:[%s10922_s11 + $0x8] sm:$0xff] %vm5489_vm1, %v5474_v32  ;;  %v3793_v29 = vadd.f32 %v3777_v13, %v3690_v6  ;;  %v12596_v32 = vld [vmem:[#allocation205_spill] sm:$0xff]  ;;  %v3481_v21 = vmul.f32 %v12599_v56, %v12598_v25  ;;  %v3590_v31 = vadd.f32 %v3574_v2, %v10901_v4  ;;  %v3780_v60 = vmul.f32 %v12606_v12, %v12605_v38  ;;  %v12607_v6 = vld [vmem:[#allocation99_spill] sm:$0xff]  ;;  %v12612_v4 = vld [vmem:[#allocation20_spill] sm:$0xff] }
 0xa58   : > { %v4090_v17 = vadd.f32 %v4074_v58, %v3987_v22  ;;  %v3875_v7 = vmul.f32 %v12596_v32, %v12595_v44  ;;  %v12602_v13 = vld [vmem:[#allocation213_spill] sm:$0xff]  ;;  %v12604_v58 = vld [vmem:[#allocation170_spill] sm:$0xff]  ;;  %v3976_v52 = vmul.f32 %v12607_v6, %v12531_v61  ;;  %v3569_v2 = vmul.f32 %v10447_v51, %v12612_v4  ;;  %v12617_v44 = vld [vmem:[#allocation211_spill] sm:$0xff] }
 0xa59   : > { %v3889_v33 = vadd.f32 %v3873_v14, %v3793_v29  ;;  %v3782_v41 = vmul.f32 %v12603_v45, %v12602_v13  ;;  %v4081_v47 = vmul.f32 %v12604_v58, %v12599_v56  ;;  %v12608_v14 = vld [vmem:[#allocation159_spill] sm:$0xff]  ;;  %v12618_v51 = vld [vmem:[#allocation164_spill] sm:$0xff]  ;;  %v12620_v25 = vld [vmem:[#allocation94_spill] sm:$0xff] }
 0xa5a   : > { %v5421_v63 = vpop.permute.xlu2 %5420  ;;  %v5417_v1 = vpop.permute.xlu0 %5416  ;;  %v3891_v19 = vadd.f32 %v3875_v7, %v3795_v16  ;;  %v4079_v59 = vmul.f32 %v12608_v14, %v12578_v27  ;;  %v12610_v16 = vld [vmem:[#allocation190_spill] sm:$0xff]  ;;  %v12623_v45 = vld [vmem:[#allocation152_spill] sm:$0xff] }
 0xa5b   : > { %v5462_v36 = vadd.f32 %v5421_v63, %v12590_v50  ;;  %v5413_v26 = vpop.permute.xlu1 %5412  ;;  %v5460_v37 = vadd.f32 %v5417_v1, %v12591_v48  ;;  %v3489_v22 = vadd.f32 %v12610_v16, %v12609_v62  ;;  %v12611_v63 = vld [vmem:[#allocation254_spill] sm:$0xff]  ;;  %v3693_v50 = vadd.f32 %v3677_v8, %v3590_v31  ;;  %v12626_v31 = vld [vmem:[#allocation207_spill] sm:$0xff] }
 0xa5c   : > { %v5458_v9 = vadd.f32 %v5413_v26, %v12594_v39  ;;  %v3492_v1 = vadd.f32 %v10895_v35, %v12611_v63  ;;  %v3992_v26 = vadd.f32 %v3976_v52, %v3889_v33  ;;  %v12615_v39 = vld [vmem:[#allocation183_spill] sm:$0xff]  ;;  %v12622_v8 = vld [vmem:[#allocation146_spill] sm:$0xff] }
 0xa5d   : > { %v5479_v55 = vsel %vm5472_vm2, %v4094_v57, %v5462_v36  ;;  %v5477_v10 = vsel %vm5472_vm2, %v4092_v11, %v5460_v37  ;;  %v3695_v11 = vadd.f32 %v3679_v30, %v3592_v46  ;;  %v3994_v57 = vadd.f32 %v3978_v42, %v3891_v19  ;;  %v12613_v36 = vld [vmem:[#allocation113_spill] sm:$0xff]  ;;  %v12614_v37 = vld [vmem:[#allocation255_spill] sm:$0xff]  ;;  %v12616_v30 = vld [vmem:[#allocation46_spill] sm:$0xff] }
 0xa5e   : > { %5496 = vst.msk [vmem:[%s10922_s11 + $0x30] sm:$0xff] %vm5489_vm1, %v5479_v55  ;;  %v5475_v54 = vsel %vm5472_vm2, %v4090_v17, %v5458_v9  ;;  %v3876_v61 = vmul.f32 %v12586_v53, %v12613_v36  ;;  %v3497_v23 = vadd.f32 %v3481_v21, %v12614_v37  ;;  %v3577_v32 = vmul.f32 %v12617_v44, %v12616_v30  ;;  %v12619_v53 = vld [vmem:[#allocation64_spill] sm:$0xff]  ;;  %v12628_v14 = vld [vmem:[#allocation270_spill] sm:$0xff] }
 0xa5f   : > { %5492 = vst.msk [vmem:[%s10922_s11 + $0x10] sm:$0xff] %vm5489_vm1, %v5475_v54  ;;  %v3798_v29 = vadd.f32 %v3782_v41, %v3695_v11  ;;  %v4097_v17 = vadd.f32 %v4081_v47, %v3994_v57  ;;  %v3796_v7 = vadd.f32 %v3780_v60, %v3693_v50  ;;  %v4095_v3 = vadd.f32 %v4079_v59, %v3992_v26  ;;  %v12624_v41 = vld [vmem:[#allocation63_spill] sm:$0xff]  ;;  %v12625_v47 = vld [vmem:[#allocation37_spill] sm:$0xff]  ;;  %v12632_v4 = vld [vmem:[#allocation162_spill] sm:$0xff] }
 0xa60   : > { %5494 = vst.msk [vmem:[%s10922_s11 + $0x20] sm:$0xff] %vm5489_vm1, %v5477_v10  ;;  %v3672_v55 = vmul.f32 %v12619_v53, %v12501_v40  ;;  %v11043_v10 = vld [vmem:[%s5988_s15 + $0xc0] sm:$0xff]  ;;  %v3981_v33 = vmul.f32 %v12622_v8, %v12621_v24  ;;  %v3585_v46 = vadd.f32 %v3569_v2, %v3489_v22  ;;  %v3680_v19 = vmul.f32 %v12624_v41, %v12623_v45  ;;  %v12627_v60 = vld [vmem:[#allocation73_spill] sm:$0xff]  ;;  %v12629_v59 = vld [vmem:[#allocation175_spill] sm:$0xff] }
 0xa61   : > { %v3878_v21 = vmul.f32 %v11043_v10, %v12620_v25  ;;  %v3892_v58 = vadd.f32 %v3876_v61, %v3796_v7  ;;  %v3483_v12 = vmul.f32 %v12626_v31, %v12625_v47  ;;  %v3775_v6 = vmul.f32 %v12627_v60, %v12524_v15  ;;  %v12630_v22 = vld [vmem:[#allocation89_spill] sm:$0xff]  ;;  %v5834_v61 = vld [vmem:[%s5988_s15 + $0x68] sm:$0xff] }
 0xa62   : > { %v5427_v48 = vpop.permute.xlu2 %5426  ;;  %v4084_v62 = vmul.f32 %v12629_v59, %v12628_v14  ;;  %v3593_v16 = vadd.f32 %v3577_v32, %v3497_v23  ;;  %v3783_v63 = vmul.f32 %v12630_v22, %v12626_v31  ;;  %v12631_v11 = vld [vmem:[#allocation101_spill] sm:$0xff]  ;;  %v4082_v2 = vmul.f32 %v12632_v4, %v12602_v13  ;;  %v12634_v26 = vld [vmem:[#allocation103_spill] sm:$0xff]  ;;  %v12646_v22 = vld [vmem:[#allocation92_spill] sm:$0xff] }
 0xa63   : > { %v5465_v9 = vadd.f32 %v5427_v48, %v12615_v39  ;;  %v5423_v35 = vpop.permute.xlu0 %5422  ;;  %v3894_v52 = vadd.f32 %v3878_v21, %v3798_v29  ;;  %v3979_v57 = vmul.f32 %v12631_v11, %v12592_v20  ;;  %v12633_v50 = vld [vmem:[#allocation57_spill] sm:$0xff]  ;;  %v3688_v15 = vadd.f32 %v3672_v55, %v3585_v46  ;;  %v5835_v29 = vld [vmem:[%s5988_s15 + $0xc8] sm:$0xff]  ;;  %v12639_v55 = vld [vmem:[#allocation70_spill] sm:$0xff] }
 0xa64   : > { %v5463_v42 = vadd.f32 %v5423_v35, %v12618_v51  ;;  %v3572_v36 = vmul.f32 %v10478_v5, %v12633_v50  ;;  %v3871_v48 = vmul.f32 %v5834_v61, %v12634_v26  ;;  %v3696_v39 = vadd.f32 %v3680_v19, %v3593_v16  ;;  %v12637_v7 = vld [vmem:[#allocation147_spill] sm:$0xff]  ;;  %v12638_v5 = vld [vmem:[#allocation214_spill] sm:$0xff]  ;;  %v5836_v4 = vld [vmem:[%s5988_s15 + $0x90] sm:$0xff] }
 0xa65   : > { %v5482_v54 = vsel %vm5472_vm2, %v4097_v17, %v5465_v9  ;;  %v3997_v37 = vadd.f32 %v3981_v33, %v3894_v52  ;;  %v12635_v17 = vld [vmem:[#allocation52_spill] sm:$0xff]  ;;  %v3995_v30 = vadd.f32 %v3979_v57, %v3892_v58  ;;  %v3791_v32 = vadd.f32 %v3775_v6, %v3688_v15  ;;  %v12640_v33 = vld [vmem:[#allocation245_spill] sm:$0xff]  ;;  %v12641_v46 = vld [vmem:[#allocation242_spill] sm:$0xff] }
 0xa66   : > { %5499 = vst.msk [vmem:[%s10922_s11 + $0x48] sm:$0xff] %vm5489_vm1, %v5482_v54  ;;  %v5480_v40 = vsel %vm5472_vm2, %v4095_v3, %v5463_v42  ;;  %v3579_v23 = vmul.f32 %v5835_v29, %v12635_v17  ;;  %v12636_v9 = vld [vmem:[#allocation96_spill] sm:$0xff]  ;;  %v3974_v3 = vmul.f32 %v12637_v7, %v12490_v0  ;;  %v3675_v25 = vmul.f32 %v12639_v55, %v12507_v18  ;;  %v12642_v19 = vld [vmem:[#allocation66_spill] sm:$0xff]  ;;  %v12644_v6 = vld [vmem:[#allocation71_spill] sm:$0xff] }
 0xa67   : > { %5497 = vst.msk [vmem:[%s10922_s11 + $0x38] sm:$0xff] %vm5489_vm1, %v5480_v40  ;;  %v3879_v35 = vmul.f32 %v5835_v29, %v12636_v9  ;;  %v4100_v51 = vadd.f32 %v4084_v62, %v3997_v37  ;;  %v3799_v21 = vadd.f32 %v3783_v63, %v3696_v39  ;;  %v4098_v8 = vadd.f32 %v4082_v2, %v3995_v30  ;;  %v12643_v58 = vld [vmem:[#allocation246_spill] sm:$0xff]  ;;  %v12647_v63 = vld [vmem:[#allocation271_spill] sm:$0xff]  ;;  %v12649_v50 = vld [vmem:[#allocation84_spill] sm:$0xff] }
 0xa68   : > { %v3499_v41 = vadd.f32 %v3483_v12, %v12641_v46  ;;  %v3682_v40 = vmul.f32 %v12643_v58, %v12642_v19  ;;  %v3887_v47 = vadd.f32 %v3871_v48, %v3791_v32  ;;  %v3588_v60 = vadd.f32 %v3572_v36, %v3492_v1  ;;  %v12645_v62 = vld [vmem:[#allocation34_spill] sm:$0xff]  ;;  %v12650_v15 = vld [vmem:[#allocation165_spill] sm:$0xff]  ;;  %v12652_v48 = vld [vmem:[#allocation167_spill] sm:$0xff] }
 0xa69   : > { %v3778_v52 = vmul.f32 %v12644_v6, %v12534_v34  ;;  %v3895_v59 = vadd.f32 %v3879_v35, %v3799_v21  ;;  %v3479_v16 = vmul.f32 %v12578_v27, %v12645_v62  ;;  %v3785_v11 = vmul.f32 %v12647_v63, %v12646_v22  ;;  %v12648_v2 = vld [vmem:[#allocation90_spill] sm:$0xff]  ;;  %v12653_v29 = vld [vmem:[#allocation97_spill] sm:$0xff]  ;;  %v12655_v30 = vld [vmem:[#allocation151_spill] sm:$0xff] }
 0xa6a   : > { %v5433_v44 = vpop.permute.xlu2 %5432  ;;  %v3595_v12 = vadd.f32 %v3579_v23, %v3499_v41  ;;  %v3990_v57 = vadd.f32 %v3974_v3, %v3887_v47  ;;  %v3691_v1 = vadd.f32 %v3675_v25, %v3588_v60  ;;  %v3874_v34 = vmul.f32 %v5836_v4, %v12648_v2  ;;  %v12651_v26 = vld [vmem:[#allocation266_spill] sm:$0xff]  ;;  %v5837_v23 = vld [vmem:[%s5988_s15 + $0x98] sm:$0xff]  ;;  %v12660_v19 = vld [vmem:[#allocation87_spill] sm:$0xff] }
 0xa6b   : > { %v5468_v42 = vadd.f32 %v5433_v44, %v12638_v5  ;;  %v5429_v53 = vpop.permute.xlu0 %5428  ;;  %v3982_v36 = vmul.f32 %v12649_v50, %v12643_v58  ;;  %v4085_v61 = vmul.f32 %v12650_v15, %v12647_v63  ;;  %v3343_v27 = vadd.f32 %v12652_v48, %v12651_v26  ;;  %v12654_v39 = vld [vmem:[#allocation62_spill] sm:$0xff]  ;;  %v12662_v47 = vld [vmem:[#allocation248_spill] sm:$0xff]  ;;  %v5839_v22 = vld [vmem:[%s5988_s15 + $0xa8] sm:$0xff] }
 0xa6c   : > { %v5466_v54 = vadd.f32 %v5429_v53, %v12640_v33  ;;  %v3698_v37 = vadd.f32 %v3682_v40, %v3595_v12  ;;  %v4077_v17 = vmul.f32 %v12653_v29, %v12538_v43  ;;  %v3575_v9 = vmul.f32 %v5837_v23, %v12654_v39  ;;  %v12657_v25 = vld [vmem:[#allocation86_spill] sm:$0xff]  ;;  %v12658_v33 = vld [vmem:[#allocation212_spill] sm:$0xff]  ;;  %v12669_v50 = vld [vmem:[#allocation83_spill] sm:$0xff] }
 0xa6d   : > { %v5485_v0 = vsel %vm5472_vm2, %v4100_v51, %v5468_v42  ;;  %v3794_v35 = vadd.f32 %v3778_v52, %v3691_v1  ;;  %v3977_v44 = vmul.f32 %v12655_v30, %v12600_v28  ;;  %v3998_v32 = vadd.f32 %v3982_v36, %v3895_v59  ;;  %v12656_v42 = vld [vmem:[#allocation208_spill] sm:$0xff]  ;;  %v12659_v46 = vld [vmem:[#allocation30_spill] sm:$0xff] }
 0xa6e   : > { %5502 = vst.msk [vmem:[%s10922_s11 + $0x60] sm:$0xff] %vm5489_vm1, %v5485_v0  ;;  %v5483_v18 = vsel %vm5472_vm2, %v4098_v8, %v5466_v54  ;;  %v3495_v3 = vadd.f32 %v3479_v16, %v3343_v27  ;;  %v3801_v51 = vadd.f32 %v3785_v11, %v3698_v37  ;;  %v4093_v5 = vadd.f32 %v4077_v17, %v3990_v57  ;;  %v5838_v41 = vld [vmem:[%s5988_s15 + $0xe0] sm:$0xff]  ;;  %v12665_v16 = vld [vmem:[#allocation160_spill] sm:$0xff] }
 0xa6f   : > { %5500 = vst.msk [vmem:[%s10922_s11 + $0x50] sm:$0xff] %vm5489_vm1, %v5483_v18  ;;  %v3678_v43 = vmul.f32 %v12657_v25, %v12512_v49  ;;  %v3890_v21 = vadd.f32 %v3874_v34, %v3794_v35  ;;  %v4101_v8 = vadd.f32 %v4085_v61, %v3998_v32  ;;  %v3330_v28 = vmul.f32 %v12592_v20, %v12659_v46  ;;  %v12661_v40 = vld [vmem:[#allocation150_spill] sm:$0xff]  ;;  %v12663_v49 = vld [vmem:[#allocation81_spill] sm:$0xff]  ;;  %v12664_v20 = vld [vmem:[#allocation179_spill] sm:$0xff] }
 0xa70   : > { %v3881_v58 = vmul.f32 %v5838_v41, %v12660_v19  ;;  %v3984_v0 = vmul.f32 %v12662_v47, %v12661_v40  ;;  %v3591_v6 = vadd.f32 %v3575_v9, %v3495_v3  ;;  %v3781_v52 = vmul.f32 %v12663_v49, %v12599_v56  ;;  %v12666_v63 = vld [vmem:[#allocation4_spill] sm:$0xff]  ;;  %v12673_v35 = vld [vmem:[#allocation250_spill] sm:$0xff]  ;;  %v12674_v32 = vld [vmem:[#allocation49_spill] sm:$0xff] }
 0xa71   : > { %v3993_v59 = vadd.f32 %v3977_v44, %v3890_v21  ;;  %v4087_v12 = vmul.f32 %v12665_v16, %v12664_v20  ;;  %v3178_v11 = vmul.f32 %v5839_v22, %v12666_v63  ;;  %v12667_v57 = vld [vmem:[#allocation56_spill] sm:$0xff]  ;;  %v5841_v25 = vld [vmem:[%s5988_s15 + $0xd8] sm:$0xff] }
 0xa72   : > { %v5419_v7 = vpop.permute.xlu1 %5418  ;;  %v3897_v62 = vadd.f32 %v3881_v58, %v3801_v51  ;;  %v3482_v1 = vmul.f32 %v12602_v13, %v12667_v57  ;;  %v3694_v4 = vadd.f32 %v3678_v43, %v3591_v6  ;;  %v12668_v56 = vld [vmem:[#allocation112_spill] sm:$0xff]  ;;  %v12671_v13 = vld [vmem:[#allocation155_spill] sm:$0xff]  ;;  %v12676_v43 = vld [vmem:[#allocation102_spill] sm:$0xff] }
 0xa73   : > { %v5461_v53 = vadd.f32 %v5419_v7, %v12656_v42  ;;  %v5435_v55 = vpop.permute.xlu0 %5434  ;;  %v4080_v2 = vmul.f32 %v12668_v56, %v12605_v38  ;;  %v5840_v34 = vld [vmem:[%s5988_s15 + $0xb0] sm:$0xff]  ;;  %v3346_v61 = vadd.f32 %v3330_v28, %v3178_v11  ;;  %v3980_v23 = vmul.f32 %v12671_v13, %v12623_v45  ;;  %v12672_v38 = vld [vmem:[#allocation189_spill] sm:$0xff]  ;;  %v12675_v42 = vld [vmem:[#allocation74_spill] sm:$0xff] }
 0xa74   : > { %v5469_v54 = vadd.f32 %v5435_v55, %v12658_v33  ;;  %v3877_v36 = vmul.f32 %v5840_v34, %v12669_v50  ;;  %v4000_v15 = vadd.f32 %v3984_v0, %v3897_v62  ;;  %v12670_v26 = vld [vmem:[#allocation144_spill] sm:$0xff]  ;;  %v3797_v27 = vadd.f32 %v3781_v52, %v3694_v4  ;;  %v12678_v28 = vld [vmem:[#allocation158_spill] sm:$0xff] }
 0xa75   : > { %v5478_v60 = vsel %vm5472_vm2, %v4093_v5, %v5461_v53  ;;  %v3578_v48 = vmul.f32 %v11043_v10, %v12670_v26  ;;  %v4096_v37 = vadd.f32 %v4080_v2, %v3993_v59  ;;  %v3498_v44 = vadd.f32 %v3482_v1, %v3346_v61  ;;  %v12679_v41 = vld [vmem:[#allocation260_spill] sm:$0xff]  ;;  %v12682_v6 = vld [vmem:[#allocation186_spill] sm:$0xff] }
 0xa76   : > { %5495 = vst.msk [vmem:[%s10922_s11 + $0x28] sm:$0xff] %vm5489_vm1, %v5478_v60  ;;  %v5486_v18 = vsel %vm5472_vm2, %v4101_v8, %v5469_v54  ;;  %v4103_v39 = vadd.f32 %v4087_v12, %v4000_v15  ;;  %v3681_v7 = vmul.f32 %v12621_v24, %v12674_v32  ;;  %v3893_v3 = vadd.f32 %v3877_v36, %v3797_v27  ;;  %v12677_v24 = vld [vmem:[#allocation148_spill] sm:$0xff]  ;;  %v12681_v60 = vld [vmem:[#allocation153_spill] sm:$0xff] }
 0xa77   : > { %5503 = vst.msk [vmem:[%s10922_s11 + $0x68] sm:$0xff] %vm5489_vm1, %v5486_v18  ;;  %v3594_v5 = vadd.f32 %v3578_v48, %v3498_v44  ;;  %v3784_v45 = vmul.f32 %v12628_v14, %v12675_v42  ;;  %v3880_v21 = vmul.f32 %v5841_v25, %v12676_v43  ;;  %v4083_v8 = vmul.f32 %v12677_v24, %v12626_v31  ;;  %v12680_v58 = vld [vmem:[#allocation264_spill] sm:$0xff]  ;;  %v12683_v31 = vld [vmem:[#allocation247_spill] sm:$0xff] }
 0xa78   : > { %v3996_v53 = vadd.f32 %v3980_v23, %v3893_v3  ;;  %v3983_v19 = vmul.f32 %v12679_v41, %v12678_v28  ;;  %v4086_v49 = vmul.f32 %v12682_v6, %v12681_v60 }
 0xa79   : > { %v3697_v55 = vadd.f32 %v3681_v7, %v3594_v5 }
 0xa7a   : > { %v5439_v29 = vpop.permute.xlu2 %5438  ;;  %v5425_v17 = vpop.permute.xlu1 %5424  ;;  %v4099_v46 = vadd.f32 %v4083_v8, %v3996_v53 }
 0xa7b   : > { %v5471_v9 = vadd.f32 %v5439_v29, %v12672_v38  ;;  %v5464_v30 = vadd.f32 %v5425_v17, %v12673_v35  ;;  %v3800_v54 = vadd.f32 %v3784_v45, %v3697_v55 }
 0xa7d   : > { %v5488_v10 = vsel %vm5472_vm2, %v4103_v39, %v5471_v9  ;;  %v5481_v51 = vsel %vm5472_vm2, %v4096_v37, %v5464_v30  ;;  %v3896_v14 = vadd.f32 %v3880_v21, %v3800_v54 }
 0xa7e   : > { %5505 = vst.msk [vmem:[%s10922_s11 + $0x78] sm:$0xff] %vm5489_vm1, %v5488_v10 }
 0xa7f   : > { %5498 = vst.msk [vmem:[%s10922_s11 + $0x40] sm:$0xff] %vm5489_vm1, %v5481_v51  ;;  %v3999_v0 = vadd.f32 %v3983_v19, %v3896_v14 }
 0xa81   : > { %v4102_v59 = vadd.f32 %v4086_v49, %v3999_v0 }
 0xa82   : > { %v5431_v33 = vpop.permute.xlu1 %5430 }
 0xa83   : > { %v5467_v40 = vadd.f32 %v5431_v33, %v12680_v58 }
 0xa85   : > { %v5484_v47 = vsel %vm5472_vm2, %v4099_v46, %v5467_v40 }
 0xa86   : > { %5501 = vst.msk [vmem:[%s10922_s11 + $0x58] sm:$0xff] %vm5489_vm1, %v5484_v47 }
 0xa8a   : > { %v5437_v52 = vpop.permute.xlu1 %5436 }
 0xa8b   : > { %v5470_v18 = vadd.f32 %v5437_v52, %v12683_v31 }
 0xa8d   : > { %v5487_v62 = vsel %vm5472_vm2, %v4102_v59, %v5470_v18 }
 0xa8e   : > { %5504 = vst.msk [vmem:[%s10922_s11 + $0x70] sm:$0xff] %vm5489_vm1, %v5487_v62 }
 0xa8f PF: > { %s17_s28 = sadd.s32 1, %s5880_s28   ;;  %s12684_s24 = smov %s5872_s26 }
 0xa90   : > { %p14_p7 = scmp.ge.s32.totalorder %s17_s28, 6   ;;  %s12685_s25 = smov %s5876_s27 }
 0xa91   : > { %s12686_s26 = smov %s12689_s29  ;;  %s12687_s27 = smov %s12693_s30 }
 0xa92   :  { %16 = sbr.rel (!%p14_p7) target bundleno = 3 (0x3), region = 78 }

</bundles_post_ra>
